<compile_context>
chip_gen: v7x
topology: tpu7x:2x2x1
jax: 0.10.0
libtpu: 0.0.40
codegen_flags: <defaults>
</compile_context>

<pallas_src>
import jax
import jax.numpy as jnp
from jax import lax
from jax.experimental import pallas as pl
from jax.experimental.pallas import tpu as pltpu

# ---------------- configuration (consistent with MAE_Decoder) -----------------
IMAGE_SIZE = 16
PATCH_SIZE = 2
EMB = 32                   # emb_dim
NUM_LAYER = 2              # num_layer
NUM_HEAD = 4               # num_head (divides EMB)
HEAD_DIM = EMB // NUM_HEAD
MLP_DIM = 4 * EMB
NUM_PATCHES = (IMAGE_SIZE // PATCH_SIZE) ** 2        # 64
SEQ = NUM_PATCHES + 1                                # 65 tokens (cls + patches)
SEQ_PAD = 128                                        # one full lane tile per sequence
OUT_DIM = 3 * PATCH_SIZE ** 2                        # 12
LN_EPS = 1e-5                                        # torch nn.LayerNorm default
SCALE = HEAD_DIM ** -0.5
MM_DTYPE = jnp.bfloat16    # MXU operand dtype for weight matmuls (f32 accumulation)
AUX_COLS = 6 * NUM_LAYER + NUM_LAYER + 1             # ln/bias vecs + fc1.b + head.b


# ---------------------------- in-kernel helpers -------------------------------
def _layernorm_f(x, g, b):
    """LayerNorm over the feature axis (axis 0) of a (EMB, tokens) slab."""
    mu = jnp.mean(x, axis=0, keepdims=True)
    xc = x - mu
    var = jnp.mean(xc * xc, axis=0, keepdims=True)
    return xc * lax.rsqrt(var + LN_EPS) * g + b


def _erf_approx(x):
    # Abramowitz & Stegun 7.1.26, |err| < 1.5e-7 (below bf16 matmul noise).
    p = 0.3275911
    a1, a2, a3, a4, a5 = 0.254829592, -0.284496736, 1.421413741, -1.453152027, 1.061405429
    ax = jnp.abs(x)
    t = pl.reciprocal(1.0 + p * ax, approx=True)          # divide on the EUP slot
    poly = ((((a5 * t + a4) * t + a3) * t + a2) * t + a1) * t
    y = 1.0 - poly * jnp.exp(-ax * ax)
    return jnp.where(x >= 0, y, -y)


def _gelu_erf(x):
    # torch.nn.GELU default (erf form)
    return 0.5 * x * (1.0 + _erf_approx(x * 0.7071067811865476))


# ---------------------------- fused Pallas kernel -----------------------------
def decoder_kernel(x_ref, wqkv_ref, wproj_ref, w1_ref, w2_ref, head_w_ref,
                   aux_ref, o_ref):
    """Whole decoder: 2x (LN + MHA + MLP) + Linear head, transposed layout."""
    tot = x_ref.shape[1]
    n_batch = tot // SEQ_PAD

    x = x_ref[...]                               # (EMB, tot) f32 residual stream
    aux = aux_ref[...]                           # (MLP_DIM, AUX_COLS) f32 packed params

    # key-padding bias: one (1, SEQ_PAD) row, built once, broadcast over queries
    kcol = lax.broadcasted_iota(jnp.int32, (1, SEQ_PAD), 1)
    key_bias = jnp.where(kcol < SEQ, 0.0, -1e30).astype(jnp.float32)

    for l in range(NUM_LAYER):                   # unrolled; static weight indexing
        ln1_g = aux[:EMB, 6 * l + 0:6 * l + 1]
        ln1_b = aux[:EMB, 6 * l + 1:6 * l + 2]
        bo    = aux[:EMB, 6 * l + 2:6 * l + 3]
        ln2_g = aux[:EMB, 6 * l + 3:6 * l + 4]
        ln2_b = aux[:EMB, 6 * l + 4:6 * l + 5]
        b2    = aux[:EMB, 6 * l + 5:6 * l + 6]
        b1    = aux[:, 6 * NUM_LAYER + l:6 * NUM_LAYER + l + 1]

        # ---------------- multi-head self-attention ----------------
        h = _layernorm_f(x, ln1_g, ln1_b)
        # fused QKV projection (q rows of wqkv pre-scaled by HEAD_DIM**-0.5)
        qkv = jnp.dot(wqkv_ref[l], h.astype(MM_DTYPE),
                      preferred_element_type=jnp.float32)        # (3E, tot) f32

        ctx_cols = []
        for b in range(n_batch):
            c0 = b * SEQ_PAD                                      # aligned lane slice
            heads = []
            for hd in range(NUM_HEAD):
                r = hd * HEAD_DIM
                q = qkv[r:r + HEAD_DIM, c0:c0 + SEQ_PAD]                  # (D, S)
                k = qkv[EMB + r:EMB + r + HEAD_DIM, c0:c0 + SEQ_PAD]      # (D, S)
                v = qkv[2 * EMB + r:2 * EMB + r + HEAD_DIM, c0:c0 + SEQ_PAD]
                # scores[q_pos, k_pos] = sum_d q[d, q_pos] * k[d, k_pos]
                s = lax.dot_general(q, k, (((0,), (0,)), ((), ())),
                                    preferred_element_type=jnp.float32)   # (S, S)
                s = s + key_bias
                s = s - jnp.max(s, axis=-1, keepdims=True)
                p = jnp.exp(s)
                p = p * pl.reciprocal(jnp.sum(p, axis=-1, keepdims=True),
                                      approx=True)
                # ctx[d, q_pos] = sum_k v[d, k] * p[q_pos, k]
                heads.append(lax.dot_general(v, p, (((1,), (1,)), ((), ())),
                                             preferred_element_type=jnp.float32))
            ctx_cols.append(jnp.concatenate(heads, axis=0))               # (E, S)
        ctx = ctx_cols[0] if n_batch == 1 else jnp.concatenate(ctx_cols, axis=1)

        # head combine: ONE (E, E) @ (E, tot) matmul over concatenated heads
        proj = jnp.dot(wproj_ref[l], ctx.astype(MM_DTYPE),
                       preferred_element_type=jnp.float32)
        x = x + proj + bo

        # --------------------------- MLP ----------------------------
        h2 = _layernorm_f(x, ln2_g, ln2_b)
        m = jnp.dot(w1_ref[l], h2.astype(MM_DTYPE),
                    preferred_element_type=jnp.float32) + b1              # (MLP, tot)
        m = _gelu_erf(m)
        m = jnp.dot(w2_ref[l], m.astype(MM_DTYPE),
                    preferred_element_type=jnp.float32)                   # (E, tot)
        x = x + m + b2

    # -------- final Linear head, stored lane-dense as (OUT_DIM, tot) --------
    head_b = aux[:OUT_DIM, AUX_COLS - 1:AUX_COLS]
    out = jnp.dot(head_w_ref[...], x.astype(MM_DTYPE),
                  preferred_element_type=jnp.float32) + head_b
    o_ref[...] = out.astype(o_ref.dtype)


def decoder_pallas(xt, params):
    """xt: (EMB, B*SEQ_PAD) f32 -> (OUT_DIM, B*SEQ_PAD) f32 (head output, transposed)."""
    tot = xt.shape[1]
    operands = (xt, params['wqkv'], params['wproj'], params['w1'], params['w2'],
                params['head_w'], params['aux'])
    vmem = pltpu.MemorySpace.VMEM
    return pl.pallas_call(
        decoder_kernel,
        out_shape=jax.ShapeDtypeStruct((OUT_DIM, tot), jnp.float32),
        in_specs=[pl.BlockSpec(memory_space=vmem) for _ in operands],
        out_specs=pl.BlockSpec(memory_space=vmem),
    )(*operands)


# ---------------------------- glue (plain JAX) --------------------------------
def mae_decoder_forward(features, backward_indexes, params):
    T, B, C = features.shape

    # ---- append mask tokens, un-shuffle (take_indexes), add pos-embedding ----
    # TODO(synk): this gather + pos-add could be folded into the kernel with
    # scalar-prefetched indexes (PrefetchScalarGridSpec); kept as XLA glue.
    bi = jnp.concatenate(
        [jnp.zeros((1, B), backward_indexes.dtype), backward_indexes + 1], axis=0)
    feat = jnp.concatenate(
        [features, jnp.broadcast_to(params['mask_token'], (SEQ - T, B, C))], axis=0)
    feat = jnp.take_along_axis(
        feat, jnp.broadcast_to(bi[:, :, None], (SEQ, B, C)), axis=0)
    feat = feat + params['pos_embedding']                      # (SEQ, B, C)

    # ---- kernel input: transposed, lane-dense (C, B*SEQ_PAD) ----
    xt = jnp.transpose(feat, (2, 1, 0))                        # (C, B, SEQ)
    xt = jnp.pad(xt, ((0, 0), (0, 0), (0, SEQ_PAD - SEQ)))     # (C, B, SEQ_PAD)
    xt = xt.reshape(C, B * SEQ_PAD)

    # ---- fused transformer + head (single Pallas call) ----
    out = decoder_pallas(xt, params)                           # (OUT_DIM, B*SEQ_PAD)
    patches = out.reshape(OUT_DIM, B, SEQ_PAD)[:, :, 1:SEQ]    # drop cls & pad -> (12, B, 64)

    # ---- patch2img: '(h w) b (c p1 p2) -> b c (h p1) (w p2)' ----
    g = IMAGE_SIZE // PATCH_SIZE
    img = patches.reshape(3, PATCH_SIZE, PATCH_SIZE, B, g, g)  # (c, p1, p2, b, h, w)
    img = jnp.transpose(img, (3, 0, 4, 1, 5, 2)).reshape(B, 3, IMAGE_SIZE, IMAGE_SIZE)

    # ---- mask: reference does mask[T:] = 1 then take_indexes(mask, bi[1:]-1),
    #      i.e. patch n is flagged iff backward_indexes[n] >= T (T counts cls) ----
    mask_nb = (backward_indexes >= T).astype(img.dtype)        # (N, B)
    m = jnp.transpose(mask_nb.reshape(g, g, B), (2, 0, 1))     # (B, h, w)
    mask_img = jnp.broadcast_to(
        m[:, None, :, None, :, None],
        (B, 3, g, PATCH_SIZE, g, PATCH_SIZE)).reshape(B, 3, IMAGE_SIZE, IMAGE_SIZE)
    return img, mask_img


# ---------------------------- parameter init ----------------------------------
def init_params(key):
    """Params in kernel layout (transposed / stacked / packed).

    Mapping to the PyTorch module:
      wqkv[l]  = Block.attn.qkv.weight   (3E, E), q rows pre-scaled by HEAD_DIM**-0.5
      wproj[l] = Block.attn.proj.weight  (E, E)
      w1[l]    = Block.mlp.fc1.weight    (4E, E)
      w2[l]    = Block.mlp.fc2.weight    (E, 4E)
      head_w   = head.weight             (OUT_DIM, E)
      aux      = f32 column slab: per layer [ln1.w, ln1.b, proj.b, ln2.w, ln2.b,
                 fc2.b] (rows :EMB), then fc1.b per layer (rows :MLP_DIM),
                 then head.bias (rows :OUT_DIM).
    """
    ks = jax.random.split(key, 4 + NUM_LAYER)
    params = {
        'mask_token': jax.random.truncated_normal(
            ks[0], -2.0, 2.0, (1, 1, EMB), jnp.float32) * 0.02,
        'pos_embedding': jax.random.truncated_normal(
            ks[1], -2.0, 2.0, (SEQ, 1, EMB), jnp.float32) * 0.02,
        'head_w': (jax.random.normal(ks[2], (OUT_DIM, EMB), jnp.float32) * 0.02
                   ).astype(MM_DTYPE),
    }
    head_b = jax.random.normal(ks[3], (OUT_DIM,), jnp.float32) * 0.02

    def pad_col(v):                       # pad an f32 vector to MLP_DIM rows
        return jnp.concatenate([v, jnp.zeros((MLP_DIM - v.shape[0],), jnp.float32)])

    wqkv, wproj, w1, w2 = [], [], [], []
    vec_cols, b1_cols = [], []
    ones_e = jnp.ones((EMB,), jnp.float32)
    zeros_e = jnp.zeros((EMB,), jnp.float32)
    for l in range(NUM_LAYER):
        lk = jax.random.split(ks[4 + l], 7)
        wq = jax.random.normal(lk[0], (3 * EMB, EMB), jnp.float32) * 0.02  # timm: qkv_bias=False
        wq = wq.at[:EMB].multiply(SCALE)          # fold attention scale into q rows
        wqkv.append(wq)
        wproj.append(jax.random.normal(lk[1], (EMB, EMB), jnp.float32) * 0.02)
        w1.append(jax.random.normal(lk[2], (MLP_DIM, EMB), jnp.float32) * 0.02)
        w2.append(jax.random.normal(lk[3], (EMB, MLP_DIM), jnp.float32) * 0.02)
        bo = jax.random.normal(lk[4], (EMB,), jnp.float32) * 0.02
        b1 = jax.random.normal(lk[5], (MLP_DIM,), jnp.float32) * 0.02
        b2 = jax.random.normal(lk[6], (EMB,), jnp.float32) * 0.02
        vec_cols += [pad_col(ones_e), pad_col(zeros_e), pad_col(bo),
                     pad_col(ones_e), pad_col(zeros_e), pad_col(b2)]
        b1_cols.append(b1)

    params['wqkv'] = jnp.stack(wqkv).astype(MM_DTYPE)     # (L, 3E, E)
    params['wproj'] = jnp.stack(wproj).astype(MM_DTYPE)   # (L, E, E)
    params['w1'] = jnp.stack(w1).astype(MM_DTYPE)         # (L, 4E, E)
    params['w2'] = jnp.stack(w2).astype(MM_DTYPE)         # (L, E, 4E)
    params['aux'] = jnp.stack(vec_cols + b1_cols + [pad_col(head_b)], axis=1)  # (4E, 15)
    return params


# ---------------------------------- main --------------------------------------
if __name__ == "__main__":
    key = jax.random.PRNGKey(0)
    kp, kf, ki = jax.random.split(key, 3)
    params = init_params(kp)

    B = 2
    T = 17   # 16 visible patch tokens + 1 cls token out of the encoder
    features = jax.random.normal(kf, (T, B, EMB), jnp.float32)

    # backward_indexes: per-batch permutation of patch indices, shape (NUM_PATCHES, B)
    backward_indexes = jnp.stack(
        [jax.random.permutation(jax.random.fold_in(ki, b), NUM_PATCHES)
         for b in range(B)], axis=1).astype(jnp.int32)

    fwd = jax.jit(mae_decoder_forward)
    img, mask = fwd(features, backward_indexes, params)
    jax.block_until_ready((img, mask))

    assert img.shape == (B, 3, IMAGE_SIZE, IMAGE_SIZE), img.shape
    assert mask.shape == (B, 3, IMAGE_SIZE, IMAGE_SIZE), mask.shape
    assert bool(jnp.all(jnp.isfinite(img)))
    assert bool(jnp.all((mask == 0.0) | (mask == 1.0)))
    print("KERNEL_OK")
</pallas_src>

<mosaic_0001>
module attributes {stable_mosaic.version = 11 : i64} {
  func.func private @main(%arg0: i32) attributes {dimension_semantics = [#tpu.dimension_semantics<core_parallel>], iteration_bounds = array<i64: 2>, tpu.core_type = #tpu.core_type<sc_scalar_subcore>, window_params = []} {
    return
  }
}

module attributes {stable_mosaic.version = 11 : i64} {
  func.func private @main(%arg0: i32) attributes {dimension_semantics = [#tpu.dimension_semantics<core_parallel>], iteration_bounds = array<i64: 2>, tpu.core_type = #tpu.core_type<sc_scalar_subcore>, window_params = []} {
    return
  }
}

module attributes {stable_mosaic.version = 11 : i64} {
  func.func @decoder_kernel(%arg0: memref<32x256xf32, #tpu.memory_space<vmem>>, %arg1: memref<2x96x32xbf16, #tpu.memory_space<vmem>>, %arg2: memref<2x32x32xbf16, #tpu.memory_space<vmem>>, %arg3: memref<2x128x32xbf16, #tpu.memory_space<vmem>>, %arg4: memref<2x32x128xbf16, #tpu.memory_space<vmem>>, %arg5: memref<12x32xbf16, #tpu.memory_space<vmem>>, %arg6: memref<128x15xf32, #tpu.memory_space<vmem>>, %arg7: memref<12x256xf32, #tpu.memory_space<vmem>>) attributes {dimension_semantics = [], scalar_prefetch = 0 : i64, scratch_operands = 0 : i64, tpu.core_type = #tpu.core_type<tc>} {
    %c0 = arith.constant 0 : index
    %c0_0 = arith.constant 0 : index
    %0 = vector.load %arg0[%c0, %c0_0] : memref<32x256xf32, #tpu.memory_space<vmem>>, vector<32x256xf32>
    %c0_1 = arith.constant 0 : index
    %c0_2 = arith.constant 0 : index
    %1 = vector.load %arg6[%c0_1, %c0_2] : memref<128x15xf32, #tpu.memory_space<vmem>>, vector<128x15xf32>
    %2 = tpu.iota {dimensions = array<i32: 1>} : vector<1x128xi32>
    %c65_i32 = arith.constant 65 : i32
    %3 = vector.broadcast %c65_i32 : i32 to vector<1x128xi32>
    %4 = arith.cmpi slt, %2, %3 : vector<1x128xi32>
    %cst = arith.constant 0.000000e+00 : f32
    %cst_3 = arith.constant -1.000000e+30 : f32
    %5 = vector.broadcast %cst : f32 to vector<1x128xf32>
    %6 = vector.broadcast %cst_3 : f32 to vector<1x128xf32>
    %7 = arith.select %4, %5, %6 : vector<1x128xi1>, vector<1x128xf32>
    %8 = vector.extract_strided_slice %1 {offsets = [0, 0], sizes = [32, 1], strides = [1, 1]} : vector<128x15xf32> to vector<32x1xf32>
    %9 = vector.extract_strided_slice %1 {offsets = [0, 1], sizes = [32, 1], strides = [1, 1]} : vector<128x15xf32> to vector<32x1xf32>
    %10 = vector.extract_strided_slice %1 {offsets = [0, 2], sizes = [32, 1], strides = [1, 1]} : vector<128x15xf32> to vector<32x1xf32>
    %11 = vector.extract_strided_slice %1 {offsets = [0, 3], sizes = [32, 1], strides = [1, 1]} : vector<128x15xf32> to vector<32x1xf32>
    %12 = vector.extract_strided_slice %1 {offsets = [0, 4], sizes = [32, 1], strides = [1, 1]} : vector<128x15xf32> to vector<32x1xf32>
    %13 = vector.extract_strided_slice %1 {offsets = [0, 5], sizes = [32, 1], strides = [1, 1]} : vector<128x15xf32> to vector<32x1xf32>
    %14 = vector.extract_strided_slice %1 {offsets = [0, 12], sizes = [128, 1], strides = [1, 1]} : vector<128x15xf32> to vector<128x1xf32>
    %cst_4 = arith.constant dense<0.000000e+00> : vector<256xf32>
    %15 = vector.multi_reduction <add>, %0, %cst_4 [0] : vector<32x256xf32> to vector<256xf32>
    %16 = vector.shape_cast %15 : vector<256xf32> to vector<1x256xf32>
    %cst_5 = arith.constant 3.200000e+01 : f32
    %17 = vector.broadcast %cst_5 : f32 to vector<1x256xf32>
    %18 = arith.divf %16, %17 : vector<1x256xf32>
    %19 = vector.broadcast %18 : vector<1x256xf32> to vector<32x256xf32>
    %20 = arith.subf %0, %19 : vector<32x256xf32>
    %21 = arith.mulf %20, %20 : vector<32x256xf32>
    %cst_6 = arith.constant dense<0.000000e+00> : vector<256xf32>
    %22 = vector.multi_reduction <add>, %21, %cst_6 [0] : vector<32x256xf32> to vector<256xf32>
    %23 = vector.shape_cast %22 : vector<256xf32> to vector<1x256xf32>
    %cst_7 = arith.constant 3.200000e+01 : f32
    %24 = vector.broadcast %cst_7 : f32 to vector<1x256xf32>
    %25 = arith.divf %23, %24 : vector<1x256xf32>
    %cst_8 = arith.constant 9.99999974E-6 : f32
    %26 = vector.broadcast %cst_8 : f32 to vector<1x256xf32>
    %27 = arith.addf %25, %26 : vector<1x256xf32>
    %28 = math.rsqrt %27 : vector<1x256xf32>
    %29 = vector.broadcast %28 : vector<1x256xf32> to vector<32x256xf32>
    %30 = arith.mulf %20, %29 : vector<32x256xf32>
    %31 = vector.broadcast %8 : vector<32x1xf32> to vector<32x256xf32>
    %32 = arith.mulf %30, %31 : vector<32x256xf32>
    %33 = vector.broadcast %9 : vector<32x1xf32> to vector<32x256xf32>
    %34 = arith.addf %32, %33 : vector<32x256xf32>
    %c0_9 = arith.constant 0 : index
    %c0_10 = arith.constant 0 : index
    %c0_11 = arith.constant 0 : index
    %35 = vector.load %arg1[%c0_9, %c0_10, %c0_11] : memref<2x96x32xbf16, #tpu.memory_space<vmem>>, vector<1x96x32xbf16>
    %36 = vector.shape_cast %35 : vector<1x96x32xbf16> to vector<96x32xbf16>
    %37 = arith.truncf %34 : vector<32x256xf32> to vector<32x256xbf16>
    %cst_12 = arith.constant dense<0.000000e+00> : vector<96x256xf32>
    %38 = tpu.matmul %36, %37, %cst_12 {dimension_numbers = #tpu.dot_dimension_numbers<[1], [0], [0], [1], [0, 0, 1, 1], [], []>} : vector<96x32xbf16>, vector<32x256xbf16>, vector<96x256xf32> -> vector<96x256xf32>
    %39 = vector.extract_strided_slice %38 {offsets = [0, 0], sizes = [8, 128], strides = [1, 1]} : vector<96x256xf32> to vector<8x128xf32>
    %40 = vector.extract_strided_slice %38 {offsets = [32, 0], sizes = [8, 128], strides = [1, 1]} : vector<96x256xf32> to vector<8x128xf32>
    %41 = vector.extract_strided_slice %38 {offsets = [64, 0], sizes = [8, 128], strides = [1, 1]} : vector<96x256xf32> to vector<8x128xf32>
    %cst_13 = arith.constant dense<0.000000e+00> : vector<128x128xf32>
    %42 = tpu.matmul %39, %40, %cst_13 {dimension_numbers = #tpu.dot_dimension_numbers<[0], [0], [1], [1], [0, 1, 1, 1], [], []>} : vector<8x128xf32>, vector<8x128xf32>, vector<128x128xf32> -> vector<128x128xf32>
    %43 = vector.broadcast %7 : vector<1x128xf32> to vector<128x128xf32>
    %44 = arith.addf %42, %43 : vector<128x128xf32>
    %cst_14 = arith.constant dense<0xFF800000> : vector<128xf32>
    %45 = vector.multi_reduction <maximumf>, %44, %cst_14 [1] : vector<128x128xf32> to vector<128xf32>
    %46 = vector.shape_cast %45 : vector<128xf32> to vector<128x1xf32>
    %47 = vector.broadcast %46 : vector<128x1xf32> to vector<128x128xf32>
    %48 = arith.subf %44, %47 : vector<128x128xf32>
    %49 = math.exp %48 : vector<128x128xf32>
    %cst_15 = arith.constant dense<0.000000e+00> : vector<128xf32>
    %50 = vector.multi_reduction <add>, %49, %cst_15 [1] : vector<128x128xf32> to vector<128xf32>
    %51 = vector.shape_cast %50 : vector<128xf32> to vector<128x1xf32>
    %52 = tpu.reciprocal %51 {approx = true} : vector<128x1xf32> -> vector<128x1xf32>
    %53 = vector.broadcast %52 : vector<128x1xf32> to vector<128x128xf32>
    %54 = arith.mulf %49, %53 : vector<128x128xf32>
    %cst_16 = arith.constant dense<0.000000e+00> : vector<8x128xf32>
    %55 = tpu.matmul %41, %54, %cst_16 {dimension_numbers = #tpu.dot_dimension_numbers<[1], [1], [0], [0], [0, 0, 1, 0], [], []>} : vector<8x128xf32>, vector<128x128xf32>, vector<8x128xf32> -> vector<8x128xf32>
    %56 = vector.extract_strided_slice %38 {offsets = [8, 0], sizes = [8, 128], strides = [1, 1]} : vector<96x256xf32> to vector<8x128xf32>
    %57 = vector.extract_strided_slice %38 {offsets = [40, 0], sizes = [8, 128], strides = [1, 1]} : vector<96x256xf32> to vector<8x128xf32>
    %58 = vector.extract_strided_slice %38 {offsets = [72, 0], sizes = [8, 128], strides = [1, 1]} : vector<96x256xf32> to vector<8x128xf32>
    %cst_17 = arith.constant dense<0.000000e+00> : vector<128x128xf32>
    %59 = tpu.matmul %56, %57, %cst_17 {dimension_numbers = #tpu.dot_dimension_numbers<[0], [0], [1], [1], [0, 1, 1, 1], [], []>} : vector<8x128xf32>, vector<8x128xf32>, vector<128x128xf32> -> vector<128x128xf32>
    %60 = vector.broadcast %7 : vector<1x128xf32> to vector<128x128xf32>
    %61 = arith.addf %59, %60 : vector<128x128xf32>
    %cst_18 = arith.constant dense<0xFF800000> : vector<128xf32>
    %62 = vector.multi_reduction <maximumf>, %61, %cst_18 [1] : vector<128x128xf32> to vector<128xf32>
    %63 = vector.shape_cast %62 : vector<128xf32> to vector<128x1xf32>
    %64 = vector.broadcast %63 : vector<128x1xf32> to vector<128x128xf32>
    %65 = arith.subf %61, %64 : vector<128x128xf32>
    %66 = math.exp %65 : vector<128x128xf32>
    %cst_19 = arith.constant dense<0.000000e+00> : vector<128xf32>
    %67 = vector.multi_reduction <add>, %66, %cst_19 [1] : vector<128x128xf32> to vector<128xf32>
    %68 = vector.shape_cast %67 : vector<128xf32> to vector<128x1xf32>
    %69 = tpu.reciprocal %68 {approx = true} : vector<128x1xf32> -> vector<128x1xf32>
    %70 = vector.broadcast %69 : vector<128x1xf32> to vector<128x128xf32>
    %71 = arith.mulf %66, %70 : vector<128x128xf32>
    %cst_20 = arith.constant dense<0.000000e+00> : vector<8x128xf32>
    %72 = tpu.matmul %58, %71, %cst_20 {dimension_numbers = #tpu.dot_dimension_numbers<[1], [1], [0], [0], [0, 0, 1, 0], [], []>} : vector<8x128xf32>, vector<128x128xf32>, vector<8x128xf32> -> vector<8x128xf32>
    %73 = vector.extract_strided_slice %38 {offsets = [16, 0], sizes = [8, 128], strides = [1, 1]} : vector<96x256xf32> to vector<8x128xf32>
    %74 = vector.extract_strided_slice %38 {offsets = [48, 0], sizes = [8, 128], strides = [1, 1]} : vector<96x256xf32> to vector<8x128xf32>
    %75 = vector.extract_strided_slice %38 {offsets = [80, 0], sizes = [8, 128], strides = [1, 1]} : vector<96x256xf32> to vector<8x128xf32>
    %cst_21 = arith.constant dense<0.000000e+00> : vector<128x128xf32>
    %76 = tpu.matmul %73, %74, %cst_21 {dimension_numbers = #tpu.dot_dimension_numbers<[0], [0], [1], [1], [0, 1, 1, 1], [], []>} : vector<8x128xf32>, vector<8x128xf32>, vector<128x128xf32> -> vector<128x128xf32>
    %77 = vector.broadcast %7 : vector<1x128xf32> to vector<128x128xf32>
    %78 = arith.addf %76, %77 : vector<128x128xf32>
    %cst_22 = arith.constant dense<0xFF800000> : vector<128xf32>
    %79 = vector.multi_reduction <maximumf>, %78, %cst_22 [1] : vector<128x128xf32> to vector<128xf32>
    %80 = vector.shape_cast %79 : vector<128xf32> to vector<128x1xf32>
    %81 = vector.broadcast %80 : vector<128x1xf32> to vector<128x128xf32>
    %82 = arith.subf %78, %81 : vector<128x128xf32>
    %83 = math.exp %82 : vector<128x128xf32>
    %cst_23 = arith.constant dense<0.000000e+00> : vector<128xf32>
    %84 = vector.multi_reduction <add>, %83, %cst_23 [1] : vector<128x128xf32> to vector<128xf32>
    %85 = vector.shape_cast %84 : vector<128xf32> to vector<128x1xf32>
    %86 = tpu.reciprocal %85 {approx = true} : vector<128x1xf32> -> vector<128x1xf32>
    %87 = vector.broadcast %86 : vector<128x1xf32> to vector<128x128xf32>
    %88 = arith.mulf %83, %87 : vector<128x128xf32>
    %cst_24 = arith.constant dense<0.000000e+00> : vector<8x128xf32>
    %89 = tpu.matmul %75, %88, %cst_24 {dimension_numbers = #tpu.dot_dimension_numbers<[1], [1], [0], [0], [0, 0, 1, 0], [], []>} : vector<8x128xf32>, vector<128x128xf32>, vector<8x128xf32> -> vector<8x128xf32>
    %90 = vector.extract_strided_slice %38 {offsets = [24, 0], sizes = [8, 128], strides = [1, 1]} : vector<96x256xf32> to vector<8x128xf32>
    %91 = vector.extract_strided_slice %38 {offsets = [56, 0], sizes = [8, 128], strides = [1, 1]} : vector<96x256xf32> to vector<8x128xf32>
    %92 = vector.extract_strided_slice %38 {offsets = [88, 0], sizes = [8, 128], strides = [1, 1]} : vector<96x256xf32> to vector<8x128xf32>
    %cst_25 = arith.constant dense<0.000000e+00> : vector<128x128xf32>
    %93 = tpu.matmul %90, %91, %cst_25 {dimension_numbers = #tpu.dot_dimension_numbers<[0], [0], [1], [1], [0, 1, 1, 1], [], []>} : vector<8x128xf32>, vector<8x128xf32>, vector<128x128xf32> -> vector<128x128xf32>
    %94 = vector.broadcast %7 : vector<1x128xf32> to vector<128x128xf32>
    %95 = arith.addf %93, %94 : vector<128x128xf32>
    %cst_26 = arith.constant dense<0xFF800000> : vector<128xf32>
    %96 = vector.multi_reduction <maximumf>, %95, %cst_26 [1] : vector<128x128xf32> to vector<128xf32>
    %97 = vector.shape_cast %96 : vector<128xf32> to vector<128x1xf32>
    %98 = vector.broadcast %97 : vector<128x1xf32> to vector<128x128xf32>
    %99 = arith.subf %95, %98 : vector<128x128xf32>
    %100 = math.exp %99 : vector<128x128xf32>
    %cst_27 = arith.constant dense<0.000000e+00> : vector<128xf32>
    %101 = vector.multi_reduction <add>, %100, %cst_27 [1] : vector<128x128xf32> to vector<128xf32>
    %102 = vector.shape_cast %101 : vector<128xf32> to vector<128x1xf32>
    %103 = tpu.reciprocal %102 {approx = true} : vector<128x1xf32> -> vector<128x1xf32>
    %104 = vector.broadcast %103 : vector<128x1xf32> to vector<128x128xf32>
    %105 = arith.mulf %100, %104 : vector<128x128xf32>
    %cst_28 = arith.constant dense<0.000000e+00> : vector<8x128xf32>
    %106 = tpu.matmul %92, %105, %cst_28 {dimension_numbers = #tpu.dot_dimension_numbers<[1], [1], [0], [0], [0, 0, 1, 0], [], []>} : vector<8x128xf32>, vector<128x128xf32>, vector<8x128xf32> -> vector<8x128xf32>
    %107 = tpu.concatenate %55, %72, %89, %106 in 0 : vector<8x128xf32>, vector<8x128xf32>, vector<8x128xf32>, vector<8x128xf32> -> vector<32x128xf32>
    %108 = vector.extract_strided_slice %38 {offsets = [0, 128], sizes = [8, 128], strides = [1, 1]} : vector<96x256xf32> to vector<8x128xf32>
    %109 = vector.extract_strided_slice %38 {offsets = [32, 128], sizes = [8, 128], strides = [1, 1]} : vector<96x256xf32> to vector<8x128xf32>
    %110 = vector.extract_strided_slice %38 {offsets = [64, 128], sizes = [8, 128], strides = [1, 1]} : vector<96x256xf32> to vector<8x128xf32>
    %cst_29 = arith.constant dense<0.000000e+00> : vector<128x128xf32>
    %111 = tpu.matmul %108, %109, %cst_29 {dimension_numbers = #tpu.dot_dimension_numbers<[0], [0], [1], [1], [0, 1, 1, 1], [], []>} : vector<8x128xf32>, vector<8x128xf32>, vector<128x128xf32> -> vector<128x128xf32>
    %112 = vector.broadcast %7 : vector<1x128xf32> to vector<128x128xf32>
    %113 = arith.addf %111, %112 : vector<128x128xf32>
    %cst_30 = arith.constant dense<0xFF800000> : vector<128xf32>
    %114 = vector.multi_reduction <maximumf>, %113, %cst_30 [1] : vector<128x128xf32> to vector<128xf32>
    %115 = vector.shape_cast %114 : vector<128xf32> to vector<128x1xf32>
    %116 = vector.broadcast %115 : vector<128x1xf32> to vector<128x128xf32>
    %117 = arith.subf %113, %116 : vector<128x128xf32>
    %118 = math.exp %117 : vector<128x128xf32>
    %cst_31 = arith.constant dense<0.000000e+00> : vector<128xf32>
    %119 = vector.multi_reduction <add>, %118, %cst_31 [1] : vector<128x128xf32> to vector<128xf32>
    %120 = vector.shape_cast %119 : vector<128xf32> to vector<128x1xf32>
    %121 = tpu.reciprocal %120 {approx = true} : vector<128x1xf32> -> vector<128x1xf32>
    %122 = vector.broadcast %121 : vector<128x1xf32> to vector<128x128xf32>
    %123 = arith.mulf %118, %122 : vector<128x128xf32>
    %cst_32 = arith.constant dense<0.000000e+00> : vector<8x128xf32>
    %124 = tpu.matmul %110, %123, %cst_32 {dimension_numbers = #tpu.dot_dimension_numbers<[1], [1], [0], [0], [0, 0, 1, 0], [], []>} : vector<8x128xf32>, vector<128x128xf32>, vector<8x128xf32> -> vector<8x128xf32>
    %125 = vector.extract_strided_slice %38 {offsets = [8, 128], sizes = [8, 128], strides = [1, 1]} : vector<96x256xf32> to vector<8x128xf32>
    %126 = vector.extract_strided_slice %38 {offsets = [40, 128], sizes = [8, 128], strides = [1, 1]} : vector<96x256xf32> to vector<8x128xf32>
    %127 = vector.extract_strided_slice %38 {offsets = [72, 128], sizes = [8, 128], strides = [1, 1]} : vector<96x256xf32> to vector<8x128xf32>
    %cst_33 = arith.constant dense<0.000000e+00> : vector<128x128xf32>
    %128 = tpu.matmul %125, %126, %cst_33 {dimension_numbers = #tpu.dot_dimension_numbers<[0], [0], [1], [1], [0, 1, 1, 1], [], []>} : vector<8x128xf32>, vector<8x128xf32>, vector<128x128xf32> -> vector<128x128xf32>
    %129 = vector.broadcast %7 : vector<1x128xf32> to vector<128x128xf32>
    %130 = arith.addf %128, %129 : vector<128x128xf32>
    %cst_34 = arith.constant dense<0xFF800000> : vector<128xf32>
    %131 = vector.multi_reduction <maximumf>, %130, %cst_34 [1] : vector<128x128xf32> to vector<128xf32>
    %132 = vector.shape_cast %131 : vector<128xf32> to vector<128x1xf32>
    %133 = vector.broadcast %132 : vector<128x1xf32> to vector<128x128xf32>
    %134 = arith.subf %130, %133 : vector<128x128xf32>
    %135 = math.exp %134 : vector<128x128xf32>
    %cst_35 = arith.constant dense<0.000000e+00> : vector<128xf32>
    %136 = vector.multi_reduction <add>, %135, %cst_35 [1] : vector<128x128xf32> to vector<128xf32>
    %137 = vector.shape_cast %136 : vector<128xf32> to vector<128x1xf32>
    %138 = tpu.reciprocal %137 {approx = true} : vector<128x1xf32> -> vector<128x1xf32>
    %139 = vector.broadcast %138 : vector<128x1xf32> to vector<128x128xf32>
    %140 = arith.mulf %135, %139 : vector<128x128xf32>
    %cst_36 = arith.constant dense<0.000000e+00> : vector<8x128xf32>
    %141 = tpu.matmul %127, %140, %cst_36 {dimension_numbers = #tpu.dot_dimension_numbers<[1], [1], [0], [0], [0, 0, 1, 0], [], []>} : vector<8x128xf32>, vector<128x128xf32>, vector<8x128xf32> -> vector<8x128xf32>
    %142 = vector.extract_strided_slice %38 {offsets = [16, 128], sizes = [8, 128], strides = [1, 1]} : vector<96x256xf32> to vector<8x128xf32>
    %143 = vector.extract_strided_slice %38 {offsets = [48, 128], sizes = [8, 128], strides = [1, 1]} : vector<96x256xf32> to vector<8x128xf32>
    %144 = vector.extract_strided_slice %38 {offsets = [80, 128], sizes = [8, 128], strides = [1, 1]} : vector<96x256xf32> to vector<8x128xf32>
    %cst_37 = arith.constant dense<0.000000e+00> : vector<128x128xf32>
    %145 = tpu.matmul %142, %143, %cst_37 {dimension_numbers = #tpu.dot_dimension_numbers<[0], [0], [1], [1], [0, 1, 1, 1], [], []>} : vector<8x128xf32>, vector<8x128xf32>, vector<128x128xf32> -> vector<128x128xf32>
    %146 = vector.broadcast %7 : vector<1x128xf32> to vector<128x128xf32>
    %147 = arith.addf %145, %146 : vector<128x128xf32>
    %cst_38 = arith.constant dense<0xFF800000> : vector<128xf32>
    %148 = vector.multi_reduction <maximumf>, %147, %cst_38 [1] : vector<128x128xf32> to vector<128xf32>
    %149 = vector.shape_cast %148 : vector<128xf32> to vector<128x1xf32>
    %150 = vector.broadcast %149 : vector<128x1xf32> to vector<128x128xf32>
    %151 = arith.subf %147, %150 : vector<128x128xf32>
    %152 = math.exp %151 : vector<128x128xf32>
    %cst_39 = arith.constant dense<0.000000e+00> : vector<128xf32>
    %153 = vector.multi_reduction <add>, %152, %cst_39 [1] : vector<128x128xf32> to vector<128xf32>
    %154 = vector.shape_cast %153 : vector<128xf32> to vector<128x1xf32>
    %155 = tpu.reciprocal %154 {approx = true} : vector<128x1xf32> -> vector<128x1xf32>
    %156 = vector.broadcast %155 : vector<128x1xf32> to vector<128x128xf32>
    %157 = arith.mulf %152, %156 : vector<128x128xf32>
    %cst_40 = arith.constant dense<0.000000e+00> : vector<8x128xf32>
    %158 = tpu.matmul %144, %157, %cst_40 {dimension_numbers = #tpu.dot_dimension_numbers<[1], [1], [0], [0], [0, 0, 1, 0], [], []>} : vector<8x128xf32>, vector<128x128xf32>, vector<8x128xf32> -> vector<8x128xf32>
    %159 = vector.extract_strided_slice %38 {offsets = [24, 128], sizes = [8, 128], strides = [1, 1]} : vector<96x256xf32> to vector<8x128xf32>
    %160 = vector.extract_strided_slice %38 {offsets = [56, 128], sizes = [8, 128], strides = [1, 1]} : vector<96x256xf32> to vector<8x128xf32>
    %161 = vector.extract_strided_slice %38 {offsets = [88, 128], sizes = [8, 128], strides = [1, 1]} : vector<96x256xf32> to vector<8x128xf32>
    %cst_41 = arith.constant dense<0.000000e+00> : vector<128x128xf32>
    %162 = tpu.matmul %159, %160, %cst_41 {dimension_numbers = #tpu.dot_dimension_numbers<[0], [0], [1], [1], [0, 1, 1, 1], [], []>} : vector<8x128xf32>, vector<8x128xf32>, vector<128x128xf32> -> vector<128x128xf32>
    %163 = vector.broadcast %7 : vector<1x128xf32> to vector<128x128xf32>
    %164 = arith.addf %162, %163 : vector<128x128xf32>
    %cst_42 = arith.constant dense<0xFF800000> : vector<128xf32>
    %165 = vector.multi_reduction <maximumf>, %164, %cst_42 [1] : vector<128x128xf32> to vector<128xf32>
    %166 = vector.shape_cast %165 : vector<128xf32> to vector<128x1xf32>
    %167 = vector.broadcast %166 : vector<128x1xf32> to vector<128x128xf32>
    %168 = arith.subf %164, %167 : vector<128x128xf32>
    %169 = math.exp %168 : vector<128x128xf32>
    %cst_43 = arith.constant dense<0.000000e+00> : vector<128xf32>
    %170 = vector.multi_reduction <add>, %169, %cst_43 [1] : vector<128x128xf32> to vector<128xf32>
    %171 = vector.shape_cast %170 : vector<128xf32> to vector<128x1xf32>
    %172 = tpu.reciprocal %171 {approx = true} : vector<128x1xf32> -> vector<128x1xf32>
    %173 = vector.broadcast %172 : vector<128x1xf32> to vector<128x128xf32>
    %174 = arith.mulf %169, %173 : vector<128x128xf32>
    %cst_44 = arith.constant dense<0.000000e+00> : vector<8x128xf32>
    %175 = tpu.matmul %161, %174, %cst_44 {dimension_numbers = #tpu.dot_dimension_numbers<[1], [1], [0], [0], [0, 0, 1, 0], [], []>} : vector<8x128xf32>, vector<128x128xf32>, vector<8x128xf32> -> vector<8x128xf32>
    %176 = tpu.concatenate %124, %141, %158, %175 in 0 : vector<8x128xf32>, vector<8x128xf32>, vector<8x128xf32>, vector<8x128xf32> -> vector<32x128xf32>
    %177 = tpu.concatenate %107, %176 in 1 : vector<32x128xf32>, vector<32x128xf32> -> vector<32x256xf32>
    %c0_45 = arith.constant 0 : index
    %c0_46 = arith.constant 0 : index
    %c0_47 = arith.constant 0 : index
    %178 = vector.load %arg2[%c0_45, %c0_46, %c0_47] : memref<2x32x32xbf16, #tpu.memory_space<vmem>>, vector<1x32x32xbf16>
    %179 = vector.shape_cast %178 : vector<1x32x32xbf16> to vector<32x32xbf16>
    %180 = arith.truncf %177 : vector<32x256xf32> to vector<32x256xbf16>
    %cst_48 = arith.constant dense<0.000000e+00> : vector<32x256xf32>
    %181 = tpu.matmul %179, %180, %cst_48 {dimension_numbers = #tpu.dot_dimension_numbers<[1], [0], [0], [1], [0, 0, 1, 1], [], []>} : vector<32x32xbf16>, vector<32x256xbf16>, vector<32x256xf32> -> vector<32x256xf32>
    %182 = arith.addf %0, %181 : vector<32x256xf32>
    %183 = vector.broadcast %10 : vector<32x1xf32> to vector<32x256xf32>
    %184 = arith.addf %182, %183 : vector<32x256xf32>
    %cst_49 = arith.constant dense<0.000000e+00> : vector<256xf32>
    %185 = vector.multi_reduction <add>, %184, %cst_49 [0] : vector<32x256xf32> to vector<256xf32>
    %186 = vector.shape_cast %185 : vector<256xf32> to vector<1x256xf32>
    %cst_50 = arith.constant 3.200000e+01 : f32
    %187 = vector.broadcast %cst_50 : f32 to vector<1x256xf32>
    %188 = arith.divf %186, %187 : vector<1x256xf32>
    %189 = vector.broadcast %188 : vector<1x256xf32> to vector<32x256xf32>
    %190 = arith.subf %184, %189 : vector<32x256xf32>
    %191 = arith.mulf %190, %190 : vector<32x256xf32>
    %cst_51 = arith.constant dense<0.000000e+00> : vector<256xf32>
    %192 = vector.multi_reduction <add>, %191, %cst_51 [0] : vector<32x256xf32> to vector<256xf32>
    %193 = vector.shape_cast %192 : vector<256xf32> to vector<1x256xf32>
    %cst_52 = arith.constant 3.200000e+01 : f32
    %194 = vector.broadcast %cst_52 : f32 to vector<1x256xf32>
    %195 = arith.divf %193, %194 : vector<1x256xf32>
    %cst_53 = arith.constant 9.99999974E-6 : f32
    %196 = vector.broadcast %cst_53 : f32 to vector<1x256xf32>
    %197 = arith.addf %195, %196 : vector<1x256xf32>
    %198 = math.rsqrt %197 : vector<1x256xf32>
    %199 = vector.broadcast %198 : vector<1x256xf32> to vector<32x256xf32>
    %200 = arith.mulf %190, %199 : vector<32x256xf32>
    %201 = vector.broadcast %11 : vector<32x1xf32> to vector<32x256xf32>
    %202 = arith.mulf %200, %201 : vector<32x256xf32>
    %203 = vector.broadcast %12 : vector<32x1xf32> to vector<32x256xf32>
    %204 = arith.addf %202, %203 : vector<32x256xf32>
    %c0_54 = arith.constant 0 : index
    %c0_55 = arith.constant 0 : index
    %c0_56 = arith.constant 0 : index
    %205 = vector.load %arg3[%c0_54, %c0_55, %c0_56] : memref<2x128x32xbf16, #tpu.memory_space<vmem>>, vector<1x128x32xbf16>
    %206 = vector.shape_cast %205 : vector<1x128x32xbf16> to vector<128x32xbf16>
    %207 = arith.truncf %204 : vector<32x256xf32> to vector<32x256xbf16>
    %cst_57 = arith.constant dense<0.000000e+00> : vector<128x256xf32>
    %208 = tpu.matmul %206, %207, %cst_57 {dimension_numbers = #tpu.dot_dimension_numbers<[1], [0], [0], [1], [0, 0, 1, 1], [], []>} : vector<128x32xbf16>, vector<32x256xbf16>, vector<128x256xf32> -> vector<128x256xf32>
    %209 = vector.broadcast %14 : vector<128x1xf32> to vector<128x256xf32>
    %210 = arith.addf %208, %209 : vector<128x256xf32>
    %cst_58 = arith.constant 5.000000e-01 : f32
    %211 = vector.broadcast %cst_58 : f32 to vector<128x256xf32>
    %212 = arith.mulf %211, %210 : vector<128x256xf32>
    %cst_59 = arith.constant 0.707106769 : f32
    %213 = vector.broadcast %cst_59 : f32 to vector<128x256xf32>
    %214 = arith.mulf %210, %213 : vector<128x256xf32>
    %215 = math.absf %214 : vector<128x256xf32>
    %cst_60 = arith.constant 0.327591091 : f32
    %216 = vector.broadcast %cst_60 : f32 to vector<128x256xf32>
    %217 = arith.mulf %216, %215 : vector<128x256xf32>
    %cst_61 = arith.constant 1.000000e+00 : f32
    %218 = vector.broadcast %cst_61 : f32 to vector<128x256xf32>
    %219 = arith.addf %218, %217 : vector<128x256xf32>
    %220 = tpu.reciprocal %219 {approx = true} : vector<128x256xf32> -> vector<128x256xf32>
    %cst_62 = arith.constant 1.06140542 : f32
    %221 = vector.broadcast %cst_62 : f32 to vector<128x256xf32>
    %222 = arith.mulf %221, %220 : vector<128x256xf32>
    %cst_63 = arith.constant -1.45315206 : f32
    %223 = vector.broadcast %cst_63 : f32 to vector<128x256xf32>
    %224 = arith.addf %222, %223 : vector<128x256xf32>
    %225 = arith.mulf %224, %220 : vector<128x256xf32>
    %cst_64 = arith.constant 1.42141378 : f32
    %226 = vector.broadcast %cst_64 : f32 to vector<128x256xf32>
    %227 = arith.addf %225, %226 : vector<128x256xf32>
    %228 = arith.mulf %227, %220 : vector<128x256xf32>
    %cst_65 = arith.constant -0.284496725 : f32
    %229 = vector.broadcast %cst_65 : f32 to vector<128x256xf32>
    %230 = arith.addf %228, %229 : vector<128x256xf32>
    %231 = arith.mulf %230, %220 : vector<128x256xf32>
    %cst_66 = arith.constant 0.254829586 : f32
    %232 = vector.broadcast %cst_66 : f32 to vector<128x256xf32>
    %233 = arith.addf %231, %232 : vector<128x256xf32>
    %234 = arith.mulf %233, %220 : vector<128x256xf32>
    %cst_67 = arith.constant 0.000000e+00 : f32
    %235 = vector.broadcast %cst_67 : f32 to vector<128x256xf32>
    %236 = arith.subf %235, %215 : vector<128x256xf32>
    %237 = arith.mulf %236, %215 : vector<128x256xf32>
    %238 = math.exp %237 : vector<128x256xf32>
    %239 = arith.mulf %234, %238 : vector<128x256xf32>
    %cst_68 = arith.constant 1.000000e+00 : f32
    %240 = vector.broadcast %cst_68 : f32 to vector<128x256xf32>
    %241 = arith.subf %240, %239 : vector<128x256xf32>
    %cst_69 = arith.constant 0.000000e+00 : f32
    %242 = vector.broadcast %cst_69 : f32 to vector<128x256xf32>
    %243 = arith.cmpf oge, %214, %242 : vector<128x256xf32>
    %cst_70 = arith.constant 0.000000e+00 : f32
    %244 = vector.broadcast %cst_70 : f32 to vector<128x256xf32>
    %245 = arith.subf %244, %241 : vector<128x256xf32>
    %246 = arith.select %243, %241, %245 : vector<128x256xi1>, vector<128x256xf32>
    %cst_71 = arith.constant 1.000000e+00 : f32
    %247 = vector.broadcast %cst_71 : f32 to vector<128x256xf32>
    %248 = arith.addf %247, %246 : vector<128x256xf32>
    %249 = arith.mulf %212, %248 : vector<128x256xf32>
    %c0_72 = arith.constant 0 : index
    %c0_73 = arith.constant 0 : index
    %c0_74 = arith.constant 0 : index
    %250 = vector.load %arg4[%c0_72, %c0_73, %c0_74] : memref<2x32x128xbf16, #tpu.memory_space<vmem>>, vector<1x32x128xbf16>
    %251 = vector.shape_cast %250 : vector<1x32x128xbf16> to vector<32x128xbf16>
    %252 = arith.truncf %249 : vector<128x256xf32> to vector<128x256xbf16>
    %cst_75 = arith.constant dense<0.000000e+00> : vector<32x256xf32>
    %253 = tpu.matmul %251, %252, %cst_75 {dimension_numbers = #tpu.dot_dimension_numbers<[1], [0], [0], [1], [0, 0, 1, 1], [], []>} : vector<32x128xbf16>, vector<128x256xbf16>, vector<32x256xf32> -> vector<32x256xf32>
    %254 = arith.addf %184, %253 : vector<32x256xf32>
    %255 = vector.broadcast %13 : vector<32x1xf32> to vector<32x256xf32>
    %256 = arith.addf %254, %255 : vector<32x256xf32>
    %257 = vector.extract_strided_slice %1 {offsets = [0, 6], sizes = [32, 1], strides = [1, 1]} : vector<128x15xf32> to vector<32x1xf32>
    %258 = vector.extract_strided_slice %1 {offsets = [0, 7], sizes = [32, 1], strides = [1, 1]} : vector<128x15xf32> to vector<32x1xf32>
    %259 = vector.extract_strided_slice %1 {offsets = [0, 8], sizes = [32, 1], strides = [1, 1]} : vector<128x15xf32> to vector<32x1xf32>
    %260 = vector.extract_strided_slice %1 {offsets = [0, 9], sizes = [32, 1], strides = [1, 1]} : vector<128x15xf32> to vector<32x1xf32>
    %261 = vector.extract_strided_slice %1 {offsets = [0, 10], sizes = [32, 1], strides = [1, 1]} : vector<128x15xf32> to vector<32x1xf32>
    %262 = vector.extract_strided_slice %1 {offsets = [0, 11], sizes = [32, 1], strides = [1, 1]} : vector<128x15xf32> to vector<32x1xf32>
    %263 = vector.extract_strided_slice %1 {offsets = [0, 13], sizes = [128, 1], strides = [1, 1]} : vector<128x15xf32> to vector<128x1xf32>
    %cst_76 = arith.constant dense<0.000000e+00> : vector<256xf32>
    %264 = vector.multi_reduction <add>, %256, %cst_76 [0] : vector<32x256xf32> to vector<256xf32>
    %265 = vector.shape_cast %264 : vector<256xf32> to vector<1x256xf32>
    %cst_77 = arith.constant 3.200000e+01 : f32
    %266 = vector.broadcast %cst_77 : f32 to vector<1x256xf32>
    %267 = arith.divf %265, %266 : vector<1x256xf32>
    %268 = vector.broadcast %267 : vector<1x256xf32> to vector<32x256xf32>
    %269 = arith.subf %256, %268 : vector<32x256xf32>
    %270 = arith.mulf %269, %269 : vector<32x256xf32>
    %cst_78 = arith.constant dense<0.000000e+00> : vector<256xf32>
    %271 = vector.multi_reduction <add>, %270, %cst_78 [0] : vector<32x256xf32> to vector<256xf32>
    %272 = vector.shape_cast %271 : vector<256xf32> to vector<1x256xf32>
    %cst_79 = arith.constant 3.200000e+01 : f32
    %273 = vector.broadcast %cst_79 : f32 to vector<1x256xf32>
    %274 = arith.divf %272, %273 : vector<1x256xf32>
    %cst_80 = arith.constant 9.99999974E-6 : f32
    %275 = vector.broadcast %cst_80 : f32 to vector<1x256xf32>
    %276 = arith.addf %274, %275 : vector<1x256xf32>
    %277 = math.rsqrt %276 : vector<1x256xf32>
    %278 = vector.broadcast %277 : vector<1x256xf32> to vector<32x256xf32>
    %279 = arith.mulf %269, %278 : vector<32x256xf32>
    %280 = vector.broadcast %257 : vector<32x1xf32> to vector<32x256xf32>
    %281 = arith.mulf %279, %280 : vector<32x256xf32>
    %282 = vector.broadcast %258 : vector<32x1xf32> to vector<32x256xf32>
    %283 = arith.addf %281, %282 : vector<32x256xf32>
    %c1 = arith.constant 1 : index
    %c0_81 = arith.constant 0 : index
    %c0_82 = arith.constant 0 : index
    %284 = vector.load %arg1[%c1, %c0_81, %c0_82] : memref<2x96x32xbf16, #tpu.memory_space<vmem>>, vector<1x96x32xbf16>
    %285 = vector.shape_cast %284 : vector<1x96x32xbf16> to vector<96x32xbf16>
    %286 = arith.truncf %283 : vector<32x256xf32> to vector<32x256xbf16>
    %cst_83 = arith.constant dense<0.000000e+00> : vector<96x256xf32>
    %287 = tpu.matmul %285, %286, %cst_83 {dimension_numbers = #tpu.dot_dimension_numbers<[1], [0], [0], [1], [0, 0, 1, 1], [], []>} : vector<96x32xbf16>, vector<32x256xbf16>, vector<96x256xf32> -> vector<96x256xf32>
    %288 = vector.extract_strided_slice %287 {offsets = [0, 0], sizes = [8, 128], strides = [1, 1]} : vector<96x256xf32> to vector<8x128xf32>
    %289 = vector.extract_strided_slice %287 {offsets = [32, 0], sizes = [8, 128], strides = [1, 1]} : vector<96x256xf32> to vector<8x128xf32>
    %290 = vector.extract_strided_slice %287 {offsets = [64, 0], sizes = [8, 128], strides = [1, 1]} : vector<96x256xf32> to vector<8x128xf32>
    %cst_84 = arith.constant dense<0.000000e+00> : vector<128x128xf32>
    %291 = tpu.matmul %288, %289, %cst_84 {dimension_numbers = #tpu.dot_dimension_numbers<[0], [0], [1], [1], [0, 1, 1, 1], [], []>} : vector<8x128xf32>, vector<8x128xf32>, vector<128x128xf32> -> vector<128x128xf32>
    %292 = vector.broadcast %7 : vector<1x128xf32> to vector<128x128xf32>
    %293 = arith.addf %291, %292 : vector<128x128xf32>
    %cst_85 = arith.constant dense<0xFF800000> : vector<128xf32>
    %294 = vector.multi_reduction <maximumf>, %293, %cst_85 [1] : vector<128x128xf32> to vector<128xf32>
    %295 = vector.shape_cast %294 : vector<128xf32> to vector<128x1xf32>
    %296 = vector.broadcast %295 : vector<128x1xf32> to vector<128x128xf32>
    %297 = arith.subf %293, %296 : vector<128x128xf32>
    %298 = math.exp %297 : vector<128x128xf32>
    %cst_86 = arith.constant dense<0.000000e+00> : vector<128xf32>
    %299 = vector.multi_reduction <add>, %298, %cst_86 [1] : vector<128x128xf32> to vector<128xf32>
    %300 = vector.shape_cast %299 : vector<128xf32> to vector<128x1xf32>
    %301 = tpu.reciprocal %300 {approx = true} : vector<128x1xf32> -> vector<128x1xf32>
    %302 = vector.broadcast %301 : vector<128x1xf32> to vector<128x128xf32>
    %303 = arith.mulf %298, %302 : vector<128x128xf32>
    %cst_87 = arith.constant dense<0.000000e+00> : vector<8x128xf32>
    %304 = tpu.matmul %290, %303, %cst_87 {dimension_numbers = #tpu.dot_dimension_numbers<[1], [1], [0], [0], [0, 0, 1, 0], [], []>} : vector<8x128xf32>, vector<128x128xf32>, vector<8x128xf32> -> vector<8x128xf32>
    %305 = vector.extract_strided_slice %287 {offsets = [8, 0], sizes = [8, 128], strides = [1, 1]} : vector<96x256xf32> to vector<8x128xf32>
    %306 = vector.extract_strided_slice %287 {offsets = [40, 0], sizes = [8, 128], strides = [1, 1]} : vector<96x256xf32> to vector<8x128xf32>
    %307 = vector.extract_strided_slice %287 {offsets = [72, 0], sizes = [8, 128], strides = [1, 1]} : vector<96x256xf32> to vector<8x128xf32>
    %cst_88 = arith.constant dense<0.000000e+00> : vector<128x128xf32>
    %308 = tpu.matmul %305, %306, %cst_88 {dimension_numbers = #tpu.dot_dimension_numbers<[0], [0], [1], [1], [0, 1, 1, 1], [], []>} : vector<8x128xf32>, vector<8x128xf32>, vector<128x128xf32> -> vector<128x128xf32>
    %309 = vector.broadcast %7 : vector<1x128xf32> to vector<128x128xf32>
    %310 = arith.addf %308, %309 : vector<128x128xf32>
    %cst_89 = arith.constant dense<0xFF800000> : vector<128xf32>
    %311 = vector.multi_reduction <maximumf>, %310, %cst_89 [1] : vector<128x128xf32> to vector<128xf32>
    %312 = vector.shape_cast %311 : vector<128xf32> to vector<128x1xf32>
    %313 = vector.broadcast %312 : vector<128x1xf32> to vector<128x128xf32>
    %314 = arith.subf %310, %313 : vector<128x128xf32>
    %315 = math.exp %314 : vector<128x128xf32>
    %cst_90 = arith.constant dense<0.000000e+00> : vector<128xf32>
    %316 = vector.multi_reduction <add>, %315, %cst_90 [1] : vector<128x128xf32> to vector<128xf32>
    %317 = vector.shape_cast %316 : vector<128xf32> to vector<128x1xf32>
    %318 = tpu.reciprocal %317 {approx = true} : vector<128x1xf32> -> vector<128x1xf32>
    %319 = vector.broadcast %318 : vector<128x1xf32> to vector<128x128xf32>
    %320 = arith.mulf %315, %319 : vector<128x128xf32>
    %cst_91 = arith.constant dense<0.000000e+00> : vector<8x128xf32>
    %321 = tpu.matmul %307, %320, %cst_91 {dimension_numbers = #tpu.dot_dimension_numbers<[1], [1], [0], [0], [0, 0, 1, 0], [], []>} : vector<8x128xf32>, vector<128x128xf32>, vector<8x128xf32> -> vector<8x128xf32>
    %322 = vector.extract_strided_slice %287 {offsets = [16, 0], sizes = [8, 128], strides = [1, 1]} : vector<96x256xf32> to vector<8x128xf32>
    %323 = vector.extract_strided_slice %287 {offsets = [48, 0], sizes = [8, 128], strides = [1, 1]} : vector<96x256xf32> to vector<8x128xf32>
    %324 = vector.extract_strided_slice %287 {offsets = [80, 0], sizes = [8, 128], strides = [1, 1]} : vector<96x256xf32> to vector<8x128xf32>
    %cst_92 = arith.constant dense<0.000000e+00> : vector<128x128xf32>
    %325 = tpu.matmul %322, %323, %cst_92 {dimension_numbers = #tpu.dot_dimension_numbers<[0], [0], [1], [1], [0, 1, 1, 1], [], []>} : vector<8x128xf32>, vector<8x128xf32>, vector<128x128xf32> -> vector<128x128xf32>
    %326 = vector.broadcast %7 : vector<1x128xf32> to vector<128x128xf32>
    %327 = arith.addf %325, %326 : vector<128x128xf32>
    %cst_93 = arith.constant dense<0xFF800000> : vector<128xf32>
    %328 = vector.multi_reduction <maximumf>, %327, %cst_93 [1] : vector<128x128xf32> to vector<128xf32>
    %329 = vector.shape_cast %328 : vector<128xf32> to vector<128x1xf32>
    %330 = vector.broadcast %329 : vector<128x1xf32> to vector<128x128xf32>
    %331 = arith.subf %327, %330 : vector<128x128xf32>
    %332 = math.exp %331 : vector<128x128xf32>
    %cst_94 = arith.constant dense<0.000000e+00> : vector<128xf32>
    %333 = vector.multi_reduction <add>, %332, %cst_94 [1] : vector<128x128xf32> to vector<128xf32>
    %334 = vector.shape_cast %333 : vector<128xf32> to vector<128x1xf32>
    %335 = tpu.reciprocal %334 {approx = true} : vector<128x1xf32> -> vector<128x1xf32>
    %336 = vector.broadcast %335 : vector<128x1xf32> to vector<128x128xf32>
    %337 = arith.mulf %332, %336 : vector<128x128xf32>
    %cst_95 = arith.constant dense<0.000000e+00> : vector<8x128xf32>
    %338 = tpu.matmul %324, %337, %cst_95 {dimension_numbers = #tpu.dot_dimension_numbers<[1], [1], [0], [0], [0, 0, 1, 0], [], []>} : vector<8x128xf32>, vector<128x128xf32>, vector<8x128xf32> -> vector<8x128xf32>
    %339 = vector.extract_strided_slice %287 {offsets = [24, 0], sizes = [8, 128], strides = [1, 1]} : vector<96x256xf32> to vector<8x128xf32>
    %340 = vector.extract_strided_slice %287 {offsets = [56, 0], sizes = [8, 128], strides = [1, 1]} : vector<96x256xf32> to vector<8x128xf32>
    %341 = vector.extract_strided_slice %287 {offsets = [88, 0], sizes = [8, 128], strides = [1, 1]} : vector<96x256xf32> to vector<8x128xf32>
    %cst_96 = arith.constant dense<0.000000e+00> : vector<128x128xf32>
    %342 = tpu.matmul %339, %340, %cst_96 {dimension_numbers = #tpu.dot_dimension_numbers<[0], [0], [1], [1], [0, 1, 1, 1], [], []>} : vector<8x128xf32>, vector<8x128xf32>, vector<128x128xf32> -> vector<128x128xf32>
    %343 = vector.broadcast %7 : vector<1x128xf32> to vector<128x128xf32>
    %344 = arith.addf %342, %343 : vector<128x128xf32>
    %cst_97 = arith.constant dense<0xFF800000> : vector<128xf32>
    %345 = vector.multi_reduction <maximumf>, %344, %cst_97 [1] : vector<128x128xf32> to vector<128xf32>
    %346 = vector.shape_cast %345 : vector<128xf32> to vector<128x1xf32>
    %347 = vector.broadcast %346 : vector<128x1xf32> to vector<128x128xf32>
    %348 = arith.subf %344, %347 : vector<128x128xf32>
    %349 = math.exp %348 : vector<128x128xf32>
    %cst_98 = arith.constant dense<0.000000e+00> : vector<128xf32>
    %350 = vector.multi_reduction <add>, %349, %cst_98 [1] : vector<128x128xf32> to vector<128xf32>
    %351 = vector.shape_cast %350 : vector<128xf32> to vector<128x1xf32>
    %352 = tpu.reciprocal %351 {approx = true} : vector<128x1xf32> -> vector<128x1xf32>
    %353 = vector.broadcast %352 : vector<128x1xf32> to vector<128x128xf32>
    %354 = arith.mulf %349, %353 : vector<128x128xf32>
    %cst_99 = arith.constant dense<0.000000e+00> : vector<8x128xf32>
    %355 = tpu.matmul %341, %354, %cst_99 {dimension_numbers = #tpu.dot_dimension_numbers<[1], [1], [0], [0], [0, 0, 1, 0], [], []>} : vector<8x128xf32>, vector<128x128xf32>, vector<8x128xf32> -> vector<8x128xf32>
    %356 = tpu.concatenate %304, %321, %338, %355 in 0 : vector<8x128xf32>, vector<8x128xf32>, vector<8x128xf32>, vector<8x128xf32> -> vector<32x128xf32>
    %357 = vector.extract_strided_slice %287 {offsets = [0, 128], sizes = [8, 128], strides = [1, 1]} : vector<96x256xf32> to vector<8x128xf32>
    %358 = vector.extract_strided_slice %287 {offsets = [32, 128], sizes = [8, 128], strides = [1, 1]} : vector<96x256xf32> to vector<8x128xf32>
    %359 = vector.extract_strided_slice %287 {offsets = [64, 128], sizes = [8, 128], strides = [1, 1]} : vector<96x256xf32> to vector<8x128xf32>
    %cst_100 = arith.constant dense<0.000000e+00> : vector<128x128xf32>
    %360 = tpu.matmul %357, %358, %cst_100 {dimension_numbers = #tpu.dot_dimension_numbers<[0], [0], [1], [1], [0, 1, 1, 1], [], []>} : vector<8x128xf32>, vector<8x128xf32>, vector<128x128xf32> -> vector<128x128xf32>
    %361 = vector.broadcast %7 : vector<1x128xf32> to vector<128x128xf32>
    %362 = arith.addf %360, %361 : vector<128x128xf32>
    %cst_101 = arith.constant dense<0xFF800000> : vector<128xf32>
    %363 = vector.multi_reduction <maximumf>, %362, %cst_101 [1] : vector<128x128xf32> to vector<128xf32>
    %364 = vector.shape_cast %363 : vector<128xf32> to vector<128x1xf32>
    %365 = vector.broadcast %364 : vector<128x1xf32> to vector<128x128xf32>
    %366 = arith.subf %362, %365 : vector<128x128xf32>
    %367 = math.exp %366 : vector<128x128xf32>
    %cst_102 = arith.constant dense<0.000000e+00> : vector<128xf32>
    %368 = vector.multi_reduction <add>, %367, %cst_102 [1] : vector<128x128xf32> to vector<128xf32>
    %369 = vector.shape_cast %368 : vector<128xf32> to vector<128x1xf32>
    %370 = tpu.reciprocal %369 {approx = true} : vector<128x1xf32> -> vector<128x1xf32>
    %371 = vector.broadcast %370 : vector<128x1xf32> to vector<128x128xf32>
    %372 = arith.mulf %367, %371 : vector<128x128xf32>
    %cst_103 = arith.constant dense<0.000000e+00> : vector<8x128xf32>
    %373 = tpu.matmul %359, %372, %cst_103 {dimension_numbers = #tpu.dot_dimension_numbers<[1], [1], [0], [0], [0, 0, 1, 0], [], []>} : vector<8x128xf32>, vector<128x128xf32>, vector<8x128xf32> -> vector<8x128xf32>
    %374 = vector.extract_strided_slice %287 {offsets = [8, 128], sizes = [8, 128], strides = [1, 1]} : vector<96x256xf32> to vector<8x128xf32>
    %375 = vector.extract_strided_slice %287 {offsets = [40, 128], sizes = [8, 128], strides = [1, 1]} : vector<96x256xf32> to vector<8x128xf32>
    %376 = vector.extract_strided_slice %287 {offsets = [72, 128], sizes = [8, 128], strides = [1, 1]} : vector<96x256xf32> to vector<8x128xf32>
    %cst_104 = arith.constant dense<0.000000e+00> : vector<128x128xf32>
    %377 = tpu.matmul %374, %375, %cst_104 {dimension_numbers = #tpu.dot_dimension_numbers<[0], [0], [1], [1], [0, 1, 1, 1], [], []>} : vector<8x128xf32>, vector<8x128xf32>, vector<128x128xf32> -> vector<128x128xf32>
    %378 = vector.broadcast %7 : vector<1x128xf32> to vector<128x128xf32>
    %379 = arith.addf %377, %378 : vector<128x128xf32>
    %cst_105 = arith.constant dense<0xFF800000> : vector<128xf32>
    %380 = vector.multi_reduction <maximumf>, %379, %cst_105 [1] : vector<128x128xf32> to vector<128xf32>
    %381 = vector.shape_cast %380 : vector<128xf32> to vector<128x1xf32>
    %382 = vector.broadcast %381 : vector<128x1xf32> to vector<128x128xf32>
    %383 = arith.subf %379, %382 : vector<128x128xf32>
    %384 = math.exp %383 : vector<128x128xf32>
    %cst_106 = arith.constant dense<0.000000e+00> : vector<128xf32>
    %385 = vector.multi_reduction <add>, %384, %cst_106 [1] : vector<128x128xf32> to vector<128xf32>
    %386 = vector.shape_cast %385 : vector<128xf32> to vector<128x1xf32>
    %387 = tpu.reciprocal %386 {approx = true} : vector<128x1xf32> -> vector<128x1xf32>
    %388 = vector.broadcast %387 : vector<128x1xf32> to vector<128x128xf32>
    %389 = arith.mulf %384, %388 : vector<128x128xf32>
    %cst_107 = arith.constant dense<0.000000e+00> : vector<8x128xf32>
    %390 = tpu.matmul %376, %389, %cst_107 {dimension_numbers = #tpu.dot_dimension_numbers<[1], [1], [0], [0], [0, 0, 1, 0], [], []>} : vector<8x128xf32>, vector<128x128xf32>, vector<8x128xf32> -> vector<8x128xf32>
    %391 = vector.extract_strided_slice %287 {offsets = [16, 128], sizes = [8, 128], strides = [1, 1]} : vector<96x256xf32> to vector<8x128xf32>
    %392 = vector.extract_strided_slice %287 {offsets = [48, 128], sizes = [8, 128], strides = [1, 1]} : vector<96x256xf32> to vector<8x128xf32>
    %393 = vector.extract_strided_slice %287 {offsets = [80, 128], sizes = [8, 128], strides = [1, 1]} : vector<96x256xf32> to vector<8x128xf32>
    %cst_108 = arith.constant dense<0.000000e+00> : vector<128x128xf32>
    %394 = tpu.matmul %391, %392, %cst_108 {dimension_numbers = #tpu.dot_dimension_numbers<[0], [0], [1], [1], [0, 1, 1, 1], [], []>} : vector<8x128xf32>, vector<8x128xf32>, vector<128x128xf32> -> vector<128x128xf32>
    %395 = vector.broadcast %7 : vector<1x128xf32> to vector<128x128xf32>
    %396 = arith.addf %394, %395 : vector<128x128xf32>
    %cst_109 = arith.constant dense<0xFF800000> : vector<128xf32>
    %397 = vector.multi_reduction <maximumf>, %396, %cst_109 [1] : vector<128x128xf32> to vector<128xf32>
    %398 = vector.shape_cast %397 : vector<128xf32> to vector<128x1xf32>
    %399 = vector.broadcast %398 : vector<128x1xf32> to vector<128x128xf32>
    %400 = arith.subf %396, %399 : vector<128x128xf32>
    %401 = math.exp %400 : vector<128x128xf32>
    %cst_110 = arith.constant dense<0.000000e+00> : vector<128xf32>
    %402 = vector.multi_reduction <add>, %401, %cst_110 [1] : vector<128x128xf32> to vector<128xf32>
    %403 = vector.shape_cast %402 : vector<128xf32> to vector<128x1xf32>
    %404 = tpu.reciprocal %403 {approx = true} : vector<128x1xf32> -> vector<128x1xf32>
    %405 = vector.broadcast %404 : vector<128x1xf32> to vector<128x128xf32>
    %406 = arith.mulf %401, %405 : vector<128x128xf32>
    %cst_111 = arith.constant dense<0.000000e+00> : vector<8x128xf32>
    %407 = tpu.matmul %393, %406, %cst_111 {dimension_numbers = #tpu.dot_dimension_numbers<[1], [1], [0], [0], [0, 0, 1, 0], [], []>} : vector<8x128xf32>, vector<128x128xf32>, vector<8x128xf32> -> vector<8x128xf32>
    %408 = vector.extract_strided_slice %287 {offsets = [24, 128], sizes = [8, 128], strides = [1, 1]} : vector<96x256xf32> to vector<8x128xf32>
    %409 = vector.extract_strided_slice %287 {offsets = [56, 128], sizes = [8, 128], strides = [1, 1]} : vector<96x256xf32> to vector<8x128xf32>
    %410 = vector.extract_strided_slice %287 {offsets = [88, 128], sizes = [8, 128], strides = [1, 1]} : vector<96x256xf32> to vector<8x128xf32>
    %cst_112 = arith.constant dense<0.000000e+00> : vector<128x128xf32>
    %411 = tpu.matmul %408, %409, %cst_112 {dimension_numbers = #tpu.dot_dimension_numbers<[0], [0], [1], [1], [0, 1, 1, 1], [], []>} : vector<8x128xf32>, vector<8x128xf32>, vector<128x128xf32> -> vector<128x128xf32>
    %412 = vector.broadcast %7 : vector<1x128xf32> to vector<128x128xf32>
    %413 = arith.addf %411, %412 : vector<128x128xf32>
    %cst_113 = arith.constant dense<0xFF800000> : vector<128xf32>
    %414 = vector.multi_reduction <maximumf>, %413, %cst_113 [1] : vector<128x128xf32> to vector<128xf32>
    %415 = vector.shape_cast %414 : vector<128xf32> to vector<128x1xf32>
    %416 = vector.broadcast %415 : vector<128x1xf32> to vector<128x128xf32>
    %417 = arith.subf %413, %416 : vector<128x128xf32>
    %418 = math.exp %417 : vector<128x128xf32>
    %cst_114 = arith.constant dense<0.000000e+00> : vector<128xf32>
    %419 = vector.multi_reduction <add>, %418, %cst_114 [1] : vector<128x128xf32> to vector<128xf32>
    %420 = vector.shape_cast %419 : vector<128xf32> to vector<128x1xf32>
    %421 = tpu.reciprocal %420 {approx = true} : vector<128x1xf32> -> vector<128x1xf32>
    %422 = vector.broadcast %421 : vector<128x1xf32> to vector<128x128xf32>
    %423 = arith.mulf %418, %422 : vector<128x128xf32>
    %cst_115 = arith.constant dense<0.000000e+00> : vector<8x128xf32>
    %424 = tpu.matmul %410, %423, %cst_115 {dimension_numbers = #tpu.dot_dimension_numbers<[1], [1], [0], [0], [0, 0, 1, 0], [], []>} : vector<8x128xf32>, vector<128x128xf32>, vector<8x128xf32> -> vector<8x128xf32>
    %425 = tpu.concatenate %373, %390, %407, %424 in 0 : vector<8x128xf32>, vector<8x128xf32>, vector<8x128xf32>, vector<8x128xf32> -> vector<32x128xf32>
    %426 = tpu.concatenate %356, %425 in 1 : vector<32x128xf32>, vector<32x128xf32> -> vector<32x256xf32>
    %c1_116 = arith.constant 1 : index
    %c0_117 = arith.constant 0 : index
    %c0_118 = arith.constant 0 : index
    %427 = vector.load %arg2[%c1_116, %c0_117, %c0_118] : memref<2x32x32xbf16, #tpu.memory_space<vmem>>, vector<1x32x32xbf16>
    %428 = vector.shape_cast %427 : vector<1x32x32xbf16> to vector<32x32xbf16>
    %429 = arith.truncf %426 : vector<32x256xf32> to vector<32x256xbf16>
    %cst_119 = arith.constant dense<0.000000e+00> : vector<32x256xf32>
    %430 = tpu.matmul %428, %429, %cst_119 {dimension_numbers = #tpu.dot_dimension_numbers<[1], [0], [0], [1], [0, 0, 1, 1], [], []>} : vector<32x32xbf16>, vector<32x256xbf16>, vector<32x256xf32> -> vector<32x256xf32>
    %431 = arith.addf %256, %430 : vector<32x256xf32>
    %432 = vector.broadcast %259 : vector<32x1xf32> to vector<32x256xf32>
    %433 = arith.addf %431, %432 : vector<32x256xf32>
    %cst_120 = arith.constant dense<0.000000e+00> : vector<256xf32>
    %434 = vector.multi_reduction <add>, %433, %cst_120 [0] : vector<32x256xf32> to vector<256xf32>
    %435 = vector.shape_cast %434 : vector<256xf32> to vector<1x256xf32>
    %cst_121 = arith.constant 3.200000e+01 : f32
    %436 = vector.broadcast %cst_121 : f32 to vector<1x256xf32>
    %437 = arith.divf %435, %436 : vector<1x256xf32>
    %438 = vector.broadcast %437 : vector<1x256xf32> to vector<32x256xf32>
    %439 = arith.subf %433, %438 : vector<32x256xf32>
    %440 = arith.mulf %439, %439 : vector<32x256xf32>
    %cst_122 = arith.constant dense<0.000000e+00> : vector<256xf32>
    %441 = vector.multi_reduction <add>, %440, %cst_122 [0] : vector<32x256xf32> to vector<256xf32>
    %442 = vector.shape_cast %441 : vector<256xf32> to vector<1x256xf32>
    %cst_123 = arith.constant 3.200000e+01 : f32
    %443 = vector.broadcast %cst_123 : f32 to vector<1x256xf32>
    %444 = arith.divf %442, %443 : vector<1x256xf32>
    %cst_124 = arith.constant 9.99999974E-6 : f32
    %445 = vector.broadcast %cst_124 : f32 to vector<1x256xf32>
    %446 = arith.addf %444, %445 : vector<1x256xf32>
    %447 = math.rsqrt %446 : vector<1x256xf32>
    %448 = vector.broadcast %447 : vector<1x256xf32> to vector<32x256xf32>
    %449 = arith.mulf %439, %448 : vector<32x256xf32>
    %450 = vector.broadcast %260 : vector<32x1xf32> to vector<32x256xf32>
    %451 = arith.mulf %449, %450 : vector<32x256xf32>
    %452 = vector.broadcast %261 : vector<32x1xf32> to vector<32x256xf32>
    %453 = arith.addf %451, %452 : vector<32x256xf32>
    %c1_125 = arith.constant 1 : index
    %c0_126 = arith.constant 0 : index
    %c0_127 = arith.constant 0 : index
    %454 = vector.load %arg3[%c1_125, %c0_126, %c0_127] : memref<2x128x32xbf16, #tpu.memory_space<vmem>>, vector<1x128x32xbf16>
    %455 = vector.shape_cast %454 : vector<1x128x32xbf16> to vector<128x32xbf16>
    %456 = arith.truncf %453 : vector<32x256xf32> to vector<32x256xbf16>
    %cst_128 = arith.constant dense<0.000000e+00> : vector<128x256xf32>
    %457 = tpu.matmul %455, %456, %cst_128 {dimension_numbers = #tpu.dot_dimension_numbers<[1], [0], [0], [1], [0, 0, 1, 1], [], []>} : vector<128x32xbf16>, vector<32x256xbf16>, vector<128x256xf32> -> vector<128x256xf32>
    %458 = vector.broadcast %263 : vector<128x1xf32> to vector<128x256xf32>
    %459 = arith.addf %457, %458 : vector<128x256xf32>
    %cst_129 = arith.constant 5.000000e-01 : f32
    %460 = vector.broadcast %cst_129 : f32 to vector<128x256xf32>
    %461 = arith.mulf %460, %459 : vector<128x256xf32>
    %cst_130 = arith.constant 0.707106769 : f32
    %462 = vector.broadcast %cst_130 : f32 to vector<128x256xf32>
    %463 = arith.mulf %459, %462 : vector<128x256xf32>
    %464 = math.absf %463 : vector<128x256xf32>
    %cst_131 = arith.constant 0.327591091 : f32
    %465 = vector.broadcast %cst_131 : f32 to vector<128x256xf32>
    %466 = arith.mulf %465, %464 : vector<128x256xf32>
    %cst_132 = arith.constant 1.000000e+00 : f32
    %467 = vector.broadcast %cst_132 : f32 to vector<128x256xf32>
    %468 = arith.addf %467, %466 : vector<128x256xf32>
    %469 = tpu.reciprocal %468 {approx = true} : vector<128x256xf32> -> vector<128x256xf32>
    %cst_133 = arith.constant 1.06140542 : f32
    %470 = vector.broadcast %cst_133 : f32 to vector<128x256xf32>
    %471 = arith.mulf %470, %469 : vector<128x256xf32>
    %cst_134 = arith.constant -1.45315206 : f32
    %472 = vector.broadcast %cst_134 : f32 to vector<128x256xf32>
    %473 = arith.addf %471, %472 : vector<128x256xf32>
    %474 = arith.mulf %473, %469 : vector<128x256xf32>
    %cst_135 = arith.constant 1.42141378 : f32
    %475 = vector.broadcast %cst_135 : f32 to vector<128x256xf32>
    %476 = arith.addf %474, %475 : vector<128x256xf32>
    %477 = arith.mulf %476, %469 : vector<128x256xf32>
    %cst_136 = arith.constant -0.284496725 : f32
    %478 = vector.broadcast %cst_136 : f32 to vector<128x256xf32>
    %479 = arith.addf %477, %478 : vector<128x256xf32>
    %480 = arith.mulf %479, %469 : vector<128x256xf32>
    %cst_137 = arith.constant 0.254829586 : f32
    %481 = vector.broadcast %cst_137 : f32 to vector<128x256xf32>
    %482 = arith.addf %480, %481 : vector<128x256xf32>
    %483 = arith.mulf %482, %469 : vector<128x256xf32>
    %cst_138 = arith.constant 0.000000e+00 : f32
    %484 = vector.broadcast %cst_138 : f32 to vector<128x256xf32>
    %485 = arith.subf %484, %464 : vector<128x256xf32>
    %486 = arith.mulf %485, %464 : vector<128x256xf32>
    %487 = math.exp %486 : vector<128x256xf32>
    %488 = arith.mulf %483, %487 : vector<128x256xf32>
    %cst_139 = arith.constant 1.000000e+00 : f32
    %489 = vector.broadcast %cst_139 : f32 to vector<128x256xf32>
    %490 = arith.subf %489, %488 : vector<128x256xf32>
    %cst_140 = arith.constant 0.000000e+00 : f32
    %491 = vector.broadcast %cst_140 : f32 to vector<128x256xf32>
    %492 = arith.cmpf oge, %463, %491 : vector<128x256xf32>
    %cst_141 = arith.constant 0.000000e+00 : f32
    %493 = vector.broadcast %cst_141 : f32 to vector<128x256xf32>
    %494 = arith.subf %493, %490 : vector<128x256xf32>
    %495 = arith.select %492, %490, %494 : vector<128x256xi1>, vector<128x256xf32>
    %cst_142 = arith.constant 1.000000e+00 : f32
    %496 = vector.broadcast %cst_142 : f32 to vector<128x256xf32>
    %497 = arith.addf %496, %495 : vector<128x256xf32>
    %498 = arith.mulf %461, %497 : vector<128x256xf32>
    %c1_143 = arith.constant 1 : index
    %c0_144 = arith.constant 0 : index
    %c0_145 = arith.constant 0 : index
    %499 = vector.load %arg4[%c1_143, %c0_144, %c0_145] : memref<2x32x128xbf16, #tpu.memory_space<vmem>>, vector<1x32x128xbf16>
    %500 = vector.shape_cast %499 : vector<1x32x128xbf16> to vector<32x128xbf16>
    %501 = arith.truncf %498 : vector<128x256xf32> to vector<128x256xbf16>
    %cst_146 = arith.constant dense<0.000000e+00> : vector<32x256xf32>
    %502 = tpu.matmul %500, %501, %cst_146 {dimension_numbers = #tpu.dot_dimension_numbers<[1], [0], [0], [1], [0, 0, 1, 1], [], []>} : vector<32x128xbf16>, vector<128x256xbf16>, vector<32x256xf32> -> vector<32x256xf32>
    %503 = arith.addf %433, %502 : vector<32x256xf32>
    %504 = vector.broadcast %262 : vector<32x1xf32> to vector<32x256xf32>
    %505 = arith.addf %503, %504 : vector<32x256xf32>
    %506 = vector.extract_strided_slice %1 {offsets = [0, 14], sizes = [12, 1], strides = [1, 1]} : vector<128x15xf32> to vector<12x1xf32>
    %c0_147 = arith.constant 0 : index
    %c0_148 = arith.constant 0 : index
    %507 = vector.load %arg5[%c0_147, %c0_148] : memref<12x32xbf16, #tpu.memory_space<vmem>>, vector<12x32xbf16>
    %508 = arith.truncf %505 : vector<32x256xf32> to vector<32x256xbf16>
    %cst_149 = arith.constant dense<0.000000e+00> : vector<12x256xf32>
    %509 = tpu.matmul %507, %508, %cst_149 {dimension_numbers = #tpu.dot_dimension_numbers<[1], [0], [0], [1], [0, 0, 1, 1], [], []>} : vector<12x32xbf16>, vector<32x256xbf16>, vector<12x256xf32> -> vector<12x256xf32>
    %510 = vector.broadcast %506 : vector<12x1xf32> to vector<12x256xf32>
    %511 = arith.addf %509, %510 : vector<12x256xf32>
    %c0_150 = arith.constant 0 : index
    %c0_151 = arith.constant 0 : index
    %512 = vector.load %arg7[%c0_150, %c0_151] : memref<12x256xf32, #tpu.memory_space<vmem>>, vector<12x256xf32>
    tpu.vector_store %arg7[%c0_150, %c0_151], %511 {strides = array<i32>} : memref<12x256xf32, #tpu.memory_space<vmem>>, vector<12x256xf32>,
    return
  }
}

</mosaic_0001>

<bundles_post_ra>
// kernel: mae_decoder_forward.1
= control target key start
LH: loop header
LB: loop body
LE: loop exit
PB: predicated region body
PF: predicated region fallthrough
CT: control target
= control target key end

     0   :  { %v14280_v0 = vmov 1   ;;  %v19695_v1 = vmov 0   ;;  %vm222_vm0 = vcmask 261120   ;;  %vm366_vm1 = vcmask 64512   ;;  %s19687_s6 = inlined_call_operand.vmem [shape: f32[128,15], index: 6, kind: input, shape index: {}]   ;;  %s19688_s0 = inlined_call_operand.vmem [shape: f32[32,256], index: 0, kind: input, shape index: {}]   ;;  %s19689_s1 = inlined_call_operand.vmem [shape: bf16[2,96,32], index: 1, kind: input, shape index: {}]   ;;  %s19690_s2 = inlined_call_operand.vmem [shape: bf16[2,32,32], index: 2, kind: input, shape index: {}]   ;;  %s19691_s3 = inlined_call_operand.vmem [shape: bf16[2,128,32], index: 3, kind: input, shape index: {}]   ;;  %s19692_s4 = inlined_call_operand.vmem [shape: bf16[2,32,128], index: 4, kind: input, shape index: {}]   ;;  %s19693_s5 = inlined_call_operand.vmem [shape: bf16[12,32], index: 5, kind: input, shape index: {}]   ;;  %s19694_s7 = inlined_call_operand.vmem [shape: f32[12,256], index: 7, kind: output, shape index: {}]  }
   0x1   :  { %12877 = vset.pattern.permute.xlu1 %v14280_v0  ;;  %12876 = vset.pattern.permute.xlu0 %v19695_v1  ;;  %v35_v2 = vld [vmem:[%s19687_s6] sm:$0xff]  ;;  %v36_v3 = vld [vmem:[%s19687_s6 + $0x8] sm:$0xff]  ;;  %v37_v4 = vld [vmem:[%s19687_s6 + $0x10] sm:$0xff]  ;;  %vm14284_vm3 = vmmov 0  }
   0x2   :  { %153 = vperm.xlu1 %12877, %v35_v2   ;;  %126 = vperm.xlu0 %12876, %v35_v2   ;;  %v38_v5 = vld [vmem:[%s19687_s6 + $0x18] sm:$0xff]  ;;  %v27_v6 = vld [vmem:[%s19688_s0] sm:$0xff]  ;;  %v29_v7 = vld [vmem:[%s19688_s0 + $0x10] sm:$0xff] }
   0x3   :  { %273 = vmatprep.mubr.bf16.mxu0 %v19695_v1  ;;  %v28_v8 = vld [vmem:[%s19688_s0 + $0x8] sm:$0xff]  ;;  %v30_v9 = vld [vmem:[%s19688_s0 + $0x18] sm:$0xff]  ;;  %v31_v10 = vld [vmem:[%s19688_s0 + $0x20] sm:$0xff]  ;;  %v55_v11 = vadd.f32 %v29_v7, %v27_v6 }
   0x4   :  { %v32_v12 = vld [vmem:[%s19688_s0 + $0x28] sm:$0xff]  ;;  %v64_v13 = vadd.f32 %v30_v9, %v28_v8  ;;  %v33_v14 = vld [vmem:[%s19688_s0 + $0x30] sm:$0xff]  ;;  %v34_v15 = vld [vmem:[%s19688_s0 + $0x38] sm:$0xff] }
   0x5   :  { %v56_v16 = vadd.f32 %v55_v11, %v31_v10 }
   0x6   :  { %157 = vperm.xlu1 %12877, %v36_v3   ;;  %131 = vperm.xlu0 %12876, %v36_v3   ;;  %v65_v17 = vadd.f32 %v64_v13, %v32_v12 }
   0x7   :  { %v57_v18 = vadd.f32 %v56_v16, %v33_v14 }
   0x8   :  { %v66_v19 = vadd.f32 %v65_v17, %v34_v15 }
   0x9   :  { %v58_v20 = vrot.slane %v57_v18, 4 }
   0xa   :  { %12878 = vset.pattern.permute.xlu1 %v19695_v1  ;;  %136 = vperm.xlu0 %12876, %v37_v4   ;;  %v67_v21 = vrot.slane %v66_v19, 4 }
   0xb   :  { %141 = vperm.xlu1 %12878, %v38_v5   ;;  %v59_v22 = vadd.f32 %v58_v20, %v57_v18 }
   0xc   :  { %v68_v23 = vadd.f32 %v67_v21, %v66_v19 }
   0xd   :  { %v60_v24 = vrot.slane %v59_v22, 2 }
   0xe   :  { %12879 = vset.pattern.permute.xlu0 %v14280_v0  ;;  %v69_v25 = vrot.slane %v68_v23, 2 }
   0xf   :  { %12880 = vset.pattern.permute.xlu1 %v14280_v0  ;;  %161 = vperm.xlu0 %12879, %v37_v4   ;;  %v61_v26 = vadd.f32 %v60_v24, %v59_v22 }
  0x10   :  { %165 = vperm.xlu1 %12880, %v38_v5   ;;  %v70_v27 = vadd.f32 %v69_v25, %v68_v23 }
  0x11   :  { %v62_v28 = vrot.slane %v61_v26, 1 }
  0x12   :  { %v71_v29 = vrot.slane %v70_v27, 1 }
  0x13   :  { %v63_v30 = vadd.f32 %v62_v28, %v61_v26 }
  0x14   :  { %v72_v31 = vadd.f32 %v71_v29, %v70_v27 }
  0x15   :  { %v74_v32 = vmul.f32 0.03125, %v63_v30 }
  0x16   :  { %v75_v33 = vmul.f32 0.03125, %v72_v31 }
  0x17   :  { %v76_v34 = vsub.f32 %v27_v6, %v74_v32  ;;  %v78_v35 = vsub.f32 %v29_v7, %v74_v32  ;;  %v80_v38 = vsub.f32 %v31_v10, %v74_v32  ;;  %v82_v44 = vsub.f32 %v33_v14, %v74_v32 }
  0x18   :  { %v77_v36 = vsub.f32 %v28_v8, %v75_v33  ;;  %v79_v37 = vsub.f32 %v30_v9, %v75_v33  ;;  %v81_v41 = vsub.f32 %v32_v12, %v75_v33  ;;  %v83_v47 = vsub.f32 %v34_v15, %v75_v33 }
  0x19   :  { %v84_v39 = vmul.f32 %v76_v34, %v76_v34  ;;  %v86_v40 = vmul.f32 %v78_v35, %v78_v35  ;;  %v88_v45 = vmul.f32 %v80_v38, %v80_v38  ;;  %v90_v50 = vmul.f32 %v82_v44, %v82_v44 }
  0x1a   :  { %v85_v42 = vmul.f32 %v77_v36, %v77_v36  ;;  %v87_v43 = vmul.f32 %v79_v37, %v79_v37  ;;  %v89_v48 = vmul.f32 %v81_v41, %v81_v41  ;;  %v91_v52 = vmul.f32 %v83_v47, %v83_v47 }
  0x1b   :  { %v92_v46 = vadd.f32 %v86_v40, %v84_v39 }
  0x1c   :  { %v101_v49 = vadd.f32 %v87_v43, %v85_v42 }
  0x1d   :  { %v93_v51 = vadd.f32 %v92_v46, %v88_v45 }
  0x1e   :  { %v102_v53 = vadd.f32 %v101_v49, %v89_v48 }
  0x1f   :  { %v94_v54 = vadd.f32 %v93_v51, %v90_v50  ;;  %v12914_v50 = vld [vmem:[%s19689_s1 + $0x18] sm:$0xff]   ;;  %v12915_v51 = vld [vmem:[%s19689_s1 + $0x20] sm:$0xff]  }
  0x20   :  { %v103_v55 = vadd.f32 %v102_v53, %v91_v52  ;;  %v12916_v52 = vld [vmem:[%s19689_s1 + $0x28] sm:$0xff]  }
  0x21   :  { %v95_v56 = vrot.slane %v94_v54, 4 }
  0x22   :  { %v104_v57 = vrot.slane %v103_v55, 4 }
  0x23   :  { %v96_v58 = vadd.f32 %v95_v56, %v94_v54 }
  0x24   :  { %v105_v59 = vadd.f32 %v104_v57, %v103_v55 }
  0x25   :  { %v97_v60 = vrot.slane %v96_v58, 2 }
  0x26   :  { %v106_v61 = vrot.slane %v105_v59, 2 }
  0x27   :  { %v98_v62 = vadd.f32 %v97_v60, %v96_v58 }
  0x28   :  { %v107_v63 = vadd.f32 %v106_v61, %v105_v59 }
  0x29   :  { %v99_v0 = vrot.slane %v98_v62, 1 }
  0x2a   :  { %v108_v2 = vrot.slane %v107_v63, 1 }
  0x2b   :  { %v100_v3 = vadd.f32 %v99_v0, %v98_v62 }
  0x2c   :  { %v109_v4 = vadd.f32 %v108_v2, %v107_v63 }
  0x2d   :  { %v110_v5 = vmul.f32 0.03125, %v100_v3 }
  0x2e   :  { %v111_v6 = vmul.f32 0.03125, %v109_v4 }
  0x2f   :  { %v112_v7 = vadd.f32 1e-05, %v110_v5 }
  0x30   :  { %v113_v8 = vadd.f32 1e-05, %v111_v6 }
  0x31   :  { %12948 = vrsqrt.f32 %v112_v7 }
  0x32   :  { %12950 = vrsqrt.f32 %v113_v8 }
  0x3b   :  { %v12949_v9 = vpop.eup %12948 }
  0x3c   :  { %v12951_v10 = vpop.eup %12950  ;;  %v116_v11 = vmul.f32 %v12949_v9, %v76_v34  ;;  %v118_v15 = vmul.f32 %v12949_v9, %v78_v35  ;;  %v120_v28 = vmul.f32 %v12949_v9, %v80_v38  ;;  %v122_v31 = vmul.f32 %v12949_v9, %v82_v44  ;;  %v12912_v44 = vld [vmem:[%s19689_s1 + $0x8] sm:$0xff]  }
  0x3d   :  { %v117_v12 = vmul.f32 %v12951_v10, %v77_v36  ;;  %v119_v16 = vmul.f32 %v12951_v10, %v79_v37  ;;  %v121_v29 = vmul.f32 %v12951_v10, %v81_v41  ;;  %v123_v32 = vmul.f32 %v12951_v10, %v83_v47  ;;  %v12911_v41 = vld [vmem:[%s19689_s1] sm:$0xff]   ;;  %v12913_v47 = vld [vmem:[%s19689_s1 + $0x10] sm:$0xff]  }
  0x81   :  { %v154_v13 = vpop.permute.xlu1 %153  ;;  %v127_v14 = vpop.permute.xlu0 %126 }
  0x82   :  { %v144_v17 = vmul.f32 %v127_v14, %v116_v11  ;;  %v145_v18 = vmul.f32 %v127_v14, %v117_v12 }
  0x84   :  { %v169_v23 = vadd.f32 %v154_v13, %v145_v18  ;;  %v168_v25 = vadd.f32 %v154_v13, %v144_v17 }
  0x85   :  { %v158_v19 = vpop.permute.xlu1 %157  ;;  %v132_v20 = vpop.permute.xlu0 %131 }
  0x86   :  { %v146_v21 = vmul.f32 %v132_v20, %v118_v15  ;;  %v147_v22 = vmul.f32 %v132_v20, %v119_v16 }
  0x88   :  { %v171_v24 = vadd.f32 %v158_v19, %v147_v22  ;;  %v170_v26 = vadd.f32 %v158_v19, %v146_v21 }
  0x89   :  { %v137_v27 = vpop.permute.xlu0 %136 }
  0x8a   :  { %v142_v30 = vpop.permute.xlu1 %141  ;;  %v189_v33 = vpack.c.bf16 %v171_v24, %v169_v23  ;;  %v188_v34 = vpack.c.bf16 %v170_v26, %v168_v25  ;;  %v148_v35 = vmul.f32 %v137_v27, %v120_v28  ;;  %v149_v36 = vmul.f32 %v137_v27, %v121_v29 }
  0x8b   :  { %v150_v37 = vmul.f32 %v142_v30, %v122_v31  ;;  %v151_v39 = vmul.f32 %v142_v30, %v123_v32 }
  0x8c   :  { %241 = vmatprep.subr.bf16.mxu0 %v189_v33 }
  0x8d   :  { %242 = vmatpush1.bf16.msra.mxu0 %v188_v34 }
  0x8e   :  { %v162_v40 = vpop.permute.xlu0 %161 }
  0x8f   :  { %v172_v42 = vadd.f32 %v162_v40, %v148_v35  ;;  %v173_v43 = vadd.f32 %v162_v40, %v149_v36  ;;  %v166_v45 = vpop.permute.xlu1 %165 }
  0x90   :  { %v174_v46 = vadd.f32 %v166_v45, %v150_v37  ;;  %v175_v48 = vadd.f32 %v166_v45, %v151_v39 }
  0x92   :  { %v190_v49 = vpack.c.bf16 %v174_v46, %v172_v42  ;;  %v191_v38 = vpack.c.bf16 %v175_v48, %v173_v43 }
  0x94   :  { %243 = vmatprep.subr.bf16.mxu0 %v191_v38  ;;  %v51_v38 = vlaneseq }
  0x95   :  { %244 = vmatpush1.bf16.msra.mxu0 %v190_v49 }
  0x98   :  { %10597 = vmatmul.mubr.msk.bf16.vlgmr.msra.gmra.mrb[0].mxu0 %vm222_vm0, %v12911_v41  ;;  %v52_v41 = vand.u32 127, %v51_v38 }
  0x99   :  { %283 = vmatprep.mubr.bf16.mxu0 %v19695_v1 }
  0x9a   :  { %vm53_vm2 = vcmp.lt.s32.totalorder %v52_v41, 65 }
  0xa0   :  { %10598 = vmatmul.mubr.msk.bf16.gmra.mrb[4].mxu0 %vm222_vm0, %v12912_v44  ;;  %v14282_v44 = vmov -1e+30  }
  0xa1   :  { %293 = vmatprep.mubr.bf16.mxu0 %v19695_v1 }
  0xa8   :  { %10599 = vmatmul.mubr.msk.bf16.gmra.mrb[8].mxu0 %vm222_vm0, %v12913_v47  ;;  %v14479_v47 = vsel %vm53_vm2, 0.0, %v14282_v44 }
  0xa9   :  { %303 = vmatprep.mubr.bf16.mxu0 %v19695_v1  ;;  %19744 = vst [vmem:[#allocation5_spill] sm:$0xff] %v14479_v47 }
  0xb0   :  { %10600 = vmatmul.mubr.msk.bf16.gmra.mrb[12].mxu0 %vm222_vm0, %v12914_v50 }
  0xb1   :  { %313 = vmatprep.mubr.bf16.mxu0 %v19695_v1 }
  0xb8   :  { %10601 = vmatmul.mubr.msk.bf16.gmra.mrb[16].mxu0 %vm222_vm0, %v12915_v51 }
  0xb9   :  { %323 = vmatprep.mubr.bf16.mxu0 %v19695_v1 }
  0xc0   :  { %10602 = vmatmul.mubr.msk.bf16.gmra.mrb[20].mxu0 %vm222_vm0, %v12916_v52 }
 0x16b   :  { %v275_v53 = vpop.f32.mrb[0].mxu0 }
 0x16c   :  { %334 = vxpose.xlu1.b32.start.end [1/1] (short) %v275_v53, 128  ;;  %v14407_v54 = vpop.f32.mrb[1].mxu0 }
 0x16d   :  { %v279_v55 = vpop.f32.mrb[2].mxu0 }
 0x16e   :  { %774 = vxpose.xlu0.b32.start.end [1/1] (short) %v279_v55, 128  ;;  %v14409_v56 = vpop.f32.mrb[3].mxu0 }
 0x173   :  { %v14411_v57 = vpop.f32.mrb[4].mxu0 }
 0x174   :  { %v14413_v58 = vpop.f32.mrb[5].mxu0 }
 0x175   :  { %v14415_v59 = vpop.f32.mrb[6].mxu0 }
 0x176   :  { %v14417_v60 = vpop.f32.mrb[7].mxu0 }
 0x17b   :  { %v295_v61 = vpop.f32.mrb[8].mxu0 }
 0x17c   :  { %v14419_v62 = vpop.f32.mrb[9].mxu0  ;;  %11497 = vmatprep.subr.mxu1 %v295_v61 }
 0x17d   :  { %v299_v63 = vpop.f32.mrb[10].mxu0  ;;  %11498 = vmatpush3.msra.mxu1 %v295_v61 }
 0x17e   :  { %v14421_v0 = vpop.f32.mrb[11].mxu0  ;;  %11558 = vmatprep.subr.mxu0 %v299_v63 }
 0x17f   :  { %11559 = vmatpush3.msra.mxu0 %v299_v63 }
 0x183   :  { %v14423_v2 = vpop.f32.mrb[12].mxu0 }
 0x184   :  { %v14425_v3 = vpop.f32.mrb[13].mxu0 }
 0x185   :  { %v14427_v4 = vpop.f32.mrb[14].mxu0 }
 0x186   :  { %v14429_v5 = vpop.f32.mrb[15].mxu0 }
 0x18b   :  { %v14431_v6 = vpop.f32.mrb[16].mxu0 }
 0x18c   :  { %v14433_v7 = vpop.f32.mrb[17].mxu0 }
 0x18d   :  { %v14435_v8 = vpop.f32.mrb[18].mxu0 }
 0x18e   :  { %v14437_v9 = vpop.f32.mrb[19].mxu0 }
 0x18f   :  { %19741 = vst [vmem:[#allocation2_spill] sm:$0xff] %v14437_v9 }
 0x193   :  { %v14439_v10 = vpop.f32.mrb[20].mxu0 }
 0x194   :  { %v14441_v11 = vpop.f32.mrb[21].mxu0 }
 0x195   :  { %19742 = vst [vmem:[#allocation3_spill] sm:$0xff] %v14441_v11  ;;  %v14443_v12 = vpop.f32.mrb[22].mxu0 }
 0x196   :  { %v14445_v13 = vpop.f32.mrb[23].mxu0 }
 0x197   :  { %19743 = vst [vmem:[#allocation4_spill] sm:$0xff] %v14445_v13 }
 0x1ec   :  { %v350_v14 = vpop.trf.xlu1 }
 0x1ed   :  { %11499 = vmatprep.mubr.msk.f32.mxu1 %vm366_vm1, %v350_v14 }
 0x1ee   :  { %v790_v15 = vpop.trf.xlu0 }
 0x1ef   :  { %11560 = vmatprep.mubr.msk.f32.mxu0 %vm366_vm1, %v790_v15 }
 0x1f0   :  { %v351_v16 = vpop.trf.xlu1 }
 0x1f1   :  { %11500 = vmatmul.mubr.msk.f32.vlgmr.msra.gmra.mrb[0].mxu1 %vm366_vm1, %v351_v16 }
 0x1f2   :  { %v791_v17 = vpop.trf.xlu0 }
 0x1f3   :  { %11561 = vmatmul.mubr.msk.f32.vlgmr.msra.gmra.mrb[24].mxu0 %vm366_vm1, %v791_v17 }
 0x1f4   :  { %v352_v18 = vpop.trf.xlu1 }
 0x1f5   :  { %11502 = vmatprep.mubr.msk.f32.mxu1 %vm366_vm1, %v352_v18 }
 0x1f6   :  { %v792_v19 = vpop.trf.xlu0 }
 0x1f7   :  { %11563 = vmatprep.mubr.msk.f32.mxu0 %vm366_vm1, %v792_v19 }
 0x1f8   :  { %v353_v20 = vpop.trf.xlu1 }
 0x1f9   :  { %11503 = vmatmul.mubr.msk.f32.gmra.mrb[2].mxu1 %vm366_vm1, %v353_v20 }
 0x1fa   :  { %v793_v21 = vpop.trf.xlu0 }
 0x1fb   :  { %11564 = vmatmul.mubr.msk.f32.gmra.mrb[26].mxu0 %vm366_vm1, %v793_v21 }
 0x1fc   :  { %v354_v22 = vpop.trf.xlu1 }
 0x1fd   :  { %11505 = vmatprep.mubr.msk.f32.mxu1 %vm366_vm1, %v354_v22 }
 0x1fe   :  { %v794_v23 = vpop.trf.xlu0 }
 0x1ff   :  { %11566 = vmatprep.mubr.msk.f32.mxu0 %vm366_vm1, %v794_v23 }
 0x200   :  { %v355_v24 = vpop.trf.xlu1 }
 0x201   :  { %11506 = vmatmul.mubr.msk.f32.gmra.mrb[4].mxu1 %vm366_vm1, %v355_v24 }
 0x202   :  { %v795_v25 = vpop.trf.xlu0 }
 0x203   :  { %11567 = vmatmul.mubr.msk.f32.gmra.mrb[28].mxu0 %vm366_vm1, %v795_v25 }
 0x204   :  { %v356_v26 = vpop.trf.xlu1 }
 0x205   :  { %11508 = vmatprep.mubr.msk.f32.mxu1 %vm366_vm1, %v356_v26 }
 0x206   :  { %v796_v27 = vpop.trf.xlu0 }
 0x207   :  { %11569 = vmatprep.mubr.msk.f32.mxu0 %vm366_vm1, %v796_v27 }
 0x208   :  { %v357_v28 = vpop.trf.xlu1 }
 0x209   :  { %11509 = vmatmul.mubr.msk.f32.gmra.mrb[6].mxu1 %vm366_vm1, %v357_v28 }
 0x20a   :  { %v797_v29 = vpop.trf.xlu0 }
 0x20b   :  { %11570 = vmatmul.mubr.msk.f32.gmra.mrb[30].mxu0 %vm366_vm1, %v797_v29 }
 0x20c   :  { %v358_v30 = vpop.trf.xlu1 }
 0x20d   :  { %11511 = vmatprep.mubr.msk.f32.mxu1 %vm366_vm1, %v358_v30 }
 0x20e   :  { %v798_v31 = vpop.trf.xlu0 }
 0x20f   :  { %11572 = vmatprep.mubr.msk.f32.mxu0 %vm366_vm1, %v798_v31 }
 0x210   :  { %v359_v32 = vpop.trf.xlu1 }
 0x211   :  { %11512 = vmatmul.mubr.msk.f32.gmra.mrb[8].mxu1 %vm366_vm1, %v359_v32 }
 0x212   :  { %v799_v33 = vpop.trf.xlu0 }
 0x213   :  { %11573 = vmatmul.mubr.msk.f32.gmra.mrb[32].mxu0 %vm366_vm1, %v799_v33 }
 0x214   :  { %v360_v34 = vpop.trf.xlu1 }
 0x215   :  { %11514 = vmatprep.mubr.msk.f32.mxu1 %vm366_vm1, %v360_v34 }
 0x216   :  { %v800_v35 = vpop.trf.xlu0 }
 0x217   :  { %11575 = vmatprep.mubr.msk.f32.mxu0 %vm366_vm1, %v800_v35 }
 0x218   :  { %v361_v36 = vpop.trf.xlu1 }
 0x219   :  { %11515 = vmatmul.mubr.msk.f32.gmra.mrb[10].mxu1 %vm366_vm1, %v361_v36 }
 0x21a   :  { %v801_v37 = vpop.trf.xlu0 }
 0x21b   :  { %11576 = vmatmul.mubr.msk.f32.gmra.mrb[34].mxu0 %vm366_vm1, %v801_v37 }
 0x21c   :  { %v362_v39 = vpop.trf.xlu1 }
 0x21d   :  { %11517 = vmatprep.mubr.msk.f32.mxu1 %vm366_vm1, %v362_v39 }
 0x21e   :  { %v802_v40 = vpop.trf.xlu0 }
 0x21f   :  { %11578 = vmatprep.mubr.msk.f32.mxu0 %vm366_vm1, %v802_v40 }
 0x220   :  { %v363_v42 = vpop.trf.xlu1 }
 0x221   :  { %11518 = vmatmul.mubr.msk.f32.gmra.mrb[12].mxu1 %vm366_vm1, %v363_v42 }
 0x222   :  { %v803_v43 = vpop.trf.xlu0 }
 0x223   :  { %11579 = vmatmul.mubr.msk.f32.gmra.mrb[36].mxu0 %vm366_vm1, %v803_v43 }
 0x224   :  { %v364_v45 = vpop.trf.xlu1 }
 0x225   :  { %11520 = vmatprep.mubr.msk.f32.mxu1 %vm366_vm1, %v364_v45 }
 0x226   :  { %v804_v46 = vpop.trf.xlu0 }
 0x227   :  { %11581 = vmatprep.mubr.msk.f32.mxu0 %vm366_vm1, %v804_v46 }
 0x228   :  { %v365_v48 = vpop.trf.xlu1 }
 0x229   :  { %11521 = vmatmul.mubr.msk.f32.gmra.mrb[14].mxu1 %vm366_vm1, %v365_v48 }
 0x22a   :  { %v805_v49 = vpop.trf.xlu0 }
 0x22b   :  { %11582 = vmatmul.mubr.msk.f32.gmra.mrb[38].mxu0 %vm366_vm1, %v805_v49 }
 0x2c4   :  { %v11501_v50 = vpop.f32.mrb[0].mxu1 }
 0x2c5   :  { %v14482_v51 = vadd.f32 %v11501_v50, %v14479_v47  ;;  %v481_v52 = vpop.f32.mrb[1].mxu1 }
 0x2c6   :  { %v14485_v53 = vadd.f32 %v481_v52, %v14479_v47  ;;  %v11562_v55 = vpop.f32.mrb[24].mxu0 }
 0x2c7   :  { %562 = vmax.xlane.f32.xlu1 %v14482_v51  ;;  %v14489_v61 = vadd.f32 %v11562_v55, %v14479_v47  ;;  %v920_v63 = vpop.f32.mrb[25].mxu0 }
 0x2c8   :  { %560 = vmax.xlane.f32.xlu0 %v14485_v53  ;;  %v14493_v14 = vadd.f32 %v920_v63, %v14479_v47 }
 0x2cb   :  { %1001 = vmax.xlane.f32.xlu1 %v14489_v61 }
 0x2cc   :  { %v11504_v15 = vpop.f32.mrb[2].mxu1  ;;  %999 = vmax.xlane.f32.xlu0 %v14493_v14 }
 0x2cd   :  { %v14498_v16 = vadd.f32 %v11504_v15, %v14479_v47  ;;  %v491_v17 = vpop.f32.mrb[3].mxu1 }
 0x2ce   :  { %v14501_v18 = vadd.f32 %v491_v17, %v14479_v47  ;;  %v11565_v19 = vpop.f32.mrb[26].mxu0 }
 0x2cf   :  { %566 = vmax.xlane.f32.xlu1 %v14498_v16  ;;  %v14505_v20 = vadd.f32 %v11565_v19, %v14479_v47  ;;  %v930_v21 = vpop.f32.mrb[27].mxu0 }
 0x2d0   :  { %v14508_v22 = vadd.f32 %v930_v21, %v14479_v47  ;;  %564 = vmax.xlane.f32.xlu0 %v14501_v18 }
 0x2d3   :  { %1005 = vmax.xlane.f32.xlu1 %v14505_v20 }
 0x2d4   :  { %v11507_v23 = vpop.f32.mrb[4].mxu1  ;;  %1003 = vmax.xlane.f32.xlu0 %v14508_v22 }
 0x2d5   :  { %v14514_v24 = vadd.f32 %v11507_v23, %v14479_v47  ;;  %v501_v25 = vpop.f32.mrb[5].mxu1 }
 0x2d6   :  { %v14517_v26 = vadd.f32 %v501_v25, %v14479_v47  ;;  %v11568_v27 = vpop.f32.mrb[28].mxu0 }
 0x2d7   :  { %570 = vmax.xlane.f32.xlu1 %v14514_v24  ;;  %v14521_v28 = vadd.f32 %v11568_v27, %v14479_v47  ;;  %v940_v29 = vpop.f32.mrb[29].mxu0 }
 0x2d8   :  { %v14524_v30 = vadd.f32 %v940_v29, %v14479_v47  ;;  %568 = vmax.xlane.f32.xlu0 %v14517_v26 }
 0x2db   :  { %1009 = vmax.xlane.f32.xlu1 %v14521_v28 }
 0x2dc   :  { %v11510_v31 = vpop.f32.mrb[6].mxu1  ;;  %1007 = vmax.xlane.f32.xlu0 %v14524_v30 }
 0x2dd   :  { %v14530_v32 = vadd.f32 %v11510_v31, %v14479_v47  ;;  %v511_v33 = vpop.f32.mrb[7].mxu1 }
 0x2de   :  { %v14533_v34 = vadd.f32 %v511_v33, %v14479_v47  ;;  %v11571_v35 = vpop.f32.mrb[30].mxu0 }
 0x2df   :  { %574 = vmax.xlane.f32.xlu1 %v14530_v32  ;;  %v14537_v36 = vadd.f32 %v11571_v35, %v14479_v47  ;;  %v950_v37 = vpop.f32.mrb[31].mxu0 }
 0x2e0   :  { %v14540_v39 = vadd.f32 %v950_v37, %v14479_v47  ;;  %572 = vmax.xlane.f32.xlu0 %v14533_v34 }
 0x2e3   :  { %1013 = vmax.xlane.f32.xlu1 %v14537_v36 }
 0x2e4   :  { %v11513_v40 = vpop.f32.mrb[8].mxu1  ;;  %1011 = vmax.xlane.f32.xlu0 %v14540_v39 }
 0x2e5   :  { %v14546_v42 = vadd.f32 %v11513_v40, %v14479_v47  ;;  %v521_v43 = vpop.f32.mrb[9].mxu1 }
 0x2e6   :  { %v14549_v45 = vadd.f32 %v521_v43, %v14479_v47  ;;  %v11574_v46 = vpop.f32.mrb[32].mxu0 }
 0x2e7   :  { %578 = vmax.xlane.f32.xlu1 %v14546_v42  ;;  %v14553_v48 = vadd.f32 %v11574_v46, %v14479_v47  ;;  %v960_v49 = vpop.f32.mrb[33].mxu0 }
 0x2e8   :  { %v14556_v38 = vadd.f32 %v960_v49, %v14479_v47  ;;  %576 = vmax.xlane.f32.xlu0 %v14549_v45 }
 0x2eb   :  { %1017 = vmax.xlane.f32.xlu1 %v14553_v48 }
 0x2ec   :  { %v11516_v41 = vpop.f32.mrb[10].mxu1  ;;  %1015 = vmax.xlane.f32.xlu0 %v14556_v38 }
 0x2ed   :  { %v14562_v44 = vadd.f32 %v11516_v41, %v14479_v47  ;;  %v531_v50 = vpop.f32.mrb[11].mxu1 }
 0x2ee   :  { %v14565_v52 = vadd.f32 %v531_v50, %v14479_v47  ;;  %v11577_v55 = vpop.f32.mrb[34].mxu0 }
 0x2ef   :  { %582 = vmax.xlane.f32.xlu1 %v14562_v44  ;;  %v14569_v63 = vadd.f32 %v11577_v55, %v14479_v47  ;;  %v970_v15 = vpop.f32.mrb[35].mxu0 }
 0x2f0   :  { %v14572_v17 = vadd.f32 %v970_v15, %v14479_v47  ;;  %580 = vmax.xlane.f32.xlu0 %v14565_v52 }
 0x2f3   :  { %1021 = vmax.xlane.f32.xlu1 %v14569_v63 }
 0x2f4   :  { %v11519_v19 = vpop.f32.mrb[12].mxu1  ;;  %1019 = vmax.xlane.f32.xlu0 %v14572_v17 }
 0x2f5   :  { %v14578_v21 = vadd.f32 %v11519_v19, %v14479_v47  ;;  %v541_v23 = vpop.f32.mrb[13].mxu1 }
 0x2f6   :  { %v14581_v25 = vadd.f32 %v541_v23, %v14479_v47  ;;  %v11580_v27 = vpop.f32.mrb[36].mxu0 }
 0x2f7   :  { %586 = vmax.xlane.f32.xlu1 %v14578_v21  ;;  %v14585_v29 = vadd.f32 %v11580_v27, %v14479_v47  ;;  %v980_v31 = vpop.f32.mrb[37].mxu0 }
 0x2f8   :  { %v14588_v33 = vadd.f32 %v980_v31, %v14479_v47  ;;  %584 = vmax.xlane.f32.xlu0 %v14581_v25 }
 0x2fb   :  { %1025 = vmax.xlane.f32.xlu1 %v14585_v29 }
 0x2fc   :  { %v11522_v35 = vpop.f32.mrb[14].mxu1  ;;  %1023 = vmax.xlane.f32.xlu0 %v14588_v33 }
 0x2fd   :  { %v14594_v37 = vadd.f32 %v11522_v35, %v14479_v47  ;;  %v551_v40 = vpop.f32.mrb[15].mxu1 }
 0x2fe   :  { %v14597_v43 = vadd.f32 %v551_v40, %v14479_v47  ;;  %v11583_v46 = vpop.f32.mrb[38].mxu0 }
 0x2ff   :  { %590 = vmax.xlane.f32.xlu1 %v14594_v37  ;;  %v14601_v49 = vadd.f32 %v11583_v46, %v14479_v47  ;;  %v990_v41 = vpop.f32.mrb[39].mxu0 }
 0x300   :  { %v14604_v50 = vadd.f32 %v990_v41, %v14479_v47  ;;  %588 = vmax.xlane.f32.xlu0 %v14597_v43 }
 0x303   :  { %1029 = vmax.xlane.f32.xlu1 %v14601_v49 }
 0x304   :  { %1027 = vmax.xlane.f32.xlu0 %v14604_v50 }
 0x354   :  { %v563_v55 = vpop.xlane.xlu1 %562 }
 0x355   :  { %v593_v15 = vsub.f32 %v14482_v51, %v563_v55  ;;  %v561_v19 = vpop.xlane.xlu0 %560 }
 0x356   :  { %v592_v23 = vsub.f32 %v14485_v53, %v561_v19 }
 0x357   :  { %v610_v27 = vmul.f32 1.442695, %v593_v15 }
 0x358   :  { %v608_v31 = vmul.f32 1.442695, %v592_v23  ;;  %v1002_v35 = vpop.xlane.xlu1 %1001 }
 0x359   :  { %12952 = vpow2.f32 %v610_v27  ;;  %v1032_v40 = vsub.f32 %v14489_v61, %v1002_v35  ;;  %v1000_v46 = vpop.xlane.xlu0 %999 }
 0x35a   :  { %12954 = vpow2.f32 %v608_v31  ;;  %v1031_v41 = vsub.f32 %v14493_v14, %v1000_v46 }
 0x35b   :  { %v1049_v1 = vmul.f32 1.442695, %v1032_v40 }
 0x35c   :  { %v1047_v13 = vmul.f32 1.442695, %v1031_v41  ;;  %v567_v11 = vpop.xlane.xlu1 %566 }
 0x35d   :  { %12956 = vpow2.f32 %v1049_v1  ;;  %v595_v9 = vsub.f32 %v14498_v16, %v567_v11  ;;  %v565_v51 = vpop.xlane.xlu0 %564 }
 0x35e   :  { %12958 = vpow2.f32 %v1047_v13  ;;  %v594_v53 = vsub.f32 %v14501_v18, %v565_v51 }
 0x35f   :  { %v614_v55 = vmul.f32 1.442695, %v595_v9 }
 0x360   :  { %v612_v15 = vmul.f32 1.442695, %v594_v53  ;;  %v1006_v19 = vpop.xlane.xlu1 %1005 }
 0x361   :  { %12960 = vpow2.f32 %v614_v55  ;;  %v1034_v61 = vsub.f32 %v14505_v20, %v1006_v19  ;;  %v1004_v23 = vpop.xlane.xlu0 %1003 }
 0x362   :  { %12962 = vpow2.f32 %v612_v15  ;;  %v1033_v14 = vsub.f32 %v14508_v22, %v1004_v23 }
 0x363   :  { %v14617_v27 = vpop.eup %12952  ;;  %v1053_v31 = vmul.f32 1.442695, %v1034_v61 }
 0x364   :  { %v14619_v1 = vpop.eup %12954  ;;  %v1051_v11 = vmul.f32 1.442695, %v1033_v14  ;;  %v571_v16 = vpop.xlane.xlu1 %570  ;;  %642 = vadd.xlane.f32.xlu1 %v14617_v27 }
 0x365   :  { %12964 = vpow2.f32 %v1053_v31  ;;  %v597_v9 = vsub.f32 %v14514_v24, %v571_v16  ;;  %640 = vadd.xlane.f32.xlu0 %v14619_v1  ;;  %v569_v13 = vpop.xlane.xlu0 %568 }
 0x366   :  { %12966 = vpow2.f32 %v1051_v11  ;;  %v596_v18 = vsub.f32 %v14517_v26, %v569_v13 }
 0x367   :  { %v14625_v20 = vpop.eup %12956  ;;  %v618_v22 = vmul.f32 1.442695, %v597_v9 }
 0x368   :  { %v14627_v35 = vpop.eup %12958  ;;  %v616_v40 = vmul.f32 1.442695, %v596_v18  ;;  %v1010_v46 = vpop.xlane.xlu1 %1009  ;;  %1081 = vadd.xlane.f32.xlu1 %v14625_v20 }
 0x369   :  { %12968 = vpow2.f32 %v618_v22  ;;  %v1036_v41 = vsub.f32 %v14521_v28, %v1010_v46  ;;  %1079 = vadd.xlane.f32.xlu0 %v14627_v35  ;;  %v1008_v24 = vpop.xlane.xlu0 %1007 }
 0x36a   :  { %12970 = vpow2.f32 %v616_v40  ;;  %v1035_v51 = vsub.f32 %v14524_v30, %v1008_v24 }
 0x36b   :  { %v14633_v53 = vpop.eup %12960  ;;  %v1057_v26 = vmul.f32 1.442695, %v1036_v41 }
 0x36c   :  { %v14635_v55 = vpop.eup %12962  ;;  %v1055_v15 = vmul.f32 1.442695, %v1035_v51  ;;  %v575_v19 = vpop.xlane.xlu1 %574  ;;  %646 = vadd.xlane.f32.xlu1 %v14633_v53 }
 0x36d   :  { %12972 = vpow2.f32 %v1057_v26  ;;  %v599_v61 = vsub.f32 %v14530_v32, %v575_v19  ;;  %644 = vadd.xlane.f32.xlu0 %v14635_v55  ;;  %v573_v28 = vpop.xlane.xlu0 %572 }
 0x36e   :  { %12974 = vpow2.f32 %v1055_v15  ;;  %v598_v23 = vsub.f32 %v14533_v34, %v573_v28 }
 0x36f   :  { %v14641_v14 = vpop.eup %12964  ;;  %v622_v30 = vmul.f32 1.442695, %v599_v61 }
 0x370   :  { %v14643_v31 = vpop.eup %12966  ;;  %v620_v11 = vmul.f32 1.442695, %v598_v23  ;;  %v1014_v16 = vpop.xlane.xlu1 %1013  ;;  %1085 = vadd.xlane.f32.xlu1 %v14641_v14 }
 0x371   :  { %12976 = vpow2.f32 %v622_v30  ;;  %v1038_v9 = vsub.f32 %v14537_v36, %v1014_v16  ;;  %1083 = vadd.xlane.f32.xlu0 %v14643_v31  ;;  %v1012_v32 = vpop.xlane.xlu0 %1011 }
 0x372   :  { %12978 = vpow2.f32 %v620_v11  ;;  %v1037_v13 = vsub.f32 %v14540_v39, %v1012_v32 }
 0x373   :  { %v14649_v18 = vpop.eup %12968  ;;  %v1061_v34 = vmul.f32 1.442695, %v1038_v9 }
 0x374   :  { %v14651_v22 = vpop.eup %12970  ;;  %v1059_v40 = vmul.f32 1.442695, %v1037_v13  ;;  %v579_v46 = vpop.xlane.xlu1 %578  ;;  %650 = vadd.xlane.f32.xlu1 %v14649_v18 }
 0x375   :  { %12980 = vpow2.f32 %v1061_v34  ;;  %v601_v41 = vsub.f32 %v14546_v42, %v579_v46  ;;  %648 = vadd.xlane.f32.xlu0 %v14651_v22  ;;  %v577_v36 = vpop.xlane.xlu0 %576 }
 0x376   :  { %12982 = vpow2.f32 %v1059_v40  ;;  %v600_v24 = vsub.f32 %v14549_v45, %v577_v36 }
 0x377   :  { %v14657_v51 = vpop.eup %12972  ;;  %v626_v39 = vmul.f32 1.442695, %v601_v41  ;;  %v19699_v41 = vmov 0.0|0.0  }
 0x378   :  { %v14659_v26 = vpop.eup %12974  ;;  %v624_v15 = vmul.f32 1.442695, %v600_v24  ;;  %v1018_v19 = vpop.xlane.xlu1 %1017  ;;  %1089 = vadd.xlane.f32.xlu1 %v14657_v51  ;;  %12473 = vmatprep.subr.bf16.mxu1 %v19699_v41 }
 0x379   :  { %12984 = vpow2.f32 %v626_v39  ;;  %v1040_v61 = vsub.f32 %v14553_v48, %v1018_v19  ;;  %1087 = vadd.xlane.f32.xlu0 %v14659_v26  ;;  %v1016_v42 = vpop.xlane.xlu0 %1015  ;;  %12497 = vmatprep.subr.bf16.mxu0 %v19699_v41 }
 0x37a   :  { %12986 = vpow2.f32 %v624_v15  ;;  %v1039_v28 = vsub.f32 %v14556_v38, %v1016_v42 }
 0x37b   :  { %v14665_v23 = vpop.eup %12976  ;;  %v1065_v45 = vmul.f32 1.442695, %v1040_v61 }
 0x37c   :  { %v14667_v30 = vpop.eup %12978  ;;  %v1063_v11 = vmul.f32 1.442695, %v1039_v28  ;;  %v583_v16 = vpop.xlane.xlu1 %582  ;;  %654 = vadd.xlane.f32.xlu1 %v14665_v23 }
 0x37d   :  { %12988 = vpow2.f32 %v1065_v45  ;;  %v603_v9 = vsub.f32 %v14562_v44, %v583_v16  ;;  %652 = vadd.xlane.f32.xlu0 %v14667_v30  ;;  %v581_v48 = vpop.xlane.xlu0 %580 }
 0x37e   :  { %12990 = vpow2.f32 %v1063_v11  ;;  %v602_v32 = vsub.f32 %v14565_v52, %v581_v48 }
 0x37f   :  { %v14673_v13 = vpop.eup %12980  ;;  %v630_v38 = vmul.f32 1.442695, %v603_v9 }
 0x380   :  { %v14675_v34 = vpop.eup %12982  ;;  %v628_v40 = vmul.f32 1.442695, %v602_v32  ;;  %v1022_v46 = vpop.xlane.xlu1 %1021  ;;  %1093 = vadd.xlane.f32.xlu1 %v14673_v13 }
 0x381   :  { %12992 = vpow2.f32 %v630_v38  ;;  %v1042_v44 = vsub.f32 %v14569_v63, %v1022_v46  ;;  %1091 = vadd.xlane.f32.xlu0 %v14675_v34  ;;  %v1020_v36 = vpop.xlane.xlu0 %1019 }
 0x382   :  { %12994 = vpow2.f32 %v628_v40  ;;  %v1041_v52 = vsub.f32 %v14572_v17, %v1020_v36 }
 0x383   :  { %v14683_v24 = vpop.eup %12984  ;;  %v1069_v39 = vmul.f32 1.442695, %v1042_v44 }
 0x384   :  { %v14685_v15 = vpop.eup %12986  ;;  %v1067_v19 = vmul.f32 1.442695, %v1041_v52  ;;  %v587_v61 = vpop.xlane.xlu1 %586  ;;  %658 = vadd.xlane.f32.xlu1 %v14683_v24 }
 0x385   :  { %12996 = vpow2.f32 %v1069_v39  ;;  %v605_v63 = vsub.f32 %v14578_v21, %v587_v61  ;;  %656 = vadd.xlane.f32.xlu0 %v14685_v15  ;;  %v585_v42 = vpop.xlane.xlu0 %584 }
 0x386   :  { %12998 = vpow2.f32 %v1067_v19  ;;  %v604_v28 = vsub.f32 %v14581_v25, %v585_v42 }
 0x387   :  { %v14691_v45 = vpop.eup %12988  ;;  %v634_v17 = vmul.f32 1.442695, %v605_v63 }
 0x388   :  { %v14693_v11 = vpop.eup %12990  ;;  %v632_v16 = vmul.f32 1.442695, %v604_v28  ;;  %v1026_v9 = vpop.xlane.xlu1 %1025  ;;  %1097 = vadd.xlane.f32.xlu1 %v14691_v45 }
 0x389   :  { %13000 = vpow2.f32 %v634_v17  ;;  %v1044_v48 = vsub.f32 %v14585_v29, %v1026_v9  ;;  %1095 = vadd.xlane.f32.xlu0 %v14693_v11  ;;  %v1024_v21 = vpop.xlane.xlu0 %1023 }
 0x38a   :  { %13002 = vpow2.f32 %v632_v16  ;;  %v1043_v32 = vsub.f32 %v14588_v33, %v1024_v21 }
 0x38b   :  { %v14699_v38 = vpop.eup %12992  ;;  %v1073_v25 = vmul.f32 1.442695, %v1044_v48 }
 0x38c   :  { %v14701_v40 = vpop.eup %12994  ;;  %v1071_v46 = vmul.f32 1.442695, %v1043_v32  ;;  %v591_v44 = vpop.xlane.xlu1 %590  ;;  %662 = vadd.xlane.f32.xlu1 %v14699_v38 }
 0x38d   :  { %13004 = vpow2.f32 %v1073_v25  ;;  %v607_v36 = vsub.f32 %v14594_v37, %v591_v44  ;;  %660 = vadd.xlane.f32.xlu0 %v14701_v40  ;;  %v589_v29 = vpop.xlane.xlu0 %588 }
 0x38e   :  { %13006 = vpow2.f32 %v1071_v46  ;;  %v606_v52 = vsub.f32 %v14597_v43, %v589_v29  ;;  %v19697_v46 = vmov 0.0  }
 0x38f   :  { %v14707_v39 = vpop.eup %12996  ;;  %v638_v33 = vmul.f32 1.442695, %v607_v36  ;;  %11555 = vmatprep.mubr.msk.f32.mxu1 %vm14284_vm3, %v19697_v46  ;;  %11616 = vmatprep.mubr.msk.f32.mxu0 %vm14284_vm3, %v19697_v46 }
 0x390   :  { %v14709_v19 = vpop.eup %12998  ;;  %v636_v61 = vmul.f32 1.442695, %v606_v52  ;;  %1101 = vadd.xlane.f32.xlu1 %v14707_v39  ;;  %v1030_v63 = vpop.xlane.xlu1 %1029 }
 0x391   :  { %13008 = vpow2.f32 %v638_v33  ;;  %v1046_v42 = vsub.f32 %v14601_v49, %v1030_v63  ;;  %1099 = vadd.xlane.f32.xlu0 %v14709_v19  ;;  %v1028_v37 = vpop.xlane.xlu0 %1027 }
 0x392   :  { %13010 = vpow2.f32 %v636_v61  ;;  %v1045_v28 = vsub.f32 %v14604_v50, %v1028_v37 }
 0x393   :  { %v14715_v17 = vpop.eup %13000  ;;  %v1077_v43 = vmul.f32 1.442695, %v1046_v42 }
 0x394   :  { %v14717_v16 = vpop.eup %13002  ;;  %v1075_v9 = vmul.f32 1.442695, %v1045_v28  ;;  %666 = vadd.xlane.f32.xlu1 %v14715_v17 }
 0x395   :  { %13012 = vpow2.f32 %v1077_v43  ;;  %664 = vadd.xlane.f32.xlu0 %v14717_v16 }
 0x396   :  { %13014 = vpow2.f32 %v1075_v9 }
 0x397   :  { %v14721_v48 = vpop.eup %13004 }
 0x398   :  { %v14723_v49 = vpop.eup %13006  ;;  %1105 = vadd.xlane.f32.xlu1 %v14721_v48 }
 0x399   :  { %1103 = vadd.xlane.f32.xlu0 %v14723_v49 }
 0x39b   :  { %v14727_v50 = vpop.eup %13008 }
 0x39c   :  { %v14729_v21 = vpop.eup %13010  ;;  %670 = vadd.xlane.f32.xlu1 %v14727_v50 }
 0x39d   :  { %668 = vadd.xlane.f32.xlu0 %v14729_v21 }
 0x39f   :  { %v14733_v32 = vpop.eup %13012 }
 0x3a0   :  { %v14735_v25 = vpop.eup %13014  ;;  %1109 = vadd.xlane.f32.xlu1 %v14733_v32 }
 0x3a1   :  { %1107 = vadd.xlane.f32.xlu0 %v14735_v25 }
 0x3ce   :  { %1213 = vxpose.xlu0.b32.start.end [1/1] (short) %v14411_v57, 128 }
 0x3d3   :  { %1652 = vxpose.xlu1.b32.start.end [1/1] (short) %v14415_v59, 128 }
 0x3f1   :  { %v643_v44 = vpop.xlane.xlu1 %642 }
 0x3f2   :  { %13016 = vrcp.f32 %v643_v44  ;;  %v641_v36 = vpop.xlane.xlu0 %640 }
 0x3f3   :  { %13018 = vrcp.f32 %v641_v36 }
 0x3f5   :  { %v1082_v29 = vpop.xlane.xlu1 %1081 }
 0x3f6   :  { %13020 = vrcp.f32 %v1082_v29  ;;  %v1080_v52 = vpop.xlane.xlu0 %1079 }
 0x3f7   :  { %13022 = vrcp.f32 %v1080_v52 }
 0x3f9   :  { %v647_v33 = vpop.xlane.xlu1 %646 }
 0x3fa   :  { %13024 = vrcp.f32 %v647_v33  ;;  %v645_v61 = vpop.xlane.xlu0 %644 }
 0x3fb   :  { %13026 = vrcp.f32 %v645_v61 }
 0x3fc   :  { %v13017_v63 = vpop.eup %13016 }
 0x3fd   :  { %v13019_v42 = vpop.eup %13018  ;;  %v1086_v37 = vpop.xlane.xlu1 %1085  ;;  %v689_v28 = vmul.f32 %v13017_v63, %v14617_v27 }
 0x3fe   :  { %13028 = vrcp.f32 %v1086_v37  ;;  %v1084_v57 = vpop.xlane.xlu0 %1083  ;;  %v688_v59 = vmul.f32 %v13019_v42, %v14619_v1 }
 0x3ff   :  { %13030 = vrcp.f32 %v1084_v57 }
 0x400   :  { %v13021_v43 = vpop.eup %13020  ;;  %v12474_v9 = vpack.c.bf16 %v689_v28, %v688_v59 }
 0x401   :  { %v13023_v44 = vpop.eup %13022  ;;  %v651_v36 = vpop.xlane.xlu1 %650  ;;  %v1128_v29 = vmul.f32 %v13021_v43, %v14625_v20 }
 0x402   :  { %13032 = vrcp.f32 %v651_v36  ;;  %12475 = vmatpush3.bf16.xpose.msra.mxu1 %v12474_v9  ;;  %v649_v52 = vpop.xlane.xlu0 %648  ;;  %v1127_v33 = vmul.f32 %v13023_v44, %v14627_v35 }
 0x403   :  { %13034 = vrcp.f32 %v649_v52  ;;  %12476 = vmatprep.subr.bf16.mxu1 %v19699_v41 }
 0x404   :  { %v13025_v27 = vpop.eup %13024  ;;  %v12498_v61 = vpack.c.bf16 %v1128_v29, %v1127_v33 }
 0x405   :  { %v13027_v63 = vpop.eup %13026  ;;  %v1090_v37 = vpop.xlane.xlu1 %1089  ;;  %v691_v1 = vmul.f32 %v13025_v27, %v14633_v53 }
 0x406   :  { %13036 = vrcp.f32 %v1090_v37  ;;  %12499 = vmatpush3.bf16.xpose.msra.mxu0 %v12498_v61  ;;  %v1088_v42 = vpop.xlane.xlu0 %1087  ;;  %v690_v28 = vmul.f32 %v13027_v63, %v14635_v55 }
 0x407   :  { %13038 = vrcp.f32 %v1088_v42  ;;  %12500 = vmatprep.subr.bf16.mxu0 %v19699_v41 }
 0x408   :  { %v13029_v20 = vpop.eup %13028  ;;  %v12477_v57 = vpack.c.bf16 %v691_v1, %v690_v28 }
 0x409   :  { %v13031_v35 = vpop.eup %13030  ;;  %v655_v59 = vpop.xlane.xlu1 %654  ;;  %v1130_v43 = vmul.f32 %v13029_v20, %v14641_v14 }
 0x40a   :  { %13040 = vrcp.f32 %v655_v59  ;;  %12478 = vmatpush3.bf16.xpose.msra.mxu1 %v12477_v57  ;;  %v653_v9 = vpop.xlane.xlu0 %652  ;;  %v1129_v44 = vmul.f32 %v13031_v35, %v14643_v31 }
 0x40b   :  { %13042 = vrcp.f32 %v653_v9  ;;  %12479 = vmatprep.subr.bf16.mxu1 %v19699_v41 }
 0x40c   :  { %v13033_v53 = vpop.eup %13032  ;;  %v12501_v36 = vpack.c.bf16 %v1130_v43, %v1129_v44 }
 0x40d   :  { %v13035_v55 = vpop.eup %13034  ;;  %v1094_v29 = vpop.xlane.xlu1 %1093  ;;  %v693_v52 = vmul.f32 %v13033_v53, %v14649_v18 }
 0x40e   :  { %13044 = vrcp.f32 %v1094_v29  ;;  %12502 = vmatpush3.bf16.xpose.msra.mxu0 %v12501_v36  ;;  %v1092_v33 = vpop.xlane.xlu0 %1091  ;;  %v692_v27 = vmul.f32 %v13035_v55, %v14651_v22 }
 0x40f   :  { %13046 = vrcp.f32 %v1092_v33  ;;  %12503 = vmatprep.subr.bf16.mxu0 %v19699_v41 }
 0x410   :  { %v13037_v14 = vpop.eup %13036  ;;  %v12480_v61 = vpack.c.bf16 %v693_v52, %v692_v27 }
 0x411   :  { %v13039_v31 = vpop.eup %13038  ;;  %v659_v63 = vpop.xlane.xlu1 %658  ;;  %v1132_v37 = vmul.f32 %v13037_v14, %v14657_v51 }
 0x412   :  { %13048 = vrcp.f32 %v659_v63  ;;  %12481 = vmatpush3.bf16.xpose.msra.mxu1 %v12480_v61  ;;  %v657_v1 = vpop.xlane.xlu0 %656  ;;  %v1131_v42 = vmul.f32 %v13039_v31, %v14659_v26 }
 0x413   :  { %13050 = vrcp.f32 %v657_v1  ;;  %12482 = vmatprep.subr.bf16.mxu1 %v19699_v41 }
 0x414   :  { %v13041_v18 = vpop.eup %13040  ;;  %v12504_v28 = vpack.c.bf16 %v1132_v37, %v1131_v42 }
 0x415   :  { %v13043_v22 = vpop.eup %13042  ;;  %v1098_v20 = vpop.xlane.xlu1 %1097  ;;  %v695_v57 = vmul.f32 %v13041_v18, %v14665_v23 }
 0x416   :  { %13052 = vrcp.f32 %v1098_v20  ;;  %12505 = vmatpush3.bf16.xpose.msra.mxu0 %v12504_v28  ;;  %v1096_v35 = vpop.xlane.xlu0 %1095  ;;  %v694_v59 = vmul.f32 %v13043_v22, %v14667_v30 }
 0x417   :  { %13054 = vrcp.f32 %v1096_v35  ;;  %12506 = vmatprep.subr.bf16.mxu0 %v19699_v41 }
 0x418   :  { %v13045_v51 = vpop.eup %13044  ;;  %v12483_v43 = vpack.c.bf16 %v695_v57, %v694_v59 }
 0x419   :  { %v13047_v26 = vpop.eup %13046  ;;  %v663_v9 = vpop.xlane.xlu1 %662  ;;  %v1134_v44 = vmul.f32 %v13045_v51, %v14673_v13 }
 0x41a   :  { %13056 = vrcp.f32 %v663_v9  ;;  %12484 = vmatpush3.bf16.xpose.msra.mxu1 %v12483_v43  ;;  %v661_v53 = vpop.xlane.xlu0 %660  ;;  %v1133_v36 = vmul.f32 %v13047_v26, %v14675_v34 }
 0x41b   :  { %13058 = vrcp.f32 %v661_v53  ;;  %12485 = vmatprep.subr.bf16.mxu1 %v19699_v41 }
 0x41c   :  { %v13049_v23 = vpop.eup %13048  ;;  %v12507_v55 = vpack.c.bf16 %v1134_v44, %v1133_v36 }
 0x41d   :  { %v13051_v30 = vpop.eup %13050  ;;  %v1102_v29 = vpop.xlane.xlu1 %1101  ;;  %v697_v52 = vmul.f32 %v13049_v23, %v14683_v24 }
 0x41e   :  { %13060 = vrcp.f32 %v1102_v29  ;;  %12508 = vmatpush3.bf16.xpose.msra.mxu0 %v12507_v55  ;;  %v1100_v33 = vpop.xlane.xlu0 %1099  ;;  %v696_v27 = vmul.f32 %v13051_v30, %v14685_v15 }
 0x41f   :  { %13062 = vrcp.f32 %v1100_v33  ;;  %12509 = vmatprep.subr.bf16.mxu0 %v19699_v41 }
 0x420   :  { %v13053_v13 = vpop.eup %13052  ;;  %v12486_v14 = vpack.c.bf16 %v697_v52, %v696_v27 }
 0x421   :  { %v13055_v34 = vpop.eup %13054  ;;  %v667_v61 = vpop.xlane.xlu1 %666  ;;  %v1136_v31 = vmul.f32 %v13053_v13, %v14691_v45 }
 0x422   :  { %13064 = vrcp.f32 %v667_v61  ;;  %12487 = vmatpush3.bf16.xpose.msra.mxu1 %v12486_v14  ;;  %v665_v63 = vpop.xlane.xlu0 %664  ;;  %v1135_v37 = vmul.f32 %v13055_v34, %v14693_v11 }
 0x423   :  { %13066 = vrcp.f32 %v665_v63  ;;  %12488 = vmatprep.subr.bf16.mxu1 %v19699_v41 }
 0x424   :  { %v13057_v24 = vpop.eup %13056  ;;  %v12510_v1 = vpack.c.bf16 %v1136_v31, %v1135_v37 }
 0x425   :  { %v13059_v15 = vpop.eup %13058  ;;  %v1106_v42 = vpop.xlane.xlu1 %1105  ;;  %v699_v18 = vmul.f32 %v13057_v24, %v14699_v38 }
 0x426   :  { %13068 = vrcp.f32 %v1106_v42  ;;  %12511 = vmatpush3.bf16.xpose.msra.mxu0 %v12510_v1  ;;  %v1104_v28 = vpop.xlane.xlu0 %1103  ;;  %v698_v22 = vmul.f32 %v13059_v15, %v14701_v40 }
 0x427   :  { %13070 = vrcp.f32 %v1104_v28  ;;  %12512 = vmatprep.subr.bf16.mxu0 %v19699_v41 }
 0x428   :  { %v13061_v45 = vpop.eup %13060  ;;  %v12489_v20 = vpack.c.bf16 %v699_v18, %v698_v22 }
 0x429   :  { %v13063_v11 = vpop.eup %13062  ;;  %v671_v57 = vpop.xlane.xlu1 %670  ;;  %v1138_v35 = vmul.f32 %v13061_v45, %v14707_v39 }
 0x42a   :  { %13072 = vrcp.f32 %v671_v57  ;;  %12490 = vmatpush3.bf16.xpose.msra.mxu1 %v12489_v20  ;;  %v669_v59 = vpop.xlane.xlu0 %668  ;;  %v1137_v51 = vmul.f32 %v13063_v11, %v14709_v19 }
 0x42b   :  { %13074 = vrcp.f32 %v669_v59  ;;  %12491 = vmatprep.subr.bf16.mxu1 %v19699_v41 }
 0x42c   :  { %v13065_v38 = vpop.eup %13064  ;;  %v12513_v43 = vpack.c.bf16 %v1138_v35, %v1137_v51 }
 0x42d   :  { %v13067_v40 = vpop.eup %13066  ;;  %v1110_v26 = vpop.xlane.xlu1 %1109  ;;  %v701_v9 = vmul.f32 %v13065_v38, %v14715_v17 }
 0x42e   :  { %13076 = vrcp.f32 %v1110_v26  ;;  %12514 = vmatpush3.bf16.xpose.msra.mxu0 %v12513_v43  ;;  %v1108_v44 = vpop.xlane.xlu0 %1107  ;;  %v700_v53 = vmul.f32 %v13067_v40, %v14717_v16 }
 0x42f   :  { %13078 = vrcp.f32 %v1108_v44  ;;  %12515 = vmatprep.subr.bf16.mxu0 %v19699_v41 }
 0x430   :  { %v13069_v39 = vpop.eup %13068  ;;  %v12492_v36 = vpack.c.bf16 %v701_v9, %v700_v53 }
 0x431   :  { %v13071_v19 = vpop.eup %13070  ;;  %v1140_v23 = vmul.f32 %v13069_v39, %v14721_v48 }
 0x432   :  { %12493 = vmatpush3.bf16.xpose.msra.mxu1 %v12492_v36  ;;  %v1139_v55 = vmul.f32 %v13071_v19, %v14723_v49 }
 0x433   :  { %12494 = vmatprep.subr.bf16.mxu1 %v19699_v41 }
 0x434   :  { %v13073_v30 = vpop.eup %13072  ;;  %v12516_v17 = vpack.c.bf16 %v1140_v23, %v1139_v55 }
 0x435   :  { %v13075_v29 = vpop.eup %13074  ;;  %v703_v52 = vmul.f32 %v13073_v30, %v14727_v50 }
 0x436   :  { %12517 = vmatpush3.bf16.xpose.msra.mxu0 %v12516_v17  ;;  %v702_v16 = vmul.f32 %v13075_v29, %v14729_v21 }
 0x437   :  { %12518 = vmatprep.subr.bf16.mxu0 %v19699_v41 }
 0x438   :  { %v13077_v33 = vpop.eup %13076  ;;  %v12495_v27 = vpack.c.bf16 %v703_v52, %v702_v16 }
 0x439   :  { %v13079_v13 = vpop.eup %13078  ;;  %v1142_v48 = vmul.f32 %v13077_v33, %v14733_v32 }
 0x43a   :  { %12496 = vmatpush3.bf16.xpose.msra.mxu1 %v12495_v27  ;;  %v1141_v49 = vmul.f32 %v13079_v13, %v14735_v25 }
 0x43b   :  { %11619 = vmatprep.subr.mxu1 %v14423_v2 }
 0x43c   :  { %v12519_v14 = vpack.c.bf16 %v1142_v48, %v1141_v49 }
 0x43e   :  { %12520 = vmatpush3.bf16.xpose.msra.mxu0 %v12519_v14 }
 0x43f   :  { %11680 = vmatprep.subr.mxu0 %v14427_v4 }
 0x441   :  { %11556 = vmatmul.mubr.f32.vlgmr.msra.gmra.mrb[16].mxu1 %v14431_v6 }
 0x442   :  { %11620 = vmatpush3.msra.mxu1 %v14423_v2 }
 0x443   :  { %12521 = vmatprep.subr.bf16.mxu1 %v19699_v41 }
 0x445   :  { %11617 = vmatmul.mubr.f32.vlgmr.msra.gmra.mrb[40].mxu0 %v14435_v8 }
 0x446   :  { %11681 = vmatpush3.msra.mxu0 %v14427_v4 }
 0x447   :  { %12545 = vmatprep.subr.bf16.mxu0 %v19699_v41 }
 0x44e   :  { %v1229_v50 = vpop.trf.xlu0 }
 0x44f   :  { %11621 = vmatprep.mubr.msk.f32.mxu1 %vm366_vm1, %v1229_v50 }
 0x452   :  { %v1230_v21 = vpop.trf.xlu0 }
 0x453   :  { %v1668_v32 = vpop.trf.xlu1  ;;  %11622 = vmatmul.mubr.msk.f32.vlgmr.msra.gmra.mrb[18].mxu1 %vm366_vm1, %v1230_v21 }
 0x454   :  { %11682 = vmatprep.mubr.msk.f32.mxu0 %vm366_vm1, %v1668_v32 }
 0x456   :  { %v1231_v6 = vpop.trf.xlu0 }
 0x457   :  { %v1669_v25 = vpop.trf.xlu1  ;;  %11624 = vmatprep.mubr.msk.f32.mxu1 %vm366_vm1, %v1231_v6 }
 0x458   :  { %11683 = vmatmul.mubr.msk.f32.vlgmr.msra.gmra.mrb[42].mxu0 %vm366_vm1, %v1669_v25 }
 0x45a   :  { %v1232_v2 = vpop.trf.xlu0 }
 0x45b   :  { %v1670_v8 = vpop.trf.xlu1  ;;  %11625 = vmatmul.mubr.msk.f32.gmra.mrb[20].mxu1 %vm366_vm1, %v1232_v2 }
 0x45c   :  { %11685 = vmatprep.mubr.msk.f32.mxu0 %vm366_vm1, %v1670_v8 }
 0x45e   :  { %v1233_v4 = vpop.trf.xlu0 }
 0x45f   :  { %v1671_v34 = vpop.trf.xlu1  ;;  %11627 = vmatprep.mubr.msk.f32.mxu1 %vm366_vm1, %v1233_v4 }
 0x460   :  { %11686 = vmatmul.mubr.msk.f32.gmra.mrb[44].mxu0 %vm366_vm1, %v1671_v34 }
 0x462   :  { %v1234_v61 = vpop.trf.xlu0 }
 0x463   :  { %v1672_v31 = vpop.trf.xlu1  ;;  %11628 = vmatmul.mubr.msk.f32.gmra.mrb[22].mxu1 %vm366_vm1, %v1234_v61 }
 0x464   :  { %11688 = vmatprep.mubr.msk.f32.mxu0 %vm366_vm1, %v1672_v31 }
 0x466   :  { %v1235_v63 = vpop.trf.xlu0 }
 0x467   :  { %v1673_v37 = vpop.trf.xlu1  ;;  %11630 = vmatprep.mubr.msk.f32.mxu1 %vm366_vm1, %v1235_v63 }
 0x468   :  { %11689 = vmatmul.mubr.msk.f32.gmra.mrb[46].mxu0 %vm366_vm1, %v1673_v37 }
 0x46a   :  { %v1236_v24 = vpop.trf.xlu0 }
 0x46b   :  { %v1674_v1 = vpop.trf.xlu1  ;;  %11631 = vmatmul.mubr.msk.f32.gmra.mrb[24].mxu1 %vm366_vm1, %v1236_v24 }
 0x46c   :  { %11691 = vmatprep.mubr.msk.f32.mxu0 %vm366_vm1, %v1674_v1 }
 0x46e   :  { %v1237_v15 = vpop.trf.xlu0 }
 0x46f   :  { %v1675_v42 = vpop.trf.xlu1  ;;  %11633 = vmatprep.mubr.msk.f32.mxu1 %vm366_vm1, %v1237_v15 }
 0x470   :  { %11692 = vmatmul.mubr.msk.f32.gmra.mrb[48].mxu0 %vm366_vm1, %v1675_v42 }
 0x472   :  { %v1238_v18 = vpop.trf.xlu0 }
 0x473   :  { %v1676_v28 = vpop.trf.xlu1  ;;  %11634 = vmatmul.mubr.msk.f32.gmra.mrb[26].mxu1 %vm366_vm1, %v1238_v18 }
 0x474   :  { %11694 = vmatprep.mubr.msk.f32.mxu0 %vm366_vm1, %v1676_v28 }
 0x476   :  { %v1239_v22 = vpop.trf.xlu0 }
 0x477   :  { %v1677_v45 = vpop.trf.xlu1  ;;  %11636 = vmatprep.mubr.msk.f32.mxu1 %vm366_vm1, %v1239_v22 }
 0x478   :  { %11695 = vmatmul.mubr.msk.f32.gmra.mrb[50].mxu0 %vm366_vm1, %v1677_v45 }
 0x47a   :  { %v1240_v20 = vpop.trf.xlu0 }
 0x47b   :  { %v1678_v11 = vpop.trf.xlu1  ;;  %11637 = vmatmul.mubr.msk.f32.gmra.mrb[28].mxu1 %vm366_vm1, %v1240_v20 }
 0x47c   :  { %11697 = vmatprep.mubr.msk.f32.mxu0 %vm366_vm1, %v1678_v11 }
 0x47e   :  { %v1241_v57 = vpop.trf.xlu0 }
 0x47f   :  { %v1679_v35 = vpop.trf.xlu1  ;;  %11639 = vmatprep.mubr.msk.f32.mxu1 %vm366_vm1, %v1241_v57 }
 0x480   :  { %11698 = vmatmul.mubr.msk.f32.gmra.mrb[52].mxu0 %vm366_vm1, %v1679_v35 }
 0x482   :  { %v1242_v59 = vpop.trf.xlu0 }
 0x483   :  { %v1680_v51 = vpop.trf.xlu1  ;;  %11640 = vmatmul.mubr.msk.f32.gmra.mrb[30].mxu1 %vm366_vm1, %v1242_v59 }
 0x484   :  { %11700 = vmatprep.mubr.msk.f32.mxu0 %vm366_vm1, %v1680_v51 }
 0x486   :  { %v1243_v38 = vpop.trf.xlu0 }
 0x487   :  { %v1681_v43 = vpop.trf.xlu1  ;;  %11642 = vmatprep.mubr.msk.f32.mxu1 %vm366_vm1, %v1243_v38 }
 0x488   :  { %11701 = vmatmul.mubr.msk.f32.gmra.mrb[54].mxu0 %vm366_vm1, %v1681_v43 }
 0x48a   :  { %v1244_v40 = vpop.trf.xlu0 }
 0x48b   :  { %v1682_v26 = vpop.trf.xlu1  ;;  %11643 = vmatmul.mubr.msk.f32.gmra.mrb[32].mxu1 %vm366_vm1, %v1244_v40 }
 0x48c   :  { %11703 = vmatprep.mubr.msk.f32.mxu0 %vm366_vm1, %v1682_v26  ;;  %11677 = vmatprep.mubr.msk.f32.mxu1 %vm14284_vm3, %v19697_v46 }
 0x48f   :  { %v1683_v9 = vpop.trf.xlu1 }
 0x490   :  { %11704 = vmatmul.mubr.msk.f32.gmra.mrb[56].mxu0 %vm366_vm1, %v1683_v9 }
 0x491   :  { %11738 = vmatprep.mubr.msk.f32.mxu0 %vm14284_vm3, %v19697_v46 }
 0x514   :  { %v14835_v44 = vpop.f32.mrb[16].mxu1 }
 0x515   :  { %v11557_v53 = vpop.f32.mrb[17].mxu1 }
 0x518   :  { %v14837_v39 = vpop.f32.mrb[40].mxu0 }
 0x519   :  { %v3851_v36 = vpack.c.bf16 %v14837_v39, %v14835_v44  ;;  %v11618_v19 = vpop.f32.mrb[41].mxu0  ;;  %v15870_v44 = vld [vmem:[%s19687_s6] sm:$0xff]  ;;  %v15876_v39 = vld [vmem:[%s19687_s6 + $0x10] sm:$0xff] }
 0x526   :  { %v11623_v23 = vpop.f32.mrb[18].mxu1 }
 0x527   :  { %v14842_v55 = vadd.f32 %v11623_v23, %v14479_v47  ;;  %v1359_v30 = vpop.f32.mrb[19].mxu1 }
 0x528   :  { %v14845_v17 = vadd.f32 %v1359_v30, %v14479_v47 }
 0x529   :  { %1440 = vmax.xlane.f32.xlu1 %v14842_v55 }
 0x52a   :  { %1438 = vmax.xlane.f32.xlu0 %v14845_v17 }
 0x52b   :  { %v11684_v29 = vpop.f32.mrb[42].mxu0 }
 0x52c   :  { %v14850_v52 = vadd.f32 %v11684_v29, %v14479_v47  ;;  %v1798_v16 = vpop.f32.mrb[43].mxu0 }
 0x52d   :  { %v14853_v33 = vadd.f32 %v1798_v16, %v14479_v47 }
 0x52e   :  { %1879 = vmax.xlane.f32.xlu1 %v14850_v52  ;;  %v11626_v27 = vpop.f32.mrb[20].mxu1 }
 0x52f   :  { %v14857_v13 = vadd.f32 %v11626_v27, %v14479_v47  ;;  %1877 = vmax.xlane.f32.xlu0 %v14853_v33  ;;  %v1369_v48 = vpop.f32.mrb[21].mxu1 }
 0x530   :  { %v14861_v49 = vadd.f32 %v1369_v48, %v14479_v47 }
 0x532   :  { %1444 = vmax.xlane.f32.xlu1 %v14857_v13 }
 0x533   :  { %v11687_v14 = vpop.f32.mrb[44].mxu0  ;;  %1442 = vmax.xlane.f32.xlu0 %v14861_v49 }
 0x534   :  { %v14866_v50 = vadd.f32 %v11687_v14, %v14479_v47  ;;  %v1808_v21 = vpop.f32.mrb[45].mxu0 }
 0x535   :  { %v14869_v32 = vadd.f32 %v1808_v21, %v14479_v47 }
 0x536   :  { %1883 = vmax.xlane.f32.xlu1 %v14866_v50  ;;  %v11629_v6 = vpop.f32.mrb[22].mxu1 }
 0x537   :  { %v14873_v25 = vadd.f32 %v11629_v6, %v14479_v47  ;;  %1881 = vmax.xlane.f32.xlu0 %v14869_v32  ;;  %v1379_v2 = vpop.f32.mrb[23].mxu1 }
 0x538   :  { %v14877_v8 = vadd.f32 %v1379_v2, %v14479_v47 }
 0x53a   :  { %1448 = vmax.xlane.f32.xlu1 %v14873_v25 }
 0x53b   :  { %v11690_v4 = vpop.f32.mrb[46].mxu0  ;;  %1446 = vmax.xlane.f32.xlu0 %v14877_v8 }
 0x53c   :  { %v14882_v34 = vadd.f32 %v11690_v4, %v14479_v47  ;;  %v1818_v61 = vpop.f32.mrb[47].mxu0 }
 0x53d   :  { %v14885_v31 = vadd.f32 %v1818_v61, %v14479_v47 }
 0x53e   :  { %1887 = vmax.xlane.f32.xlu1 %v14882_v34  ;;  %v11632_v63 = vpop.f32.mrb[24].mxu1 }
 0x53f   :  { %v14889_v37 = vadd.f32 %v11632_v63, %v14479_v47  ;;  %1885 = vmax.xlane.f32.xlu0 %v14885_v31  ;;  %v1389_v24 = vpop.f32.mrb[25].mxu1 }
 0x540   :  { %v14893_v1 = vadd.f32 %v1389_v24, %v14479_v47 }
 0x542   :  { %1452 = vmax.xlane.f32.xlu1 %v14889_v37 }
 0x543   :  { %v11693_v15 = vpop.f32.mrb[48].mxu0  ;;  %1450 = vmax.xlane.f32.xlu0 %v14893_v1 }
 0x544   :  { %v14898_v42 = vadd.f32 %v11693_v15, %v14479_v47  ;;  %v1828_v18 = vpop.f32.mrb[49].mxu0 }
 0x545   :  { %v14901_v28 = vadd.f32 %v1828_v18, %v14479_v47 }
 0x546   :  { %1891 = vmax.xlane.f32.xlu1 %v14898_v42  ;;  %v11635_v22 = vpop.f32.mrb[26].mxu1 }
 0x547   :  { %v14905_v45 = vadd.f32 %v11635_v22, %v14479_v47  ;;  %1889 = vmax.xlane.f32.xlu0 %v14901_v28  ;;  %v1399_v20 = vpop.f32.mrb[27].mxu1 }
 0x548   :  { %v14909_v11 = vadd.f32 %v1399_v20, %v14479_v47 }
 0x54a   :  { %1456 = vmax.xlane.f32.xlu1 %v14905_v45 }
 0x54b   :  { %v11696_v57 = vpop.f32.mrb[50].mxu0  ;;  %1454 = vmax.xlane.f32.xlu0 %v14909_v11 }
 0x54c   :  { %v14914_v35 = vadd.f32 %v11696_v57, %v14479_v47  ;;  %v1838_v59 = vpop.f32.mrb[51].mxu0 }
 0x54d   :  { %v14917_v51 = vadd.f32 %v1838_v59, %v14479_v47 }
 0x54e   :  { %1895 = vmax.xlane.f32.xlu1 %v14914_v35  ;;  %v11638_v38 = vpop.f32.mrb[28].mxu1 }
 0x54f   :  { %v14921_v43 = vadd.f32 %v11638_v38, %v14479_v47  ;;  %1893 = vmax.xlane.f32.xlu0 %v14917_v51  ;;  %v1409_v40 = vpop.f32.mrb[29].mxu1 }
 0x550   :  { %v14925_v26 = vadd.f32 %v1409_v40, %v14479_v47 }
 0x552   :  { %1460 = vmax.xlane.f32.xlu1 %v14921_v43 }
 0x553   :  { %v11699_v9 = vpop.f32.mrb[52].mxu0  ;;  %1458 = vmax.xlane.f32.xlu0 %v14925_v26 }
 0x554   :  { %v14930_v53 = vadd.f32 %v11699_v9, %v14479_v47  ;;  %v1848_v19 = vpop.f32.mrb[53].mxu0 }
 0x555   :  { %v14933_v23 = vadd.f32 %v1848_v19, %v14479_v47 }
 0x556   :  { %1899 = vmax.xlane.f32.xlu1 %v14930_v53  ;;  %v11641_v30 = vpop.f32.mrb[30].mxu1 }
 0x557   :  { %v14937_v29 = vadd.f32 %v11641_v30, %v14479_v47  ;;  %1897 = vmax.xlane.f32.xlu0 %v14933_v23  ;;  %v1419_v16 = vpop.f32.mrb[31].mxu1 }
 0x558   :  { %v14941_v27 = vadd.f32 %v1419_v16, %v14479_v47 }
 0x55a   :  { %1464 = vmax.xlane.f32.xlu1 %v14937_v29 }
 0x55b   :  { %v11702_v48 = vpop.f32.mrb[54].mxu0  ;;  %1462 = vmax.xlane.f32.xlu0 %v14941_v27 }
 0x55c   :  { %v14946_v14 = vadd.f32 %v11702_v48, %v14479_v47  ;;  %v1858_v21 = vpop.f32.mrb[55].mxu0 }
 0x55d   :  { %v14949_v6 = vadd.f32 %v1858_v21, %v14479_v47 }
 0x55e   :  { %1903 = vmax.xlane.f32.xlu1 %v14946_v14  ;;  %v11644_v2 = vpop.f32.mrb[32].mxu1 }
 0x55f   :  { %v14953_v4 = vadd.f32 %v11644_v2, %v14479_v47  ;;  %1901 = vmax.xlane.f32.xlu0 %v14949_v6  ;;  %v1429_v61 = vpop.f32.mrb[33].mxu1 }
 0x560   :  { %v14957_v63 = vadd.f32 %v1429_v61, %v14479_v47 }
 0x562   :  { %1468 = vmax.xlane.f32.xlu1 %v14953_v4 }
 0x563   :  { %v11705_v24 = vpop.f32.mrb[56].mxu0  ;;  %1466 = vmax.xlane.f32.xlu0 %v14957_v63 }
 0x564   :  { %v14962_v15 = vadd.f32 %v11705_v24, %v14479_v47  ;;  %v1868_v18 = vpop.f32.mrb[57].mxu0 }
 0x565   :  { %v14965_v22 = vadd.f32 %v1868_v18, %v14479_v47 }
 0x566   :  { %1907 = vmax.xlane.f32.xlu1 %v14962_v15 }
 0x567   :  { %1905 = vmax.xlane.f32.xlu0 %v14965_v22 }
 0x5b6   :  { %v1441_v20 = vpop.xlane.xlu1 %1440 }
 0x5b7   :  { %v1471_v57 = vsub.f32 %v14842_v55, %v1441_v20  ;;  %v1439_v59 = vpop.xlane.xlu0 %1438 }
 0x5b8   :  { %v1470_v38 = vsub.f32 %v14845_v17, %v1439_v59 }
 0x5b9   :  { %v1488_v40 = vmul.f32 1.442695, %v1471_v57 }
 0x5ba   :  { %v1486_v9 = vmul.f32 1.442695, %v1470_v38 }
 0x5bb   :  { %13080 = vpow2.f32 %v1488_v40  ;;  %v1880_v19 = vpop.xlane.xlu1 %1879 }
 0x5bc   :  { %13082 = vpow2.f32 %v1486_v9  ;;  %v1910_v30 = vsub.f32 %v14850_v52, %v1880_v19  ;;  %v1878_v16 = vpop.xlane.xlu0 %1877 }
 0x5bd   :  { %v1909_v48 = vsub.f32 %v14853_v33, %v1878_v16 }
 0x5be   :  { %v1927_v21 = vmul.f32 1.442695, %v1910_v30 }
 0x5bf   :  { %v1925_v2 = vmul.f32 1.442695, %v1909_v48  ;;  %v1445_v61 = vpop.xlane.xlu1 %1444 }
 0x5c0   :  { %13084 = vpow2.f32 %v1927_v21  ;;  %v1473_v24 = vsub.f32 %v14857_v13, %v1445_v61  ;;  %v1443_v55 = vpop.xlane.xlu0 %1442 }
 0x5c1   :  { %13086 = vpow2.f32 %v1925_v2  ;;  %v1472_v17 = vsub.f32 %v14861_v49, %v1443_v55 }
 0x5c2   :  { %v1492_v18 = vmul.f32 1.442695, %v1473_v24 }
 0x5c3   :  { %v1490_v20 = vmul.f32 1.442695, %v1472_v17  ;;  %v1884_v57 = vpop.xlane.xlu1 %1883 }
 0x5c4   :  { %13088 = vpow2.f32 %v1492_v18  ;;  %v1912_v59 = vsub.f32 %v14866_v50, %v1884_v57  ;;  %v1882_v52 = vpop.xlane.xlu0 %1881 }
 0x5c5   :  { %v14976_v38 = vpop.eup %13080  ;;  %13090 = vpow2.f32 %v1490_v20  ;;  %v1911_v33 = vsub.f32 %v14869_v32, %v1882_v52 }
 0x5c6   :  { %v14979_v40 = vpop.eup %13082  ;;  %v1931_v9 = vmul.f32 1.442695, %v1912_v59  ;;  %1520 = vadd.xlane.f32.xlu1 %v14976_v38 }
 0x5c7   :  { %v1929_v13 = vmul.f32 1.442695, %v1911_v33  ;;  %v1449_v19 = vpop.xlane.xlu1 %1448  ;;  %1518 = vadd.xlane.f32.xlu0 %v14979_v40 }
 0x5c8   :  { %13092 = vpow2.f32 %v1931_v9  ;;  %v1475_v49 = vsub.f32 %v14873_v25, %v1449_v19  ;;  %v1447_v30 = vpop.xlane.xlu0 %1446 }
 0x5c9   :  { %13094 = vpow2.f32 %v1929_v13  ;;  %v1474_v50 = vsub.f32 %v14877_v8, %v1447_v30 }
 0x5ca   :  { %v14985_v16 = vpop.eup %13084  ;;  %v1496_v48 = vmul.f32 1.442695, %v1475_v49 }
 0x5cb   :  { %v14987_v32 = vpop.eup %13086  ;;  %v1494_v21 = vmul.f32 1.442695, %v1474_v50  ;;  %v1888_v2 = vpop.xlane.xlu1 %1887  ;;  %1959 = vadd.xlane.f32.xlu1 %v14985_v16 }
 0x5cc   :  { %13096 = vpow2.f32 %v1496_v48  ;;  %v1914_v61 = vsub.f32 %v14882_v34, %v1888_v2  ;;  %1957 = vadd.xlane.f32.xlu0 %v14987_v32  ;;  %v1886_v24 = vpop.xlane.xlu0 %1885 }
 0x5cd   :  { %13098 = vpow2.f32 %v1494_v21  ;;  %v1913_v25 = vsub.f32 %v14885_v31, %v1886_v24 }
 0x5ce   :  { %v14993_v55 = vpop.eup %13088  ;;  %v1935_v8 = vmul.f32 1.442695, %v1914_v61 }
 0x5cf   :  { %v14995_v17 = vpop.eup %13090  ;;  %v1933_v18 = vmul.f32 1.442695, %v1913_v25  ;;  %v1453_v20 = vpop.xlane.xlu1 %1452  ;;  %1524 = vadd.xlane.f32.xlu1 %v14993_v55 }
 0x5d0   :  { %13100 = vpow2.f32 %v1935_v8  ;;  %v1477_v57 = vsub.f32 %v14889_v37, %v1453_v20  ;;  %1522 = vadd.xlane.f32.xlu0 %v14995_v17  ;;  %v1451_v34 = vpop.xlane.xlu0 %1450 }
 0x5d1   :  { %13102 = vpow2.f32 %v1933_v18  ;;  %v1476_v59 = vsub.f32 %v14893_v1, %v1451_v34 }
 0x5d2   :  { %v15001_v52 = vpop.eup %13092  ;;  %v1500_v31 = vmul.f32 1.442695, %v1477_v57 }
 0x5d3   :  { %v15003_v33 = vpop.eup %13094  ;;  %v1498_v9 = vmul.f32 1.442695, %v1476_v59  ;;  %v1892_v13 = vpop.xlane.xlu1 %1891  ;;  %1963 = vadd.xlane.f32.xlu1 %v15001_v52 }
 0x5d4   :  { %13104 = vpow2.f32 %v1500_v31  ;;  %v1916_v19 = vsub.f32 %v14898_v42, %v1892_v13  ;;  %1961 = vadd.xlane.f32.xlu0 %v15003_v33  ;;  %v1890_v37 = vpop.xlane.xlu0 %1889 }
 0x5d5   :  { %13106 = vpow2.f32 %v1498_v9  ;;  %v1915_v49 = vsub.f32 %v14901_v28, %v1890_v37 }
 0x5d6   :  { %v15009_v30 = vpop.eup %13096  ;;  %v1939_v1 = vmul.f32 1.442695, %v1916_v19 }
 0x5d7   :  { %v15011_v50 = vpop.eup %13098  ;;  %v1937_v48 = vmul.f32 1.442695, %v1915_v49  ;;  %v1457_v21 = vpop.xlane.xlu1 %1456  ;;  %1528 = vadd.xlane.f32.xlu1 %v15009_v30 }
 0x5d8   :  { %13108 = vpow2.f32 %v1939_v1  ;;  %v1479_v2 = vsub.f32 %v14905_v45, %v1457_v21  ;;  %1526 = vadd.xlane.f32.xlu0 %v15011_v50  ;;  %v1455_v42 = vpop.xlane.xlu0 %1454 }
 0x5d9   :  { %13110 = vpow2.f32 %v1937_v48  ;;  %v1478_v61 = vsub.f32 %v14909_v11, %v1455_v42 }
 0x5da   :  { %v15017_v24 = vpop.eup %13100  ;;  %v1504_v28 = vmul.f32 1.442695, %v1479_v2 }
 0x5db   :  { %v15019_v25 = vpop.eup %13102  ;;  %v1502_v8 = vmul.f32 1.442695, %v1478_v61  ;;  %v1896_v18 = vpop.xlane.xlu1 %1895  ;;  %1967 = vadd.xlane.f32.xlu1 %v15017_v24 }
 0x5dc   :  { %13112 = vpow2.f32 %v1504_v28  ;;  %v1918_v20 = vsub.f32 %v14914_v35, %v1896_v18  ;;  %1965 = vadd.xlane.f32.xlu0 %v15019_v25  ;;  %v1894_v45 = vpop.xlane.xlu0 %1893 }
 0x5dd   :  { %13114 = vpow2.f32 %v1502_v8  ;;  %v1917_v57 = vsub.f32 %v14917_v51, %v1894_v45 }
 0x5de   :  { %v15025_v34 = vpop.eup %13104  ;;  %v1943_v11 = vmul.f32 1.442695, %v1918_v20 }
 0x5df   :  { %v15027_v59 = vpop.eup %13106  ;;  %v1941_v31 = vmul.f32 1.442695, %v1917_v57  ;;  %v1461_v9 = vpop.xlane.xlu1 %1460  ;;  %1532 = vadd.xlane.f32.xlu1 %v15025_v34 }
 0x5e0   :  { %13116 = vpow2.f32 %v1943_v11  ;;  %v1481_v13 = vsub.f32 %v14921_v43, %v1461_v9  ;;  %1530 = vadd.xlane.f32.xlu0 %v15027_v59  ;;  %v1459_v35 = vpop.xlane.xlu0 %1458 }
 0x5e1   :  { %13118 = vpow2.f32 %v1941_v31  ;;  %v1480_v19 = vsub.f32 %v14925_v26, %v1459_v35 }
 0x5e2   :  { %v15033_v37 = vpop.eup %13108  ;;  %v1508_v51 = vmul.f32 1.442695, %v1481_v13 }
 0x5e3   :  { %v15035_v49 = vpop.eup %13110  ;;  %v1506_v1 = vmul.f32 1.442695, %v1480_v19  ;;  %v1900_v48 = vpop.xlane.xlu1 %1899  ;;  %1971 = vadd.xlane.f32.xlu1 %v15033_v37 }
 0x5e4   :  { %13120 = vpow2.f32 %v1508_v51  ;;  %v1920_v21 = vsub.f32 %v14930_v53, %v1900_v48  ;;  %1969 = vadd.xlane.f32.xlu0 %v15035_v49  ;;  %v1898_v43 = vpop.xlane.xlu0 %1897 }
 0x5e5   :  { %13122 = vpow2.f32 %v1506_v1  ;;  %v1919_v2 = vsub.f32 %v14933_v23, %v1898_v43 }
 0x5e6   :  { %v15041_v42 = vpop.eup %13112  ;;  %v1947_v26 = vmul.f32 1.442695, %v1920_v21 }
 0x5e7   :  { %v15043_v61 = vpop.eup %13114  ;;  %v1945_v28 = vmul.f32 1.442695, %v1919_v2  ;;  %v1465_v8 = vpop.xlane.xlu1 %1464  ;;  %1536 = vadd.xlane.f32.xlu1 %v15041_v42 }
 0x5e8   :  { %13124 = vpow2.f32 %v1947_v26  ;;  %v1483_v18 = vsub.f32 %v14937_v29, %v1465_v8  ;;  %1534 = vadd.xlane.f32.xlu0 %v15043_v61  ;;  %v1463_v53 = vpop.xlane.xlu0 %1462 }
 0x5e9   :  { %13126 = vpow2.f32 %v1945_v28  ;;  %v1482_v20 = vsub.f32 %v14941_v27, %v1463_v53 }
 0x5ea   :  { %v15049_v45 = vpop.eup %13116  ;;  %v1512_v23 = vmul.f32 1.442695, %v1483_v18 }
 0x5eb   :  { %v15051_v57 = vpop.eup %13118  ;;  %v1510_v11 = vmul.f32 1.442695, %v1482_v20  ;;  %v1904_v31 = vpop.xlane.xlu1 %1903  ;;  %1975 = vadd.xlane.f32.xlu1 %v15049_v45 }
 0x5ec   :  { %13128 = vpow2.f32 %v1512_v23  ;;  %v1922_v9 = vsub.f32 %v14946_v14, %v1904_v31  ;;  %1973 = vadd.xlane.f32.xlu0 %v15051_v57  ;;  %v1902_v29 = vpop.xlane.xlu0 %1901 }
 0x5ed   :  { %13130 = vpow2.f32 %v1510_v11  ;;  %v1921_v13 = vsub.f32 %v14949_v6, %v1902_v29 }
 0x5ee   :  { %v15057_v35 = vpop.eup %13120  ;;  %v1951_v27 = vmul.f32 1.442695, %v1922_v9 }
 0x5ef   :  { %v15059_v19 = vpop.eup %13122  ;;  %v1949_v51 = vmul.f32 1.442695, %v1921_v13  ;;  %1540 = vadd.xlane.f32.xlu1 %v15057_v35  ;;  %v1469_v1 = vpop.xlane.xlu1 %1468 }
 0x5f0   :  { %13132 = vpow2.f32 %v1951_v27  ;;  %v1485_v48 = vsub.f32 %v14953_v4, %v1469_v1  ;;  %1538 = vadd.xlane.f32.xlu0 %v15059_v19  ;;  %v1467_v14 = vpop.xlane.xlu0 %1466 }
 0x5f1   :  { %13134 = vpow2.f32 %v1949_v51  ;;  %v1484_v21 = vsub.f32 %v14957_v63, %v1467_v14 }
 0x5f2   :  { %v15065_v43 = vpop.eup %13124  ;;  %v1516_v6 = vmul.f32 1.442695, %v1485_v48 }
 0x5f3   :  { %v15067_v2 = vpop.eup %13126  ;;  %v1514_v26 = vmul.f32 1.442695, %v1484_v21  ;;  %1979 = vadd.xlane.f32.xlu1 %v15065_v43  ;;  %v1908_v28 = vpop.xlane.xlu1 %1907 }
 0x5f4   :  { %13136 = vpow2.f32 %v1516_v6  ;;  %v1924_v8 = vsub.f32 %v14962_v15, %v1908_v28  ;;  %1977 = vadd.xlane.f32.xlu0 %v15067_v2  ;;  %v1906_v4 = vpop.xlane.xlu0 %1905 }
 0x5f5   :  { %13138 = vpow2.f32 %v1514_v26  ;;  %v1923_v18 = vsub.f32 %v14965_v22, %v1906_v4 }
 0x5f6   :  { %v15073_v53 = vpop.eup %13128  ;;  %v1955_v63 = vmul.f32 1.442695, %v1924_v8 }
 0x5f7   :  { %v15075_v20 = vpop.eup %13130  ;;  %v1953_v23 = vmul.f32 1.442695, %v1923_v18  ;;  %1544 = vadd.xlane.f32.xlu1 %v15073_v53 }
 0x5f8   :  { %13140 = vpow2.f32 %v1955_v63  ;;  %1542 = vadd.xlane.f32.xlu0 %v15075_v20 }
 0x5f9   :  { %13142 = vpow2.f32 %v1953_v23 }
 0x5fa   :  { %v15079_v11 = vpop.eup %13132 }
 0x5fb   :  { %v15081_v15 = vpop.eup %13134  ;;  %1983 = vadd.xlane.f32.xlu1 %v15079_v11 }
 0x5fc   :  { %1981 = vadd.xlane.f32.xlu0 %v15081_v15 }
 0x5fe   :  { %v15085_v22 = vpop.eup %13136 }
 0x5ff   :  { %v15087_v31 = vpop.eup %13138  ;;  %1548 = vadd.xlane.f32.xlu1 %v15085_v22 }
 0x600   :  { %1546 = vadd.xlane.f32.xlu0 %v15087_v31 }
 0x602   :  { %v15091_v9 = vpop.eup %13140 }
 0x603   :  { %v15093_v29 = vpop.eup %13142  ;;  %1987 = vadd.xlane.f32.xlu1 %v15091_v9 }
 0x604   :  { %1985 = vadd.xlane.f32.xlu0 %v15093_v29 }
 0x631   :  { %2091 = vxpose.xlu0.b32.start.end [1/1] (short) %v14407_v54, 128 }
 0x636   :  { %2530 = vxpose.xlu1.b32.start.end [1/1] (short) %v14409_v56, 128 }
 0x653   :  { %v1521_v13 = vpop.xlane.xlu1 %1520 }
 0x654   :  { %13144 = vrcp.f32 %v1521_v13  ;;  %v1519_v27 = vpop.xlane.xlu0 %1518 }
 0x655   :  { %13146 = vrcp.f32 %v1519_v27 }
 0x658   :  { %v1960_v51 = vpop.xlane.xlu1 %1959 }
 0x659   :  { %13148 = vrcp.f32 %v1960_v51  ;;  %v1958_v1 = vpop.xlane.xlu0 %1957 }
 0x65a   :  { %13150 = vrcp.f32 %v1958_v1 }
 0x65c   :  { %v1525_v48 = vpop.xlane.xlu1 %1524 }
 0x65d   :  { %13152 = vrcp.f32 %v1525_v48  ;;  %v1523_v14 = vpop.xlane.xlu0 %1522 }
 0x65e   :  { %v13145_v21 = vpop.eup %13144  ;;  %13154 = vrcp.f32 %v1523_v14 }
 0x65f   :  { %v13147_v6 = vpop.eup %13146  ;;  %v1567_v26 = vmul.f32 %v13145_v21, %v14976_v38 }
 0x660   :  { %v1964_v28 = vpop.xlane.xlu1 %1963  ;;  %v1566_v54 = vmul.f32 %v13147_v6, %v14979_v40 }
 0x661   :  { %13156 = vrcp.f32 %v1964_v28  ;;  %v1962_v56 = vpop.xlane.xlu0 %1961 }
 0x662   :  { %13158 = vrcp.f32 %v1962_v56  ;;  %v12522_v8 = vpack.c.bf16 %v1567_v26, %v1566_v54 }
 0x663   :  { %v13149_v4 = vpop.eup %13148 }
 0x664   :  { %v13151_v18 = vpop.eup %13150  ;;  %v1529_v63 = vpop.xlane.xlu1 %1528  ;;  %12523 = vmatpush3.bf16.xpose.msra.mxu1 %v12522_v8  ;;  %v2006_v23 = vmul.f32 %v13149_v4, %v14985_v16 }
 0x665   :  { %13160 = vrcp.f32 %v1529_v63  ;;  %v1527_v13 = vpop.xlane.xlu0 %1526  ;;  %v2005_v27 = vmul.f32 %v13151_v18, %v14987_v32  ;;  %12524 = vmatprep.subr.bf16.mxu1 %v19699_v41 }
 0x666   :  { %13162 = vrcp.f32 %v1527_v13 }
 0x667   :  { %v13153_v38 = vpop.eup %13152  ;;  %v12546_v51 = vpack.c.bf16 %v2006_v23, %v2005_v27 }
 0x668   :  { %v13155_v40 = vpop.eup %13154  ;;  %v1968_v1 = vpop.xlane.xlu1 %1967  ;;  %v1569_v48 = vmul.f32 %v13153_v38, %v14993_v55 }
 0x669   :  { %13164 = vrcp.f32 %v1968_v1  ;;  %12547 = vmatpush3.bf16.xpose.msra.mxu0 %v12546_v51  ;;  %v1966_v14 = vpop.xlane.xlu0 %1965  ;;  %v1568_v21 = vmul.f32 %v13155_v40, %v14995_v17 }
 0x66a   :  { %13166 = vrcp.f32 %v1966_v14  ;;  %12548 = vmatprep.subr.bf16.mxu0 %v19699_v41 }
 0x66b   :  { %v13157_v16 = vpop.eup %13156  ;;  %v12525_v6 = vpack.c.bf16 %v1569_v48, %v1568_v21 }
 0x66c   :  { %v13159_v32 = vpop.eup %13158  ;;  %v1533_v26 = vpop.xlane.xlu1 %1532  ;;  %v2008_v28 = vmul.f32 %v13157_v16, %v15001_v52 }
 0x66d   :  { %13168 = vrcp.f32 %v1533_v26  ;;  %12526 = vmatpush3.bf16.xpose.msra.mxu1 %v12525_v6  ;;  %v1531_v54 = vpop.xlane.xlu0 %1530  ;;  %v2007_v56 = vmul.f32 %v13159_v32, %v15003_v33 }
 0x66e   :  { %13170 = vrcp.f32 %v1531_v54  ;;  %12527 = vmatprep.subr.bf16.mxu1 %v19699_v41 }
 0x66f   :  { %v13161_v55 = vpop.eup %13160  ;;  %v12549_v8 = vpack.c.bf16 %v2008_v28, %v2007_v56 }
 0x670   :  { %v13163_v17 = vpop.eup %13162  ;;  %v1972_v4 = vpop.xlane.xlu1 %1971  ;;  %v1571_v18 = vmul.f32 %v13161_v55, %v15009_v30 }
 0x671   :  { %13172 = vrcp.f32 %v1972_v4  ;;  %12550 = vmatpush3.bf16.xpose.msra.mxu0 %v12549_v8  ;;  %v1970_v63 = vpop.xlane.xlu0 %1969  ;;  %v1570_v23 = vmul.f32 %v13163_v17, %v15011_v50 }
 0x672   :  { %13174 = vrcp.f32 %v1970_v63  ;;  %12551 = vmatprep.subr.bf16.mxu0 %v19699_v41 }
 0x673   :  { %v13165_v52 = vpop.eup %13164  ;;  %v12528_v13 = vpack.c.bf16 %v1571_v18, %v1570_v23 }
 0x674   :  { %v13167_v33 = vpop.eup %13166  ;;  %v1537_v27 = vpop.xlane.xlu1 %1536  ;;  %v2010_v38 = vmul.f32 %v13165_v52, %v15017_v24 }
 0x675   :  { %13176 = vrcp.f32 %v1537_v27  ;;  %12529 = vmatpush3.bf16.xpose.msra.mxu1 %v12528_v13  ;;  %v1535_v51 = vpop.xlane.xlu0 %1534  ;;  %v2009_v40 = vmul.f32 %v13167_v33, %v15019_v25 }
 0x676   :  { %13178 = vrcp.f32 %v1535_v51  ;;  %12530 = vmatprep.subr.bf16.mxu1 %v19699_v41 }
 0x677   :  { %v13169_v30 = vpop.eup %13168  ;;  %v12552_v1 = vpack.c.bf16 %v2010_v38, %v2009_v40 }
 0x678   :  { %v13171_v50 = vpop.eup %13170  ;;  %v1976_v48 = vpop.xlane.xlu1 %1975  ;;  %v1573_v14 = vmul.f32 %v13169_v30, %v15025_v34 }
 0x679   :  { %13180 = vrcp.f32 %v1976_v48  ;;  %12553 = vmatpush3.bf16.xpose.msra.mxu0 %v12552_v1  ;;  %v1974_v21 = vpop.xlane.xlu0 %1973  ;;  %v1572_v16 = vmul.f32 %v13171_v50, %v15027_v59 }
 0x67a   :  { %13182 = vrcp.f32 %v1974_v21  ;;  %12554 = vmatprep.subr.bf16.mxu0 %v19699_v41 }
 0x67b   :  { %v13173_v24 = vpop.eup %13172  ;;  %v12531_v6 = vpack.c.bf16 %v1573_v14, %v1572_v16 }
 0x67c   :  { %v13175_v25 = vpop.eup %13174  ;;  %v1541_v32 = vpop.xlane.xlu1 %1540  ;;  %v2012_v26 = vmul.f32 %v13173_v24, %v15033_v37 }
 0x67d   :  { %13184 = vrcp.f32 %v1541_v32  ;;  %12532 = vmatpush3.bf16.xpose.msra.mxu1 %v12531_v6  ;;  %v1539_v28 = vpop.xlane.xlu0 %1538  ;;  %v2011_v54 = vmul.f32 %v13175_v25, %v15035_v49 }
 0x67e   :  { %13186 = vrcp.f32 %v1539_v28  ;;  %12533 = vmatprep.subr.bf16.mxu1 %v19699_v41 }
 0x67f   :  { %v13177_v34 = vpop.eup %13176  ;;  %v12555_v56 = vpack.c.bf16 %v2012_v26, %v2011_v54 }
 0x680   :  { %v13179_v59 = vpop.eup %13178  ;;  %v1980_v55 = vpop.xlane.xlu1 %1979  ;;  %v1575_v8 = vmul.f32 %v13177_v34, %v15041_v42 }
 0x681   :  { %13188 = vrcp.f32 %v1980_v55  ;;  %12556 = vmatpush3.bf16.xpose.msra.mxu0 %v12555_v56  ;;  %v1978_v17 = vpop.xlane.xlu0 %1977  ;;  %v1574_v4 = vmul.f32 %v13179_v59, %v15043_v61 }
 0x682   :  { %13190 = vrcp.f32 %v1978_v17  ;;  %12557 = vmatprep.subr.bf16.mxu0 %v19699_v41 }
 0x683   :  { %v13181_v37 = vpop.eup %13180  ;;  %v12534_v18 = vpack.c.bf16 %v1575_v8, %v1574_v4 }
 0x684   :  { %v13183_v49 = vpop.eup %13182  ;;  %v1545_v63 = vpop.xlane.xlu1 %1544  ;;  %v2014_v23 = vmul.f32 %v13181_v37, %v15049_v45 }
 0x685   :  { %13192 = vrcp.f32 %v1545_v63  ;;  %12535 = vmatpush3.bf16.xpose.msra.mxu1 %v12534_v18  ;;  %v1543_v52 = vpop.xlane.xlu0 %1542  ;;  %v2013_v13 = vmul.f32 %v13183_v49, %v15051_v57 }
 0x686   :  { %13194 = vrcp.f32 %v1543_v52  ;;  %12536 = vmatprep.subr.bf16.mxu1 %v19699_v41 }
 0x687   :  { %v13185_v42 = vpop.eup %13184  ;;  %v12558_v33 = vpack.c.bf16 %v2014_v23, %v2013_v13 }
 0x688   :  { %v13187_v61 = vpop.eup %13186  ;;  %v1984_v27 = vpop.xlane.xlu1 %1983  ;;  %v1577_v38 = vmul.f32 %v13185_v42, %v15057_v35 }
 0x689   :  { %13196 = vrcp.f32 %v1984_v27  ;;  %12559 = vmatpush3.bf16.xpose.msra.mxu0 %v12558_v33  ;;  %v1982_v51 = vpop.xlane.xlu0 %1981  ;;  %v1576_v40 = vmul.f32 %v13187_v61, %v15059_v19 }
 0x68a   :  { %13198 = vrcp.f32 %v1982_v51  ;;  %12560 = vmatprep.subr.bf16.mxu0 %v19699_v41 }
 0x68b   :  { %v13189_v45 = vpop.eup %13188  ;;  %v12537_v30 = vpack.c.bf16 %v1577_v38, %v1576_v40 }
 0x68c   :  { %v13191_v57 = vpop.eup %13190  ;;  %v1549_v1 = vpop.xlane.xlu1 %1548  ;;  %v2016_v50 = vmul.f32 %v13189_v45, %v15065_v43 }
 0x68d   :  { %13200 = vrcp.f32 %v1549_v1  ;;  %12538 = vmatpush3.bf16.xpose.msra.mxu1 %v12537_v30  ;;  %v1547_v48 = vpop.xlane.xlu0 %1546  ;;  %v2015_v14 = vmul.f32 %v13191_v57, %v15067_v2 }
 0x68e   :  { %13202 = vrcp.f32 %v1547_v48  ;;  %12539 = vmatprep.subr.bf16.mxu1 %v19699_v41 }
 0x68f   :  { %v13193_v35 = vpop.eup %13192  ;;  %v12561_v21 = vpack.c.bf16 %v2016_v50, %v2015_v14 }
 0x690   :  { %v13195_v19 = vpop.eup %13194  ;;  %v1988_v16 = vpop.xlane.xlu1 %1987  ;;  %v1579_v24 = vmul.f32 %v13193_v35, %v15073_v53 }
 0x691   :  { %13204 = vrcp.f32 %v1988_v16  ;;  %12562 = vmatpush3.bf16.xpose.msra.mxu0 %v12561_v21  ;;  %v1986_v6 = vpop.xlane.xlu0 %1985  ;;  %v1578_v25 = vmul.f32 %v13195_v19, %v15075_v20 }
 0x692   :  { %13206 = vrcp.f32 %v1986_v6  ;;  %12563 = vmatprep.subr.bf16.mxu0 %v19699_v41 }
 0x693   :  { %v13197_v43 = vpop.eup %13196  ;;  %v12540_v32 = vpack.c.bf16 %v1579_v24, %v1578_v25 }
 0x694   :  { %v13199_v2 = vpop.eup %13198  ;;  %v2018_v26 = vmul.f32 %v13197_v43, %v15079_v11 }
 0x695   :  { %12541 = vmatpush3.bf16.xpose.msra.mxu1 %v12540_v32  ;;  %v2017_v28 = vmul.f32 %v13199_v2, %v15081_v15 }
 0x696   :  { %12542 = vmatprep.subr.bf16.mxu1 %v19699_v41 }
 0x697   :  { %v13201_v54 = vpop.eup %13200  ;;  %v12564_v53 = vpack.c.bf16 %v2018_v26, %v2017_v28 }
 0x698   :  { %v13203_v34 = vpop.eup %13202  ;;  %v1581_v56 = vmul.f32 %v13201_v54, %v15085_v22 }
 0x699   :  { %12565 = vmatpush3.bf16.xpose.msra.mxu0 %v12564_v53  ;;  %v1580_v20 = vmul.f32 %v13203_v34, %v15087_v31 }
 0x69a   :  { %12566 = vmatprep.subr.bf16.mxu0 %v19699_v41 }
 0x69b   :  { %v13205_v59 = vpop.eup %13204  ;;  %v12543_v55 = vpack.c.bf16 %v1581_v56, %v1580_v20 }
 0x69c   :  { %v13207_v8 = vpop.eup %13206  ;;  %v2020_v11 = vmul.f32 %v13205_v59, %v15091_v9 }
 0x69d   :  { %12544 = vmatpush3.bf16.xpose.msra.mxu1 %v12543_v55  ;;  %v2019_v15 = vmul.f32 %v13207_v8, %v15093_v29 }
 0x69e   :  { %11741 = vmatprep.subr.mxu1 %v14419_v62 }
 0x69f   :  { %v12567_v17 = vpack.c.bf16 %v2020_v11, %v2019_v15 }
 0x6a1   :  { %12568 = vmatpush3.bf16.xpose.msra.mxu0 %v12567_v17 }
 0x6a2   :  { %11802 = vmatprep.subr.mxu0 %v14421_v0 }
 0x6a4   :  { %11678 = vmatmul.mubr.f32.vlgmr.msra.gmra.mrb[34].mxu1 %v14439_v10 }
 0x6a5   :  { %11742 = vmatpush3.msra.mxu1 %v14419_v62 }
 0x6a6   :  { %12569 = vmatprep.subr.bf16.mxu1 %v19699_v41 }
 0x6a8   :  { %11739 = vmatmul.mubr.f32.vlgmr.msra.gmra.mrb[58].mxu0 %v14443_v12 }
 0x6a9   :  { %11803 = vmatpush3.msra.mxu0 %v14421_v0 }
 0x6aa   :  { %12593 = vmatprep.subr.bf16.mxu0 %v19699_v41 }
 0x6b1   :  { %v2107_v22 = vpop.trf.xlu0 }
 0x6b2   :  { %11743 = vmatprep.mubr.msk.f32.mxu1 %vm366_vm1, %v2107_v22 }
 0x6b5   :  { %v2108_v31 = vpop.trf.xlu0 }
 0x6b6   :  { %v2546_v9 = vpop.trf.xlu1  ;;  %11744 = vmatmul.mubr.msk.f32.vlgmr.msra.gmra.mrb[36].mxu1 %vm366_vm1, %v2108_v31 }
 0x6b7   :  { %11804 = vmatprep.mubr.msk.f32.mxu0 %vm366_vm1, %v2546_v9 }
 0x6b9   :  { %v2109_v10 = vpop.trf.xlu0 }
 0x6ba   :  { %v2547_v29 = vpop.trf.xlu1  ;;  %11746 = vmatprep.mubr.msk.f32.mxu1 %vm366_vm1, %v2109_v10 }
 0x6bb   :  { %11805 = vmatmul.mubr.msk.f32.vlgmr.msra.gmra.mrb[60].mxu0 %vm366_vm1, %v2547_v29 }
 0x6bd   :  { %v2110_v62 = vpop.trf.xlu0 }
 0x6be   :  { %v2548_v12 = vpop.trf.xlu1  ;;  %11747 = vmatmul.mubr.msk.f32.gmra.mrb[38].mxu1 %vm366_vm1, %v2110_v62 }
 0x6bf   :  { %11807 = vmatprep.mubr.msk.f32.mxu0 %vm366_vm1, %v2548_v12 }
 0x6c1   :  { %v2111_v0 = vpop.trf.xlu0 }
 0x6c2   :  { %v2549_v4 = vpop.trf.xlu1  ;;  %11749 = vmatprep.mubr.msk.f32.mxu1 %vm366_vm1, %v2111_v0 }
 0x6c3   :  { %11808 = vmatmul.mubr.msk.f32.gmra.mrb[62].mxu0 %vm366_vm1, %v2549_v4 }
 0x6c5   :  { %v2112_v37 = vpop.trf.xlu0 }
 0x6c6   :  { %v2550_v18 = vpop.trf.xlu1  ;;  %11750 = vmatmul.mubr.msk.f32.gmra.mrb[40].mxu1 %vm366_vm1, %v2112_v37 }
 0x6c7   :  { %11810 = vmatprep.mubr.msk.f32.mxu0 %vm366_vm1, %v2550_v18 }
 0x6c9   :  { %v2113_v49 = vpop.trf.xlu0 }
 0x6ca   :  { %v2551_v63 = vpop.trf.xlu1  ;;  %11752 = vmatprep.mubr.msk.f32.mxu1 %vm366_vm1, %v2113_v49 }
 0x6cb   :  { %11811 = vmatmul.mubr.msk.f32.gmra.mrb[64].mxu0 %vm366_vm1, %v2551_v63 }
 0x6cd   :  { %v2114_v23 = vpop.trf.xlu0 }
 0x6ce   :  { %v2552_v52 = vpop.trf.xlu1  ;;  %11753 = vmatmul.mubr.msk.f32.gmra.mrb[42].mxu1 %vm366_vm1, %v2114_v23 }
 0x6cf   :  { %11813 = vmatprep.mubr.msk.f32.mxu0 %vm366_vm1, %v2552_v52 }
 0x6d1   :  { %v2115_v13 = vpop.trf.xlu0 }
 0x6d2   :  { %v2553_v42 = vpop.trf.xlu1  ;;  %11755 = vmatprep.mubr.msk.f32.mxu1 %vm366_vm1, %v2115_v13 }
 0x6d3   :  { %11814 = vmatmul.mubr.msk.f32.gmra.mrb[66].mxu0 %vm366_vm1, %v2553_v42 }
 0x6d5   :  { %v2116_v33 = vpop.trf.xlu0 }
 0x6d6   :  { %v2554_v61 = vpop.trf.xlu1  ;;  %11756 = vmatmul.mubr.msk.f32.gmra.mrb[44].mxu1 %vm366_vm1, %v2116_v33 }
 0x6d7   :  { %11816 = vmatprep.mubr.msk.f32.mxu0 %vm366_vm1, %v2554_v61 }
 0x6d9   :  { %v2117_v27 = vpop.trf.xlu0 }
 0x6da   :  { %v2555_v38 = vpop.trf.xlu1  ;;  %11758 = vmatprep.mubr.msk.f32.mxu1 %vm366_vm1, %v2117_v27 }
 0x6db   :  { %11817 = vmatmul.mubr.msk.f32.gmra.mrb[68].mxu0 %vm366_vm1, %v2555_v38 }
 0x6dd   :  { %v2118_v51 = vpop.trf.xlu0 }
 0x6de   :  { %v2556_v40 = vpop.trf.xlu1  ;;  %11759 = vmatmul.mubr.msk.f32.gmra.mrb[46].mxu1 %vm366_vm1, %v2118_v51 }
 0x6df   :  { %11819 = vmatprep.mubr.msk.f32.mxu0 %vm366_vm1, %v2556_v40 }
 0x6e1   :  { %v2119_v45 = vpop.trf.xlu0 }
 0x6e2   :  { %v2557_v30 = vpop.trf.xlu1  ;;  %11761 = vmatprep.mubr.msk.f32.mxu1 %vm366_vm1, %v2119_v45 }
 0x6e3   :  { %11820 = vmatmul.mubr.msk.f32.gmra.mrb[70].mxu0 %vm366_vm1, %v2557_v30 }
 0x6e5   :  { %v2120_v57 = vpop.trf.xlu0 }
 0x6e6   :  { %v2558_v1 = vpop.trf.xlu1  ;;  %11762 = vmatmul.mubr.msk.f32.gmra.mrb[48].mxu1 %vm366_vm1, %v2120_v57 }
 0x6e7   :  { %11822 = vmatprep.mubr.msk.f32.mxu0 %vm366_vm1, %v2558_v1 }
 0x6e9   :  { %v2121_v50 = vpop.trf.xlu0 }
 0x6ea   :  { %v2559_v48 = vpop.trf.xlu1  ;;  %11764 = vmatprep.mubr.msk.f32.mxu1 %vm366_vm1, %v2121_v50 }
 0x6eb   :  { %11823 = vmatmul.mubr.msk.f32.gmra.mrb[72].mxu0 %vm366_vm1, %v2559_v48 }
 0x6ed   :  { %v2122_v14 = vpop.trf.xlu0 }
 0x6ee   :  { %v2560_v35 = vpop.trf.xlu1  ;;  %11765 = vmatmul.mubr.msk.f32.gmra.mrb[50].mxu1 %vm366_vm1, %v2122_v14 }
 0x6ef   :  { %11825 = vmatprep.mubr.msk.f32.mxu0 %vm366_vm1, %v2560_v35  ;;  %11799 = vmatprep.mubr.msk.f32.mxu1 %vm14284_vm3, %v19697_v46 }
 0x6f2   :  { %v2561_v21 = vpop.trf.xlu1 }
 0x6f3   :  { %11826 = vmatmul.mubr.msk.f32.gmra.mrb[74].mxu0 %vm366_vm1, %v2561_v21 }
 0x6f4   :  { %11860 = vmatprep.mubr.msk.f32.mxu0 %vm14284_vm3, %v19697_v46 }
 0x777   :  { %v15189_v19 = vpop.f32.mrb[34].mxu1 }
 0x778   :  { %v11679_v16 = vpop.f32.mrb[35].mxu1 }
 0x77b   :  { %v15191_v24 = vpop.f32.mrb[58].mxu0 }
 0x77c   :  { %v3853_v6 = vpack.c.bf16 %v15191_v24, %v15189_v19  ;;  %v11740_v25 = vpop.f32.mrb[59].mxu0  ;;  %v14248_v19 = vld [vmem:[%s19688_s0 + $0x10] sm:$0xff] }
 0x789   :  { %v11745_v43 = vpop.f32.mrb[36].mxu1 }
 0x78a   :  { %v15196_v32 = vadd.f32 %v11745_v43, %v14479_v47  ;;  %v2237_v2 = vpop.f32.mrb[37].mxu1 }
 0x78b   :  { %v15199_v26 = vadd.f32 %v2237_v2, %v14479_v47 }
 0x78c   :  { %2318 = vmax.xlane.f32.xlu1 %v15196_v32 }
 0x78d   :  { %2316 = vmax.xlane.f32.xlu0 %v15199_v26 }
 0x78e   :  { %v11806_v28 = vpop.f32.mrb[60].mxu0 }
 0x78f   :  { %v15204_v54 = vadd.f32 %v11806_v28, %v14479_v47  ;;  %v2676_v53 = vpop.f32.mrb[61].mxu0 }
 0x790   :  { %v15207_v34 = vadd.f32 %v2676_v53, %v14479_v47 }
 0x791   :  { %2757 = vmax.xlane.f32.xlu1 %v15204_v54  ;;  %v11748_v56 = vpop.f32.mrb[38].mxu1 }
 0x792   :  { %v15211_v20 = vadd.f32 %v11748_v56, %v14479_v47  ;;  %2755 = vmax.xlane.f32.xlu0 %v15207_v34  ;;  %v2247_v59 = vpop.f32.mrb[39].mxu1 }
 0x793   :  { %v15215_v55 = vadd.f32 %v2247_v59, %v14479_v47 }
 0x795   :  { %2322 = vmax.xlane.f32.xlu1 %v15211_v20 }
 0x796   :  { %v11809_v8 = vpop.f32.mrb[62].mxu0  ;;  %2320 = vmax.xlane.f32.xlu0 %v15215_v55 }
 0x797   :  { %v15220_v11 = vadd.f32 %v11809_v8, %v14479_v47  ;;  %v2686_v15 = vpop.f32.mrb[63].mxu0 }
 0x798   :  { %v15223_v17 = vadd.f32 %v2686_v15, %v14479_v47 }
 0x799   :  { %2761 = vmax.xlane.f32.xlu1 %v15220_v11  ;;  %v11751_v22 = vpop.f32.mrb[40].mxu1 }
 0x79a   :  { %v15227_v31 = vadd.f32 %v11751_v22, %v14479_v47  ;;  %2759 = vmax.xlane.f32.xlu0 %v15223_v17  ;;  %v2257_v9 = vpop.f32.mrb[41].mxu1 }
 0x79b   :  { %v15231_v10 = vadd.f32 %v2257_v9, %v14479_v47 }
 0x79d   :  { %2326 = vmax.xlane.f32.xlu1 %v15227_v31 }
 0x79e   :  { %v11812_v29 = vpop.f32.mrb[64].mxu0  ;;  %2324 = vmax.xlane.f32.xlu0 %v15231_v10 }
 0x79f   :  { %v15236_v62 = vadd.f32 %v11812_v29, %v14479_v47  ;;  %v2696_v12 = vpop.f32.mrb[65].mxu0 }
 0x7a0   :  { %v15239_v0 = vadd.f32 %v2696_v12, %v14479_v47 }
 0x7a1   :  { %2765 = vmax.xlane.f32.xlu1 %v15236_v62  ;;  %v11754_v4 = vpop.f32.mrb[42].mxu1 }
 0x7a2   :  { %v15243_v37 = vadd.f32 %v11754_v4, %v14479_v47  ;;  %2763 = vmax.xlane.f32.xlu0 %v15239_v0  ;;  %v2267_v18 = vpop.f32.mrb[43].mxu1 }
 0x7a3   :  { %v15247_v49 = vadd.f32 %v2267_v18, %v14479_v47 }
 0x7a5   :  { %2330 = vmax.xlane.f32.xlu1 %v15243_v37 }
 0x7a6   :  { %v11815_v63 = vpop.f32.mrb[66].mxu0  ;;  %2328 = vmax.xlane.f32.xlu0 %v15247_v49 }
 0x7a7   :  { %v15252_v23 = vadd.f32 %v11815_v63, %v14479_v47  ;;  %v2706_v52 = vpop.f32.mrb[67].mxu0 }
 0x7a8   :  { %v15255_v13 = vadd.f32 %v2706_v52, %v14479_v47 }
 0x7a9   :  { %2769 = vmax.xlane.f32.xlu1 %v15252_v23  ;;  %v11757_v42 = vpop.f32.mrb[44].mxu1 }
 0x7aa   :  { %v15259_v33 = vadd.f32 %v11757_v42, %v14479_v47  ;;  %2767 = vmax.xlane.f32.xlu0 %v15255_v13  ;;  %v2277_v61 = vpop.f32.mrb[45].mxu1 }
 0x7ab   :  { %v15263_v27 = vadd.f32 %v2277_v61, %v14479_v47 }
 0x7ad   :  { %2334 = vmax.xlane.f32.xlu1 %v15259_v33 }
 0x7ae   :  { %v11818_v38 = vpop.f32.mrb[68].mxu0  ;;  %2332 = vmax.xlane.f32.xlu0 %v15263_v27 }
 0x7af   :  { %v15268_v51 = vadd.f32 %v11818_v38, %v14479_v47  ;;  %v2716_v40 = vpop.f32.mrb[69].mxu0 }
 0x7b0   :  { %v15271_v45 = vadd.f32 %v2716_v40, %v14479_v47 }
 0x7b1   :  { %2773 = vmax.xlane.f32.xlu1 %v15268_v51  ;;  %v11760_v30 = vpop.f32.mrb[46].mxu1 }
 0x7b2   :  { %v15275_v57 = vadd.f32 %v11760_v30, %v14479_v47  ;;  %2771 = vmax.xlane.f32.xlu0 %v15271_v45  ;;  %v2287_v1 = vpop.f32.mrb[47].mxu1 }
 0x7b3   :  { %v15279_v50 = vadd.f32 %v2287_v1, %v14479_v47 }
 0x7b5   :  { %2338 = vmax.xlane.f32.xlu1 %v15275_v57 }
 0x7b6   :  { %v11821_v48 = vpop.f32.mrb[70].mxu0  ;;  %2336 = vmax.xlane.f32.xlu0 %v15279_v50 }
 0x7b7   :  { %v15284_v14 = vadd.f32 %v11821_v48, %v14479_v47  ;;  %v2726_v35 = vpop.f32.mrb[71].mxu0 }
 0x7b8   :  { %v15287_v21 = vadd.f32 %v2726_v35, %v14479_v47 }
 0x7b9   :  { %2777 = vmax.xlane.f32.xlu1 %v15284_v14  ;;  %v11763_v16 = vpop.f32.mrb[48].mxu1 }
 0x7ba   :  { %v15291_v25 = vadd.f32 %v11763_v16, %v14479_v47  ;;  %2775 = vmax.xlane.f32.xlu0 %v15287_v21  ;;  %v2297_v43 = vpop.f32.mrb[49].mxu1 }
 0x7bb   :  { %v15295_v2 = vadd.f32 %v2297_v43, %v14479_v47 }
 0x7bd   :  { %2342 = vmax.xlane.f32.xlu1 %v15291_v25 }
 0x7be   :  { %v11824_v28 = vpop.f32.mrb[72].mxu0  ;;  %2340 = vmax.xlane.f32.xlu0 %v15295_v2 }
 0x7bf   :  { %v15300_v53 = vadd.f32 %v11824_v28, %v14479_v47  ;;  %v2736_v56 = vpop.f32.mrb[73].mxu0 }
 0x7c0   :  { %v15303_v59 = vadd.f32 %v2736_v56, %v14479_v47 }
 0x7c1   :  { %2781 = vmax.xlane.f32.xlu1 %v15300_v53  ;;  %v11766_v8 = vpop.f32.mrb[50].mxu1 }
 0x7c2   :  { %v15307_v15 = vadd.f32 %v11766_v8, %v14479_v47  ;;  %2779 = vmax.xlane.f32.xlu0 %v15303_v59  ;;  %v2307_v22 = vpop.f32.mrb[51].mxu1 }
 0x7c3   :  { %v15311_v9 = vadd.f32 %v2307_v22, %v14479_v47 }
 0x7c5   :  { %2346 = vmax.xlane.f32.xlu1 %v15307_v15 }
 0x7c6   :  { %v11827_v29 = vpop.f32.mrb[74].mxu0  ;;  %2344 = vmax.xlane.f32.xlu0 %v15311_v9 }
 0x7c7   :  { %v15316_v12 = vadd.f32 %v11827_v29, %v14479_v47  ;;  %v2746_v4 = vpop.f32.mrb[75].mxu0 }
 0x7c8   :  { %v15319_v18 = vadd.f32 %v2746_v4, %v14479_v47 }
 0x7c9   :  { %2785 = vmax.xlane.f32.xlu1 %v15316_v12 }
 0x7ca   :  { %2783 = vmax.xlane.f32.xlu0 %v15319_v18 }
 0x819   :  { %v2319_v63 = vpop.xlane.xlu1 %2318 }
 0x81a   :  { %v2349_v52 = vsub.f32 %v15196_v32, %v2319_v63  ;;  %v2317_v42 = vpop.xlane.xlu0 %2316 }
 0x81b   :  { %v2348_v61 = vsub.f32 %v15199_v26, %v2317_v42 }
 0x81c   :  { %v2366_v38 = vmul.f32 1.442695, %v2349_v52 }
 0x81d   :  { %v2364_v40 = vmul.f32 1.442695, %v2348_v61 }
 0x81e   :  { %13208 = vpow2.f32 %v2366_v38  ;;  %v2758_v30 = vpop.xlane.xlu1 %2757 }
 0x81f   :  { %13210 = vpow2.f32 %v2364_v40  ;;  %v2788_v1 = vsub.f32 %v15204_v54, %v2758_v30  ;;  %v2756_v48 = vpop.xlane.xlu0 %2755 }
 0x820   :  { %v2787_v35 = vsub.f32 %v15207_v34, %v2756_v48 }
 0x821   :  { %v2805_v16 = vmul.f32 1.442695, %v2788_v1 }
 0x822   :  { %v2803_v43 = vmul.f32 1.442695, %v2787_v35  ;;  %v2323_v28 = vpop.xlane.xlu1 %2322 }
 0x823   :  { %13212 = vpow2.f32 %v2805_v16  ;;  %v2351_v56 = vsub.f32 %v15211_v20, %v2323_v28  ;;  %v2321_v32 = vpop.xlane.xlu0 %2320 }
 0x824   :  { %13214 = vpow2.f32 %v2803_v43  ;;  %v2350_v26 = vsub.f32 %v15215_v55, %v2321_v32 }
 0x825   :  { %v2370_v8 = vmul.f32 1.442695, %v2351_v56 }
 0x826   :  { %v2368_v22 = vmul.f32 1.442695, %v2350_v26  ;;  %v2762_v29 = vpop.xlane.xlu1 %2761 }
 0x827   :  { %13216 = vpow2.f32 %v2370_v8  ;;  %v2790_v4 = vsub.f32 %v15220_v11, %v2762_v29  ;;  %v2760_v54 = vpop.xlane.xlu0 %2759 }
 0x828   :  { %v15330_v63 = vpop.eup %13208  ;;  %13218 = vpow2.f32 %v2368_v22  ;;  %v2789_v34 = vsub.f32 %v15223_v17, %v2760_v54 }
 0x829   :  { %v15333_v52 = vpop.eup %13210  ;;  %v2809_v42 = vmul.f32 1.442695, %v2790_v4  ;;  %2398 = vadd.xlane.f32.xlu1 %v15330_v63 }
 0x82a   :  { %v2807_v20 = vmul.f32 1.442695, %v2789_v34  ;;  %v2327_v61 = vpop.xlane.xlu1 %2326  ;;  %2396 = vadd.xlane.f32.xlu0 %v15333_v52 }
 0x82b   :  { %13220 = vpow2.f32 %v2809_v42  ;;  %v2353_v55 = vsub.f32 %v15227_v31, %v2327_v61  ;;  %v2325_v38 = vpop.xlane.xlu0 %2324 }
 0x82c   :  { %13222 = vpow2.f32 %v2807_v20  ;;  %v2352_v11 = vsub.f32 %v15231_v10, %v2325_v38 }
 0x82d   :  { %v15339_v40 = vpop.eup %13212  ;;  %v2374_v30 = vmul.f32 1.442695, %v2353_v55 }
 0x82e   :  { %v15341_v17 = vpop.eup %13214  ;;  %v2372_v1 = vmul.f32 1.442695, %v2352_v11  ;;  %v2766_v48 = vpop.xlane.xlu1 %2765  ;;  %2837 = vadd.xlane.f32.xlu1 %v15339_v40 }
 0x82f   :  { %13224 = vpow2.f32 %v2374_v30  ;;  %v2792_v35 = vsub.f32 %v15236_v62, %v2766_v48  ;;  %2835 = vadd.xlane.f32.xlu0 %v15341_v17  ;;  %v2764_v16 = vpop.xlane.xlu0 %2763 }
 0x830   :  { %13226 = vpow2.f32 %v2372_v1  ;;  %v2791_v31 = vsub.f32 %v15239_v0, %v2764_v16 }
 0x831   :  { %v15347_v43 = vpop.eup %13216  ;;  %v2813_v10 = vmul.f32 1.442695, %v2792_v35 }
 0x832   :  { %v15349_v28 = vpop.eup %13218  ;;  %v2811_v56 = vmul.f32 1.442695, %v2791_v31  ;;  %v2331_v32 = vpop.xlane.xlu1 %2330  ;;  %2402 = vadd.xlane.f32.xlu1 %v15347_v43 }
 0x833   :  { %13228 = vpow2.f32 %v2813_v10  ;;  %v2355_v26 = vsub.f32 %v15243_v37, %v2331_v32  ;;  %2400 = vadd.xlane.f32.xlu0 %v15349_v28  ;;  %v2329_v62 = vpop.xlane.xlu0 %2328 }
 0x834   :  { %13230 = vpow2.f32 %v2811_v56  ;;  %v2354_v8 = vsub.f32 %v15247_v49, %v2329_v62 }
 0x835   :  { %v15355_v22 = vpop.eup %13220  ;;  %v2378_v0 = vmul.f32 1.442695, %v2355_v26 }
 0x836   :  { %v15357_v29 = vpop.eup %13222  ;;  %v2376_v4 = vmul.f32 1.442695, %v2354_v8  ;;  %v2770_v54 = vpop.xlane.xlu1 %2769  ;;  %2841 = vadd.xlane.f32.xlu1 %v15355_v22 }
 0x837   :  { %13232 = vpow2.f32 %v2378_v0  ;;  %v2794_v34 = vsub.f32 %v15252_v23, %v2770_v54  ;;  %2839 = vadd.xlane.f32.xlu0 %v15357_v29  ;;  %v2768_v37 = vpop.xlane.xlu0 %2767 }
 0x838   :  { %13234 = vpow2.f32 %v2376_v4  ;;  %v2793_v42 = vsub.f32 %v15255_v13, %v2768_v37 }
 0x839   :  { %v15363_v20 = vpop.eup %13224  ;;  %v2817_v49 = vmul.f32 1.442695, %v2794_v34 }
 0x83a   :  { %v15365_v61 = vpop.eup %13226  ;;  %v2815_v55 = vmul.f32 1.442695, %v2793_v42  ;;  %v2335_v38 = vpop.xlane.xlu1 %2334  ;;  %2406 = vadd.xlane.f32.xlu1 %v15363_v20 }
 0x83b   :  { %13236 = vpow2.f32 %v2817_v49  ;;  %v2357_v11 = vsub.f32 %v15259_v33, %v2335_v38  ;;  %2404 = vadd.xlane.f32.xlu0 %v15365_v61  ;;  %v2333_v23 = vpop.xlane.xlu0 %2332 }
 0x83c   :  { %13238 = vpow2.f32 %v2815_v55  ;;  %v2356_v30 = vsub.f32 %v15263_v27, %v2333_v23 }
 0x83d   :  { %v15371_v1 = vpop.eup %13228  ;;  %v2382_v13 = vmul.f32 1.442695, %v2357_v11 }
 0x83e   :  { %v15373_v48 = vpop.eup %13230  ;;  %v2380_v35 = vmul.f32 1.442695, %v2356_v30  ;;  %v2774_v16 = vpop.xlane.xlu1 %2773  ;;  %2845 = vadd.xlane.f32.xlu1 %v15371_v1 }
 0x83f   :  { %13240 = vpow2.f32 %v2382_v13  ;;  %v2796_v31 = vsub.f32 %v15268_v51, %v2774_v16  ;;  %2843 = vadd.xlane.f32.xlu0 %v15373_v48  ;;  %v2772_v33 = vpop.xlane.xlu0 %2771 }
 0x840   :  { %13242 = vpow2.f32 %v2380_v35  ;;  %v2795_v10 = vsub.f32 %v15271_v45, %v2772_v33 }
 0x841   :  { %v15379_v56 = vpop.eup %13232  ;;  %v2821_v27 = vmul.f32 1.442695, %v2796_v31 }
 0x842   :  { %v15381_v32 = vpop.eup %13234  ;;  %v2819_v26 = vmul.f32 1.442695, %v2795_v10  ;;  %v2339_v62 = vpop.xlane.xlu1 %2338  ;;  %2410 = vadd.xlane.f32.xlu1 %v15379_v56 }
 0x843   :  { %13244 = vpow2.f32 %v2821_v27  ;;  %v2359_v8 = vsub.f32 %v15275_v57, %v2339_v62  ;;  %2408 = vadd.xlane.f32.xlu0 %v15381_v32  ;;  %v2337_v51 = vpop.xlane.xlu0 %2336 }
 0x844   :  { %13246 = vpow2.f32 %v2819_v26  ;;  %v2358_v0 = vsub.f32 %v15279_v50, %v2337_v51 }
 0x845   :  { %v15387_v4 = vpop.eup %13236  ;;  %v2386_v45 = vmul.f32 1.442695, %v2359_v8 }
 0x846   :  { %v15389_v54 = vpop.eup %13238  ;;  %v2384_v34 = vmul.f32 1.442695, %v2358_v0  ;;  %v2778_v37 = vpop.xlane.xlu1 %2777  ;;  %2849 = vadd.xlane.f32.xlu1 %v15387_v4 }
 0x847   :  { %13248 = vpow2.f32 %v2386_v45  ;;  %v2798_v42 = vsub.f32 %v15284_v14, %v2778_v37  ;;  %2847 = vadd.xlane.f32.xlu0 %v15389_v54  ;;  %v2776_v57 = vpop.xlane.xlu0 %2775 }
 0x848   :  { %13250 = vpow2.f32 %v2384_v34  ;;  %v2797_v49 = vsub.f32 %v15287_v21, %v2776_v57 }
 0x849   :  { %v15395_v55 = vpop.eup %13240  ;;  %v2825_v50 = vmul.f32 1.442695, %v2798_v42 }
 0x84a   :  { %v15397_v38 = vpop.eup %13242  ;;  %v2823_v11 = vmul.f32 1.442695, %v2797_v49  ;;  %v2343_v23 = vpop.xlane.xlu1 %2342  ;;  %2414 = vadd.xlane.f32.xlu1 %v15395_v55 }
 0x84b   :  { %13252 = vpow2.f32 %v2825_v50  ;;  %v2361_v30 = vsub.f32 %v15291_v25, %v2343_v23  ;;  %2412 = vadd.xlane.f32.xlu0 %v15397_v38  ;;  %v2341_v14 = vpop.xlane.xlu0 %2340 }
 0x84c   :  { %13254 = vpow2.f32 %v2823_v11  ;;  %v2360_v13 = vsub.f32 %v15295_v2, %v2341_v14 }
 0x84d   :  { %v15403_v35 = vpop.eup %13244  ;;  %v2390_v21 = vmul.f32 1.442695, %v2361_v30 }
 0x84e   :  { %v15405_v16 = vpop.eup %13246  ;;  %v2388_v31 = vmul.f32 1.442695, %v2360_v13  ;;  %v2782_v33 = vpop.xlane.xlu1 %2781  ;;  %2853 = vadd.xlane.f32.xlu1 %v15403_v35 }
 0x84f   :  { %13256 = vpow2.f32 %v2390_v21  ;;  %v2800_v10 = vsub.f32 %v15300_v53, %v2782_v33  ;;  %2851 = vadd.xlane.f32.xlu0 %v15405_v16  ;;  %v2780_v25 = vpop.xlane.xlu0 %2779 }
 0x850   :  { %13258 = vpow2.f32 %v2388_v31  ;;  %v2799_v27 = vsub.f32 %v15303_v59, %v2780_v25 }
 0x851   :  { %v15411_v26 = vpop.eup %13248  ;;  %v2829_v2 = vmul.f32 1.442695, %v2800_v10 }
 0x852   :  { %v15413_v62 = vpop.eup %13250  ;;  %v2827_v8 = vmul.f32 1.442695, %v2799_v27  ;;  %2418 = vadd.xlane.f32.xlu1 %v15411_v26  ;;  %v2347_v51 = vpop.xlane.xlu1 %2346 }
 0x853   :  { %13260 = vpow2.f32 %v2829_v2  ;;  %v2363_v0 = vsub.f32 %v15307_v15, %v2347_v51  ;;  %2416 = vadd.xlane.f32.xlu0 %v15413_v62  ;;  %v2345_v53 = vpop.xlane.xlu0 %2344 }
 0x854   :  { %13262 = vpow2.f32 %v2827_v8  ;;  %v2362_v45 = vsub.f32 %v15311_v9, %v2345_v53 }
 0x855   :  { %v15419_v34 = vpop.eup %13252  ;;  %v2394_v59 = vmul.f32 1.442695, %v2363_v0 }
 0x856   :  { %v15421_v37 = vpop.eup %13254  ;;  %v2392_v42 = vmul.f32 1.442695, %v2362_v45  ;;  %2857 = vadd.xlane.f32.xlu1 %v15419_v34  ;;  %v2786_v57 = vpop.xlane.xlu1 %2785 }
 0x857   :  { %13264 = vpow2.f32 %v2394_v59  ;;  %v2802_v49 = vsub.f32 %v15316_v12, %v2786_v57  ;;  %2855 = vadd.xlane.f32.xlu0 %v15421_v37  ;;  %v2784_v15 = vpop.xlane.xlu0 %2783 }
 0x858   :  { %13266 = vpow2.f32 %v2392_v42  ;;  %v2801_v50 = vsub.f32 %v15319_v18, %v2784_v15 }
 0x859   :  { %v15427_v11 = vpop.eup %13256  ;;  %v2833_v9 = vmul.f32 1.442695, %v2802_v49 }
 0x85a   :  { %v15429_v23 = vpop.eup %13258  ;;  %v2831_v30 = vmul.f32 1.442695, %v2801_v50  ;;  %2422 = vadd.xlane.f32.xlu1 %v15427_v11 }
 0x85b   :  { %13268 = vpow2.f32 %v2833_v9  ;;  %2420 = vadd.xlane.f32.xlu0 %v15429_v23 }
 0x85c   :  { %13270 = vpow2.f32 %v2831_v30 }
 0x85d   :  { %v15433_v14 = vpop.eup %13260 }
 0x85e   :  { %v15435_v12 = vpop.eup %13262  ;;  %2861 = vadd.xlane.f32.xlu1 %v15433_v14 }
 0x85f   :  { %2859 = vadd.xlane.f32.xlu0 %v15435_v12 }
 0x861   :  { %v15439_v18 = vpop.eup %13264 }
 0x862   :  { %v15441_v13 = vpop.eup %13266  ;;  %2426 = vadd.xlane.f32.xlu1 %v15439_v18 }
 0x863   :  { %2424 = vadd.xlane.f32.xlu0 %v15441_v13 }
 0x865   :  { %v15445_v21 = vpop.eup %13268 }
 0x866   :  { %v15447_v31 = vpop.eup %13270  ;;  %2865 = vadd.xlane.f32.xlu1 %v15445_v21 }
 0x867   :  { %2863 = vadd.xlane.f32.xlu0 %v15447_v31 }
 0x894   :  { %2969 = vxpose.xlu0.b32.start.end [1/1] (short) %v14413_v58, 128 }
 0x899   :  { %3408 = vxpose.xlu1.b32.start.end [1/1] (short) %v14417_v60, 128 }
 0x8b6   :  { %v2399_v33 = vpop.xlane.xlu1 %2398 }
 0x8b7   :  { %13272 = vrcp.f32 %v2399_v33  ;;  %v2397_v10 = vpop.xlane.xlu0 %2396 }
 0x8b8   :  { %13274 = vrcp.f32 %v2397_v10 }
 0x8bb   :  { %v2838_v25 = vpop.xlane.xlu1 %2837 }
 0x8bc   :  { %13276 = vrcp.f32 %v2838_v25  ;;  %v2836_v27 = vpop.xlane.xlu0 %2835 }
 0x8bd   :  { %13278 = vrcp.f32 %v2836_v27 }
 0x8bf   :  { %v2403_v2 = vpop.xlane.xlu1 %2402 }
 0x8c0   :  { %13280 = vrcp.f32 %v2403_v2  ;;  %v2401_v8 = vpop.xlane.xlu0 %2400 }
 0x8c1   :  { %v13273_v51 = vpop.eup %13272  ;;  %13282 = vrcp.f32 %v2401_v8 }
 0x8c2   :  { %v13275_v0 = vpop.eup %13274  ;;  %v2445_v53 = vmul.f32 %v13273_v51, %v15330_v63 }
 0x8c3   :  { %v2842_v45 = vpop.xlane.xlu1 %2841  ;;  %v2444_v58 = vmul.f32 %v13275_v0, %v15333_v52 }
 0x8c4   :  { %13284 = vrcp.f32 %v2842_v45  ;;  %v2840_v60 = vpop.xlane.xlu0 %2839 }
 0x8c5   :  { %13286 = vrcp.f32 %v2840_v60  ;;  %v12570_v59 = vpack.c.bf16 %v2445_v53, %v2444_v58 }
 0x8c6   :  { %v13277_v42 = vpop.eup %13276 }
 0x8c7   :  { %v13279_v57 = vpop.eup %13278  ;;  %v2407_v49 = vpop.xlane.xlu1 %2406  ;;  %12571 = vmatpush3.bf16.xpose.msra.mxu1 %v12570_v59  ;;  %v2884_v15 = vmul.f32 %v13277_v42, %v15339_v40 }
 0x8c8   :  { %13288 = vrcp.f32 %v2407_v49  ;;  %v2405_v50 = vpop.xlane.xlu0 %2404  ;;  %v2883_v9 = vmul.f32 %v13279_v57, %v15341_v17  ;;  %12572 = vmatprep.subr.bf16.mxu1 %v19699_v41 }
 0x8c9   :  { %13290 = vrcp.f32 %v2405_v50 }
 0x8ca   :  { %v13281_v63 = vpop.eup %13280  ;;  %v12594_v30 = vpack.c.bf16 %v2884_v15, %v2883_v9 }
 0x8cb   :  { %v13283_v52 = vpop.eup %13282  ;;  %v2846_v33 = vpop.xlane.xlu1 %2845  ;;  %v2447_v10 = vmul.f32 %v13281_v63, %v15347_v43 }
 0x8cc   :  { %13292 = vrcp.f32 %v2846_v33  ;;  %12595 = vmatpush3.bf16.xpose.msra.mxu0 %v12594_v30  ;;  %v2844_v25 = vpop.xlane.xlu0 %2843  ;;  %v2446_v27 = vmul.f32 %v13283_v52, %v15349_v28 }
 0x8cd   :  { %13294 = vrcp.f32 %v2844_v25  ;;  %12596 = vmatprep.subr.bf16.mxu0 %v19699_v41 }
 0x8ce   :  { %v13285_v40 = vpop.eup %13284  ;;  %v12573_v2 = vpack.c.bf16 %v2447_v10, %v2446_v27 }
 0x8cf   :  { %v13287_v17 = vpop.eup %13286  ;;  %v2411_v8 = vpop.xlane.xlu1 %2410  ;;  %v2886_v51 = vmul.f32 %v13285_v40, %v15355_v22 }
 0x8d0   :  { %13296 = vrcp.f32 %v2411_v8  ;;  %12574 = vmatpush3.bf16.xpose.msra.mxu1 %v12573_v2  ;;  %v2409_v0 = vpop.xlane.xlu0 %2408  ;;  %v2885_v53 = vmul.f32 %v13287_v17, %v15357_v29 }
 0x8d1   :  { %13298 = vrcp.f32 %v2409_v0  ;;  %12575 = vmatprep.subr.bf16.mxu1 %v19699_v41 }
 0x8d2   :  { %v13289_v43 = vpop.eup %13288  ;;  %v12597_v45 = vpack.c.bf16 %v2886_v51, %v2885_v53 }
 0x8d3   :  { %v13291_v28 = vpop.eup %13290  ;;  %v2850_v58 = vpop.xlane.xlu1 %2849  ;;  %v2449_v60 = vmul.f32 %v13289_v43, %v15363_v20 }
 0x8d4   :  { %13300 = vrcp.f32 %v2850_v58  ;;  %12598 = vmatpush3.bf16.xpose.msra.mxu0 %v12597_v45  ;;  %v2848_v59 = vpop.xlane.xlu0 %2847  ;;  %v2448_v42 = vmul.f32 %v13291_v28, %v15365_v61 }
 0x8d5   :  { %13302 = vrcp.f32 %v2848_v59  ;;  %12599 = vmatprep.subr.bf16.mxu0 %v19699_v41 }
 0x8d6   :  { %v13293_v22 = vpop.eup %13292  ;;  %v12576_v57 = vpack.c.bf16 %v2449_v60, %v2448_v42 }
 0x8d7   :  { %v13295_v29 = vpop.eup %13294  ;;  %v2415_v49 = vpop.xlane.xlu1 %2414  ;;  %v2888_v15 = vmul.f32 %v13293_v22, %v15371_v1 }
 0x8d8   :  { %13304 = vrcp.f32 %v2415_v49  ;;  %12577 = vmatpush3.bf16.xpose.msra.mxu1 %v12576_v57  ;;  %v2413_v50 = vpop.xlane.xlu0 %2412  ;;  %v2887_v9 = vmul.f32 %v13295_v29, %v15373_v48 }
 0x8d9   :  { %13306 = vrcp.f32 %v2413_v50  ;;  %12578 = vmatprep.subr.bf16.mxu1 %v19699_v41 }
 0x8da   :  { %v13297_v20 = vpop.eup %13296  ;;  %v12600_v63 = vpack.c.bf16 %v2888_v15, %v2887_v9 }
 0x8db   :  { %v13299_v61 = vpop.eup %13298  ;;  %v2854_v30 = vpop.xlane.xlu1 %2853  ;;  %v2451_v52 = vmul.f32 %v13297_v20, %v15379_v56 }
 0x8dc   :  { %13308 = vrcp.f32 %v2854_v30  ;;  %12601 = vmatpush3.bf16.xpose.msra.mxu0 %v12600_v63  ;;  %v2852_v33 = vpop.xlane.xlu0 %2851  ;;  %v2450_v10 = vmul.f32 %v13299_v61, %v15381_v32 }
 0x8dd   :  { %13310 = vrcp.f32 %v2852_v33  ;;  %12602 = vmatprep.subr.bf16.mxu0 %v19699_v41 }
 0x8de   :  { %v13301_v1 = vpop.eup %13300  ;;  %v12579_v25 = vpack.c.bf16 %v2451_v52, %v2450_v10 }
 0x8df   :  { %v13303_v48 = vpop.eup %13302  ;;  %v2419_v27 = vpop.xlane.xlu1 %2418  ;;  %v2890_v40 = vmul.f32 %v13301_v1, %v15387_v4 }
 0x8e0   :  { %13312 = vrcp.f32 %v2419_v27  ;;  %12580 = vmatpush3.bf16.xpose.msra.mxu1 %v12579_v25  ;;  %v2417_v2 = vpop.xlane.xlu0 %2416  ;;  %v2889_v17 = vmul.f32 %v13303_v48, %v15389_v54 }
 0x8e1   :  { %13314 = vrcp.f32 %v2417_v2  ;;  %12581 = vmatprep.subr.bf16.mxu1 %v19699_v41 }
 0x8e2   :  { %v13305_v56 = vpop.eup %13304  ;;  %v12603_v8 = vpack.c.bf16 %v2890_v40, %v2889_v17 }
 0x8e3   :  { %v13307_v32 = vpop.eup %13306  ;;  %v2858_v51 = vpop.xlane.xlu1 %2857  ;;  %v2453_v0 = vmul.f32 %v13305_v56, %v15395_v55 }
 0x8e4   :  { %13316 = vrcp.f32 %v2858_v51  ;;  %12604 = vmatpush3.bf16.xpose.msra.mxu0 %v12603_v8  ;;  %v2856_v53 = vpop.xlane.xlu0 %2855  ;;  %v2452_v43 = vmul.f32 %v13307_v32, %v15397_v38 }
 0x8e5   :  { %13318 = vrcp.f32 %v2856_v53  ;;  %12605 = vmatprep.subr.bf16.mxu0 %v19699_v41 }
 0x8e6   :  { %v13309_v4 = vpop.eup %13308  ;;  %v12582_v45 = vpack.c.bf16 %v2453_v0, %v2452_v43 }
 0x8e7   :  { %v13311_v54 = vpop.eup %13310  ;;  %v2423_v28 = vpop.xlane.xlu1 %2422  ;;  %v2892_v58 = vmul.f32 %v13309_v4, %v15403_v35 }
 0x8e8   :  { %13320 = vrcp.f32 %v2423_v28  ;;  %12583 = vmatpush3.bf16.xpose.msra.mxu1 %v12582_v45  ;;  %v2421_v60 = vpop.xlane.xlu0 %2420  ;;  %v2891_v59 = vmul.f32 %v13311_v54, %v15405_v16 }
 0x8e9   :  { %13322 = vrcp.f32 %v2421_v60  ;;  %12584 = vmatprep.subr.bf16.mxu1 %v19699_v41 }
 0x8ea   :  { %v13313_v55 = vpop.eup %13312  ;;  %v12606_v42 = vpack.c.bf16 %v2892_v58, %v2891_v59 }
 0x8eb   :  { %v13315_v38 = vpop.eup %13314  ;;  %v2862_v22 = vpop.xlane.xlu1 %2861  ;;  %v2455_v57 = vmul.f32 %v13313_v55, %v15411_v26 }
 0x8ec   :  { %13324 = vrcp.f32 %v2862_v22  ;;  %12607 = vmatpush3.bf16.xpose.msra.mxu0 %v12606_v42  ;;  %v2860_v29 = vpop.xlane.xlu0 %2859  ;;  %v2454_v49 = vmul.f32 %v13315_v38, %v15413_v62 }
 0x8ed   :  { %13326 = vrcp.f32 %v2860_v29  ;;  %12608 = vmatprep.subr.bf16.mxu0 %v19699_v41 }
 0x8ee   :  { %v13317_v35 = vpop.eup %13316  ;;  %v12585_v15 = vpack.c.bf16 %v2455_v57, %v2454_v49 }
 0x8ef   :  { %v13319_v16 = vpop.eup %13318  ;;  %v2427_v50 = vpop.xlane.xlu1 %2426  ;;  %v2894_v9 = vmul.f32 %v13317_v35, %v15419_v34 }
 0x8f0   :  { %13328 = vrcp.f32 %v2427_v50  ;;  %12586 = vmatpush3.bf16.xpose.msra.mxu1 %v12585_v15  ;;  %v2425_v20 = vpop.xlane.xlu0 %2424  ;;  %v2893_v63 = vmul.f32 %v13319_v16, %v15421_v37 }
 0x8f1   :  { %13330 = vrcp.f32 %v2425_v20  ;;  %12587 = vmatprep.subr.bf16.mxu1 %v19699_v41 }
 0x8f2   :  { %v13321_v26 = vpop.eup %13320  ;;  %v12609_v61 = vpack.c.bf16 %v2894_v9, %v2893_v63 }
 0x8f3   :  { %v13323_v62 = vpop.eup %13322  ;;  %v2866_v30 = vpop.xlane.xlu1 %2865  ;;  %v2457_v52 = vmul.f32 %v13321_v26, %v15427_v11 }
 0x8f4   :  { %13332 = vrcp.f32 %v2866_v30  ;;  %12610 = vmatpush3.bf16.xpose.msra.mxu0 %v12609_v61  ;;  %v2864_v33 = vpop.xlane.xlu0 %2863  ;;  %v2456_v10 = vmul.f32 %v13323_v62, %v15429_v23 }
 0x8f5   :  { %13334 = vrcp.f32 %v2864_v33  ;;  %12611 = vmatprep.subr.bf16.mxu0 %v19699_v41 }
 0x8f6   :  { %v13325_v34 = vpop.eup %13324  ;;  %v12588_v1 = vpack.c.bf16 %v2457_v52, %v2456_v10 }
 0x8f7   :  { %v13327_v37 = vpop.eup %13326  ;;  %v2896_v25 = vmul.f32 %v13325_v34, %v15433_v14 }
 0x8f8   :  { %12589 = vmatpush3.bf16.xpose.msra.mxu1 %v12588_v1  ;;  %v2895_v48 = vmul.f32 %v13327_v37, %v15435_v12 }
 0x8f9   :  { %12590 = vmatprep.subr.bf16.mxu1 %v19699_v41 }
 0x8fa   :  { %v13329_v27 = vpop.eup %13328  ;;  %v12612_v11 = vpack.c.bf16 %v2896_v25, %v2895_v48 }
 0x8fb   :  { %v13331_v40 = vpop.eup %13330  ;;  %v2459_v2 = vmul.f32 %v13329_v27, %v15439_v18  ;;  %v19745_v18 = vld [vmem:[#allocation2_spill] sm:$0xff] }
 0x8fc   :  { %12613 = vmatpush3.bf16.xpose.msra.mxu0 %v12612_v11  ;;  %v2458_v23 = vmul.f32 %v13331_v40, %v15441_v13 }
 0x8fd   :  { %12614 = vmatprep.subr.bf16.mxu0 %v19699_v41 }
 0x8fe   :  { %v13333_v17 = vpop.eup %13332  ;;  %v12591_v56 = vpack.c.bf16 %v2459_v2, %v2458_v23 }
 0x8ff   :  { %v13335_v8 = vpop.eup %13334  ;;  %v2898_v14 = vmul.f32 %v13333_v17, %v15445_v21 }
 0x900   :  { %12592 = vmatpush3.bf16.xpose.msra.mxu1 %v12591_v56  ;;  %v2897_v12 = vmul.f32 %v13335_v8, %v15447_v31 }
 0x901   :  { %11863 = vmatprep.subr.mxu1 %v14425_v3 }
 0x902   :  { %v12615_v32 = vpack.c.bf16 %v2898_v14, %v2897_v12 }
 0x904   :  { %12616 = vmatpush3.bf16.xpose.msra.mxu0 %v12615_v32 }
 0x905   :  { %11924 = vmatprep.subr.mxu0 %v14429_v5 }
 0x907   :  { %11800 = vmatmul.mubr.f32.vlgmr.msra.gmra.mrb[52].mxu1 %v14433_v7 }
 0x908   :  { %11864 = vmatpush3.msra.mxu1 %v14425_v3 }
 0x909   :  { %12617 = vmatprep.subr.bf16.mxu1 %v19699_v41 }
 0x90b   :  { %11861 = vmatmul.mubr.f32.vlgmr.msra.gmra.mrb[76].mxu0 %v19745_v18 }
 0x90c   :  { %11925 = vmatpush3.msra.mxu0 %v14429_v5 }
 0x90d   :  { %12641 = vmatprep.subr.bf16.mxu0 %v19699_v41 }
 0x914   :  { %v2985_v13 = vpop.trf.xlu0 }
 0x915   :  { %11865 = vmatprep.mubr.msk.f32.mxu1 %vm366_vm1, %v2985_v13 }
 0x918   :  { %v2986_v21 = vpop.trf.xlu0 }
 0x919   :  { %v3424_v31 = vpop.trf.xlu1  ;;  %11866 = vmatmul.mubr.msk.f32.vlgmr.msra.gmra.mrb[54].mxu1 %vm366_vm1, %v2986_v21 }
 0x91a   :  { %11926 = vmatprep.mubr.msk.f32.mxu0 %vm366_vm1, %v3424_v31 }
 0x91c   :  { %v2987_v7 = vpop.trf.xlu0 }
 0x91d   :  { %v3425_v51 = vpop.trf.xlu1  ;;  %11868 = vmatprep.mubr.msk.f32.mxu1 %vm366_vm1, %v2987_v7 }
 0x91e   :  { %11927 = vmatmul.mubr.msk.f32.vlgmr.msra.gmra.mrb[78].mxu0 %vm366_vm1, %v3425_v51 }
 0x920   :  { %v2988_v3 = vpop.trf.xlu0 }
 0x921   :  { %v3426_v0 = vpop.trf.xlu1  ;;  %11869 = vmatmul.mubr.msk.f32.gmra.mrb[56].mxu1 %vm366_vm1, %v2988_v3 }
 0x922   :  { %11929 = vmatprep.mubr.msk.f32.mxu0 %vm366_vm1, %v3426_v0 }
 0x924   :  { %v2989_v5 = vpop.trf.xlu0 }
 0x925   :  { %v3427_v53 = vpop.trf.xlu1  ;;  %11871 = vmatprep.mubr.msk.f32.mxu1 %vm366_vm1, %v2989_v5 }
 0x926   :  { %11930 = vmatmul.mubr.msk.f32.gmra.mrb[80].mxu0 %vm366_vm1, %v3427_v53 }
 0x928   :  { %v2990_v43 = vpop.trf.xlu0 }
 0x929   :  { %v3428_v4 = vpop.trf.xlu1  ;;  %11872 = vmatmul.mubr.msk.f32.gmra.mrb[58].mxu1 %vm366_vm1, %v2990_v43 }
 0x92a   :  { %11932 = vmatprep.mubr.msk.f32.mxu0 %vm366_vm1, %v3428_v4 }
 0x92c   :  { %v2991_v45 = vpop.trf.xlu0 }
 0x92d   :  { %v3429_v54 = vpop.trf.xlu1  ;;  %11874 = vmatprep.mubr.msk.f32.mxu1 %vm366_vm1, %v2991_v45 }
 0x92e   :  { %11933 = vmatmul.mubr.msk.f32.gmra.mrb[82].mxu0 %vm366_vm1, %v3429_v54 }
 0x930   :  { %v2992_v28 = vpop.trf.xlu0 }
 0x931   :  { %v3430_v58 = vpop.trf.xlu1  ;;  %11875 = vmatmul.mubr.msk.f32.gmra.mrb[60].mxu1 %vm366_vm1, %v2992_v28 }
 0x932   :  { %11935 = vmatprep.mubr.msk.f32.mxu0 %vm366_vm1, %v3430_v58 }
 0x934   :  { %v2993_v60 = vpop.trf.xlu0 }
 0x935   :  { %v3431_v59 = vpop.trf.xlu1  ;;  %11877 = vmatprep.mubr.msk.f32.mxu1 %vm366_vm1, %v2993_v60 }
 0x936   :  { %11936 = vmatmul.mubr.msk.f32.gmra.mrb[84].mxu0 %vm366_vm1, %v3431_v59 }
 0x938   :  { %v2994_v55 = vpop.trf.xlu0 }
 0x939   :  { %v3432_v42 = vpop.trf.xlu1  ;;  %11878 = vmatmul.mubr.msk.f32.gmra.mrb[62].mxu1 %vm366_vm1, %v2994_v55 }
 0x93a   :  { %11938 = vmatprep.mubr.msk.f32.mxu0 %vm366_vm1, %v3432_v42 }
 0x93c   :  { %v2995_v38 = vpop.trf.xlu0 }
 0x93d   :  { %v3433_v22 = vpop.trf.xlu1  ;;  %11880 = vmatprep.mubr.msk.f32.mxu1 %vm366_vm1, %v2995_v38 }
 0x93e   :  { %11939 = vmatmul.mubr.msk.f32.gmra.mrb[86].mxu0 %vm366_vm1, %v3433_v22 }
 0x940   :  { %v2996_v57 = vpop.trf.xlu0 }
 0x941   :  { %v3434_v29 = vpop.trf.xlu1  ;;  %11881 = vmatmul.mubr.msk.f32.gmra.mrb[64].mxu1 %vm366_vm1, %v2996_v57 }
 0x942   :  { %11941 = vmatprep.mubr.msk.f32.mxu0 %vm366_vm1, %v3434_v29 }
 0x944   :  { %v2997_v49 = vpop.trf.xlu0 }
 0x945   :  { %v3435_v35 = vpop.trf.xlu1  ;;  %11883 = vmatprep.mubr.msk.f32.mxu1 %vm366_vm1, %v2997_v49 }
 0x946   :  { %11942 = vmatmul.mubr.msk.f32.gmra.mrb[88].mxu0 %vm366_vm1, %v3435_v35 }
 0x948   :  { %v2998_v15 = vpop.trf.xlu0 }
 0x949   :  { %v3436_v16 = vpop.trf.xlu1  ;;  %11884 = vmatmul.mubr.msk.f32.gmra.mrb[66].mxu1 %vm366_vm1, %v2998_v15 }
 0x94a   :  { %11944 = vmatprep.mubr.msk.f32.mxu0 %vm366_vm1, %v3436_v16 }
 0x94c   :  { %v2999_v50 = vpop.trf.xlu0 }
 0x94d   :  { %v3437_v9 = vpop.trf.xlu1  ;;  %11886 = vmatprep.mubr.msk.f32.mxu1 %vm366_vm1, %v2999_v50 }
 0x94e   :  { %11945 = vmatmul.mubr.msk.f32.gmra.mrb[90].mxu0 %vm366_vm1, %v3437_v9 }
 0x950   :  { %v3000_v20 = vpop.trf.xlu0 }
 0x951   :  { %v3438_v63 = vpop.trf.xlu1  ;;  %11887 = vmatmul.mubr.msk.f32.gmra.mrb[68].mxu1 %vm366_vm1, %v3000_v20 }
 0x952   :  { %11947 = vmatprep.mubr.msk.f32.mxu0 %vm366_vm1, %v3438_v63  ;;  %11921 = vmatprep.mubr.msk.f32.mxu1 %vm14284_vm3, %v19697_v46 }
 0x955   :  { %v3439_v26 = vpop.trf.xlu1 }
 0x956   :  { %11948 = vmatmul.mubr.msk.f32.gmra.mrb[92].mxu0 %vm366_vm1, %v3439_v26 }
 0x957   :  { %11982 = vmatprep.mubr.msk.f32.mxu0 %vm14284_vm3, %v19697_v46 }
 0x9da   :  { %v15543_v61 = vpop.f32.mrb[52].mxu1 }
 0x9db   :  { %v11801_v62 = vpop.f32.mrb[53].mxu1 }
 0x9de   :  { %v15545_v30 = vpop.f32.mrb[76].mxu0 }
 0x9df   :  { %v3852_v52 = vpack.c.bf16 %v15545_v30, %v15543_v61  ;;  %v11862_v33 = vpop.f32.mrb[77].mxu0  ;;  %v15864_v61 = vld [vmem:[%s19687_s6 + $0x8] sm:$0xff]  ;;  %v15882_v30 = vld [vmem:[%s19687_s6 + $0x18] sm:$0xff] }
 0x9ec   :  { %v11867_v10 = vpop.f32.mrb[54].mxu1 }
 0x9ed   :  { %v15550_v34 = vadd.f32 %v11867_v10, %v14479_v47  ;;  %v3115_v1 = vpop.f32.mrb[55].mxu1 }
 0x9ee   :  { %v15553_v37 = vadd.f32 %v3115_v1, %v14479_v47 }
 0x9ef   :  { %3196 = vmax.xlane.f32.xlu1 %v15550_v34 }
 0x9f0   :  { %3194 = vmax.xlane.f32.xlu0 %v15553_v37 }
 0x9f1   :  { %v11928_v25 = vpop.f32.mrb[78].mxu0 }
 0x9f2   :  { %v15558_v48 = vadd.f32 %v11928_v25, %v14479_v47  ;;  %v3554_v27 = vpop.f32.mrb[79].mxu0 }
 0x9f3   :  { %v15561_v11 = vadd.f32 %v3554_v27, %v14479_v47 }
 0x9f4   :  { %3635 = vmax.xlane.f32.xlu1 %v15558_v48  ;;  %v11870_v40 = vpop.f32.mrb[56].mxu1 }
 0x9f5   :  { %v15565_v2 = vadd.f32 %v11870_v40, %v14479_v47  ;;  %3633 = vmax.xlane.f32.xlu0 %v15561_v11  ;;  %v3125_v23 = vpop.f32.mrb[57].mxu1 }
 0x9f6   :  { %v15569_v17 = vadd.f32 %v3125_v23, %v14479_v47 }
 0x9f8   :  { %3200 = vmax.xlane.f32.xlu1 %v15565_v2 }
 0x9f9   :  { %v11931_v56 = vpop.f32.mrb[80].mxu0  ;;  %3198 = vmax.xlane.f32.xlu0 %v15569_v17 }
 0x9fa   :  { %v15574_v8 = vadd.f32 %v11931_v56, %v14479_v47  ;;  %v3564_v14 = vpop.f32.mrb[81].mxu0 }
 0x9fb   :  { %v15577_v12 = vadd.f32 %v3564_v14, %v14479_v47 }
 0x9fc   :  { %3639 = vmax.xlane.f32.xlu1 %v15574_v8  ;;  %v11873_v32 = vpop.f32.mrb[58].mxu1 }
 0x9fd   :  { %v15581_v18 = vadd.f32 %v11873_v32, %v14479_v47  ;;  %3637 = vmax.xlane.f32.xlu0 %v15577_v12  ;;  %v3135_v13 = vpop.f32.mrb[59].mxu1 }
 0x9fe   :  { %v15585_v21 = vadd.f32 %v3135_v13, %v14479_v47 }
 0xa00   :  { %3204 = vmax.xlane.f32.xlu1 %v15581_v18 }
 0xa01   :  { %v11934_v31 = vpop.f32.mrb[82].mxu0  ;;  %3202 = vmax.xlane.f32.xlu0 %v15585_v21 }
 0xa02   :  { %v15590_v7 = vadd.f32 %v11934_v31, %v14479_v47  ;;  %v3574_v51 = vpop.f32.mrb[83].mxu0 }
 0xa03   :  { %v15593_v3 = vadd.f32 %v3574_v51, %v14479_v47 }
 0xa04   :  { %3643 = vmax.xlane.f32.xlu1 %v15590_v7  ;;  %v11876_v0 = vpop.f32.mrb[60].mxu1 }
 0xa05   :  { %v15597_v5 = vadd.f32 %v11876_v0, %v14479_v47  ;;  %3641 = vmax.xlane.f32.xlu0 %v15593_v3  ;;  %v3145_v53 = vpop.f32.mrb[61].mxu1 }
 0xa06   :  { %v15601_v43 = vadd.f32 %v3145_v53, %v14479_v47 }
 0xa08   :  { %3208 = vmax.xlane.f32.xlu1 %v15597_v5 }
 0xa09   :  { %v11937_v4 = vpop.f32.mrb[84].mxu0  ;;  %3206 = vmax.xlane.f32.xlu0 %v15601_v43 }
 0xa0a   :  { %v15606_v45 = vadd.f32 %v11937_v4, %v14479_v47  ;;  %v3584_v54 = vpop.f32.mrb[85].mxu0 }
 0xa0b   :  { %v15609_v28 = vadd.f32 %v3584_v54, %v14479_v47 }
 0xa0c   :  { %3647 = vmax.xlane.f32.xlu1 %v15606_v45  ;;  %v11879_v58 = vpop.f32.mrb[62].mxu1 }
 0xa0d   :  { %v15613_v60 = vadd.f32 %v11879_v58, %v14479_v47  ;;  %3645 = vmax.xlane.f32.xlu0 %v15609_v28  ;;  %v3155_v59 = vpop.f32.mrb[63].mxu1 }
 0xa0e   :  { %v15617_v55 = vadd.f32 %v3155_v59, %v14479_v47 }
 0xa10   :  { %3212 = vmax.xlane.f32.xlu1 %v15613_v60 }
 0xa11   :  { %v11940_v42 = vpop.f32.mrb[86].mxu0  ;;  %3210 = vmax.xlane.f32.xlu0 %v15617_v55 }
 0xa12   :  { %v15622_v38 = vadd.f32 %v11940_v42, %v14479_v47  ;;  %v3594_v22 = vpop.f32.mrb[87].mxu0 }
 0xa13   :  { %v15625_v57 = vadd.f32 %v3594_v22, %v14479_v47 }
 0xa14   :  { %3651 = vmax.xlane.f32.xlu1 %v15622_v38  ;;  %v11882_v29 = vpop.f32.mrb[64].mxu1 }
 0xa15   :  { %v15629_v49 = vadd.f32 %v11882_v29, %v14479_v47  ;;  %3649 = vmax.xlane.f32.xlu0 %v15625_v57  ;;  %v3165_v35 = vpop.f32.mrb[65].mxu1 }
 0xa16   :  { %v15633_v15 = vadd.f32 %v3165_v35, %v14479_v47 }
 0xa18   :  { %3216 = vmax.xlane.f32.xlu1 %v15629_v49 }
 0xa19   :  { %v11943_v16 = vpop.f32.mrb[88].mxu0  ;;  %3214 = vmax.xlane.f32.xlu0 %v15633_v15 }
 0xa1a   :  { %v15638_v50 = vadd.f32 %v11943_v16, %v14479_v47  ;;  %v3604_v9 = vpop.f32.mrb[89].mxu0 }
 0xa1b   :  { %v15641_v20 = vadd.f32 %v3604_v9, %v14479_v47 }
 0xa1c   :  { %3655 = vmax.xlane.f32.xlu1 %v15638_v50  ;;  %v11885_v63 = vpop.f32.mrb[66].mxu1 }
 0xa1d   :  { %v15645_v26 = vadd.f32 %v11885_v63, %v14479_v47  ;;  %3653 = vmax.xlane.f32.xlu0 %v15641_v20  ;;  %v3175_v62 = vpop.f32.mrb[67].mxu1 }
 0xa1e   :  { %v15649_v33 = vadd.f32 %v3175_v62, %v14479_v47 }
 0xa20   :  { %3220 = vmax.xlane.f32.xlu1 %v15645_v26 }
 0xa21   :  { %v11946_v10 = vpop.f32.mrb[90].mxu0  ;;  %3218 = vmax.xlane.f32.xlu0 %v15649_v33 }
 0xa22   :  { %v15654_v1 = vadd.f32 %v11946_v10, %v14479_v47  ;;  %v3614_v25 = vpop.f32.mrb[91].mxu0 }
 0xa23   :  { %v15657_v27 = vadd.f32 %v3614_v25, %v14479_v47 }
 0xa24   :  { %3659 = vmax.xlane.f32.xlu1 %v15654_v1  ;;  %v11888_v40 = vpop.f32.mrb[68].mxu1 }
 0xa25   :  { %v15661_v23 = vadd.f32 %v11888_v40, %v14479_v47  ;;  %3657 = vmax.xlane.f32.xlu0 %v15657_v27  ;;  %v3185_v56 = vpop.f32.mrb[69].mxu1 }
 0xa26   :  { %v15665_v14 = vadd.f32 %v3185_v56, %v14479_v47 }
 0xa28   :  { %3224 = vmax.xlane.f32.xlu1 %v15661_v23 }
 0xa29   :  { %v11949_v32 = vpop.f32.mrb[92].mxu0  ;;  %3222 = vmax.xlane.f32.xlu0 %v15665_v14 }
 0xa2a   :  { %v15670_v13 = vadd.f32 %v11949_v32, %v14479_v47  ;;  %v3624_v31 = vpop.f32.mrb[93].mxu0 }
 0xa2b   :  { %v15673_v51 = vadd.f32 %v3624_v31, %v14479_v47 }
 0xa2c   :  { %3663 = vmax.xlane.f32.xlu1 %v15670_v13 }
 0xa2d   :  { %3661 = vmax.xlane.f32.xlu0 %v15673_v51 }
 0xa7c   :  { %v3197_v0 = vpop.xlane.xlu1 %3196 }
 0xa7d   :  { %v3227_v53 = vsub.f32 %v15550_v34, %v3197_v0  ;;  %v3195_v4 = vpop.xlane.xlu0 %3194 }
 0xa7e   :  { %v3226_v54 = vsub.f32 %v15553_v37, %v3195_v4 }
 0xa7f   :  { %v3244_v58 = vmul.f32 1.442695, %v3227_v53 }
 0xa80   :  { %v3242_v59 = vmul.f32 1.442695, %v3226_v54 }
 0xa81   :  { %13336 = vpow2.f32 %v3244_v58  ;;  %v3636_v42 = vpop.xlane.xlu1 %3635 }
 0xa82   :  { %13338 = vpow2.f32 %v3242_v59  ;;  %v3666_v22 = vsub.f32 %v15558_v48, %v3636_v42  ;;  %v3634_v29 = vpop.xlane.xlu0 %3633 }
 0xa83   :  { %v3665_v35 = vsub.f32 %v15561_v11, %v3634_v29 }
 0xa84   :  { %v3683_v16 = vmul.f32 1.442695, %v3666_v22 }
 0xa85   :  { %v3681_v9 = vmul.f32 1.442695, %v3665_v35  ;;  %v3201_v63 = vpop.xlane.xlu1 %3200 }
 0xa86   :  { %13340 = vpow2.f32 %v3683_v16  ;;  %v3229_v62 = vsub.f32 %v15565_v2, %v3201_v63  ;;  %v3199_v34 = vpop.xlane.xlu0 %3198 }
 0xa87   :  { %13342 = vpow2.f32 %v3681_v9  ;;  %v3228_v37 = vsub.f32 %v15569_v17, %v3199_v34 }
 0xa88   :  { %v3248_v10 = vmul.f32 1.442695, %v3229_v62 }
 0xa89   :  { %v3246_v25 = vmul.f32 1.442695, %v3228_v37  ;;  %v3640_v40 = vpop.xlane.xlu1 %3639 }
 0xa8a   :  { %13344 = vpow2.f32 %v3248_v10  ;;  %v3668_v56 = vsub.f32 %v15574_v8, %v3640_v40  ;;  %v3638_v48 = vpop.xlane.xlu0 %3637 }
 0xa8b   :  { %v15684_v32 = vpop.eup %13336  ;;  %13346 = vpow2.f32 %v3246_v25  ;;  %v3667_v11 = vsub.f32 %v15577_v12, %v3638_v48 }
 0xa8c   :  { %v15687_v31 = vpop.eup %13338  ;;  %v3687_v0 = vmul.f32 1.442695, %v3668_v56  ;;  %3276 = vadd.xlane.f32.xlu1 %v15684_v32 }
 0xa8d   :  { %v3685_v2 = vmul.f32 1.442695, %v3667_v11  ;;  %v3205_v53 = vpop.xlane.xlu1 %3204  ;;  %3274 = vadd.xlane.f32.xlu0 %v15687_v31 }
 0xa8e   :  { %13348 = vpow2.f32 %v3687_v0  ;;  %v3231_v17 = vsub.f32 %v15581_v18, %v3205_v53  ;;  %v3203_v4 = vpop.xlane.xlu0 %3202 }
 0xa8f   :  { %13350 = vpow2.f32 %v3685_v2  ;;  %v3230_v8 = vsub.f32 %v15585_v21, %v3203_v4 }
 0xa90   :  { %v15693_v54 = vpop.eup %13340  ;;  %v3252_v58 = vmul.f32 1.442695, %v3231_v17 }
 0xa91   :  { %v15695_v12 = vpop.eup %13342  ;;  %v3250_v59 = vmul.f32 1.442695, %v3230_v8  ;;  %v3644_v42 = vpop.xlane.xlu1 %3643  ;;  %3715 = vadd.xlane.f32.xlu1 %v15693_v54 }
 0xa92   :  { %13352 = vpow2.f32 %v3252_v58  ;;  %v3670_v22 = vsub.f32 %v15590_v7, %v3644_v42  ;;  %3713 = vadd.xlane.f32.xlu0 %v15695_v12  ;;  %v3642_v29 = vpop.xlane.xlu0 %3641 }
 0xa93   :  { %13354 = vpow2.f32 %v3250_v59  ;;  %v3669_v18 = vsub.f32 %v15593_v3, %v3642_v29 }
 0xa94   :  { %v15701_v35 = vpop.eup %13344  ;;  %v3691_v21 = vmul.f32 1.442695, %v3670_v22 }
 0xa95   :  { %v15703_v16 = vpop.eup %13346  ;;  %v3689_v9 = vmul.f32 1.442695, %v3669_v18  ;;  %v3209_v63 = vpop.xlane.xlu1 %3208  ;;  %3280 = vadd.xlane.f32.xlu1 %v15701_v35 }
 0xa96   :  { %13356 = vpow2.f32 %v3691_v21  ;;  %v3233_v62 = vsub.f32 %v15597_v5, %v3209_v63  ;;  %3278 = vadd.xlane.f32.xlu0 %v15703_v16  ;;  %v3207_v7 = vpop.xlane.xlu0 %3206 }
 0xa97   :  { %13358 = vpow2.f32 %v3689_v9  ;;  %v3232_v34 = vsub.f32 %v15601_v43, %v3207_v7 }
 0xa98   :  { %v15709_v37 = vpop.eup %13348  ;;  %v3256_v3 = vmul.f32 1.442695, %v3233_v62 }
 0xa99   :  { %v15711_v10 = vpop.eup %13350  ;;  %v3254_v25 = vmul.f32 1.442695, %v3232_v34  ;;  %v3648_v40 = vpop.xlane.xlu1 %3647  ;;  %3719 = vadd.xlane.f32.xlu1 %v15709_v37 }
 0xa9a   :  { %13360 = vpow2.f32 %v3256_v3  ;;  %v3672_v56 = vsub.f32 %v15606_v45, %v3648_v40  ;;  %3717 = vadd.xlane.f32.xlu0 %v15711_v10  ;;  %v3646_v5 = vpop.xlane.xlu0 %3645 }
 0xa9b   :  { %13362 = vpow2.f32 %v3254_v25  ;;  %v3671_v48 = vsub.f32 %v15609_v28, %v3646_v5 }
 0xa9c   :  { %v15717_v11 = vpop.eup %13352  ;;  %v3695_v43 = vmul.f32 1.442695, %v3672_v56 }
 0xa9d   :  { %v15719_v0 = vpop.eup %13354  ;;  %v3693_v2 = vmul.f32 1.442695, %v3671_v48  ;;  %v3213_v53 = vpop.xlane.xlu1 %3212  ;;  %3284 = vadd.xlane.f32.xlu1 %v15717_v11 }
 0xa9e   :  { %13364 = vpow2.f32 %v3695_v43  ;;  %v3235_v17 = vsub.f32 %v15613_v60, %v3213_v53  ;;  %3282 = vadd.xlane.f32.xlu0 %v15719_v0  ;;  %v3211_v45 = vpop.xlane.xlu0 %3210 }
 0xa9f   :  { %13366 = vpow2.f32 %v3693_v2  ;;  %v3234_v4 = vsub.f32 %v15617_v55, %v3211_v45 }
 0xaa0   :  { %v15725_v8 = vpop.eup %13356  ;;  %v3260_v28 = vmul.f32 1.442695, %v3235_v17 }
 0xaa1   :  { %v15727_v58 = vpop.eup %13358  ;;  %v3258_v59 = vmul.f32 1.442695, %v3234_v4  ;;  %v3652_v42 = vpop.xlane.xlu1 %3651  ;;  %3723 = vadd.xlane.f32.xlu1 %v15725_v8 }
 0xaa2   :  { %13368 = vpow2.f32 %v3260_v28  ;;  %v3674_v22 = vsub.f32 %v15622_v38, %v3652_v42  ;;  %3721 = vadd.xlane.f32.xlu0 %v15727_v58  ;;  %v3650_v60 = vpop.xlane.xlu0 %3649 }
 0xaa3   :  { %13370 = vpow2.f32 %v3258_v59  ;;  %v3673_v29 = vsub.f32 %v15625_v57, %v3650_v60 }
 0xaa4   :  { %v15733_v18 = vpop.eup %13360  ;;  %v3699_v55 = vmul.f32 1.442695, %v3674_v22 }
 0xaa5   :  { %v15735_v21 = vpop.eup %13362  ;;  %v3697_v9 = vmul.f32 1.442695, %v3673_v29  ;;  %v3217_v63 = vpop.xlane.xlu1 %3216  ;;  %3288 = vadd.xlane.f32.xlu1 %v15733_v18 }
 0xaa6   :  { %13372 = vpow2.f32 %v3699_v55  ;;  %v3237_v62 = vsub.f32 %v15629_v49, %v3217_v63  ;;  %3286 = vadd.xlane.f32.xlu0 %v15735_v21  ;;  %v3215_v38 = vpop.xlane.xlu0 %3214 }
 0xaa7   :  { %13374 = vpow2.f32 %v3697_v9  ;;  %v3236_v7 = vsub.f32 %v15633_v15, %v3215_v38 }
 0xaa8   :  { %v15741_v34 = vpop.eup %13364  ;;  %v3264_v57 = vmul.f32 1.442695, %v3237_v62 }
 0xaa9   :  { %v15743_v3 = vpop.eup %13366  ;;  %v3262_v25 = vmul.f32 1.442695, %v3236_v7  ;;  %v3656_v40 = vpop.xlane.xlu1 %3655  ;;  %3727 = vadd.xlane.f32.xlu1 %v15741_v34 }
 0xaaa   :  { %13376 = vpow2.f32 %v3264_v57  ;;  %v3676_v56 = vsub.f32 %v15638_v50, %v3656_v40  ;;  %3725 = vadd.xlane.f32.xlu0 %v15743_v3  ;;  %v3654_v49 = vpop.xlane.xlu0 %3653 }
 0xaab   :  { %13378 = vpow2.f32 %v3262_v25  ;;  %v3675_v5 = vsub.f32 %v15641_v20, %v3654_v49 }
 0xaac   :  { %v15749_v48 = vpop.eup %13368  ;;  %v3703_v15 = vmul.f32 1.442695, %v3676_v56 }
 0xaad   :  { %v15751_v43 = vpop.eup %13370  ;;  %v3701_v2 = vmul.f32 1.442695, %v3675_v5  ;;  %v3221_v53 = vpop.xlane.xlu1 %3220  ;;  %3292 = vadd.xlane.f32.xlu1 %v15749_v48 }
 0xaae   :  { %13380 = vpow2.f32 %v3703_v15  ;;  %v3239_v17 = vsub.f32 %v15645_v26, %v3221_v53  ;;  %3290 = vadd.xlane.f32.xlu0 %v15751_v43  ;;  %v3219_v50 = vpop.xlane.xlu0 %3218 }
 0xaaf   :  { %13382 = vpow2.f32 %v3701_v2  ;;  %v3238_v45 = vsub.f32 %v15649_v33, %v3219_v50 }
 0xab0   :  { %v15757_v4 = vpop.eup %13372  ;;  %v3268_v20 = vmul.f32 1.442695, %v3239_v17 }
 0xab1   :  { %v15759_v28 = vpop.eup %13374  ;;  %v3266_v59 = vmul.f32 1.442695, %v3238_v45  ;;  %v3660_v42 = vpop.xlane.xlu1 %3659  ;;  %3731 = vadd.xlane.f32.xlu1 %v15757_v4 }
 0xab2   :  { %13384 = vpow2.f32 %v3268_v20  ;;  %v3678_v22 = vsub.f32 %v15654_v1, %v3660_v42  ;;  %3729 = vadd.xlane.f32.xlu0 %v15759_v28  ;;  %v3658_v26 = vpop.xlane.xlu0 %3657 }
 0xab3   :  { %13386 = vpow2.f32 %v3266_v59  ;;  %v3677_v60 = vsub.f32 %v15657_v27, %v3658_v26 }
 0xab4   :  { %v15765_v29 = vpop.eup %13376  ;;  %v3707_v33 = vmul.f32 1.442695, %v3678_v22 }
 0xab5   :  { %v15767_v55 = vpop.eup %13378  ;;  %v3705_v9 = vmul.f32 1.442695, %v3677_v60  ;;  %3296 = vadd.xlane.f32.xlu1 %v15765_v29  ;;  %v3225_v63 = vpop.xlane.xlu1 %3224 }
 0xab6   :  { %13388 = vpow2.f32 %v3707_v33  ;;  %v3241_v62 = vsub.f32 %v15661_v23, %v3225_v63  ;;  %3294 = vadd.xlane.f32.xlu0 %v15767_v55  ;;  %v3223_v1 = vpop.xlane.xlu0 %3222 }
 0xab7   :  { %13390 = vpow2.f32 %v3705_v9  ;;  %v3240_v38 = vsub.f32 %v15665_v14, %v3223_v1 }
 0xab8   :  { %v15773_v7 = vpop.eup %13380  ;;  %v3272_v27 = vmul.f32 1.442695, %v3241_v62 }
 0xab9   :  { %v15775_v57 = vpop.eup %13382  ;;  %v3270_v25 = vmul.f32 1.442695, %v3240_v38  ;;  %3735 = vadd.xlane.f32.xlu1 %v15773_v7  ;;  %v3664_v40 = vpop.xlane.xlu1 %3663 }
 0xaba   :  { %13392 = vpow2.f32 %v3272_v27  ;;  %v3680_v56 = vsub.f32 %v15670_v13, %v3664_v40  ;;  %3733 = vadd.xlane.f32.xlu0 %v15775_v57  ;;  %v3662_v23 = vpop.xlane.xlu0 %3661 }
 0xabb   :  { %13394 = vpow2.f32 %v3270_v25  ;;  %v3679_v49 = vsub.f32 %v15673_v51, %v3662_v23 }
 0xabc   :  { %v15781_v5 = vpop.eup %13384  ;;  %v3711_v14 = vmul.f32 1.442695, %v3680_v56 }
 0xabd   :  { %v15783_v15 = vpop.eup %13386  ;;  %v3709_v2 = vmul.f32 1.442695, %v3679_v49  ;;  %3300 = vadd.xlane.f32.xlu1 %v15781_v5 }
 0xabe   :  { %13396 = vpow2.f32 %v3711_v14  ;;  %3298 = vadd.xlane.f32.xlu0 %v15783_v15 }
 0xabf   :  { %13398 = vpow2.f32 %v3709_v2 }
 0xac0   :  { %v15787_v53 = vpop.eup %13388 }
 0xac1   :  { %v15789_v13 = vpop.eup %13390  ;;  %3739 = vadd.xlane.f32.xlu1 %v15787_v53 }
 0xac2   :  { %3737 = vadd.xlane.f32.xlu0 %v15789_v13 }
 0xac4   :  { %v15793_v51 = vpop.eup %13392 }
 0xac5   :  { %v15795_v17 = vpop.eup %13394  ;;  %3304 = vadd.xlane.f32.xlu1 %v15793_v51 }
 0xac6   :  { %3302 = vadd.xlane.f32.xlu0 %v15795_v17 }
 0xac8   :  { %v15799_v50 = vpop.eup %13396 }
 0xac9   :  { %v15801_v45 = vpop.eup %13398  ;;  %3743 = vadd.xlane.f32.xlu1 %v15799_v50 }
 0xaca   :  { %3741 = vadd.xlane.f32.xlu0 %v15801_v45 }
 0xb19   :  { %v3277_v20 = vpop.xlane.xlu1 %3276 }
 0xb1a   :  { %13400 = vrcp.f32 %v3277_v20  ;;  %v3275_v59 = vpop.xlane.xlu0 %3274 }
 0xb1b   :  { %13402 = vrcp.f32 %v3275_v59 }
 0xb1e   :  { %v3716_v42 = vpop.xlane.xlu1 %3715 }
 0xb1f   :  { %13404 = vrcp.f32 %v3716_v42  ;;  %v3714_v22 = vpop.xlane.xlu0 %3713 }
 0xb20   :  { %13406 = vrcp.f32 %v3714_v22 }
 0xb22   :  { %v3281_v26 = vpop.xlane.xlu1 %3280 }
 0xb23   :  { %13408 = vrcp.f32 %v3281_v26  ;;  %v3279_v60 = vpop.xlane.xlu0 %3278 }
 0xb24   :  { %v13401_v33 = vpop.eup %13400  ;;  %13410 = vrcp.f32 %v3279_v60 }
 0xb25   :  { %v13403_v9 = vpop.eup %13402  ;;  %v3323_v63 = vmul.f32 %v13401_v33, %v15684_v32 }
 0xb26   :  { %v3720_v62 = vpop.xlane.xlu1 %3719  ;;  %v3322_v1 = vmul.f32 %v13403_v9, %v15687_v31 }
 0xb27   :  { %13412 = vrcp.f32 %v3720_v62  ;;  %v3718_v38 = vpop.xlane.xlu0 %3717 }
 0xb28   :  { %13414 = vrcp.f32 %v3718_v38  ;;  %v12618_v27 = vpack.c.bf16 %v3323_v63, %v3322_v1 }
 0xb29   :  { %v13405_v25 = vpop.eup %13404 }
 0xb2a   :  { %v13407_v40 = vpop.eup %13406  ;;  %v3285_v56 = vpop.xlane.xlu1 %3284  ;;  %12619 = vmatpush3.bf16.xpose.msra.mxu1 %v12618_v27  ;;  %v3762_v23 = vmul.f32 %v13405_v25, %v15693_v54 }
 0xb2b   :  { %13416 = vrcp.f32 %v3285_v56  ;;  %v3283_v49 = vpop.xlane.xlu0 %3282  ;;  %v3761_v14 = vmul.f32 %v13407_v40, %v15695_v12  ;;  %12620 = vmatprep.subr.bf16.mxu1 %v19699_v41 }
 0xb2c   :  { %13418 = vrcp.f32 %v3283_v49 }
 0xb2d   :  { %v13409_v32 = vpop.eup %13408  ;;  %v12642_v2 = vpack.c.bf16 %v3762_v23, %v3761_v14 }
 0xb2e   :  { %v13411_v31 = vpop.eup %13410  ;;  %v3724_v20 = vpop.xlane.xlu1 %3723  ;;  %v3325_v59 = vmul.f32 %v13409_v32, %v15701_v35 }
 0xb2f   :  { %13420 = vrcp.f32 %v3724_v20  ;;  %12643 = vmatpush3.bf16.xpose.msra.mxu0 %v12642_v2  ;;  %v3722_v42 = vpop.xlane.xlu0 %3721  ;;  %v3324_v22 = vmul.f32 %v13411_v31, %v15703_v16 }
 0xb30   :  { %13422 = vrcp.f32 %v3722_v42  ;;  %12644 = vmatprep.subr.bf16.mxu0 %v19699_v41 }
 0xb31   :  { %v13413_v54 = vpop.eup %13412  ;;  %v12621_v26 = vpack.c.bf16 %v3325_v59, %v3324_v22 }
 0xb32   :  { %v13415_v12 = vpop.eup %13414  ;;  %v3289_v60 = vpop.xlane.xlu1 %3288  ;;  %v3764_v33 = vmul.f32 %v13413_v54, %v15709_v37 }
 0xb33   :  { %13424 = vrcp.f32 %v3289_v60  ;;  %12622 = vmatpush3.bf16.xpose.msra.mxu1 %v12621_v26  ;;  %v3287_v9 = vpop.xlane.xlu0 %3286  ;;  %v3763_v63 = vmul.f32 %v13415_v12, %v15711_v10 }
 0xb34   :  { %13426 = vrcp.f32 %v3287_v9  ;;  %12623 = vmatprep.subr.bf16.mxu1 %v19699_v41 }
 0xb35   :  { %v13417_v35 = vpop.eup %13416  ;;  %v12645_v62 = vpack.c.bf16 %v3764_v33, %v3763_v63 }
 0xb36   :  { %v13419_v16 = vpop.eup %13418  ;;  %v3728_v1 = vpop.xlane.xlu1 %3727  ;;  %v3327_v38 = vmul.f32 %v13417_v35, %v15717_v11 }
 0xb37   :  { %13428 = vrcp.f32 %v3728_v1  ;;  %12646 = vmatpush3.bf16.xpose.msra.mxu0 %v12645_v62  ;;  %v3726_v27 = vpop.xlane.xlu0 %3725  ;;  %v3326_v25 = vmul.f32 %v13419_v16, %v15719_v0 }
 0xb38   :  { %13430 = vrcp.f32 %v3726_v27  ;;  %12647 = vmatprep.subr.bf16.mxu0 %v19699_v41 }
 0xb39   :  { %v13421_v37 = vpop.eup %13420  ;;  %v12624_v40 = vpack.c.bf16 %v3327_v38, %v3326_v25 }
 0xb3a   :  { %v13423_v10 = vpop.eup %13422  ;;  %v3293_v56 = vpop.xlane.xlu1 %3292  ;;  %v3766_v23 = vmul.f32 %v13421_v37, %v15725_v8 }
 0xb3b   :  { %13432 = vrcp.f32 %v3293_v56  ;;  %12625 = vmatpush3.bf16.xpose.msra.mxu1 %v12624_v40  ;;  %v3291_v49 = vpop.xlane.xlu0 %3290  ;;  %v3765_v14 = vmul.f32 %v13423_v10, %v15727_v58 }
 0xb3c   :  { %13434 = vrcp.f32 %v3291_v49  ;;  %12626 = vmatprep.subr.bf16.mxu1 %v19699_v41 }
 0xb3d   :  { %v13425_v11 = vpop.eup %13424  ;;  %v12648_v32 = vpack.c.bf16 %v3766_v23, %v3765_v14 }
 0xb3e   :  { %v13427_v0 = vpop.eup %13426  ;;  %v3732_v2 = vpop.xlane.xlu1 %3731  ;;  %v3329_v31 = vmul.f32 %v13425_v11, %v15733_v18 }
 0xb3f   :  { %13436 = vrcp.f32 %v3732_v2  ;;  %12649 = vmatpush3.bf16.xpose.msra.mxu0 %v12648_v32  ;;  %v3730_v20 = vpop.xlane.xlu0 %3729  ;;  %v3328_v59 = vmul.f32 %v13427_v0, %v15735_v21 }
 0xb40   :  { %13438 = vrcp.f32 %v3730_v20  ;;  %12650 = vmatprep.subr.bf16.mxu0 %v19699_v41 }
 0xb41   :  { %v13429_v8 = vpop.eup %13428  ;;  %v12627_v42 = vpack.c.bf16 %v3329_v31, %v3328_v59 }
 0xb42   :  { %v13431_v58 = vpop.eup %13430  ;;  %v3297_v22 = vpop.xlane.xlu1 %3296  ;;  %v3768_v54 = vmul.f32 %v13429_v8, %v15741_v34 }
 0xb43   :  { %13440 = vrcp.f32 %v3297_v22  ;;  %12628 = vmatpush3.bf16.xpose.msra.mxu1 %v12627_v42  ;;  %v3295_v26 = vpop.xlane.xlu0 %3294  ;;  %v3767_v12 = vmul.f32 %v13431_v58, %v15743_v3 }
 0xb44   :  { %13442 = vrcp.f32 %v3295_v26  ;;  %12629 = vmatprep.subr.bf16.mxu1 %v19699_v41 }
 0xb45   :  { %v13433_v18 = vpop.eup %13432  ;;  %v12651_v60 = vpack.c.bf16 %v3768_v54, %v3767_v12 }
 0xb46   :  { %v13435_v21 = vpop.eup %13434  ;;  %v3736_v33 = vpop.xlane.xlu1 %3735  ;;  %v3331_v9 = vmul.f32 %v13433_v18, %v15749_v48 }
 0xb47   :  { %13444 = vrcp.f32 %v3736_v33  ;;  %12652 = vmatpush3.bf16.xpose.msra.mxu0 %v12651_v60  ;;  %v3734_v63 = vpop.xlane.xlu0 %3733  ;;  %v3330_v35 = vmul.f32 %v13435_v21, %v15751_v43  ;;  %v19748_v33 = vld [vmem:[#allocation4_spill] sm:$0xff] }
 0xb48   :  { %13446 = vrcp.f32 %v3734_v63  ;;  %12653 = vmatprep.subr.bf16.mxu0 %v19699_v41 }
 0xb49   :  { %v13437_v34 = vpop.eup %13436  ;;  %v12630_v62 = vpack.c.bf16 %v3331_v9, %v3330_v35 }
 0xb4a   :  { %v13439_v3 = vpop.eup %13438  ;;  %v3301_v16 = vpop.xlane.xlu1 %3300  ;;  %v3770_v1 = vmul.f32 %v13437_v34, %v15757_v4 }
 0xb4b   :  { %13448 = vrcp.f32 %v3301_v16  ;;  %12631 = vmatpush3.bf16.xpose.msra.mxu1 %v12630_v62  ;;  %v3299_v38 = vpop.xlane.xlu0 %3298  ;;  %v3769_v27 = vmul.f32 %v13439_v3, %v15759_v28  ;;  %v12917_v62 = vld [vmem:[%s19690_s2] sm:$0xff]   ;;  %v12918_v3 = vld [vmem:[%s19690_s2 + $0x8] sm:$0xff]  }
 0xb4c   :  { %13450 = vrcp.f32 %v3299_v38  ;;  %12632 = vmatprep.subr.bf16.mxu1 %v19699_v41 }
 0xb4d   :  { %v13441_v48 = vpop.eup %13440  ;;  %v12654_v25 = vpack.c.bf16 %v3770_v1, %v3769_v27 }
 0xb4e   :  { %v13443_v43 = vpop.eup %13442  ;;  %v3740_v37 = vpop.xlane.xlu1 %3739  ;;  %v3333_v40 = vmul.f32 %v13441_v48, %v15765_v29  ;;  %v14249_v48 = vld [vmem:[%s19688_s0 + $0x18] sm:$0xff] }
 0xb4f   :  { %13452 = vrcp.f32 %v3740_v37  ;;  %12655 = vmatpush3.bf16.xpose.msra.mxu0 %v12654_v25  ;;  %v3738_v10 = vpop.xlane.xlu0 %3737  ;;  %v3332_v56 = vmul.f32 %v13443_v43, %v15767_v55  ;;  %v14250_v43 = vld [vmem:[%s19688_s0] sm:$0xff] }
 0xb50   :  { %13454 = vrcp.f32 %v3738_v10  ;;  %12656 = vmatprep.subr.bf16.mxu0 %v19699_v41  ;;  %v14251_v10 = vld [vmem:[%s19688_s0 + $0x8] sm:$0xff] }
 0xb51   :  { %v13445_v4 = vpop.eup %13444  ;;  %v12633_v23 = vpack.c.bf16 %v3333_v40, %v3332_v56 }
 0xb52   :  { %v13447_v28 = vpop.eup %13446  ;;  %v3305_v49 = vpop.xlane.xlu1 %3304  ;;  %v3772_v14 = vmul.f32 %v13445_v4, %v15773_v7 }
 0xb53   :  { %13456 = vrcp.f32 %v3305_v49  ;;  %12634 = vmatpush3.bf16.xpose.msra.mxu1 %v12633_v23  ;;  %v3303_v11 = vpop.xlane.xlu0 %3302  ;;  %v3771_v32 = vmul.f32 %v13447_v28, %v15775_v57 }
 0xb54   :  { %13458 = vrcp.f32 %v3303_v11  ;;  %12635 = vmatprep.subr.bf16.mxu1 %v19699_v41  ;;  %v14252_v11 = vld [vmem:[%s19688_s0 + $0x20] sm:$0xff] }
 0xb55   :  { %v13449_v29 = vpop.eup %13448  ;;  %v12657_v0 = vpack.c.bf16 %v3772_v14, %v3771_v32 }
 0xb56   :  { %v13451_v55 = vpop.eup %13450  ;;  %v3744_v2 = vpop.xlane.xlu1 %3743  ;;  %v3335_v31 = vmul.f32 %v13449_v29, %v15781_v5 }
 0xb57   :  { %13460 = vrcp.f32 %v3744_v2  ;;  %12658 = vmatpush3.bf16.xpose.msra.mxu0 %v12657_v0  ;;  %v3742_v20 = vpop.xlane.xlu0 %3741  ;;  %v3334_v59 = vmul.f32 %v13451_v55, %v15783_v15  ;;  %v14253_v55 = vld [vmem:[%s19688_s0 + $0x28] sm:$0xff] }
 0xb58   :  { %13462 = vrcp.f32 %v3742_v20  ;;  %12659 = vmatprep.subr.bf16.mxu0 %v19699_v41 }
 0xb59   :  { %v13453_v7 = vpop.eup %13452  ;;  %v12636_v8 = vpack.c.bf16 %v3335_v31, %v3334_v59 }
 0xb5a   :  { %v13455_v57 = vpop.eup %13454  ;;  %v3774_v42 = vmul.f32 %v13453_v7, %v15787_v53  ;;  %v14254_v7 = vld [vmem:[%s19688_s0 + $0x30] sm:$0xff] }
 0xb5b   :  { %12637 = vmatpush3.bf16.xpose.msra.mxu1 %v12636_v8  ;;  %v3773_v58 = vmul.f32 %v13455_v57, %v15789_v13 }
 0xb5c   :  { %12638 = vmatprep.subr.bf16.mxu1 %v19699_v41 }
 0xb5d   :  { %v13457_v22 = vpop.eup %13456  ;;  %v12660_v5 = vpack.c.bf16 %v3774_v42, %v3773_v58 }
 0xb5e   :  { %v13459_v54 = vpop.eup %13458  ;;  %v3337_v26 = vmul.f32 %v13457_v22, %v15793_v51  ;;  %v19746_v51 = vld [vmem:[#allocation3_spill] sm:$0xff] }
 0xb5f   :  { %12661 = vmatpush3.bf16.xpose.msra.mxu0 %v12660_v5  ;;  %v3336_v15 = vmul.f32 %v13459_v54, %v15795_v17  ;;  %v19747_v17 = vmov 0   ;;  %v14255_v5 = vld [vmem:[%s19688_s0 + $0x38] sm:$0xff] }
 0xb60   :  { %12662 = vmatprep.subr.bf16.mxu0 %v19699_v41 }
 0xb61   :  { %v13461_v12 = vpop.eup %13460  ;;  %v12639_v18 = vpack.c.bf16 %v3337_v26, %v3336_v15 }
 0xb62   :  { %v13463_v60 = vpop.eup %13462  ;;  %v3776_v53 = vmul.f32 %v13461_v12, %v15799_v50  ;;  %v14286_v50 = vmov 2  }
 0xb63   :  { %12640 = vmatpush3.bf16.xpose.msra.mxu1 %v12639_v18  ;;  %v3775_v13 = vmul.f32 %v13463_v60, %v15801_v45  ;;  %12882 = vset.pattern.permute.xlu1 %v14286_v50  ;;  %v14289_v60 = vmov 12  }
 0xb64   :  { %3871 = vmatprep.subr.bf16.mxu1 %v3852_v52  ;;  %12881 = vset.pattern.permute.xlu0 %v14286_v50  ;;  %v14288_v52 = vmov 4  }
 0xb65   :  { %v12663_v21 = vpack.c.bf16 %v3776_v53, %v3775_v13  ;;  %3937 = vperm.xlu1 %12882, %v15864_v61   ;;  %3933 = vperm.xlu0 %12881, %v15870_v44  }
 0xb67   :  { %12664 = vmatpush3.bf16.xpose.msra.mxu0 %v12663_v21 }
 0xb69   :  { %3941 = vperm.xlu1 %12882, %v15876_v39  }
 0xb6a   :  { %11922 = vmatmul.mubr.f32.vlgmr.msra.gmra.mrb[70].mxu1 %v19746_v51 }
 0xb6b   :  { %3872 = vmatpush1.bf16.msra.mxu1 %v3851_v36  ;;  %3903 = vmatprep.mubr.bf16.mxu1 %v19747_v17  ;;  %v14287_v36 = vmov 3  }
 0xb6c   :  { %12886 = vset.pattern.permute.xlu0 %v14287_v36 }
 0xb6d   :  { %4037 = vperm.xlu0 %12886, %v15882_v30   ;;  %3945 = vperm.xlu1 %12882, %v15882_v30  }
 0xb6e   :  { %11983 = vmatmul.mubr.f32.vlgmr.msra.gmra.mrb[94].mxu0 %v19748_v33 }
 0xb6f   :  { %5241 = vmatprep.mubr.bf16.mxu0 %v19747_v17 }
 0xb71   :  { %12883 = vset.pattern.permute.xlu1 %v14287_v36  ;;  %12888 = vset.pattern.permute.xlu0 %v14289_v60 }
 0xb72   :  { %4025 = vperm.xlu1 %12883, %v15870_v44   ;;  %4093 = vperm.xlu0 %12888, %v15870_v44  }
 0xb76   :  { %4029 = vperm.xlu1 %12883, %v15864_v61   ;;  %4105 = vperm.xlu0 %12888, %v15882_v30  }
 0xb7a   :  { %12884 = vset.pattern.permute.xlu1 %v14288_v52 }
 0xb7b   :  { %4049 = vperm.xlu1 %12884, %v15870_v44   ;;  %v40_v44 = vld [vmem:[%s19687_s6 + $0x28] sm:$0xff] }
 0xb7c   :  { %4115 = vperm.xlu0 %12888, %v40_v44  }
 0xb7f   :  { %4053 = vperm.xlu1 %12884, %v15864_v61  }
 0xb83   :  { %12885 = vset.pattern.permute.xlu1 %v14287_v36  ;;  %v39_v36 = vld [vmem:[%s19687_s6 + $0x20] sm:$0xff] }
 0xb84   :  { %4033 = vperm.xlu1 %12885, %v15876_v39  }
 0xb88   :  { %12887 = vset.pattern.permute.xlu1 %v14288_v52 }
 0xb89   :  { %4057 = vperm.xlu1 %12887, %v15876_v39  }
 0xb8d   :  { %4061 = vperm.xlu1 %12887, %v15882_v30   ;;  %v42_v30 = vld [vmem:[%s19687_s6 + $0x38] sm:$0xff] }
 0xb8e   :  { %4125 = vperm.xlu0 %12888, %v42_v30  }
 0xb91   :  { %12889 = vset.pattern.permute.xlu1 %v14289_v60 }
 0xb92   :  { %4097 = vperm.xlu1 %12889, %v15864_v61  }
 0xb96   :  { %4101 = vperm.xlu1 %12889, %v15876_v39   ;;  %v41_v39 = vld [vmem:[%s19687_s6 + $0x30] sm:$0xff] }
 0xb9a   :  { %4110 = vperm.xlu1 %12889, %v39_v36  }
 0xb9e   :  { %4120 = vperm.xlu1 %12889, %v41_v39  }
 0xbe4   :  { %v3938_v16 = vpop.permute.xlu1 %3937  ;;  %v3934_v4 = vpop.permute.xlu0 %3933 }
 0xbe8   :  { %v3942_v40 = vpop.permute.xlu1 %3941 }
 0xbec   :  { %v3946_v58 = vpop.permute.xlu1 %3945 }
 0xc3d   :  { %v3404_v45 = vpop.f32.mrb[70].mxu1 }
 0xc3e   :  { %v11923_v9 = vpop.f32.mrb[71].mxu1 }
 0xc41   :  { %v3843_v63 = vpop.f32.mrb[94].mxu0 }
 0xc42   :  { %v3854_v35 = vpack.c.bf16 %v3843_v63, %v3404_v45  ;;  %v11984_v34 = vpop.f32.mrb[95].mxu0 }
 0xc44   :  { %3873 = vmatprep.subr.bf16.mxu1 %v3854_v35 }
 0xc45   :  { %3874 = vmatpush1.bf16.msra.mxu1 %v3853_v6 }
 0xc48   :  { %10733 = vmatmul.mubr.msk.bf16.vlgmr.msra.gmra.mrb[72].mxu1 %vm222_vm0, %v12917_v62 }
 0xc49   :  { %3913 = vmatprep.mubr.bf16.mxu1 %v19747_v17 }
 0xc50   :  { %10734 = vmatmul.mubr.msk.bf16.gmra.mrb[76].mxu1 %vm222_vm0, %v12918_v3  ;;  %v43_v3 = vld [vmem:[%s19687_s6 + $0x40] sm:$0xff] }
 0xc51   :  { %4264 = vmatprep.mubr.bf16.mxu1 %v19747_v17  ;;  %4130 = vperm.xlu1 %12889, %v43_v3  }
 0xd1b   :  { %v3905_v1 = vpop.f32.mrb[72].mxu1 }
 0xd1c   :  { %v3907_v38 = vpop.f32.mrb[73].mxu1  ;;  %v3924_v37 = vadd.f32 %v14250_v43, %v3905_v1  ;;  %v44_v1 = vld [vmem:[%s19687_s6 + $0x48] sm:$0xff]  ;;  %v45_v43 = vld [vmem:[%s19687_s6 + $0x50] sm:$0xff] }
 0xd1d   :  { %v3909_v27 = vpop.f32.mrb[74].mxu1  ;;  %v3925_v56 = vadd.f32 %v14251_v10, %v3907_v38  ;;  %4135 = vperm.xlu0 %12888, %v44_v1   ;;  %4140 = vperm.xlu1 %12889, %v45_v43  }
 0xd1e   :  { %v3926_v24 = vadd.f32 %v14248_v19, %v3909_v27  ;;  %v3911_v6 = vpop.f32.mrb[75].mxu1  ;;  %v15922_v14 = vadd.f32 %v3934_v4, %v3924_v37 }
 0xd1f   :  { %v3927_v25 = vadd.f32 %v14249_v48, %v3911_v6  ;;  %v15927_v0 = vadd.f32 %v3934_v4, %v3925_v56  ;;  %v46_v56 = vld [vmem:[%s19687_s6 + $0x58] sm:$0xff] }
 0xd20   :  { %v15918_v23 = vadd.f32 %v3938_v16, %v3926_v24  ;;  %19751 = vst [vmem:[#allocation4_spill] sm:$0xff] %v15922_v14 }
 0xd21   :  { %v15920_v28 = vadd.f32 %v3938_v16, %v3927_v25  ;;  %19752 = vst [vmem:[#allocation6_spill] sm:$0xff] %v15927_v0  ;;  %4145 = vperm.xlu0 %12888, %v46_v56  }
 0xd22   :  { %19749 = vst [vmem:[#allocation2_spill] sm:$0xff] %v15918_v23  ;;  %v3956_v20 = vadd.f32 %v15918_v23, %v15922_v14 }
 0xd23   :  { %19750 = vst [vmem:[#allocation3_spill] sm:$0xff] %v15920_v28  ;;  %v3915_v49 = vpop.f32.mrb[76].mxu1  ;;  %v3965_v42 = vadd.f32 %v15920_v28, %v15927_v0 }
 0xd24   :  { %v3928_v32 = vadd.f32 %v14252_v11, %v3915_v49  ;;  %v3917_v29 = vpop.f32.mrb[77].mxu1  ;;  %v4026_v49 = vpop.permute.xlu1 %4025 }
 0xd25   :  { %v3929_v2 = vadd.f32 %v14253_v55, %v3917_v29  ;;  %v3919_v31 = vpop.f32.mrb[78].mxu1 }
 0xd26   :  { %v15934_v59 = vadd.f32 %v3942_v40, %v3928_v32  ;;  %v3930_v8 = vadd.f32 %v14254_v7, %v3919_v31  ;;  %v3921_v57 = vpop.f32.mrb[79].mxu1 }
 0xd27   :  { %v15941_v22 = vadd.f32 %v3942_v40, %v3929_v2  ;;  %v3931_v54 = vadd.f32 %v14255_v5, %v3921_v57  ;;  %v48_v57 = vld [vmem:[%s19687_s6 + $0x68] sm:$0xff] }
 0xd28   :  { %19753 = vst [vmem:[#allocation7_spill] sm:$0xff] %v15934_v59  ;;  %v3957_v26 = vadd.f32 %v3956_v20, %v15934_v59  ;;  %v15947_v15 = vadd.f32 %v3946_v58, %v3930_v8  ;;  %v47_v20 = vld [vmem:[%s19687_s6 + $0x60] sm:$0xff]  ;;  %4155 = vperm.xlu0 %12888, %v48_v57  }
 0xd29   :  { %19754 = vst [vmem:[#allocation8_spill] sm:$0xff] %v15941_v22  ;;  %v3966_v12 = vadd.f32 %v3965_v42, %v15941_v22  ;;  %v15950_v18 = vadd.f32 %v3946_v58, %v3931_v54  ;;  %4150 = vperm.xlu1 %12889, %v47_v20  }
 0xd2a   :  { %19755 = vst [vmem:[#allocation9_spill] sm:$0xff] %v15947_v15  ;;  %v3958_v53 = vadd.f32 %v3957_v26, %v15947_v15  ;;  %v4030_v26 = vpop.permute.xlu1 %4029 }
 0xd2b   :  { %19756 = vst [vmem:[#allocation10_spill] sm:$0xff] %v15950_v18  ;;  %v3967_v13 = vadd.f32 %v3966_v12, %v15950_v18  ;;  %v49_v12 = vld [vmem:[%s19687_s6 + $0x70] sm:$0xff] }
 0xd2c   :  { %v3959_v21 = vrot.slane %v3958_v53, 4 }
 0xd2d   :  { %v3968_v51 = vrot.slane %v3967_v13, 4  ;;  %4160 = vperm.xlu1 %12889, %v49_v12  }
 0xd2e   :  { %v3960_v33 = vadd.f32 %v3959_v21, %v3958_v53  ;;  %v50_v53 = vld [vmem:[%s19687_s6 + $0x78] sm:$0xff]  ;;  %v4050_v36 = vpop.permute.xlu1 %4049 }
 0xd2f   :  { %v3969_v50 = vadd.f32 %v3968_v51, %v3967_v13  ;;  %4165 = vperm.xlu0 %12888, %v50_v53  }
 0xd30   :  { %v3961_v52 = vrot.slane %v3960_v33, 2 }
 0xd31   :  { %v3970_v61 = vrot.slane %v3969_v50, 2 }
 0xd32   :  { %v3962_v45 = vadd.f32 %v3961_v52, %v3960_v33  ;;  %v4054_v30 = vpop.permute.xlu1 %4053 }
 0xd33   :  { %v3971_v9 = vadd.f32 %v3970_v61, %v3969_v50 }
 0xd34   :  { %v3963_v63 = vrot.slane %v3962_v45, 1 }
 0xd35   :  { %v3972_v35 = vrot.slane %v3971_v9, 1 }
 0xd36   :  { %v3964_v34 = vadd.f32 %v3963_v63, %v3962_v45  ;;  %v4034_v3 = vpop.permute.xlu1 %4033 }
 0xd37   :  { %v3973_v62 = vadd.f32 %v3972_v35, %v3971_v9 }
 0xd38   :  { %v3974_v16 = vmul.f32 0.03125, %v3964_v34 }
 0xd39   :  { %v3975_v38 = vmul.f32 0.03125, %v3973_v62 }
 0xd3a   :  { %v15977_v27 = vsub.f32 %v15918_v23, %v3974_v16  ;;  %v15980_v19 = vsub.f32 %v15934_v59, %v3974_v16  ;;  %v3976_v24 = vsub.f32 %v15922_v14, %v3974_v16  ;;  %v3982_v37 = vsub.f32 %v15947_v15, %v3974_v16  ;;  %v4058_v16 = vpop.permute.xlu1 %4057 }
 0xd3b   :  { %v15984_v6 = vsub.f32 %v15920_v28, %v3975_v38  ;;  %v15987_v48 = vsub.f32 %v15941_v22, %v3975_v38  ;;  %v3977_v25 = vsub.f32 %v15927_v0, %v3975_v38  ;;  %v3983_v4 = vsub.f32 %v15950_v18, %v3975_v38 }
 0xd3c   :  { %v3984_v40 = vmul.f32 %v3976_v24, %v3976_v24  ;;  %v3986_v10 = vmul.f32 %v15977_v27, %v15977_v27  ;;  %v3988_v29 = vmul.f32 %v15980_v19, %v15980_v19  ;;  %v3990_v7 = vmul.f32 %v3982_v37, %v3982_v37 }
 0xd3d   :  { %v3985_v11 = vmul.f32 %v3977_v25, %v3977_v25  ;;  %v3987_v32 = vmul.f32 %v15984_v6, %v15984_v6  ;;  %v3989_v2 = vmul.f32 %v15987_v48, %v15987_v48  ;;  %v3991_v42 = vmul.f32 %v3983_v4, %v3983_v4 }
 0xd3e   :  { %v3992_v55 = vadd.f32 %v3986_v10, %v3984_v40 }
 0xd3f   :  { %v4001_v31 = vadd.f32 %v3987_v32, %v3985_v11  ;;  %v4038_v11 = vpop.permute.xlu0 %4037 }
 0xd40   :  { %v3993_v8 = vadd.f32 %v3992_v55, %v3988_v29 }
 0xd41   :  { %v4002_v58 = vadd.f32 %v4001_v31, %v3989_v2 }
 0xd42   :  { %v3994_v5 = vadd.f32 %v3993_v8, %v3990_v7  ;;  %v4062_v7 = vpop.permute.xlu1 %4061 }
 0xd43   :  { %v4003_v54 = vadd.f32 %v4002_v58, %v3991_v42 }
 0xd44   :  { %v3995_v60 = vrot.slane %v3994_v5, 4 }
 0xd45   :  { %v4004_v13 = vrot.slane %v4003_v54, 4 }
 0xd46   :  { %v3996_v21 = vadd.f32 %v3995_v60, %v3994_v5 }
 0xd47   :  { %v4005_v51 = vadd.f32 %v4004_v13, %v4003_v54  ;;  %v12920_v13 = vld [vmem:[%s19691_s3 + $0x8] sm:$0xff]  }
 0xd48   :  { %v3997_v33 = vrot.slane %v3996_v21, 2 }
 0xd49   :  { %v4006_v50 = vrot.slane %v4005_v51, 2 }
 0xd4a   :  { %v3998_v44 = vadd.f32 %v3997_v33, %v3996_v21  ;;  %v12921_v21 = vld [vmem:[%s19691_s3 + $0x10] sm:$0xff]   ;;  %v12923_v33 = vld [vmem:[%s19691_s3 + $0x20] sm:$0xff]  }
 0xd4b   :  { %v4007_v52 = vadd.f32 %v4006_v50, %v4005_v51  ;;  %v12922_v51 = vld [vmem:[%s19691_s3 + $0x18] sm:$0xff]   ;;  %v12924_v50 = vld [vmem:[%s19691_s3 + $0x28] sm:$0xff]  }
 0xd4c   :  { %v3999_v61 = vrot.slane %v3998_v44, 1 }
 0xd4d   :  { %v4008_v45 = vrot.slane %v4007_v52, 1 }
 0xd4e   :  { %v4000_v9 = vadd.f32 %v3999_v61, %v3998_v44  ;;  %v12926_v44 = vld [vmem:[%s19691_s3 + $0x38] sm:$0xff]  }
 0xd4f   :  { %v4009_v39 = vadd.f32 %v4008_v45, %v4007_v52  ;;  %v4094_v52 = vpop.permute.xlu0 %4093  ;;  %v4098_v45 = vpop.permute.xlu1 %4097 }
 0xd50   :  { %v4010_v63 = vmul.f32 0.03125, %v4000_v9 }
 0xd51   :  { %v4011_v35 = vmul.f32 0.03125, %v4009_v39 }
 0xd52   :  { %v4012_v34 = vadd.f32 1e-05, %v4010_v63 }
 0xd53   :  { %v4013_v62 = vadd.f32 1e-05, %v4011_v35 }
 0xd54   :  { %13464 = vrsqrt.f32 %v4012_v34 }
 0xd55   :  { %13466 = vrsqrt.f32 %v4013_v62 }
 0xd5e   :  { %v13465_v1 = vpop.eup %13464 }
 0xd5f   :  { %v13467_v38 = vpop.eup %13466  ;;  %v4016_v43 = vmul.f32 %v13465_v1, %v3976_v24  ;;  %v4018_v40 = vmul.f32 %v13465_v1, %v15977_v27  ;;  %v4020_v10 = vmul.f32 %v13465_v1, %v15980_v19  ;;  %v4022_v56 = vmul.f32 %v13465_v1, %v3982_v37 }
 0xd60   :  { %v4017_v32 = vmul.f32 %v13467_v38, %v3977_v25  ;;  %v4019_v29 = vmul.f32 %v13467_v38, %v15984_v6  ;;  %v4021_v55 = vmul.f32 %v13467_v38, %v15987_v48  ;;  %v4023_v2 = vmul.f32 %v13467_v38, %v3983_v4 }
 0xd61   :  { %v4040_v31 = vmul.f32 %v4026_v49, %v4016_v43  ;;  %v4042_v20 = vmul.f32 %v4030_v26, %v4018_v40  ;;  %v4044_v27 = vmul.f32 %v4034_v3, %v4020_v10  ;;  %v4046_v54 = vmul.f32 %v4038_v11, %v4022_v56 }
 0xd62   :  { %v4041_v8 = vmul.f32 %v4026_v49, %v4017_v32  ;;  %v4043_v57 = vmul.f32 %v4030_v26, %v4019_v29  ;;  %v4045_v42 = vmul.f32 %v4034_v3, %v4021_v55  ;;  %v4047_v58 = vmul.f32 %v4038_v11, %v4023_v2  ;;  %v12919_v26 = vld [vmem:[%s19691_s3] sm:$0xff]  }
 0xd63   :  { %v4064_v24 = vadd.f32 %v4050_v36, %v4040_v31  ;;  %v4066_v5 = vadd.f32 %v4054_v30, %v4042_v20  ;;  %v4068_v53 = vadd.f32 %v4058_v16, %v4044_v27  ;;  %v4070_v48 = vadd.f32 %v4062_v7, %v4046_v54 }
 0xd64   :  { %v4065_v19 = vadd.f32 %v4050_v36, %v4041_v8  ;;  %v4067_v37 = vadd.f32 %v4054_v30, %v4043_v57  ;;  %v4069_v12 = vadd.f32 %v4058_v16, %v4045_v42  ;;  %v4071_v25 = vadd.f32 %v4062_v7, %v4047_v58  ;;  %v12925_v36 = vld [vmem:[%s19691_s3 + $0x30] sm:$0xff]   ;;  %v4102_v7 = vpop.permute.xlu1 %4101 }
 0xd65   :  { %v4088_v6 = vpack.c.bf16 %v4066_v5, %v4064_v24  ;;  %v4090_v49 = vpack.c.bf16 %v4070_v48, %v4068_v53  ;;  %v4106_v5 = vpop.permute.xlu0 %4105 }
 0xd66   :  { %v4089_v60 = vpack.c.bf16 %v4067_v37, %v4065_v19  ;;  %v4091_v4 = vpack.c.bf16 %v4071_v25, %v4069_v12 }
 0xd68   :  { %4232 = vmatprep.subr.bf16.mxu1 %v4089_v60 }
 0xd69   :  { %4233 = vmatpush1.bf16.msra.mxu1 %v4088_v6 }
 0xd6a   :  { %4234 = vmatprep.subr.bf16.mxu1 %v4091_v4 }
 0xd6d   :  { %4235 = vmatpush1.bf16.msra.mxu1 %v4090_v49 }
 0xd70   :  { %10743 = vmatmul.mubr.msk.bf16.vlgmr.msra.gmra.mrb[80].mxu1 %vm222_vm0, %v12919_v26 }
 0xd71   :  { %4274 = vmatprep.mubr.bf16.mxu1 %v19747_v17 }
 0xd78   :  { %10744 = vmatmul.mubr.msk.bf16.gmra.mrb[84].mxu1 %vm222_vm0, %v12920_v13 }
 0xd79   :  { %4284 = vmatprep.mubr.bf16.mxu1 %v19747_v17 }
 0xd80   :  { %10745 = vmatmul.mubr.msk.bf16.gmra.mrb[88].mxu1 %vm222_vm0, %v12921_v21 }
 0xd81   :  { %4294 = vmatprep.mubr.bf16.mxu1 %v19747_v17 }
 0xd88   :  { %10746 = vmatmul.mubr.msk.bf16.gmra.mrb[92].mxu1 %vm222_vm0, %v12922_v51 }
 0xd89   :  { %4304 = vmatprep.mubr.bf16.mxu1 %v19747_v17 }
 0xd90   :  { %10747 = vmatmul.mubr.msk.bf16.gmra.mrb[96].mxu1 %vm222_vm0, %v12923_v33 }
 0xd91   :  { %4314 = vmatprep.mubr.bf16.mxu1 %v19747_v17 }
 0xd98   :  { %10748 = vmatmul.mubr.msk.bf16.gmra.mrb[100].mxu1 %vm222_vm0, %v12924_v50 }
 0xd99   :  { %4324 = vmatprep.mubr.bf16.mxu1 %v19747_v17 }
 0xda0   :  { %10749 = vmatmul.mubr.msk.bf16.gmra.mrb[104].mxu1 %vm222_vm0, %v12925_v36 }
 0xda1   :  { %4334 = vmatprep.mubr.bf16.mxu1 %v19747_v17 }
 0xda8   :  { %10750 = vmatmul.mubr.msk.bf16.gmra.mrb[108].mxu1 %vm222_vm0, %v12926_v44 }
 0xda9   :  { %5507 = vmatprep.mubr.bf16.mxu1 %v19747_v17 }
 0xe43   :  { %v4266_v61 = vpop.f32.mrb[80].mxu1 }
 0xe44   :  { %v16062_v9 = vadd.f32 %v4266_v61, %v4094_v52  ;;  %v4268_v39 = vpop.f32.mrb[81].mxu1 }
 0xe45   :  { %v16064_v30 = vadd.f32 %v4268_v39, %v4094_v52  ;;  %v4270_v63 = vpop.f32.mrb[82].mxu1 }
 0xe46   :  { %v16067_v35 = vmul.f32 0.70710677, %v16062_v9  ;;  %v16069_v34 = vadd.f32 %v4270_v63, %v4098_v45  ;;  %v4272_v62 = vpop.f32.mrb[83].mxu1 }
 0xe47   :  { %v16072_v3 = vmul.f32 0.70710677, %v16064_v30  ;;  %v16074_v16 = vadd.f32 %v4272_v62, %v4098_v45 }
 0xe48   :  { %v4409_v1 = vand.u32 2147483647, %v16067_v35  ;;  %v16078_v38 = vmul.f32 0.70710677, %v16069_v34  ;;  %vm5017_vm4 = vcmp.ge.f32.partialorder %v16067_v35, 0.0 }
 0xe49   :  { %v16081_v43 = vand.u32 2147483647, %v16072_v3  ;;  %v16084_v40 = vmul.f32 0.70710677, %v16074_v16  ;;  %vm5018_vm8 = vcmp.ge.f32.partialorder %v16072_v3, 0.0 }
 0xe4a   :  { %v4441_v10 = vmul.f32 0.3275911, %v4409_v1  ;;  %v4411_v56 = vand.u32 2147483647, %v16078_v38  ;;  %v4825_v53 = vsub.f32 0.0, %v4409_v1  ;;  %vm5019_vm5 = vcmp.ge.f32.partialorder %v16078_v38, 0.0 }
 0xe4b   :  { %v4442_v11 = vmul.f32 0.3275911, %v16081_v43  ;;  %v16089_v32 = vand.u32 2147483647, %v16084_v40  ;;  %v4276_v2 = vpop.f32.mrb[84].mxu1  ;;  %vm5020_vm9 = vcmp.ge.f32.partialorder %v16084_v40, 0.0 }
 0xe4c   :  { %v4473_v29 = vadd.f32 1.0, %v4441_v10  ;;  %v4443_v55 = vmul.f32 0.3275911, %v4411_v56  ;;  %v4278_v8 = vpop.f32.mrb[85].mxu1  ;;  %v16092_v27 = vadd.f32 %v4276_v2, %v4102_v7  ;;  %v4857_v44 = vmul.f32 %v4825_v53, %v4409_v1 }
 0xe4d   :  { %v4474_v31 = vadd.f32 1.0, %v4442_v11  ;;  %v4444_v20 = vmul.f32 0.3275911, %v16089_v32  ;;  %v4280_v42 = vpop.f32.mrb[86].mxu1  ;;  %v16094_v54 = vadd.f32 %v4278_v8, %v4102_v7  ;;  %v4827_v52 = vsub.f32 0.0, %v4411_v56 }
 0xe4e   :  { %13468 = vrcp.f32 %v4473_v29  ;;  %v4475_v57 = vadd.f32 1.0, %v4443_v55  ;;  %v4282_v58 = vpop.f32.mrb[87].mxu1  ;;  %v16096_v19 = vadd.f32 %v4280_v42, %v4106_v5  ;;  %v16099_v37 = vmul.f32 0.70710677, %v16092_v27 }
 0xe4f   :  { %13470 = vrcp.f32 %v4474_v31  ;;  %v4476_v24 = vadd.f32 1.0, %v4444_v20  ;;  %v16101_v12 = vadd.f32 %v4282_v58, %v4106_v5  ;;  %v16104_v25 = vmul.f32 0.70710677, %v16094_v54 }
 0xe50   :  { %13472 = vrcp.f32 %v4475_v57  ;;  %v16107_v60 = vmul.f32 0.70710677, %v16096_v19  ;;  %v4413_v48 = vand.u32 2147483647, %v16099_v37  ;;  %v4889_v31 = vmul.f32 1.442695, %v4857_v44 }
 0xe51   :  { %13474 = vrcp.f32 %v4476_v24  ;;  %v16113_v49 = vand.u32 2147483647, %v16104_v25  ;;  %v16121_v51 = vmul.f32 0.70710677, %v16101_v12  ;;  %v4859_v7 = vmul.f32 %v4827_v52, %v4411_v56  ;;  %v16143_v24 = vpop.permute.xlu1 %4110 }
 0xe52   :  { %v16116_v26 = vand.u32 2147483647, %v16107_v60  ;;  %v4445_v21 = vmul.f32 0.3275911, %v4413_v48  ;;  %v4829_v8 = vsub.f32 0.0, %v4413_v48  ;;  %v4828_v47 = vsub.f32 0.0, %v16089_v32 }
 0xe53   :  { %v4286_v6 = vpop.f32.mrb[88].mxu1  ;;  %v4446_v33 = vmul.f32 0.3275911, %v16113_v49  ;;  %v16128_v45 = vand.u32 2147483647, %v16121_v51  ;;  %vm5021_vm6 = vcmp.ge.f32.partialorder %v16099_v37, 0.0 }
 0xe54   :  { %v16110_v4 = vpop.f32.mrb[89].mxu1  ;;  %v4447_v50 = vmul.f32 0.3275911, %v16116_v26  ;;  %v4477_v61 = vadd.f32 1.0, %v4445_v21  ;;  %v4826_v21 = vsub.f32 0.0, %v16081_v43  ;;  %vm5023_vm7 = vcmp.ge.f32.partialorder %v16107_v60, 0.0 }
 0xe55   :  { %v16118_v13 = vpop.f32.mrb[90].mxu1  ;;  %v4478_v10 = vadd.f32 1.0, %v4446_v33  ;;  %v4448_v1 = vmul.f32 0.3275911, %v16128_v45  ;;  %v16234_v35 = vadd.f32 %v16110_v4, %v16143_v24  ;;  %vm5022_vm10 = vcmp.ge.f32.partialorder %v16104_v25, 0.0 }
 0xe56   :  { %v16130_v39 = vpop.f32.mrb[91].mxu1  ;;  %13476 = vrcp.f32 %v4477_v61  ;;  %v4479_v29 = vadd.f32 1.0, %v4447_v50  ;;  %v16151_v50 = vadd.f32 %v4286_v6, %v16143_v24  ;;  %vm5024_vm12 = vcmp.ge.f32.partialorder %v16121_v51, 0.0 }
 0xe57   :  { %13478 = vrcp.f32 %v4478_v10  ;;  %v4480_v33 = vadd.f32 1.0, %v4448_v1  ;;  %v4893_v10 = vmul.f32 1.442695, %v4859_v7 }
 0xe58   :  { %v16125_v36 = vpop.eup %13468  ;;  %13480 = vrcp.f32 %v4479_v29  ;;  %v16162_v6 = vmul.f32 0.70710677, %v16151_v50 }
 0xe59   :  { %v16132_v63 = vpop.eup %13470  ;;  %v4537_v62 = vmul.f32 1.0614054, %v16125_v36  ;;  %13482 = vpow2.f32 %v4889_v31  ;;  %v4831_v31 = vsub.f32 0.0, %v16116_v26 }
 0xe5a   :  { %v4538_v11 = vmul.f32 1.0614054, %v16132_v63  ;;  %v16137_v2 = vpop.eup %13472  ;;  %13484 = vrcp.f32 %v4480_v33  ;;  %v16172_v7 = vand.u32 2147483647, %v16162_v6  ;;  %vm5025_vm11 = vcmp.ge.f32.partialorder %v16162_v6, 0.0 }
 0xe5b   :  { %v4569_v55 = vadd.f32 -1.4531521, %v4537_v62  ;;  %v16139_v57 = vpop.f32.mrb[92].mxu1  ;;  %v4539_v58 = vmul.f32 1.0614054, %v16137_v2  ;;  %v16147_v53 = vpop.eup %13474  ;;  %13486 = vpow2.f32 %v4893_v10 }
 0xe5c   :  { %v4570_v20 = vadd.f32 -1.4531521, %v4538_v11  ;;  %v16145_v5 = vpop.f32.mrb[93].mxu1  ;;  %v4540_v61 = vmul.f32 1.0614054, %v16147_v53  ;;  %v4861_v11 = vmul.f32 %v4829_v8, %v4413_v48 }
 0xe5d   :  { %v4601_v42 = vmul.f32 %v16125_v36, %v4569_v55  ;;  %v16153_v56 = vpop.f32.mrb[94].mxu1  ;;  %v4571_v52 = vadd.f32 -1.4531521, %v4539_v58  ;;  %v16168_v58 = vmul.f32 0.5, %v16069_v34 }
 0xe5e   :  { %v4602_v62 = vmul.f32 %v16132_v63, %v4570_v20  ;;  %v16157_v55 = vpop.f32.mrb[95].mxu1  ;;  %v4572_v1 = vadd.f32 -1.4531521, %v4540_v61  ;;  %v4897_v33 = vmul.f32 1.442695, %v4861_v11 }
 0xe5f   :  { %v4633_v44 = vadd.f32 1.4214138, %v4601_v42  ;;  %v4603_v29 = vmul.f32 %v16137_v2, %v4571_v52  ;;  %v16165_v42 = vmul.f32 0.5, %v16062_v9  ;;  %v4858_v52 = vmul.f32 %v4826_v21, %v16081_v43 }
 0xe60   :  { %v16174_v8 = vpop.eup %13476  ;;  %v4604_v9 = vmul.f32 %v16147_v53, %v4572_v1  ;;  %v4449_v43 = vmul.f32 0.3275911, %v16172_v7 }
 0xe61   :  { %v4665_v46 = vmul.f32 %v16125_v36, %v4633_v44  ;;  %v4635_v20 = vadd.f32 1.4214138, %v4603_v29  ;;  %v4634_v44 = vadd.f32 1.4214138, %v4602_v62  ;;  %v16178_v61 = vpop.eup %13478  ;;  %v4891_v28 = vmul.f32 1.442695, %v4858_v52 }
 0xe62   :  { %v4542_v62 = vmul.f32 1.0614054, %v16178_v61  ;;  %v16191_v15 = vpop.eup %13480  ;;  %v4481_v59 = vadd.f32 1.0, %v4449_v43 }
 0xe63   :  { %v4697_v48 = vadd.f32 -0.28449672, %v4665_v46  ;;  %v4667_v41 = vmul.f32 %v16137_v2, %v4635_v20  ;;  %v4541_v46 = vmul.f32 1.0614054, %v16174_v8  ;;  %v16183_v29 = vpop.f32.mrb[96].mxu1  ;;  %v4666_v11 = vmul.f32 %v16132_v63, %v4634_v44 }
 0xe64   :  { %v16188_v21 = vpop.f32.mrb[97].mxu1  ;;  %v4636_v20 = vadd.f32 1.4214138, %v4604_v9  ;;  %v4574_v22 = vadd.f32 -1.4531521, %v4542_v62  ;;  %13488 = vrcp.f32 %v4481_v59 }
 0xe65   :  { %v4729_v34 = vmul.f32 %v16125_v36, %v4697_v48  ;;  %v4699_v1 = vadd.f32 -0.28449672, %v4667_v41  ;;  %v4573_v18 = vadd.f32 -1.4531521, %v4541_v46  ;;  %v4863_v48 = vmul.f32 %v4831_v31, %v16116_v26  ;;  %v16195_v0 = vpop.f32.mrb[98].mxu1  ;;  %v13483_v26 = vpop.eup %13482 }
 0xe66   :  { %v16200_v46 = vpop.f32.mrb[99].mxu1  ;;  %v4860_v31 = vmul.f32 %v4828_v47, %v16089_v32  ;;  %v4606_v23 = vmul.f32 %v16178_v61, %v4574_v22  ;;  %v4543_v44 = vmul.f32 1.0614054, %v16191_v15  ;;  %13490 = vpow2.f32 %v4897_v33  ;;  %v16207_v52 = vpop.eup %13484 }
 0xe67   :  { %v4761_v10 = vadd.f32 0.2548296, %v4729_v34  ;;  %v4731_v34 = vmul.f32 %v16137_v2, %v4699_v1  ;;  %v4605_v41 = vmul.f32 %v16174_v8, %v4573_v18  ;;  %19757 = vst [vmem:[#allocation11_spill] sm:$0xff] %v16200_v46  ;;  %v4668_v18 = vmul.f32 %v16147_v53, %v4636_v20 }
 0xe68   :  { %v4575_v1 = vadd.f32 -1.4531521, %v4543_v44  ;;  %v4901_v17 = vmul.f32 1.442695, %v4863_v48  ;;  %v4638_v32 = vadd.f32 1.4214138, %v4606_v23  ;;  %13492 = vpow2.f32 %v4891_v28 }
 0xe69   :  { %v4793_v14 = vmul.f32 %v16125_v36, %v4761_v10  ;;  %v4763_v62 = vadd.f32 0.2548296, %v4731_v34  ;;  %v4637_v43 = vadd.f32 1.4214138, %v4605_v41  ;;  %v4698_v10 = vadd.f32 -0.28449672, %v4666_v11 }
 0xe6a   :  { %v4895_v33 = vmul.f32 1.442695, %v4860_v31  ;;  %v4830_v34 = vsub.f32 0.0, %v16113_v49  ;;  %v4607_v41 = vmul.f32 %v16191_v15, %v4575_v1  ;;  %v4544_v44 = vmul.f32 1.0614054, %v16207_v52 }
 0xe6b   :  { %v4953_v9 = vmul.f32 %v13483_v26, %v4793_v14  ;;  %v16205_v36 = vpop.f32.mrb[100].mxu1  ;;  %v4795_v47 = vmul.f32 %v16137_v2, %v4763_v62  ;;  %v4669_v22 = vmul.f32 %v16174_v8, %v4637_v43  ;;  %v13487_v14 = vpop.eup %13486  ;;  %v4730_v23 = vmul.f32 %v16132_v63, %v4698_v10 }
 0xe6c   :  { %v16212_v59 = vpop.f32.mrb[101].mxu1  ;;  %v4639_v62 = vadd.f32 1.4214138, %v4607_v41  ;;  %13494 = vpow2.f32 %v4901_v17  ;;  %v4670_v1 = vmul.f32 %v16178_v61, %v4638_v32  ;;  %v4576_v17 = vadd.f32 -1.4531521, %v4544_v44 }
 0xe6d   :  { %v4985_v46 = vsub.f32 1.0, %v4953_v9  ;;  %v16216_v11 = vpop.f32.mrb[102].mxu1  ;;  %v4955_v26 = vmul.f32 %v13487_v14, %v4795_v47  ;;  %v4701_v48 = vadd.f32 -0.28449672, %v4669_v22  ;;  %v4700_v9 = vadd.f32 -0.28449672, %v4668_v18 }
 0xe6e   :  { %v16219_v2 = vpop.f32.mrb[103].mxu1  ;;  %v16228_v47 = vmul.f32 0.5, %v16092_v27  ;;  %v4862_v22 = vmul.f32 %v4830_v34, %v16113_v49  ;;  %v4671_v10 = vmul.f32 %v16191_v15, %v4639_v62  ;;  %v16238_v41 = vpop.eup %13488  ;;  %v4762_v38 = vadd.f32 0.2548296, %v4730_v23 }
 0xe6f   :  { %v5049_v20 = vsub.f32 0.0, %v4985_v46  ;;  %v4987_v31 = vsub.f32 1.0, %v4955_v26  ;;  %v4733_v43 = vmul.f32 %v16174_v8, %v4701_v48  ;;  %13496 = vpow2.f32 %v4895_v33 }
 0xe70   :  { %v4703_v27 = vadd.f32 -0.28449672, %v4671_v10  ;;  %v4732_v49 = vmul.f32 %v16147_v53, %v4700_v9  ;;  %v4702_v48 = vadd.f32 -0.28449672, %v4670_v1  ;;  %v4899_v4 = vmul.f32 1.442695, %v4862_v22 }
 0xe71   :  { %v5081_v28 = vsel %vm5017_vm4, %v4985_v46, %v5049_v20  ;;  %v5051_v18 = vsub.f32 0.0, %v4987_v31  ;;  %v4765_v14 = vadd.f32 0.2548296, %v4733_v43  ;;  %v13491_v20 = vpop.eup %13490  ;;  %v4832_v43 = vsub.f32 0.0, %v16128_v45 }
 0xe72   :  { %v5113_v32 = vadd.f32 1.0, %v5081_v28  ;;  %v4735_v24 = vmul.f32 %v16191_v15, %v4703_v27  ;;  %v4608_v33 = vmul.f32 %v16207_v52, %v4576_v17  ;;  %v4545_v28 = vmul.f32 1.0614054, %v16238_v41 }
 0xe73   :  { %v16236_v46 = vpop.f32.mrb[104].mxu1  ;;  %v5083_v26 = vsel %vm5019_vm5, %v4987_v31, %v5051_v18  ;;  %v4797_v34 = vmul.f32 %v16174_v8, %v4765_v14  ;;  %v16251_v9 = vmul.f32 0.70710677, %v16234_v35  ;;  %v13493_v31 = vpop.eup %13492  ;;  %v4794_v22 = vmul.f32 %v16132_v63, %v4762_v38 }
 0xe74   :  { %19758 = vst [vmem:[#allocation12_spill] sm:$0xff] %v16236_v46  ;;  %v16242_v44 = vpop.f32.mrb[105].mxu1  ;;  %v5115_v62 = vadd.f32 1.0, %v5083_v26  ;;  %v16256_v1 = vmul.f32 %v5113_v32, %v16165_v42  ;;  %v4767_v18 = vadd.f32 0.2548296, %v4735_v24  ;;  %v4734_v17 = vmul.f32 %v16178_v61, %v4702_v48  ;;  %v4116_v38 = vpop.permute.xlu0 %4115 }
 0xe75   :  { %v16246_v46 = vpop.f32.mrb[106].mxu1  ;;  %v4957_v23 = vmul.f32 %v13491_v20, %v4797_v34  ;;  %v4764_v14 = vadd.f32 0.2548296, %v4732_v49  ;;  %v4577_v20 = vadd.f32 -1.4531521, %v4545_v28  ;;  %13498 = vpow2.f32 %v4899_v4 }
 0xe76   :  { %v16253_v8 = vpop.f32.mrb[107].mxu1  ;;  %19760 = vst [vmem:[#allocation14_spill] sm:$0xff] %v16256_v1  ;;  %v16260_v10 = vmul.f32 %v5115_v62, %v16168_v58  ;;  %v13495_v26 = vpop.eup %13494  ;;  %v4833_v42 = vsub.f32 0.0, %v16172_v7  ;;  %v4640_v63 = vadd.f32 1.4214138, %v4608_v33  ;;  %v4954_v48 = vmul.f32 %v13493_v31, %v4794_v22 }
 0xe77   :  { %19759 = vst [vmem:[#allocation13_spill] sm:$0xff] %v16253_v8  ;;  %v4989_v27 = vsub.f32 1.0, %v4957_v23  ;;  %v4799_v8 = vmul.f32 %v16191_v15, %v4767_v18  ;;  %v4609_v58 = vmul.f32 %v16238_v41, %v4577_v20  ;;  %v16269_v49 = vand.u32 2147483647, %v16251_v9 }
 0xe78   :  { %19761 = vst [vmem:[#allocation15_spill] sm:$0xff] %v16260_v10  ;;  %v16275_v4 = vadd.f32 %v16118_v13, %v4116_v38  ;;  %v4796_v23 = vmul.f32 %v16147_v53, %v4764_v14  ;;  %v4766_v33 = vadd.f32 0.2548296, %v4734_v17  ;;  %v4351_v1 = vmul.f32 0.5, %v16096_v19 }
 0xe79   :  { %v5053_v32 = vsub.f32 0.0, %v4989_v27  ;;  %v4959_v24 = vmul.f32 %v13495_v26, %v4799_v8  ;;  %v4641_v28 = vadd.f32 1.4214138, %v4609_v58  ;;  %v4450_v18 = vmul.f32 0.3275911, %v16269_v49  ;;  %v13497_v20 = vpop.eup %13496 }
 0xe7a   :  { %v4864_v31 = vmul.f32 %v4832_v43, %v16128_v45  ;;  %v4672_v13 = vmul.f32 %v16207_v52, %v4640_v63  ;;  %v4865_v22 = vmul.f32 %v4833_v42, %v16172_v7  ;;  %v4986_v17 = vsub.f32 1.0, %v4954_v48 }
 0xe7b   :  { %v16271_v62 = vpop.f32.mrb[108].mxu1  ;;  %v5085_v34 = vsel %vm5021_vm6, %v4989_v27, %v5053_v32  ;;  %v4991_v10 = vsub.f32 1.0, %v4959_v24  ;;  %v4673_v8 = vmul.f32 %v16238_v41, %v4641_v28  ;;  %v4482_v53 = vadd.f32 1.0, %v4450_v18  ;;  %v4121_v28 = vpop.permute.xlu1 %4120 }
 0xe7c   :  { %19762 = vst [vmem:[#allocation16_spill] sm:$0xff] %v16271_v62  ;;  %v16277_v15 = vpop.f32.mrb[109].mxu1  ;;  %v16292_v19 = vmul.f32 0.70710677, %v16275_v4  ;;  %v4956_v26 = vmul.f32 %v13497_v20, %v4796_v23  ;;  %v5117_v45 = vadd.f32 1.0, %v5085_v34  ;;  %v4798_v43 = vmul.f32 %v16178_v61, %v4766_v33 }
 0xe7d   :  { %19763 = vst [vmem:[#allocation17_spill] sm:$0xff] %v16277_v15  ;;  %v16283_v37 = vpop.f32.mrb[110].mxu1  ;;  %v5055_v27 = vsub.f32 0.0, %v4991_v10  ;;  %13500 = vrcp.f32 %v4482_v53  ;;  %v4903_v63 = vmul.f32 1.442695, %v4864_v31  ;;  %v16297_v60 = vadd.f32 %v16130_v39, %v4116_v38 }
 0xe7e   :  { %19764 = vst [vmem:[#allocation18_spill] sm:$0xff] %v16283_v37  ;;  %v16288_v14 = vpop.f32.mrb[111].mxu1  ;;  %v4705_v58 = vadd.f32 -0.28449672, %v4673_v8  ;;  %v4419_v7 = vand.u32 2147483647, %v16292_v19  ;;  %v16301_v61 = vadd.f32 %v16139_v57, %v4121_v28  ;;  %v16304_v33 = vmul.f32 %v5117_v45, %v16228_v47 }
 0xe7f   :  { %19765 = vst [vmem:[#allocation19_spill] sm:$0xff] %v16288_v14  ;;  %v5087_v32 = vsel %vm5023_vm7, %v4991_v10, %v5055_v27  ;;  %v4704_v24 = vadd.f32 -0.28449672, %v4672_v13  ;;  %v4905_v48 = vmul.f32 1.442695, %v4865_v22  ;;  %v13499_v18 = vpop.eup %13498  ;;  %v4346_v14 = vmul.f32 0.5, %v16064_v30 }
 0xe80   :  { %v5119_v42 = vadd.f32 1.0, %v5087_v32  ;;  %v5050_v23 = vsub.f32 0.0, %v4986_v17  ;;  %v4451_v34 = vmul.f32 0.3275911, %v4419_v7  ;;  %v4988_v10 = vsub.f32 1.0, %v4956_v26  ;;  %19766 = vst [vmem:[#allocation20_spill] sm:$0xff] %v16304_v33 }
 0xe81   :  { %v4958_v20 = vmul.f32 %v13499_v18, %v4798_v43  ;;  %13502 = vpow2.f32 %v4903_v63  ;;  %v4737_v13 = vmul.f32 %v16238_v41, %v4705_v58  ;;  %v16310_v38 = vmul.f32 0.70710677, %v16297_v60 }
 0xe82   :  { %v16306_v31 = vmul.f32 %v5119_v42, %v4351_v1  ;;  %v4483_v39 = vadd.f32 1.0, %v4451_v34  ;;  %v4736_v57 = vmul.f32 %v16207_v52, %v4704_v24  ;;  %13504 = vpow2.f32 %v4905_v48  ;;  %v4126_v24 = vpop.permute.xlu0 %4125 }
 0xe83   :  { %v16316_v8 = vmul.f32 0.70710677, %v16301_v61  ;;  %v4348_v47 = vmul.f32 0.5, %v16074_v16  ;;  %v16321_v1 = vand.u32 2147483647, %v16310_v38  ;;  %v5082_v22 = vsel %vm5018_vm8, %v4986_v17, %v5050_v23 }
 0xe84   :  { %19767 = vst [vmem:[#allocation21_spill] sm:$0xff] %v16306_v31  ;;  %13506 = vrcp.f32 %v4483_v39  ;;  %v5052_v53 = vsub.f32 0.0, %v4988_v10  ;;  %v4990_v27 = vsub.f32 1.0, %v4958_v20  ;;  %v16328_v45 = vmul.f32 0.5, %v16094_v54 }
 0xe85   :  { %v16324_v26 = vand.u32 2147483647, %v16316_v8  ;;  %v4769_v43 = vadd.f32 0.2548296, %v4737_v13  ;;  %v4452_v3 = vmul.f32 0.3275911, %v16321_v1  ;;  %v16338_v58 = vadd.f32 %v16145_v5, %v4121_v28 }
 0xe86   :  { %v16334_v16 = vmul.f32 0.5, %v16101_v12  ;;  %v4768_v63 = vadd.f32 0.2548296, %v4736_v57  ;;  %v5114_v42 = vadd.f32 1.0, %v5082_v22  ;;  %v4835_v54 = vsub.f32 0.0, %v4419_v7 }
 0xe87   :  { %v16331_v32 = vpop.eup %13500  ;;  %v4453_v17 = vmul.f32 0.3275911, %v16324_v26  ;;  %v4484_v48 = vadd.f32 1.0, %v4452_v3  ;;  %v5084_v18 = vsel %vm5020_vm9, %v4988_v10, %v5052_v53  ;;  %v5054_v23 = vsub.f32 0.0, %v4990_v27 }
 0xe88   :  { %v4546_v40 = vmul.f32 1.0614054, %v16331_v32  ;;  %v16342_v20 = vadd.f32 %v16153_v56, %v4126_v24  ;;  %v4801_v12 = vmul.f32 %v16238_v41, %v4769_v43  ;;  %v4834_v13 = vsub.f32 0.0, %v16269_v49 }
 0xe89   :  { %v4485_v34 = vadd.f32 1.0, %v4453_v17  ;;  %13508 = vrcp.f32 %v4484_v48  ;;  %v16347_v5 = vmul.f32 0.70710677, %v16338_v58  ;;  %v4800_v28 = vmul.f32 %v16207_v52, %v4768_v63 }
 0xe8a   :  { %v4578_v39 = vadd.f32 -1.4531521, %v4546_v40  ;;  %v16352_v57 = vmul.f32 0.5, %v16151_v50  ;;  %v16355_v56 = vmul.f32 0.5, %v16234_v35  ;;  %v4867_v41 = vmul.f32 %v4835_v54, %v4419_v7 }
 0xe8b   :  { %13510 = vrcp.f32 %v4485_v34  ;;  %v13503_v10 = vpop.eup %13502  ;;  %v16358_v22 = vand.u32 2147483647, %v16347_v5  ;;  %v16360_v43 = vmul.f32 %v5114_v42, %v4346_v14  ;;  %v5116_v3 = vadd.f32 1.0, %v5084_v18 }
 0xe8c   :  { %v13505_v53 = vpop.eup %13504  ;;  %v16363_v25 = vmul.f32 0.70710677, %v16342_v20  ;;  %v16366_v52 = vadd.f32 %v16157_v55, %v4126_v24  ;;  %v5086_v50 = vsel %vm5022_vm10, %v4990_v27, %v5054_v23  ;;  %v4866_v35 = vmul.f32 %v4834_v13, %v16269_v49 }
 0xe8d   :  { %19768 = vst [vmem:[#allocation22_spill] sm:$0xff] %v16360_v43  ;;  %v4961_v17 = vmul.f32 %v13505_v53, %v4801_v12  ;;  %v4454_v7 = vmul.f32 0.3275911, %v16358_v22  ;;  %v16372_v40 = vmul.f32 %v13503_v10, %v4800_v28  ;;  %v4610_v14 = vmul.f32 %v16331_v32, %v4578_v39 }
 0xe8e   :  { %v16368_v63 = vpop.eup %13506  ;;  %v16377_v54 = vand.u32 2147483647, %v16363_v25  ;;  %v4909_v48 = vmul.f32 1.442695, %v4867_v41  ;;  %v4837_v55 = vsub.f32 0.0, %v16324_v26  ;;  %v16383_v18 = vmul.f32 %v5116_v3, %v4348_v47  ;;  %v4131_v3 = vpop.permute.xlu1 %4130 }
 0xe8f   :  { %v4547_v42 = vmul.f32 1.0614054, %v16368_v63  ;;  %v4486_v24 = vadd.f32 1.0, %v4454_v7  ;;  %v16381_v27 = vmul.f32 0.70710677, %v16366_v52  ;;  %v16387_v49 = vmul.f32 0.5, %v16275_v4 }
 0xe90   :  { %19769 = vst [vmem:[#allocation23_spill] sm:$0xff] %v16383_v18  ;;  %v4455_v34 = vmul.f32 0.3275911, %v16377_v54  ;;  %v16390_v12 = vadd.f32 1.0, %v5086_v50  ;;  %v4993_v13 = vsub.f32 1.0, %v4961_v17  ;;  %v4992_v39 = vsub.f32 1.0, %v16372_v40 }
 0xe91   :  { %v4579_v23 = vadd.f32 -1.4531521, %v4547_v42  ;;  %13512 = vrcp.f32 %v4486_v24  ;;  %v16393_v28 = vand.u32 2147483647, %v16381_v27  ;;  %v4642_v10 = vadd.f32 1.4214138, %v4610_v14 }
 0xe92   :  { %v4487_v41 = vadd.f32 1.0, %v4455_v34  ;;  %v4907_v4 = vmul.f32 1.442695, %v4866_v35  ;;  %13514 = vpow2.f32 %v4909_v48  ;;  %v4869_v7 = vmul.f32 %v4837_v55, %v16324_v26 }
 0xe93   :  { %v4611_v47 = vmul.f32 %v16368_v63, %v4579_v23  ;;  %v16397_v53 = vpop.eup %13508  ;;  %v4456_v50 = vmul.f32 0.3275911, %v16393_v28  ;;  %v16406_v14 = vadd.f32 %v16183_v29, %v4131_v3  ;;  %v5057_v24 = vsub.f32 0.0, %v4993_v13 }
 0xe94   :  { %v4548_v40 = vmul.f32 1.0614054, %v16397_v53  ;;  %13516 = vrcp.f32 %v4487_v41  ;;  %v4836_v35 = vsub.f32 0.0, %v16321_v1  ;;  %v5056_v26 = vsub.f32 0.0, %v4992_v39 }
 0xe95   :  { %v16401_v17 = vpop.eup %13510  ;;  %v4643_v42 = vadd.f32 1.4214138, %v4611_v47  ;;  %v4488_v23 = vadd.f32 1.0, %v4456_v50  ;;  %v4674_v55 = vmul.f32 %v16331_v32, %v4642_v10  ;;  %v16413_v47 = vmul.f32 0.5, %v16297_v60 }
 0xe96   :  { %v4549_v48 = vmul.f32 1.0614054, %v16401_v17  ;;  %v4580_v30 = vadd.f32 -1.4531521, %v4548_v40  ;;  %v4913_v41 = vmul.f32 1.442695, %v4869_v7  ;;  %v16420_v50 = vadd.f32 %v16188_v21, %v4131_v3 }
 0xe97   :  { %v4675_v34 = vmul.f32 %v16368_v63, %v4643_v42  ;;  %13518 = vrcp.f32 %v4488_v23  ;;  %v16417_v37 = vmul.f32 0.70710677, %v16406_v14  ;;  %v5089_v10 = vsel %vm5025_vm11, %v4993_v13, %v5057_v24 }
 0xe98   :  { %v4581_v33 = vadd.f32 -1.4531521, %v4549_v48  ;;  %v4612_v31 = vmul.f32 %v16397_v53, %v4580_v30  ;;  %v4868_v42 = vmul.f32 %v4836_v35, %v16321_v1  ;;  %v16426_v60 = vmul.f32 0.5, %v16301_v61 }
 0xe99   :  { %v4707_v29 = vadd.f32 -0.28449672, %v4675_v34  ;;  %v4706_v40 = vadd.f32 -0.28449672, %v4674_v55  ;;  %v4839_v30 = vsub.f32 0.0, %v16377_v54  ;;  %13520 = vpow2.f32 %v4907_v4 }
 0xe9a   :  { %v4613_v7 = vmul.f32 %v16401_v17, %v4581_v33  ;;  %v16432_v23 = vand.u32 2147483647, %v16417_v37  ;;  %v4644_v6 = vadd.f32 1.4214138, %v4612_v31  ;;  %v16437_v1 = vmul.f32 0.70710677, %v16420_v50 }
 0xe9b   :  { %v4739_v48 = vmul.f32 %v16368_v63, %v4707_v29  ;;  %v16434_v21 = vpop.eup %13512  ;;  %13522 = vpow2.f32 %v4913_v41  ;;  %v5088_v35 = vsel %vm5024_vm12, %v4992_v39, %v5056_v26  ;;  %v5121_v55 = vadd.f32 1.0, %v5089_v10 }
 0xe9c   :  { %v4645_v13 = vadd.f32 1.4214138, %v4613_v7  ;;  %19770 = vst [vmem:[#allocation24_spill] sm:$0xff] %v16437_v1  ;;  %v4550_v33 = vmul.f32 1.0614054, %v16434_v21  ;;  %v13515_v24 = vpop.eup %13514  ;;  %vm5027_vm13 = vcmp.ge.f32.partialorder %v16292_v19, 0.0  ;;  %v4871_v41 = vmul.f32 %v4839_v30, %v16377_v54  ;;  %v4136_v19 = vpop.permute.xlu0 %4135 }
 0xe9d   :  { %v4771_v61 = vadd.f32 0.2548296, %v4739_v48  ;;  %v4457_v3 = vmul.f32 0.3275911, %v16432_v23  ;;  %v4911_v34 = vmul.f32 1.442695, %v4868_v42  ;;  %v4738_v15 = vmul.f32 %v16331_v32, %v4706_v40 }
 0xe9e   :  { %v4677_v31 = vmul.f32 %v16401_v17, %v4645_v13  ;;  %v16445_v4 = vpop.eup %13516  ;;  %v4582_v7 = vadd.f32 -1.4531521, %v4550_v33  ;;  %v4838_v51 = vsub.f32 0.0, %v16358_v22  ;;  %v4676_v10 = vmul.f32 %v16397_v53, %v4644_v6 }
 0xe9f   :  { %v4803_v29 = vmul.f32 %v16368_v63, %v4771_v61  ;;  %v4489_v48 = vadd.f32 1.0, %v4457_v3  ;;  %v4551_v39 = vmul.f32 1.0614054, %v16445_v4  ;;  %v16455_v13 = vand.u32 2147483647, %v16437_v1 }
 0xea0   :  { %v4709_v18 = vadd.f32 -0.28449672, %v4677_v31  ;;  %v4614_v42 = vmul.f32 %v16434_v21, %v4582_v7  ;;  %v16460_v54 = vmul.f32 %v5121_v55, %v16352_v57  ;;  %v4917_v3 = vmul.f32 1.442695, %v4871_v41 }
 0xea1   :  { %v4963_v26 = vmul.f32 %v13515_v24, %v4803_v29  ;;  %v16457_v63 = vpop.eup %13518  ;;  %v4583_v30 = vadd.f32 -1.4531521, %v4551_v39  ;;  %13524 = vrcp.f32 %v4489_v48  ;;  %v4840_v24 = vsub.f32 0.0, %v16393_v28 }
 0xea2   :  { %v4741_v40 = vmul.f32 %v16401_v17, %v4709_v18  ;;  %v4646_v33 = vadd.f32 1.4214138, %v4614_v42  ;;  %v4770_v6 = vadd.f32 0.2548296, %v4738_v15  ;;  %v4552_v7 = vmul.f32 1.0614054, %v16457_v63 }
 0xea3   :  { %v4995_v61 = vsub.f32 1.0, %v4963_v26  ;;  %v4615_v29 = vmul.f32 %v16445_v4, %v4583_v30  ;;  %v4708_v62 = vadd.f32 -0.28449672, %v4676_v10  ;;  %v4870_v57 = vmul.f32 %v4838_v51, %v16358_v22  ;;  %v13521_v18 = vpop.eup %13520 }
 0xea4   :  { %v4773_v31 = vadd.f32 0.2548296, %v4741_v40  ;;  %v4458_v55 = vmul.f32 0.3275911, %v16455_v13  ;;  %v4678_v39 = vmul.f32 %v16434_v21, %v4646_v33  ;;  %v4584_v26 = vadd.f32 -1.4531521, %v4552_v7 }
 0xea5   :  { %v5059_v43 = vsub.f32 0.0, %v4995_v61  ;;  %v4647_v41 = vadd.f32 1.4214138, %v4615_v29  ;;  %v13523_v42 = vpop.eup %13522  ;;  %13526 = vpow2.f32 %v4917_v3  ;;  %v4872_v40 = vmul.f32 %v4840_v24, %v16393_v28 }
 0xea6   :  { %v4805_v48 = vmul.f32 %v16401_v17, %v4773_v31  ;;  %v4490_v30 = vadd.f32 1.0, %v4458_v55  ;;  %v4616_v51 = vmul.f32 %v16457_v63, %v4584_v26  ;;  %v4802_v17 = vmul.f32 %v16331_v32, %v4770_v6 }
 0xea7   :  { %v5091_v15 = vsel %vm5027_vm13, %v4995_v61, %v5059_v43  ;;  %v4679_v22 = vmul.f32 %v16445_v4, %v4647_v41  ;;  %v4740_v33 = vmul.f32 %v16397_v53, %v4708_v62  ;;  %v4915_v31 = vmul.f32 1.442695, %v4870_v57 }
 0xea8   :  { %v5123_v10 = vadd.f32 1.0, %v5091_v15  ;;  %v4965_v1 = vmul.f32 %v13523_v42, %v4805_v48  ;;  %13528 = vrcp.f32 %v4490_v30  ;;  %v4710_v43 = vadd.f32 -0.28449672, %v4678_v39 }
 0xea9   :  { %v4711_v61 = vadd.f32 -0.28449672, %v4679_v22  ;;  %v4648_v28 = vadd.f32 1.4214138, %v4616_v51  ;;  %v16480_v3 = vadd.f32 1.0, %v5088_v35  ;;  %13530 = vpow2.f32 %v4911_v34 }
 0xeaa   :  { %v16478_v29 = vmul.f32 %v5123_v10, %v16387_v49  ;;  %v4919_v24 = vmul.f32 1.442695, %v4872_v40  ;;  %v16483_v7 = vadd.f32 %v16195_v0, %v4136_v19  ;;  %v4997_v32 = vsub.f32 1.0, %v4965_v1 }
 0xeab   :  { %v16485_v55 = vpop.eup %13524  ;;  %v4743_v49 = vmul.f32 %v16445_v4, %v4711_v61  ;;  %v4680_v6 = vmul.f32 %v16457_v63, %v4648_v28  ;;  %v16491_v57 = vmul.f32 %v13521_v18, %v4802_v17  ;;  %13532 = vpow2.f32 %v4915_v31  ;;  %v19771_v17 = vld [vmem:[#allocation11_spill] sm:$0xff] }
 0xeac   :  { %v5185_v62 = vpack.c.bf16 %v16478_v29, %v16460_v54  ;;  %v4553_v35 = vmul.f32 1.0614054, %v16485_v55  ;;  %v4841_v34 = vsub.f32 0.0, %v16432_v23  ;;  %v4772_v48 = vadd.f32 0.2548296, %v4740_v33 }
 0xead   :  { %v4742_v0 = vmul.f32 %v16434_v21, %v4710_v43  ;;  %v4775_v39 = vadd.f32 0.2548296, %v4743_v49  ;;  %v4712_v41 = vadd.f32 -0.28449672, %v4680_v6  ;;  %vm5029_vm14 = vcmp.ge.f32.partialorder %v16316_v8, 0.0 }
 0xeae   :  { %v16498_v1 = vmul.f32 0.5, %v16338_v58  ;;  %13534 = vpow2.f32 %v4919_v24  ;;  %v4585_v26 = vadd.f32 -1.4531521, %v4553_v35  ;;  %v5061_v42 = vsub.f32 0.0, %v4997_v32 }
 0xeaf   :  { %v4807_v18 = vmul.f32 %v16445_v4, %v4775_v39  ;;  %v4744_v15 = vmul.f32 %v16457_v63, %v4712_v41  ;;  %v16503_v40 = vmul.f32 0.70710677, %v16483_v7  ;;  %v13527_v30 = vpop.eup %13526  ;;  %v4994_v10 = vsub.f32 1.0, %v16491_v57 }
 0xeb0   :  { %v4617_v22 = vmul.f32 %v16485_v55, %v4585_v26  ;;  %v4873_v51 = vmul.f32 %v4841_v34, %v16432_v23  ;;  %v16509_v58 = vadd.f32 %v19771_v17, %v4136_v19  ;;  %v4804_v33 = vmul.f32 %v16397_v53, %v4772_v48 }
 0xeb1   :  { %v4774_v31 = vadd.f32 0.2548296, %v4742_v0  ;;  %v4967_v43 = vmul.f32 %v13527_v30, %v4807_v18  ;;  %v16513_v4 = vand.u32 2147483647, %v16503_v40  ;;  %v16519_v28 = vmul.f32 %v16390_v12, %v16328_v45 }
 0xeb2   :  { %v16515_v61 = vpop.eup %13528  ;;  %vm5026_vm15 = vcmp.ge.f32.partialorder %v16251_v9, 0.0  ;;  %v4776_v24 = vadd.f32 0.2548296, %v4744_v15  ;;  %v4649_v23 = vadd.f32 1.4214138, %v4617_v22  ;;  %v5093_v53 = vsel %vm5029_vm14, %v4997_v32, %v5061_v42 }
 0xeb3   :  { %v16523_v19 = vmul.f32 0.70710677, %v16509_v58  ;;  %v4999_v49 = vsub.f32 1.0, %v4967_v43  ;;  %v4554_v6 = vmul.f32 1.0614054, %v16515_v61  ;;  %v13531_v35 = vpop.eup %13530  ;;  %vm5031_vm2 = vcmp.ge.f32.partialorder %v16363_v25, 0.0 }
 0xeb4   :  { %v4459_v57 = vmul.f32 0.3275911, %v16513_v4  ;;  %v4681_v45 = vmul.f32 %v16485_v55, %v4649_v23  ;;  %v4921_v12 = vmul.f32 1.442695, %v4873_v51  ;;  %v4964_v48 = vmul.f32 %v13531_v35, %v4804_v33 }
 0xeb5   :  { %v16532_v34 = vand.u32 2147483647, %v16523_v19  ;;  %v4806_v0 = vmul.f32 %v16434_v21, %v4774_v31  ;;  %v5063_v39 = vsub.f32 0.0, %v4999_v49  ;;  %v4586_v8 = vadd.f32 -1.4531521, %v4554_v6  ;;  %v13533_v32 = vpop.eup %13532 }
 0xeb6   :  { %v5125_v41 = vadd.f32 1.0, %v5093_v53  ;;  %v4713_v26 = vadd.f32 -0.28449672, %v4681_v45  ;;  %v4491_v42 = vadd.f32 1.0, %v4459_v57  ;;  %v5058_v15 = vsub.f32 0.0, %v4994_v10  ;;  %v4141_v57 = vpop.permute.xlu1 %4140 }
 0xeb7   :  { %v4460_v18 = vmul.f32 0.3275911, %v16532_v34  ;;  %v4359_v30 = vmul.f32 0.5, %v16342_v20  ;;  %v5095_v22 = vsel %vm5031_vm2, %v4999_v49, %v5063_v39  ;;  %v4808_v51 = vmul.f32 %v16457_v63, %v4776_v24 }
 0xeb8   :  { %v13535_v17 = vpop.eup %13534  ;;  %vm5028_vm4 = vcmp.ge.f32.partialorder %v16310_v38, 0.0  ;;  %v5127_v21 = vadd.f32 1.0, %v5095_v22  ;;  %v4618_v33 = vmul.f32 %v16515_v61, %v4586_v8  ;;  %v4842_v31 = vsub.f32 0.0, %v16455_v13 }
 0xeb9   :  { %13536 = vrcp.f32 %v4491_v42  ;;  %v4996_v43 = vsub.f32 1.0, %v4964_v48  ;;  %v16544_v23 = vmul.f32 0.5, %v16366_v52  ;;  %v4745_v20 = vmul.f32 %v16485_v55, %v4713_v26 }
 0xeba   :  { %v4492_v53 = vadd.f32 1.0, %v4460_v18  ;;  %v16548_v25 = vmul.f32 %v5125_v41, %v16426_v60  ;;  %v4966_v63 = vmul.f32 %v13533_v32, %v4806_v0  ;;  %v16550_v24 = vmul.f32 %v5127_v21, %v4359_v30  ;;  %v4146_v0 = vpop.permute.xlu0 %4145 }
 0xebb   :  { %13538 = vpow2.f32 %v4921_v12  ;;  %v16554_v49 = vmul.f32 %v16480_v3, %v16334_v16  ;;  %v5090_v6 = vsel %vm5026_vm15, %v4994_v10, %v5058_v15  ;;  %v4968_v52 = vmul.f32 %v13535_v17, %v4808_v51 }
 0xebc   :  { %13540 = vrcp.f32 %v4492_v53  ;;  %v4650_v45 = vadd.f32 1.4214138, %v4618_v33  ;;  %v4874_v60 = vmul.f32 %v4842_v31, %v16455_v13  ;;  %v16562_v48 = vadd.f32 %v16205_v36, %v4141_v57 }
 0xebd   :  { %v5060_v12 = vsub.f32 0.0, %v4996_v43  ;;  %vm5030_vm5 = vcmp.ge.f32.partialorder %v16347_v5, 0.0  ;;  %v4777_v16 = vadd.f32 0.2548296, %v4745_v20  ;;  %v4843_v9 = vsub.f32 0.0, %v16513_v4 }
 0xebe   :  { %v16567_v3 = vadd.f32 %v16212_v59, %v4141_v57  ;;  %v4998_v10 = vsub.f32 1.0, %v4966_v63  ;;  %vm5032_vm6 = vcmp.ge.f32.partialorder %v16381_v27, 0.0  ;;  %v16571_v39 = vmul.f32 0.70710677, %v16562_v48 }
 0xebf   :  { %v16574_v13 = vadd.f32 %v16216_v11, %v4146_v0  ;;  %v5122_v36 = vadd.f32 1.0, %v5090_v6  ;;  %v5000_v8 = vsub.f32 1.0, %v4968_v52  ;;  %v16577_v32 = vmul.f32 0.5, %v16406_v14 }
 0xec0   :  { %v16580_v41 = vmul.f32 0.70710677, %v16567_v3  ;;  %v16583_v59 = vmul.f32 0.5, %v16420_v50  ;;  %v4682_v26 = vmul.f32 %v16515_v61, %v4650_v45  ;;  %v4923_v42 = vmul.f32 1.442695, %v4874_v60 }
 0xec1   :  { %v16587_v18 = vand.u32 2147483647, %v16571_v39  ;;  %v5092_v11 = vsel %vm5028_vm4, %v4996_v43, %v5060_v12  ;;  %v4809_v15 = vmul.f32 %v16485_v55, %v4777_v16  ;;  %v4875_v14 = vmul.f32 %v4843_v9, %v16513_v4 }
 0xec2   :  { %v16594_v30 = vand.u32 2147483647, %v16580_v41  ;;  %v5062_v50 = vsub.f32 0.0, %v4998_v10  ;;  %v4844_v51 = vsub.f32 0.0, %v16532_v34  ;;  %v16601_v21 = vmul.f32 0.70710677, %v16574_v13 }
 0xec3   :  { %v16596_v22 = vpop.eup %13536  ;;  %v4461_v17 = vmul.f32 0.3275911, %v16587_v18  ;;  %v16604_v38 = vmul.f32 %v5122_v36, %v16355_v56  ;;  %v5064_v33 = vsub.f32 0.0, %v5000_v8  ;;  %v5124_v43 = vadd.f32 1.0, %v5092_v11 }
 0xec4   :  { %v4555_v55 = vmul.f32 1.0614054, %v16596_v22  ;;  %v4462_v4 = vmul.f32 0.3275911, %v16594_v30  ;;  %v4714_v20 = vadd.f32 -0.28449672, %v4682_v26  ;;  %v5094_v56 = vsel %vm5030_vm5, %v4998_v10, %v5062_v50 }
 0xec5   :  { %v13539_v31 = vpop.eup %13538  ;;  %v4493_v53 = vadd.f32 1.0, %v4461_v17  ;;  %v16609_v63 = vand.u32 2147483647, %v16601_v21  ;;  %v4925_v45 = vmul.f32 1.442695, %v4875_v14  ;;  %v4876_v16 = vmul.f32 %v4844_v51, %v16532_v34 }
 0xec6   :  { %v16611_v6 = vpop.eup %13540  ;;  %v4969_v57 = vmul.f32 %v13539_v31, %v4809_v15  ;;  %v4587_v52 = vadd.f32 -1.4531521, %v4555_v55  ;;  %v4494_v60 = vadd.f32 1.0, %v4462_v4  ;;  %v5096_v9 = vsel %vm5032_vm6, %v5000_v8, %v5064_v33  ;;  %v19772_v4 = vld [vmem:[#allocation12_spill] sm:$0xff] }
 0xec7   :  { %v4556_v12 = vmul.f32 1.0614054, %v16611_v6  ;;  %13542 = vrcp.f32 %v4493_v53  ;;  %v16621_v26 = vadd.f32 %v16219_v2, %v4146_v0  ;;  %vm5033_vm7 = vcmp.ge.f32.partialorder %v16417_v37, 0.0  ;;  %v4151_v0 = vpop.permute.xlu1 %4150 }
 0xec8   :  { %v4619_v36 = vmul.f32 %v16596_v22, %v4587_v52  ;;  %13544 = vrcp.f32 %v4494_v60  ;;  %v4746_v11 = vmul.f32 %v16515_v61, %v4714_v20  ;;  %v16626_v5 = vmul.f32 0.5, %v16483_v7 }
 0xec9   :  { %13546 = vpow2.f32 %v4923_v42  ;;  %v4463_v34 = vmul.f32 0.3275911, %v16609_v63  ;;  %v5126_v10 = vadd.f32 1.0, %v5094_v56  ;;  %v5001_v15 = vsub.f32 1.0, %v4969_v57 }
 0xeca   :  { %v4651_v27 = vadd.f32 1.4214138, %v4619_v36  ;;  %13548 = vpow2.f32 %v4925_v45  ;;  %v5128_v8 = vadd.f32 1.0, %v5096_v9  ;;  %v4588_v14 = vadd.f32 -1.4531521, %v4556_v12 }
 0xecb   :  { %v4927_v50 = vmul.f32 1.442695, %v4876_v16  ;;  %v4495_v51 = vadd.f32 1.0, %v4463_v34  ;;  %v16630_v2 = vmul.f32 %v5124_v43, %v16413_v47  ;;  %v4845_v42 = vsub.f32 0.0, %v16587_v18 }
 0xecc   :  { %v4683_v17 = vmul.f32 %v16596_v22, %v4651_v27  ;;  %v16635_v7 = vmul.f32 0.70710677, %v16621_v26  ;;  %v4778_v33 = vadd.f32 0.2548296, %v4746_v11  ;;  %v16638_v55 = vmul.f32 0.5, %v16509_v58 }
 0xecd   :  { %13550 = vrcp.f32 %v4495_v51  ;;  %v16641_v31 = vadd.f32 %v19772_v4, %v4151_v0  ;;  %v16644_v20 = vmul.f32 %v5126_v10, %v16498_v1  ;;  %v5065_v47 = vsub.f32 0.0, %v5001_v15 }
 0xece   :  { %v4715_v43 = vadd.f32 -0.28449672, %v4683_v17  ;;  %v16647_v53 = vand.u32 2147483647, %v16635_v7  ;;  %v16650_v57 = vmul.f32 %v5128_v8, %v16544_v23  ;;  %v4620_v52 = vmul.f32 %v16611_v6, %v4588_v14 }
 0xecf   :  { %13552 = vpow2.f32 %v4927_v50  ;;  %v16654_v58 = vmul.f32 0.5, %v16562_v48  ;;  %v4877_v60 = vmul.f32 %v4845_v42, %v16587_v18  ;;  %v16659_v1 = vmul.f32 0.5, %v16567_v3 }
 0xed0   :  { %v4747_v45 = vmul.f32 %v16596_v22, %v4715_v43  ;;  %v4464_v56 = vmul.f32 0.3275911, %v16647_v53  ;;  %v4810_v23 = vmul.f32 %v16515_v61, %v4778_v33  ;;  %v4846_v16 = vsub.f32 0.0, %v16594_v30 }
 0xed1   :  { %v16662_v12 = vpop.eup %13542  ;;  %v4847_v9 = vsub.f32 0.0, %v16609_v63  ;;  %v16668_v48 = vmul.f32 0.70710677, %v16641_v31  ;;  %v5097_v18 = vsel %vm5033_vm7, %v5001_v15, %v5065_v47  ;;  %vm5035_vm8 = vcmp.ge.f32.partialorder %v16503_v40, 0.0 }
 0xed2   :  { %v16670_v36 = vpop.eup %13544  ;;  %v4779_v3 = vadd.f32 0.2548296, %v4747_v45  ;;  %v4557_v11 = vmul.f32 1.0614054, %v16662_v12  ;;  %v4496_v34 = vadd.f32 1.0, %v4464_v56  ;;  %v16681_v14 = vadd.f32 %v16242_v44, %v4151_v0 }
 0xed3   :  { %v13547_v10 = vpop.eup %13546  ;;  %v4652_v61 = vadd.f32 1.4214138, %v4620_v52  ;;  %v4558_v27 = vmul.f32 1.0614054, %v16670_v36  ;;  %v16678_v8 = vand.u32 2147483647, %v16668_v48  ;;  %v4879_v33 = vmul.f32 %v4847_v9, %v16609_v63 }
 0xed4   :  { %v13549_v50 = vpop.eup %13548  ;;  %v4811_v37 = vmul.f32 %v16596_v22, %v4779_v3  ;;  %v4589_v15 = vadd.f32 -1.4531521, %v4557_v11  ;;  %v4929_v51 = vmul.f32 1.442695, %v4877_v60  ;;  %13554 = vrcp.f32 %v4496_v34 }
 0xed5   :  { %v5129_v17 = vadd.f32 1.0, %v5097_v18  ;;  %v4590_v42 = vadd.f32 -1.4531521, %v4558_v27  ;;  %v4465_v4 = vmul.f32 0.3275911, %v16678_v8  ;;  %v16686_v47 = vmul.f32 %v13547_v10, %v4810_v23 }
 0xed6   :  { %v4971_v43 = vmul.f32 %v13549_v50, %v4811_v37  ;;  %v4621_v52 = vmul.f32 %v16662_v12, %v4589_v15  ;;  %v4878_v44 = vmul.f32 %v4846_v16, %v16594_v30  ;;  %v4684_v22 = vmul.f32 %v16611_v6, %v4652_v61 }
 0xed7   :  { %v16690_v0 = vpop.eup %13550  ;;  %v4622_v45 = vmul.f32 %v16670_v36, %v4590_v42  ;;  %v4497_v60 = vadd.f32 1.0, %v4465_v4  ;;  %v16695_v56 = vmul.f32 0.70710677, %v16681_v14  ;;  %13556 = vpow2.f32 %v4929_v51 }
 0xed8   :  { %v5003_v63 = vsub.f32 1.0, %v4971_v43  ;;  %v4653_v9 = vadd.f32 1.4214138, %v4621_v52  ;;  %v4559_v23 = vmul.f32 1.0614054, %v16690_v0  ;;  %v4848_v61 = vsub.f32 0.0, %v16647_v53  ;;  %v4156_v43 = vpop.permute.xlu0 %4155 }
 0xed9   :  { %v16698_v18 = vpop.eup %13552  ;;  %v4654_v3 = vadd.f32 1.4214138, %v4622_v45  ;;  %v4933_v11 = vmul.f32 1.442695, %v4879_v33  ;;  %13558 = vrcp.f32 %v4497_v60  ;;  %v16701_v30 = vand.u32 2147483647, %v16695_v56 }
 0xeda   :  { %v5067_v16 = vsub.f32 0.0, %v5003_v63  ;;  %v4685_v34 = vmul.f32 %v16662_v12, %v4653_v9  ;;  %v4591_v10 = vadd.f32 -1.4531521, %v4559_v23  ;;  %v16706_v27 = vmul.f32 %v5129_v17, %v16577_v32 }
 0xedb   :  { %v4716_v50 = vadd.f32 -0.28449672, %v4684_v22  ;;  %v4686_v37 = vmul.f32 %v16670_v36, %v4654_v3  ;;  %v4466_v15 = vmul.f32 0.3275911, %v16701_v30  ;;  %v5002_v51 = vsub.f32 1.0, %v16686_v47 }
 0xedc   :  { %v5099_v42 = vsel %vm5035_vm8, %v5003_v63, %v5067_v16  ;;  %v4717_v33 = vadd.f32 -0.28449672, %v4685_v34  ;;  %v4623_v4 = vmul.f32 %v16690_v0, %v4591_v10  ;;  %v4931_v45 = vmul.f32 1.442695, %v4878_v44  ;;  %v19773_v10 = vld [vmem:[#allocation24_spill] sm:$0xff] }
 0xedd   :  { %v5131_v52 = vadd.f32 1.0, %v5099_v42  ;;  %13560 = vpow2.f32 %v4933_v11  ;;  %v4498_v60 = vadd.f32 1.0, %v4466_v15  ;;  %v4880_v9 = vmul.f32 %v4848_v61, %v16647_v53 }
 0xede   :  { %v16714_v32 = vpop.eup %13554  ;;  %v4749_v17 = vmul.f32 %v16662_v12, %v4717_v33  ;;  %v4655_v22 = vadd.f32 1.4214138, %v4623_v4  ;;  %v16719_v23 = vadd.f32 %v16246_v46, %v4156_v43  ;;  %v4748_v63 = vmul.f32 %v16611_v6, %v4716_v50 }
 0xedf   :  { %v16722_v40 = vmul.f32 %v5131_v52, %v16626_v5  ;;  %v4718_v3 = vadd.f32 -0.28449672, %v4686_v37  ;;  %v4560_v44 = vmul.f32 1.0614054, %v16714_v32  ;;  %v16727_v16 = vmul.f32 0.5, %v16574_v13 }
 0xee0   :  { %v4781_v11 = vadd.f32 0.2548296, %v4749_v17  ;;  %v4687_v34 = vmul.f32 %v16690_v0, %v4655_v22  ;;  %13562 = vrcp.f32 %v4498_v60  ;;  %vm5034_vm9 = vcmp.ge.f32.partialorder %v19773_v10, 0.0 }
 0xee1   :  { %v5066_v46 = vsub.f32 0.0, %v5002_v51  ;;  %v4592_v53 = vadd.f32 -1.4531521, %v4560_v44  ;;  %v4849_v61 = vsub.f32 0.0, %v16678_v8  ;;  %v13557_v50 = vpop.eup %13556  ;;  %13564 = vpow2.f32 %v4931_v45  ;;  %v19774_v45 = vld [vmem:[#allocation13_spill] sm:$0xff] }
 0xee2   :  { %v4813_v37 = vmul.f32 %v16662_v12, %v4781_v11  ;;  %v4719_v13 = vadd.f32 -0.28449672, %v4687_v34  ;;  %v4935_v15 = vmul.f32 1.442695, %v4880_v9  ;;  %v4780_v33 = vadd.f32 0.2548296, %v4748_v63 }
 0xee3   :  { %v16737_v42 = vpop.eup %13558  ;;  %vm5037_vm10 = vcmp.ge.f32.partialorder %v16571_v39, 0.0  ;;  %v4750_v4 = vmul.f32 %v16670_v36, %v4718_v3  ;;  %v4624_v52 = vmul.f32 %v16714_v32, %v4592_v53  ;;  %v16743_v60 = vmul.f32 0.70710677, %v16719_v23 }
 0xee4   :  { %v4973_v17 = vmul.f32 %v13557_v50, %v4813_v37  ;;  %v4751_v22 = vmul.f32 %v16690_v0, %v4719_v13  ;;  %v4561_v12 = vmul.f32 1.0614054, %v16737_v42  ;;  %v16748_v44 = vadd.f32 %v19774_v45, %v4156_v43 }
 0xee5   :  { %v16751_v9 = vmul.f32 0.5, %v16621_v26  ;;  %v4656_v63 = vadd.f32 1.4214138, %v4624_v52  ;;  %v4881_v11 = vmul.f32 %v4849_v61, %v16678_v8  ;;  %v16755_v3 = vand.u32 2147483647, %v16743_v60 }
 0xee6   :  { %v5005_v34 = vsub.f32 1.0, %v4973_v17  ;;  %v4783_v53 = vadd.f32 0.2548296, %v4751_v22  ;;  %13566 = vpow2.f32 %v4935_v15  ;;  %v4593_v50 = vadd.f32 -1.4531521, %v4561_v12 }
 0xee7   :  { %v13561_v37 = vpop.eup %13560  ;;  %v4812_v13 = vmul.f32 %v16611_v6, %v4780_v33  ;;  %v4782_v5 = vadd.f32 0.2548296, %v4750_v4  ;;  %vm5039_vm11 = vcmp.ge.f32.partialorder %v16601_v21, 0.0  ;;  %v4688_v43 = vmul.f32 %v16714_v32, %v4656_v63 }
 0xee8   :  { %v4467_v26 = vmul.f32 0.3275911, %v16755_v3  ;;  %v5069_v52 = vsub.f32 0.0, %v5005_v34  ;;  %v4815_v8 = vmul.f32 %v16690_v0, %v4783_v53  ;;  %v4625_v61 = vmul.f32 %v16737_v42, %v4593_v50 }
 0xee9   :  { %v16764_v17 = vmul.f32 0.70710677, %v16748_v44  ;;  %v4720_v15 = vadd.f32 -0.28449672, %v4688_v43  ;;  %v4937_v22 = vmul.f32 1.442695, %v4881_v11  ;;  %v5098_v4 = vsel %vm5034_vm9, %v5002_v51, %v5066_v46  ;;  %v4161_v46 = vpop.permute.xlu1 %4160 }
 0xeea   :  { %v4850_v12 = vsub.f32 0.0, %v16701_v30  ;;  %v4499_v6 = vadd.f32 1.0, %v4467_v26  ;;  %v16767_v33 = vpop.eup %13562  ;;  %v4975_v45 = vmul.f32 %v13561_v37, %v4815_v8  ;;  %v4657_v63 = vadd.f32 1.4214138, %v4625_v61  ;;  %v19775_v61 = vld [vmem:[#allocation16_spill] sm:$0xff] }
 0xeeb   :  { %v16774_v0 = vand.u32 2147483647, %v16764_v17  ;;  %v16777_v53 = vmul.f32 %v16698_v18, %v4812_v13  ;;  %v4814_v11 = vmul.f32 %v16670_v36, %v4782_v5  ;;  %v4752_v50 = vmul.f32 %v16714_v32, %v4720_v15  ;;  %v13565_v26 = vpop.eup %13564 }
 0xeec   :  { %v4562_v43 = vmul.f32 1.0614054, %v16767_v33  ;;  %v5101_v47 = vsel %vm5037_vm10, %v5005_v34, %v5069_v52  ;;  %v5007_v10 = vsub.f32 1.0, %v4975_v45  ;;  %v4689_v51 = vmul.f32 %v16737_v42, %v4657_v63 }
 0xeed   :  { %13568 = vrcp.f32 %v4499_v6  ;;  %v4784_v37 = vadd.f32 0.2548296, %v4752_v50  ;;  %v4882_v18 = vmul.f32 %v4850_v12, %v16701_v30  ;;  %v4468_v5 = vmul.f32 0.3275911, %v16774_v0 }
 0xeee   :  { %13570 = vpow2.f32 %v4937_v22  ;;  %v4594_v8 = vadd.f32 -1.4531521, %v4562_v43  ;;  %v5071_v13 = vsub.f32 0.0, %v5007_v10  ;;  %v4721_v36 = vadd.f32 -0.28449672, %v4689_v51 }
 0xeef   :  { %v16788_v15 = vadd.f32 %v19775_v61, %v4161_v46  ;;  %v5133_v35 = vadd.f32 1.0, %v5101_v47  ;;  %v16790_v39 = vmul.f32 %v13565_v26, %v4814_v11  ;;  %v4816_v34 = vmul.f32 %v16714_v32, %v4784_v37 }
 0xef0   :  { %v4626_v52 = vmul.f32 %v16767_v33, %v4594_v8  ;;  %v13567_v6 = vpop.eup %13566  ;;  %vm5036_vm12 = vcmp.ge.f32.partialorder %v16523_v19, 0.0  ;;  %v5103_v30 = vsel %vm5039_vm11, %v5007_v10, %v5071_v13  ;;  %v4753_v22 = vmul.f32 %v16737_v42, %v4721_v36  ;;  %v19776_v13 = vld [vmem:[#allocation22_spill] sm:$0xff]  ;;  %v19777_v36 = vld [vmem:[#allocation23_spill] sm:$0xff] }
 0xef1   :  { %v4851_v12 = vsub.f32 0.0, %v16755_v3  ;;  %v4500_v45 = vadd.f32 1.0, %v4468_v5  ;;  %v5004_v63 = vsub.f32 1.0, %v16777_v53  ;;  %v5135_v50 = vadd.f32 1.0, %v5103_v30 }
 0xef2   :  { %v4976_v11 = vmul.f32 %v13567_v6, %v4816_v34  ;;  %v4658_v43 = vadd.f32 1.4214138, %v4626_v52  ;;  %v4785_v26 = vadd.f32 0.2548296, %v4753_v22  ;;  %v4939_v32 = vmul.f32 1.442695, %v4882_v18 }
 0xef3   :  { %13572 = vrcp.f32 %v4500_v45  ;;  %v16801_v47 = vmul.f32 0.70710677, %v16788_v15  ;;  %v5130_v51 = vadd.f32 1.0, %v5098_v4  ;;  %v16804_v21 = vmul.f32 %v5133_v35, %v16654_v58 }
 0xef4   :  { %vm5038_vm13 = vcmp.ge.f32.partialorder %v16580_v41, 0.0  ;;  %v16808_v10 = vmul.f32 %v5135_v50, %v16727_v16  ;;  %v4690_v53 = vmul.f32 %v16767_v33, %v4658_v43  ;;  %v5006_v37 = vsub.f32 1.0, %v16790_v39  ;;  %v4166_v16 = vpop.permute.xlu0 %4165  ;;  %v19779_v50 = vld [vmem:[#allocation15_spill] sm:$0xff] }
 0xef5   :  { %v4883_v8 = vmul.f32 %v4851_v12, %v16755_v3  ;;  %v4437_v18 = vand.u32 2147483647, %v16801_v47  ;;  %v5182_v5 = vpack.c.bf16 %v19777_v36, %v19776_v13  ;;  %v5068_v4 = vsub.f32 0.0, %v5004_v63  ;;  %v19778_v12 = vld [vmem:[#allocation17_spill] sm:$0xff] }
 0xef6   :  { %v5191_v35 = vpack.c.bf16 %v16808_v10, %v16804_v21  ;;  %v5008_v58 = vsub.f32 1.0, %v4976_v11  ;;  %v4722_v61 = vadd.f32 -0.28449672, %v4690_v53  ;;  %v4817_v52 = vmul.f32 %v16737_v42, %v4785_v26  ;;  %v19780_v11 = vld [vmem:[#allocation14_spill] sm:$0xff] }
 0xef7   :  { %v16818_v34 = vpop.eup %13568  ;;  %13574 = vpow2.f32 %v4939_v32  ;;  %v4852_v39 = vsub.f32 0.0, %v16774_v0  ;;  %v4469_v3 = vmul.f32 0.3275911, %v4437_v18  ;;  %5209 = vmatprep.subr.bf16.mxu0 %v5182_v5  ;;  %v16825_v45 = vadd.f32 %v19778_v12, %v4161_v46  ;;  %v19782_v53 = vld [vmem:[#allocation18_spill] sm:$0xff] }
 0xef8   :  { %v13571_v6 = vpop.eup %13570  ;;  %v4754_v30 = vmul.f32 %v16767_v33, %v4722_v61  ;;  %v4563_v22 = vmul.f32 1.0614054, %v16818_v34  ;;  %v19781_v43 = vpack.c.bf16 %v19779_v50, %v19780_v11  ;;  %v16831_v13 = vadd.f32 %v19782_v53, %v4166_v16  ;;  %v19784_v53 = vld [vmem:[#allocation21_spill] sm:$0xff] }
 0xef9   :  { %v16834_v42 = vmul.f32 %v5130_v51, %v16583_v59  ;;  %v5070_v26 = vsub.f32 0.0, %v5006_v37  ;;  %v4941_v32 = vmul.f32 1.442695, %v4883_v8  ;;  %v4501_v36 = vadd.f32 1.0, %v4469_v3 }
 0xefa   :  { %5210 = vmatpush1.bf16.msra.mxu0 %v19781_v43  ;;  %v5100_v5 = vsel %vm5036_vm12, %v5004_v63, %v5068_v4  ;;  %vm5040_vm14 = vcmp.ge.f32.partialorder %v16635_v7, 0.0  ;;  %v5072_v46 = vsub.f32 0.0, %v5008_v58  ;;  %v4595_v61 = vadd.f32 -1.4531521, %v4563_v22  ;;  %v19783_v7 = vld [vmem:[#allocation19_spill] sm:$0xff] }
 0xefb   :  { %v16840_v12 = vmul.f32 0.5, %v16641_v31  ;;  %v4977_v50 = vmul.f32 %v13571_v6, %v4817_v52  ;;  %v4786_v11 = vadd.f32 0.2548296, %v4754_v30  ;;  %13576 = vrcp.f32 %v4501_v36 }
 0xefc   :  { %v4627_v43 = vmul.f32 %v16818_v34, %v4595_v61  ;;  %v4884_v59 = vmul.f32 %v4852_v39, %v16774_v0  ;;  %v16845_v51 = vmul.f32 0.70710677, %v16825_v45  ;;  %v16848_v19 = vmul.f32 0.70710677, %v16831_v13 }
 0xefd   :  { %v16850_v63 = vpop.eup %13572  ;;  %v5132_v8 = vadd.f32 1.0, %v5100_v5  ;;  %v5102_v31 = vsel %vm5038_vm13, %v5006_v37, %v5070_v26  ;;  %13578 = vpow2.f32 %v4941_v32  ;;  %v5184_v4 = vpack.c.bf16 %v16554_v49, %v16519_v28  ;;  %v19785_v26 = vld [vmem:[#allocation20_spill] sm:$0xff] }
 0xefe   :  { %v5104_v52 = vsel %vm5040_vm14, %v5008_v58, %v5072_v46  ;;  %v4659_v0 = vadd.f32 1.4214138, %v4627_v43  ;;  %v4564_v39 = vmul.f32 1.0614054, %v16850_v63  ;;  %v4853_v3 = vsub.f32 0.0, %v4437_v18 }
 0xeff   :  { %v5009_v6 = vsub.f32 1.0, %v4977_v50  ;;  %v4818_v30 = vmul.f32 %v16767_v33, %v4786_v11  ;;  %v16861_v22 = vand.u32 2147483647, %v16845_v51  ;;  %v16864_v41 = vand.u32 2147483647, %v16848_v19  ;;  %5211 = vmatprep.subr.bf16.mxu0 %v5184_v4 }
 0xf00   :  { %v4691_v37 = vmul.f32 %v16818_v34, %v4659_v0  ;;  %v4596_v28 = vadd.f32 -1.4531521, %v4564_v39  ;;  %v4943_v49 = vmul.f32 1.442695, %v4884_v59  ;;  %v16868_v58 = vadd.f32 %v19783_v7, %v4166_v16 }
 0xf01   :  { %v19786_v32 = vpack.c.bf16 %v19784_v53, %v19785_v26  ;;  %v13575_v36 = vpop.eup %13574  ;;  %v5134_v33 = vadd.f32 1.0, %v5102_v31  ;;  %v5136_v5 = vadd.f32 1.0, %v5104_v52  ;;  %v4470_v46 = vmul.f32 0.3275911, %v16861_v22 }
 0xf02   :  { %v4471_v61 = vmul.f32 0.3275911, %v16864_v41  ;;  %vm5041_vm15 = vcmp.ge.f32.partialorder %v16668_v48, 0.0  ;;  %v4723_v50 = vadd.f32 -0.28449672, %v4691_v37  ;;  %v4628_v11 = vmul.f32 %v16850_v63, %v4596_v28 }
 0xf03   :  { %5212 = vmatpush1.bf16.msra.mxu0 %v19786_v32  ;;  %v4885_v43 = vmul.f32 %v4853_v3, %v4437_v18  ;;  %v5073_v59 = vsub.f32 0.0, %v5009_v6  ;;  %v4978_v16 = vmul.f32 %v13575_v36, %v4818_v30  ;;  %v4502_v4 = vadd.f32 1.0, %v4470_v46 }
 0xf04   :  { %v4503_v0 = vadd.f32 1.0, %v4471_v61  ;;  %v4755_v39 = vmul.f32 %v16818_v34, %v4723_v50  ;;  %v4660_v7 = vadd.f32 1.4214138, %v4628_v11  ;;  %13580 = vpow2.f32 %v4943_v49 }
 0xf05   :  { %v16879_v31 = vmul.f32 0.70710677, %v16868_v58  ;;  %v16881_v52 = vpop.eup %13576  ;;  %v16884_v53 = vmul.f32 %v5132_v8, %v16638_v55  ;;  %v16887_v37 = vmul.f32 %v5134_v33, %v16659_v1  ;;  %v16890_v18 = vmul.f32 %v5136_v5, %v16751_v9 }
 0xf06   :  { %13582 = vrcp.f32 %v4502_v4  ;;  %v4787_v3 = vadd.f32 0.2548296, %v4755_v39  ;;  %v4692_v30 = vmul.f32 %v16850_v63, %v4660_v7  ;;  %v4565_v28 = vmul.f32 1.0614054, %v16881_v52 }
 0xf07   :  { %13584 = vrcp.f32 %v4503_v0  ;;  %v13579_v49 = vpop.eup %13578  ;;  %v5105_v26 = vsel %vm5041_vm15, %v5009_v6, %v5073_v59  ;;  %v5010_v32 = vsub.f32 1.0, %v4978_v16  ;;  %v4945_v55 = vmul.f32 1.442695, %v4885_v43 }
 0xf08   :  { %v16897_v8 = vand.u32 2147483647, %v16879_v31  ;;  %v4819_v1 = vmul.f32 %v16818_v34, %v4787_v3  ;;  %v4724_v9 = vadd.f32 -0.28449672, %v4692_v30  ;;  %v4597_v36 = vadd.f32 -1.4531521, %v4565_v28 }
 0xf09   :  { %v4854_v33 = vsub.f32 0.0, %v16861_v22  ;;  %v4855_v5 = vsub.f32 0.0, %v16864_v41  ;;  %v5186_v61 = vpack.c.bf16 %v16630_v2, %v16604_v38  ;;  %v5188_v48 = vpack.c.bf16 %v16650_v57, %v16644_v20 }
 0xf0a   :  { %v4472_v46 = vmul.f32 0.3275911, %v16897_v8  ;;  %v4979_v6 = vmul.f32 %v13579_v49, %v4819_v1  ;;  %v4756_v50 = vmul.f32 %v16850_v63, %v4724_v9  ;;  %v4629_v11 = vmul.f32 %v16881_v52, %v4597_v36 }
 0xf0b   :  { %v5190_v34 = vpack.c.bf16 %v16884_v53, %v16834_v42  ;;  %v5074_v43 = vsub.f32 0.0, %v5010_v32  ;;  %5213 = vmatprep.subr.bf16.mxu0 %v5186_v61  ;;  %v5192_v16 = vpack.c.bf16 %v16890_v18, %v16887_v37  ;;  %v16914_v4 = vmul.f32 0.5, %v16681_v14  ;;  %v16924_v14 = vld [vmem:[%s19687_s6] sm:$0xff]  ;;  %v14257_v37 = vld [vmem:[%s19687_s6 + $0x8] sm:$0xff] }
 0xf0c   :  { %v4504_v59 = vadd.f32 1.0, %v4472_v46  ;;  %v5011_v38 = vsub.f32 1.0, %v4979_v6  ;;  %v4788_v2 = vadd.f32 0.2548296, %v4756_v50  ;;  %v4661_v20 = vadd.f32 1.4214138, %v4629_v11  ;;  %5214 = vmatpush1.bf16.msra.mxu0 %v5185_v62 }
 0xf0d   :  { %v14290_v57 = vmov 5   ;;  %v5137_v0 = vadd.f32 1.0, %v5105_v26  ;;  %vm5042_vm2 = vcmp.ge.f32.partialorder %v16695_v56, 0.0  ;;  %v4886_v42 = vmul.f32 %v4854_v33, %v16861_v22  ;;  %5215 = vmatprep.subr.bf16.mxu0 %v5188_v48 }
 0xf0e   :  { %12890 = vset.pattern.permute.xlu1 %v14290_v57  ;;  %13586 = vrcp.f32 %v4504_v59  ;;  %v13581_v39 = vpop.eup %13580  ;;  %v5075_v7 = vsub.f32 0.0, %v5011_v38  ;;  %v4820_v54 = vmul.f32 %v16850_v63, %v4788_v2  ;;  %v4693_v29 = vmul.f32 %v16881_v52, %v4661_v20  ;;  %12891 = vset.pattern.permute.xlu0 %v14290_v57 }
 0xf0f   :  { %5271 = vperm.xlu1 %12890, %v16924_v14   ;;  %13588 = vpow2.f32 %v4945_v55  ;;  %v5106_v56 = vsel %vm5042_vm2, %v5010_v32, %v5074_v43  ;;  %v4371_v22 = vmul.f32 0.5, %v16719_v23  ;;  %vm5043_vm4 = vcmp.ge.f32.partialorder %v16743_v60, 0.0  ;;  %5275 = vperm.xlu0 %12891, %v14257_v37   ;;  %v16950_v32 = vld [vmem:[%s19687_s6 + $0x10] sm:$0xff]  ;;  %v16968_v43 = vld [vmem:[%s19687_s6 + $0x18] sm:$0xff] }
 0xf10   :  { %v16929_v62 = vpop.eup %13582  ;;  %v4887_v53 = vmul.f32 %v4855_v5, %v16864_v41  ;;  %v5107_v63 = vsel %vm5043_vm4, %v5011_v38, %v5075_v7  ;;  %v4980_v3 = vmul.f32 %v13581_v39, %v4820_v54  ;;  %v4725_v30 = vadd.f32 -0.28449672, %v4693_v29 }
 0xf11   :  { %v16937_v18 = vpop.eup %13584  ;;  %v4566_v28 = vmul.f32 1.0614054, %v16929_v62  ;;  %v19787_v49 = vpack.c.bf16 %v16550_v24, %v16548_v25  ;;  %v16944_v23 = vmul.f32 %v5137_v0, %v16840_v12  ;;  %v5139_v60 = vadd.f32 1.0, %v5107_v63 }
 0xf12   :  { %v4947_v41 = vmul.f32 1.442695, %v4886_v42  ;;  %v4567_v26 = vmul.f32 1.0614054, %v16937_v18  ;;  %v5012_v55 = vsub.f32 1.0, %v4980_v3  ;;  %v4757_v1 = vmul.f32 %v16881_v52, %v4725_v30 }
 0xf13   :  { %5216 = vmatpush1.bf16.msra.mxu0 %v19787_v49  ;;  %5279 = vperm.xlu1 %12890, %v16950_v32   ;;  %v4598_v25 = vadd.f32 -1.4531521, %v4566_v28  ;;  %v5138_v24 = vadd.f32 1.0, %v5106_v56  ;;  %v5171_v9 = vmul.f32 %v5139_v60, %v4371_v22  ;;  %v4856_v36 = vsub.f32 0.0, %v16897_v8 }
 0xf14   :  { %5217 = vmatprep.subr.bf16.mxu0 %v5190_v34  ;;  %v4599_v12 = vadd.f32 -1.4531521, %v4567_v26  ;;  %v14291_v33 = vmov 6   ;;  %v5076_v5 = vsub.f32 0.0, %v5012_v55  ;;  %v4789_v46 = vadd.f32 0.2548296, %v4757_v1 }
 0xf15   :  { %12892 = vset.pattern.permute.xlu0 %v14291_v33  ;;  %v4630_v61 = vmul.f32 %v16929_v62, %v4598_v25  ;;  %v4949_v48 = vmul.f32 1.442695, %v4887_v53  ;;  %v19788_v6 = vpack.c.bf16 %v16722_v40, %v16706_v27  ;;  %v5193_v50 = vpack.c.bf16 %v5171_v9, %v16944_v23 }
 0xf16   :  { %5363 = vperm.xlu0 %12892, %v16924_v14   ;;  %v4372_v11 = vmul.f32 0.5, %v16748_v44  ;;  %vm5044_vm5 = vcmp.ge.f32.partialorder %v16764_v17, 0.0  ;;  %v4631_v34 = vmul.f32 %v16937_v18, %v4599_v12  ;;  %v4821_v40 = vmul.f32 %v16881_v52, %v4789_v46 }
 0xf17   :  { %5218 = vmatpush1.bf16.msra.mxu0 %v19788_v6  ;;  %5283 = vperm.xlu1 %12890, %v16968_v43   ;;  %v5108_v27 = vsel %vm5044_vm5, %v5012_v55, %v5076_v5  ;;  %v4662_v59 = vadd.f32 1.4214138, %v4630_v61  ;;  %13590 = vpow2.f32 %v4947_v41  ;;  %v4888_v17 = vmul.f32 %v4856_v36, %v16897_v8 }
 0xf18   :  { %5219 = vmatprep.subr.bf16.mxu0 %v5192_v16  ;;  %v13587_v38 = vpop.eup %13586  ;;  %v5140_v2 = vadd.f32 1.0, %v5108_v27  ;;  %v4663_v44 = vadd.f32 1.4214138, %v4631_v34  ;;  %v5170_v16 = vmul.f32 %v5138_v24, %v16914_v4  ;;  %13592 = vpow2.f32 %v4949_v48 }
 0xf19   :  { %v13589_v20 = vpop.eup %13588  ;;  %v4694_v57 = vmul.f32 %v16929_v62, %v4662_v59  ;;  %v4568_v0 = vmul.f32 1.0614054, %v13587_v38  ;;  %v14292_v42 = vmov 7   ;;  %v4951_v29 = vmul.f32 1.442695, %v4888_v17 }
 0xf1a   :  { %12895 = vset.pattern.permute.xlu0 %v14292_v42  ;;  %v5172_v52 = vmul.f32 %v5140_v2, %v4372_v11  ;;  %v4981_v39 = vmul.f32 %v13589_v20, %v4821_v40  ;;  %v4695_v7 = vmul.f32 %v16937_v18, %v4663_v44  ;;  %vm5045_vm6 = vcmp.ge.f32.partialorder %v16801_v47, 0.0  ;;  %v12927_v44 = vld [vmem:[%s19692_s4] sm:$0xff]  }
 0xf1b   :  { %5220 = vmatpush1.bf16.msra.mxu0 %v5191_v35  ;;  %12893 = vset.pattern.permute.xlu1 %v14291_v33  ;;  %v4726_v8 = vadd.f32 -0.28449672, %v4694_v57  ;;  %v4600_v54 = vadd.f32 -1.4531521, %v4568_v0  ;;  %13594 = vpow2.f32 %v4951_v29  ;;  %vm5047_vm7 = vcmp.ge.f32.partialorder %v16848_v19, 0.0 }
 0xf1c   :  { %5391 = vperm.xlu0 %12895, %v14257_v37   ;;  %5367 = vperm.xlu1 %12893, %v14257_v37   ;;  %v4727_v4 = vadd.f32 -0.28449672, %v4695_v7  ;;  %v5194_v56 = vpack.c.bf16 %v5172_v52, %v5170_v16  ;;  %v5013_v21 = vsub.f32 1.0, %v4981_v39  ;;  %v4375_v47 = vmul.f32 0.5, %v16831_v13  ;;  %v19790_v16 = vld [vmem:[#allocation2_spill] sm:$0xff]  ;;  %v19792_v7 = vld [vmem:[#allocation4_spill] sm:$0xff] }
 0xf1d   :  { %v4758_v22 = vmul.f32 %v16929_v62, %v4726_v8  ;;  %v4632_v53 = vmul.f32 %v13587_v38, %v4600_v54  ;;  %vm5046_vm8 = vcmp.ge.f32.partialorder %v16845_v51, 0.0  ;;  %vm5048_vm9 = vcmp.ge.f32.partialorder %v16879_v31, 0.0  ;;  %v12928_v31 = vld [vmem:[%s19692_s4 + $0x8] sm:$0xff]  }
 0xf1e   :  { %v4759_v10 = vmul.f32 %v16937_v18, %v4727_v4  ;;  %5221 = vmatprep.subr.bf16.mxu0 %v5194_v56  ;;  %v5077_v49 = vsub.f32 0.0, %v5013_v21  ;;  %v4376_v13 = vmul.f32 0.5, %v16868_v58  ;;  %v19793_v4 = vld [vmem:[#allocation6_spill] sm:$0xff] }
 0xf1f   :  { %v4790_v35 = vadd.f32 0.2548296, %v4758_v22  ;;  %v4664_v63 = vadd.f32 1.4214138, %v4632_v53  ;;  %5222 = vmatpush1.bf16.msra.mxu0 %v5193_v50 }
 0xf20   :  { %5395 = vperm.xlu0 %12895, %v16950_v32   ;;  %12894 = vset.pattern.permute.xlu1 %v14292_v42  ;;  %v4791_v3 = vadd.f32 0.2548296, %v4759_v10  ;;  %v19797_v10 = vld [vmem:[#allocation7_spill] sm:$0xff] }
 0xf21   :  { %5387 = vperm.xlu1 %12894, %v16924_v14   ;;  %v13591_v37 = vpop.eup %13590  ;;  %v4822_v30 = vmul.f32 %v16929_v62, %v4790_v35  ;;  %v4696_v28 = vmul.f32 %v13587_v38, %v4664_v63  ;;  %v5109_v14 = vsel %vm5045_vm6, %v5013_v21, %v5077_v49 }
 0xf22   :  { %v4823_v23 = vmul.f32 %v16937_v18, %v4791_v3  ;;  %v13593_v60 = vpop.eup %13592  ;;  %v5141_v12 = vadd.f32 1.0, %v5109_v14  ;;  %v19803_v14 = vld [vmem:[#allocation10_spill] sm:$0xff] }
 0xf23   :  { %v4982_v41 = vmul.f32 %v13591_v37, %v4822_v30  ;;  %v4728_v26 = vadd.f32 -0.28449672, %v4696_v28  ;;  %v19799_v37 = vld [vmem:[#allocation8_spill] sm:$0xff] }
 0xf24   :  { %v4983_v55 = vmul.f32 %v13593_v60, %v4823_v23  ;;  %v19801_v60 = vld [vmem:[#allocation9_spill] sm:$0xff] }
 0xf25   :  { %12896 = vset.pattern.permute.xlu1 %v14291_v33  ;;  %v5014_v1 = vsub.f32 1.0, %v4982_v41  ;;  %v4760_v25 = vmul.f32 %v13587_v38, %v4728_v26  ;;  %v13595_v5 = vpop.eup %13594  ;;  %v4373_v33 = vmul.f32 0.5, %v16788_v15  ;;  %v4374_v15 = vmul.f32 0.5, %v16825_v45 }
 0xf26   :  { %5371 = vperm.xlu1 %12896, %v16950_v32   ;;  %v5015_v24 = vsub.f32 1.0, %v4983_v55 }
 0xf27   :  { %v4792_v9 = vadd.f32 0.2548296, %v4760_v25  ;;  %v5078_v36 = vsub.f32 0.0, %v5014_v1  ;;  %v5173_v32 = vmul.f32 %v5141_v12, %v4373_v33 }
 0xf28   :  { %v5079_v62 = vsub.f32 0.0, %v5015_v24 }
 0xf29   :  { %v4824_v18 = vmul.f32 %v13587_v38, %v4792_v9  ;;  %v5110_v6 = vsel %vm5046_vm8, %v5014_v1, %v5078_v36 }
 0xf2a   :  { %5375 = vperm.xlu1 %12896, %v16968_v43   ;;  %v5111_v46 = vsel %vm5047_vm7, %v5015_v24, %v5079_v62  ;;  %v5142_v27 = vadd.f32 1.0, %v5110_v6 }
 0xf2b   :  { %v5143_v61 = vadd.f32 1.0, %v5111_v46  ;;  %v4984_v48 = vmul.f32 %v13595_v5, %v4824_v18 }
 0xf2c   :  { %v5174_v38 = vmul.f32 %v5142_v27, %v4374_v15 }
 0xf2d   :  { %v5175_v50 = vmul.f32 %v5143_v61, %v4375_v47  ;;  %v5016_v11 = vsub.f32 1.0, %v4984_v48 }
 0xf2e   :  { %12897 = vset.pattern.permute.xlu1 %v14292_v42  ;;  %v19791_v42 = vld [vmem:[#allocation3_spill] sm:$0xff] }
 0xf2f   :  { %5399 = vperm.xlu1 %12897, %v16968_v43   ;;  %v5195_v19 = vpack.c.bf16 %v5175_v50, %v5173_v32  ;;  %v5080_v34 = vsub.f32 0.0, %v5016_v11  ;;  %v19789_v43 = vmov 0  }
 0xf31   :  { %v5112_v40 = vsel %vm5048_vm9, %v5016_v11, %v5080_v34 }
 0xf32   :  { %v5144_v59 = vadd.f32 1.0, %v5112_v40 }
 0xf34   :  { %v5176_v51 = vmul.f32 %v5144_v59, %v4376_v13 }
 0xf36   :  { %v5196_v2 = vpack.c.bf16 %v5176_v51, %v5174_v38 }
 0xf38   :  { %5223 = vmatprep.subr.bf16.mxu0 %v5196_v2 }
 0xf39   :  { %5224 = vmatpush1.bf16.msra.mxu0 %v5195_v19 }
 0xf3c   :  { %5242 = vmatmul.mubr.bf16.vlgmr.msra.gmra.mrb[96].mxu0 %v12927_v44 }
 0xf3d   :  { %5251 = vmatprep.mubr.bf16.mxu0 %v19789_v43 }
 0xf44   :  { %5252 = vmatmul.mubr.bf16.gmra.mrb[100].mxu0 %v12928_v31 }
 0xf8e   :  { %v5272_v45 = vpop.permute.xlu1 %5271  ;;  %v5276_v39 = vpop.permute.xlu0 %5275 }
 0xf92   :  { %v5280_v54 = vpop.permute.xlu1 %5279 }
 0xf96   :  { %v5284_v1 = vpop.permute.xlu1 %5283 }
0x100f   :  { %v5243_v58 = vpop.f32.mrb[96].mxu0 }
0x1010   :  { %v5245_v17 = vpop.f32.mrb[97].mxu0  ;;  %v5262_v8 = vadd.f32 %v5243_v58, %v19792_v7 }
0x1011   :  { %v5247_v20 = vpop.f32.mrb[98].mxu0  ;;  %v5263_v29 = vadd.f32 %v5245_v17, %v19793_v4 }
0x1012   :  { %v5264_v57 = vadd.f32 %v5247_v20, %v19790_v16  ;;  %v5249_v0 = vpop.f32.mrb[99].mxu0  ;;  %v17013_v21 = vadd.f32 %v5272_v45, %v5262_v8 }
0x1013   :  { %v5265_v52 = vadd.f32 %v5249_v0, %v19791_v42  ;;  %v17016_v3 = vadd.f32 %v5272_v45, %v5263_v29 }
0x1014   :  { %v17009_v56 = vadd.f32 %v5276_v39, %v5264_v57  ;;  %19796 = vst [vmem:[#allocation24_spill] sm:$0xff] %v17013_v21 }
0x1015   :  { %v17011_v22 = vadd.f32 %v5276_v39, %v5265_v52  ;;  %19798 = vst [vmem:[#allocation13_spill] sm:$0xff] %v17016_v3 }
0x1016   :  { %19794 = vst [vmem:[#allocation11_spill] sm:$0xff] %v17009_v56  ;;  %v5294_v49 = vadd.f32 %v17009_v56, %v17013_v21 }
0x1017   :  { %19795 = vst [vmem:[#allocation12_spill] sm:$0xff] %v17011_v22  ;;  %v5253_v53 = vpop.f32.mrb[100].mxu0  ;;  %v5303_v55 = vadd.f32 %v17011_v22, %v17016_v3 }
0x1018   :  { %v5266_v35 = vadd.f32 %v5253_v53, %v19797_v10  ;;  %v5255_v63 = vpop.f32.mrb[101].mxu0 }
0x1019   :  { %v5267_v30 = vadd.f32 %v5255_v63, %v19799_v37  ;;  %v5257_v28 = vpop.f32.mrb[102].mxu0 }
0x101a   :  { %v17021_v23 = vadd.f32 %v5280_v54, %v5266_v35  ;;  %v5268_v41 = vadd.f32 %v5257_v28, %v19801_v60  ;;  %v5259_v26 = vpop.f32.mrb[103].mxu0 }
0x101b   :  { %v17026_v25 = vadd.f32 %v5280_v54, %v5267_v30  ;;  %v5269_v24 = vadd.f32 %v5259_v26, %v19803_v14  ;;  %v5368_v30 = vpop.permute.xlu1 %5367 }
0x101c   :  { %19800 = vst [vmem:[#allocation16_spill] sm:$0xff] %v17021_v23  ;;  %v5295_v9 = vadd.f32 %v5294_v49, %v17021_v23  ;;  %v17030_v62 = vadd.f32 %v5284_v1, %v5268_v41 }
0x101d   :  { %19802 = vst [vmem:[#allocation22_spill] sm:$0xff] %v17026_v25  ;;  %v5304_v12 = vadd.f32 %v5303_v55, %v17026_v25  ;;  %v17033_v36 = vadd.f32 %v5284_v1, %v5269_v24 }
0x101e   :  { %19804 = vst [vmem:[#allocation23_spill] sm:$0xff] %v17030_v62  ;;  %v5296_v18 = vadd.f32 %v5295_v9, %v17030_v62 }
0x101f   :  { %19805 = vst [vmem:[#allocation17_spill] sm:$0xff] %v17033_v36  ;;  %v5305_v5 = vadd.f32 %v5304_v12, %v17033_v36  ;;  %v5388_v14 = vpop.permute.xlu1 %5387 }
0x1020   :  { %v5297_v46 = vrot.slane %v5296_v18, 4 }
0x1021   :  { %v5306_v33 = vrot.slane %v5305_v5, 4 }
0x1022   :  { %v5298_v47 = vadd.f32 %v5297_v46, %v5296_v18  ;;  %v5364_v46 = vpop.permute.xlu0 %5363 }
0x1023   :  { %v5307_v61 = vadd.f32 %v5306_v33, %v5305_v5  ;;  %v5372_v5 = vpop.permute.xlu1 %5371 }
0x1024   :  { %v5299_v48 = vrot.slane %v5298_v47, 2 }
0x1025   :  { %v5308_v32 = vrot.slane %v5307_v61, 2 }
0x1026   :  { %v5300_v6 = vadd.f32 %v5299_v48, %v5298_v47  ;;  %v5392_v47 = vpop.permute.xlu0 %5391 }
0x1027   :  { %v5309_v50 = vadd.f32 %v5308_v32, %v5307_v61  ;;  %v5376_v33 = vpop.permute.xlu1 %5375 }
0x1028   :  { %v5301_v11 = vrot.slane %v5300_v6, 1 }
0x1029   :  { %v5310_v19 = vrot.slane %v5309_v50, 1 }
0x102a   :  { %v5302_v34 = vadd.f32 %v5301_v11, %v5300_v6 }
0x102b   :  { %v5311_v27 = vadd.f32 %v5310_v19, %v5309_v50 }
0x102c   :  { %v5312_v40 = vmul.f32 0.03125, %v5302_v34 }
0x102d   :  { %v5313_v15 = vmul.f32 0.03125, %v5311_v27 }
0x102e   :  { %v5318_v13 = vsub.f32 %v17021_v23, %v5312_v40  ;;  %v5314_v59 = vsub.f32 %v17013_v21, %v5312_v40  ;;  %v5316_v38 = vsub.f32 %v17009_v56, %v5312_v40  ;;  %v5320_v31 = vsub.f32 %v17030_v62, %v5312_v40 }
0x102f   :  { %v5319_v51 = vsub.f32 %v17026_v25, %v5313_v15  ;;  %v5315_v2 = vsub.f32 %v17016_v3, %v5313_v15  ;;  %v5317_v44 = vsub.f32 %v17011_v22, %v5313_v15  ;;  %v5321_v17 = vsub.f32 %v17033_v36, %v5313_v15 }
0x1030   :  { %v5322_v45 = vmul.f32 %v5314_v59, %v5314_v59  ;;  %v5324_v58 = vmul.f32 %v5316_v38, %v5316_v38  ;;  %v5326_v57 = vmul.f32 %v5318_v13, %v5318_v13  ;;  %v5328_v39 = vmul.f32 %v5320_v31, %v5320_v31 }
0x1031   :  { %v5323_v20 = vmul.f32 %v5315_v2, %v5315_v2  ;;  %v5325_v16 = vmul.f32 %v5317_v44, %v5317_v44  ;;  %v5327_v42 = vmul.f32 %v5319_v51, %v5319_v51  ;;  %v5329_v8 = vmul.f32 %v5321_v17, %v5321_v17 }
0x1032   :  { %v5330_v0 = vadd.f32 %v5324_v58, %v5322_v45  ;;  %v5400_v58 = vpop.permute.xlu1 %5399 }
0x1033   :  { %v5339_v52 = vadd.f32 %v5325_v16, %v5323_v20  ;;  %v5396_v20 = vpop.permute.xlu0 %5395 }
0x1034   :  { %v5331_v7 = vadd.f32 %v5330_v0, %v5326_v57 }
0x1035   :  { %v5340_v54 = vadd.f32 %v5339_v52, %v5327_v42 }
0x1036   :  { %v5332_v4 = vadd.f32 %v5331_v7, %v5328_v39 }
0x1037   :  { %v5341_v29 = vadd.f32 %v5340_v54, %v5329_v8 }
0x1038   :  { %v5333_v53 = vrot.slane %v5332_v4, 4 }
0x1039   :  { %v5342_v10 = vrot.slane %v5341_v29, 4 }
0x103a   :  { %v5334_v35 = vadd.f32 %v5333_v53, %v5332_v4  ;;  %v19806_v53 = vmov 0.0|0.0  }
0x103b   :  { %v5343_v63 = vadd.f32 %v5342_v10, %v5341_v29  ;;  %v12929_v29 = vld [vmem:[%s19689_s1 + $0x30] sm:$0xff]   ;;  %v12930_v10 = vld [vmem:[%s19689_s1 + $0x38] sm:$0xff]  }
0x103c   :  { %v5335_v37 = vrot.slane %v5334_v35, 2 }
0x103d   :  { %v5344_v28 = vrot.slane %v5343_v63, 2 }
0x103e   :  { %v5336_v49 = vadd.f32 %v5335_v37, %v5334_v35  ;;  %v12931_v35 = vld [vmem:[%s19689_s1 + $0x40] sm:$0xff]  }
0x103f   :  { %v5345_v60 = vadd.f32 %v5344_v28, %v5343_v63 }
0x1040   :  { %v5337_v41 = vrot.slane %v5336_v49, 1 }
0x1041   :  { %v5346_v26 = vrot.slane %v5345_v60, 1 }
0x1042   :  { %v5338_v55 = vadd.f32 %v5337_v41, %v5336_v49 }
0x1043   :  { %v5347_v1 = vadd.f32 %v5346_v26, %v5345_v60 }
0x1044   :  { %v5348_v24 = vmul.f32 0.03125, %v5338_v55 }
0x1045   :  { %v5349_v9 = vmul.f32 0.03125, %v5347_v1 }
0x1046   :  { %v5350_v12 = vadd.f32 1e-05, %v5348_v24 }
0x1047   :  { %v5351_v18 = vadd.f32 1e-05, %v5349_v9 }
0x1048   :  { %13596 = vrsqrt.f32 %v5350_v12 }
0x1049   :  { %13598 = vrsqrt.f32 %v5351_v18 }
0x1052   :  { %v13597_v61 = vpop.eup %13596 }
0x1053   :  { %v13599_v48 = vpop.eup %13598  ;;  %v5356_v32 = vmul.f32 %v13597_v61, %v5316_v38  ;;  %v5358_v6 = vmul.f32 %v13597_v61, %v5318_v13  ;;  %v5354_v50 = vmul.f32 %v13597_v61, %v5314_v59  ;;  %v5360_v11 = vmul.f32 %v13597_v61, %v5320_v31 }
0x1054   :  { %v5357_v19 = vmul.f32 %v13599_v48, %v5317_v44  ;;  %v5359_v34 = vmul.f32 %v13599_v48, %v5319_v51  ;;  %v5355_v27 = vmul.f32 %v13599_v48, %v5315_v2  ;;  %v5361_v40 = vmul.f32 %v13599_v48, %v5321_v17 }
0x1055   :  { %v5380_v15 = vmul.f32 %v5368_v30, %v5356_v32  ;;  %v5378_v45 = vmul.f32 %v5364_v46, %v5354_v50  ;;  %v5382_v52 = vmul.f32 %v5372_v5, %v5358_v6  ;;  %v5384_v7 = vmul.f32 %v5376_v33, %v5360_v11 }
0x1056   :  { %v5381_v16 = vmul.f32 %v5368_v30, %v5357_v19  ;;  %v5383_v57 = vmul.f32 %v5372_v5, %v5359_v34  ;;  %v5379_v0 = vmul.f32 %v5364_v46, %v5355_v27  ;;  %v5385_v42 = vmul.f32 %v5376_v33, %v5361_v40 }
0x1057   :  { %v5402_v39 = vadd.f32 %v5388_v14, %v5378_v45  ;;  %v5404_v8 = vadd.f32 %v5392_v47, %v5380_v15  ;;  %v5408_v2 = vadd.f32 %v5400_v58, %v5384_v7  ;;  %v5406_v17 = vadd.f32 %v5396_v20, %v5382_v52 }
0x1058   :  { %v5403_v38 = vadd.f32 %v5388_v14, %v5379_v0  ;;  %v5405_v13 = vadd.f32 %v5392_v47, %v5381_v16  ;;  %v5409_v59 = vadd.f32 %v5400_v58, %v5385_v42  ;;  %v5407_v31 = vadd.f32 %v5396_v20, %v5383_v57 }
0x1059   :  { %v5423_v51 = vpack.c.bf16 %v5404_v8, %v5402_v39  ;;  %v5425_v4 = vpack.c.bf16 %v5408_v2, %v5406_v17 }
0x105a   :  { %v5424_v44 = vpack.c.bf16 %v5405_v13, %v5403_v38  ;;  %v5426_v54 = vpack.c.bf16 %v5409_v59, %v5407_v31  ;;  %v19807_v31 = vmov 0.0  }
0x105c   :  { %5475 = vmatprep.subr.bf16.mxu1 %v5424_v44 }
0x105d   :  { %5476 = vmatpush1.bf16.msra.mxu1 %v5423_v51  ;;  %v19808_v51 = vld [vmem:[#allocation5_spill] sm:$0xff] }
0x105e   :  { %5477 = vmatprep.subr.bf16.mxu1 %v5426_v54 }
0x1061   :  { %5478 = vmatpush1.bf16.msra.mxu1 %v5425_v4 }
0x1062   :  { %12665 = vmatprep.subr.bf16.mxu1 %v19806_v53 }
0x1064   :  { %10771 = vmatmul.mubr.msk.bf16.vlgmr.msra.gmra.mrb[112].mxu1 %vm222_vm0, %v12929_v29 }
0x1065   :  { %5517 = vmatprep.mubr.bf16.mxu1 %v19789_v43 }
0x106c   :  { %10772 = vmatmul.mubr.msk.bf16.gmra.mrb[116].mxu1 %vm222_vm0, %v12930_v10 }
0x106d   :  { %5527 = vmatprep.mubr.bf16.mxu1 %v19789_v43 }
0x1074   :  { %10773 = vmatmul.mubr.msk.bf16.gmra.mrb[120].mxu1 %vm222_vm0, %v12931_v35 }
0x1075   :  { %5537 = vmatprep.mubr.bf16.mxu1 %v19789_v43 }
0x1137   :  { %v5509_v63 = vpop.f32.mrb[112].mxu1 }
0x1138   :  { %5568 = vxpose.xlu0.b32.start.end [1/1] (short) %v5509_v63, 128  ;;  %v17061_v37 = vpop.f32.mrb[113].mxu1 }
0x1139   :  { %v5513_v30 = vpop.f32.mrb[114].mxu1 }
0x113a   :  { %v17063_v28 = vpop.f32.mrb[115].mxu1  ;;  %6007 = vxpose.xlu1.b32.start.end [1/1] (short) %v5513_v30, 128 }
0x113f   :  { %v17065_v49 = vpop.f32.mrb[116].mxu1 }
0x1140   :  { %v17067_v60 = vpop.f32.mrb[117].mxu1 }
0x1141   :  { %v17069_v41 = vpop.f32.mrb[118].mxu1 }
0x1142   :  { %v17071_v26 = vpop.f32.mrb[119].mxu1 }
0x1147   :  { %v5529_v55 = vpop.f32.mrb[120].mxu1 }
0x1148   :  { %11985 = vmatprep.subr.mxu0 %v5529_v55  ;;  %v17073_v1 = vpop.f32.mrb[121].mxu1 }
0x1149   :  { %11986 = vmatpush3.msra.mxu0 %v5529_v55  ;;  %v5533_v14 = vpop.f32.mrb[122].mxu1 }
0x114a   :  { %v17075_v24 = vpop.f32.mrb[123].mxu1  ;;  %12046 = vmatprep.subr.mxu0 %v5533_v14 }
0x11b8   :  { %v5584_v9 = vpop.trf.xlu0 }
0x11b9   :  { %11987 = vmatprep.mubr.msk.f32.mxu0 %vm366_vm1, %v5584_v9 }
0x11ba   :  { %v6023_v12 = vpop.trf.xlu1 }
0x11bc   :  { %v5585_v18 = vpop.trf.xlu0 }
0x11bd   :  { %11988 = vmatmul.mubr.msk.f32.vlgmr.msra.gmra.mrb[104].mxu0 %vm366_vm1, %v5585_v18 }
0x11be   :  { %12047 = vmatpush3.msra.mxu0 %v5533_v14  ;;  %v6024_v5 = vpop.trf.xlu1 }
0x11bf   :  { %12689 = vmatprep.subr.bf16.mxu0 %v19806_v53 }
0x11c0   :  { %v5586_v46 = vpop.trf.xlu0 }
0x11c1   :  { %11990 = vmatprep.mubr.msk.f32.mxu0 %vm366_vm1, %v5586_v46 }
0x11c2   :  { %v6025_v47 = vpop.trf.xlu1 }
0x11c4   :  { %v5587_v33 = vpop.trf.xlu0 }
0x11c5   :  { %11991 = vmatmul.mubr.msk.f32.gmra.mrb[106].mxu0 %vm366_vm1, %v5587_v33 }
0x11c6   :  { %v6026_v48 = vpop.trf.xlu1 }
0x11c8   :  { %v5588_v61 = vpop.trf.xlu0 }
0x11c9   :  { %11993 = vmatprep.mubr.msk.f32.mxu0 %vm366_vm1, %v5588_v61 }
0x11ca   :  { %v6027_v50 = vpop.trf.xlu1 }
0x11cc   :  { %v5589_v32 = vpop.trf.xlu0 }
0x11cd   :  { %11994 = vmatmul.mubr.msk.f32.gmra.mrb[108].mxu0 %vm366_vm1, %v5589_v32 }
0x11ce   :  { %v6028_v19 = vpop.trf.xlu1 }
0x11d0   :  { %v5590_v6 = vpop.trf.xlu0 }
0x11d1   :  { %11996 = vmatprep.mubr.msk.f32.mxu0 %vm366_vm1, %v5590_v6 }
0x11d2   :  { %v6029_v40 = vpop.trf.xlu1 }
0x11d4   :  { %v5591_v11 = vpop.trf.xlu0 }
0x11d5   :  { %11997 = vmatmul.mubr.msk.f32.gmra.mrb[110].mxu0 %vm366_vm1, %v5591_v11 }
0x11d6   :  { %v6030_v45 = vpop.trf.xlu1 }
0x11d8   :  { %v5592_v34 = vpop.trf.xlu0 }
0x11d9   :  { %11999 = vmatprep.mubr.msk.f32.mxu0 %vm366_vm1, %v5592_v34 }
0x11da   :  { %v6031_v16 = vpop.trf.xlu1 }
0x11dc   :  { %v5593_v27 = vpop.trf.xlu0 }
0x11dd   :  { %12000 = vmatmul.mubr.msk.f32.gmra.mrb[112].mxu0 %vm366_vm1, %v5593_v27 }
0x11de   :  { %v6032_v0 = vpop.trf.xlu1 }
0x11e0   :  { %v5594_v15 = vpop.trf.xlu0 }
0x11e1   :  { %12002 = vmatprep.mubr.msk.f32.mxu0 %vm366_vm1, %v5594_v15 }
0x11e2   :  { %v6033_v39 = vpop.trf.xlu1 }
0x11e4   :  { %v5595_v58 = vpop.trf.xlu0 }
0x11e5   :  { %12003 = vmatmul.mubr.msk.f32.gmra.mrb[114].mxu0 %vm366_vm1, %v5595_v58 }
0x11e6   :  { %v6034_v7 = vpop.trf.xlu1 }
0x11e8   :  { %v5596_v20 = vpop.trf.xlu0 }
0x11e9   :  { %12005 = vmatprep.mubr.msk.f32.mxu0 %vm366_vm1, %v5596_v20 }
0x11ea   :  { %v6035_v8 = vpop.trf.xlu1 }
0x11ec   :  { %v5597_v57 = vpop.trf.xlu0 }
0x11ed   :  { %12006 = vmatmul.mubr.msk.f32.gmra.mrb[116].mxu0 %vm366_vm1, %v5597_v57 }
0x11ee   :  { %v6036_v38 = vpop.trf.xlu1 }
0x11f0   :  { %v5598_v42 = vpop.trf.xlu0 }
0x11f1   :  { %12008 = vmatprep.mubr.msk.f32.mxu0 %vm366_vm1, %v5598_v42 }
0x11f2   :  { %v6037_v13 = vpop.trf.xlu1 }
0x11f4   :  { %v5599_v52 = vpop.trf.xlu0 }
0x11f5   :  { %12009 = vmatmul.mubr.msk.f32.gmra.mrb[118].mxu0 %vm366_vm1, %v5599_v52 }
0x11f6   :  { %12048 = vmatprep.mubr.msk.f32.mxu0 %vm366_vm1, %v6023_v12  ;;  %v6038_v59 = vpop.trf.xlu1 }
0x11f9   :  { %12049 = vmatmul.mubr.msk.f32.vlgmr.msra.gmra.mrb[120].mxu0 %vm366_vm1, %v6024_v5 }
0x11fa   :  { %12051 = vmatprep.mubr.msk.f32.mxu0 %vm366_vm1, %v6025_v47 }
0x11fd   :  { %12052 = vmatmul.mubr.msk.f32.gmra.mrb[122].mxu0 %vm366_vm1, %v6026_v48 }
0x11fe   :  { %12054 = vmatprep.mubr.msk.f32.mxu0 %vm366_vm1, %v6027_v50 }
0x1201   :  { %12055 = vmatmul.mubr.msk.f32.gmra.mrb[124].mxu0 %vm366_vm1, %v6028_v19 }
0x1202   :  { %12057 = vmatprep.mubr.msk.f32.mxu0 %vm366_vm1, %v6029_v40 }
0x1205   :  { %12058 = vmatmul.mubr.msk.f32.gmra.mrb[126].mxu0 %vm366_vm1, %v6030_v45 }
0x1206   :  { %12060 = vmatprep.mubr.msk.f32.mxu0 %vm366_vm1, %v6031_v16 }
0x1209   :  { %12061 = vmatmul.mubr.msk.f32.gmra.mrb[128].mxu0 %vm366_vm1, %v6032_v0 }
0x120a   :  { %12063 = vmatprep.mubr.msk.f32.mxu0 %vm366_vm1, %v6033_v39 }
0x120d   :  { %12064 = vmatmul.mubr.msk.f32.gmra.mrb[130].mxu0 %vm366_vm1, %v6034_v7 }
0x120e   :  { %12066 = vmatprep.mubr.msk.f32.mxu0 %vm366_vm1, %v6035_v8 }
0x1211   :  { %12067 = vmatmul.mubr.msk.f32.gmra.mrb[132].mxu0 %vm366_vm1, %v6036_v38 }
0x1212   :  { %12069 = vmatprep.mubr.msk.f32.mxu0 %vm366_vm1, %v6037_v13 }
0x1215   :  { %12070 = vmatmul.mubr.msk.f32.gmra.mrb[134].mxu0 %vm366_vm1, %v6038_v59 }
0x1216   :  { %12104 = vmatprep.mubr.msk.f32.mxu0 %vm14284_vm3, %v19807_v31 }
0x1290   :  { %v11989_v44 = vpop.f32.mrb[104].mxu0 }
0x1291   :  { %v17113_v2 = vadd.f32 %v11989_v44, %v19808_v51  ;;  %v5714_v17 = vpop.f32.mrb[105].mxu0 }
0x1292   :  { %v17116_v54 = vadd.f32 %v5714_v17, %v19808_v51 }
0x1293   :  { %5795 = vmax.xlane.f32.xlu1 %v17113_v2 }
0x1294   :  { %5793 = vmax.xlane.f32.xlu0 %v17116_v54 }
0x1298   :  { %v11992_v4 = vpop.f32.mrb[106].mxu0 }
0x1299   :  { %v5724_v29 = vpop.f32.mrb[107].mxu0  ;;  %v17143_v27 = vadd.f32 %v11992_v4, %v19808_v51 }
0x129a   :  { %v17121_v10 = vadd.f32 %v5724_v29, %v19808_v51 }
0x129c   :  { %5797 = vmax.xlane.f32.xlu1 %v17121_v10 }
0x12a0   :  { %v11995_v35 = vpop.f32.mrb[108].mxu0 }
0x12a1   :  { %v5734_v63 = vpop.f32.mrb[109].mxu0  ;;  %v17159_v0 = vadd.f32 %v11995_v35, %v19808_v51 }
0x12a2   :  { %v17146_v15 = vadd.f32 %v5734_v63, %v19808_v51 }
0x12a8   :  { %v11998_v30 = vpop.f32.mrb[110].mxu0 }
0x12a9   :  { %v5744_v55 = vpop.f32.mrb[111].mxu0  ;;  %v17175_v59 = vadd.f32 %v11998_v30, %v19808_v51 }
0x12aa   :  { %v17162_v52 = vadd.f32 %v5744_v55, %v19808_v51 }
0x12b0   :  { %v12001_v14 = vpop.f32.mrb[112].mxu0 }
0x12b1   :  { %v5754_v9 = vpop.f32.mrb[113].mxu0  ;;  %v17191_v30 = vadd.f32 %v12001_v14, %v19808_v51  ;;  %v12932_v14 = vld [vmem:[%s19689_s1 + $0x48] sm:$0xff]  }
0x12b2   :  { %v17178_v17 = vadd.f32 %v5754_v9, %v19808_v51  ;;  %10774 = vmatmul.mubr.msk.bf16.gmra.mrb[124].mxu1 %vm222_vm0, %v12932_v14 }
0x12b3   :  { %5547 = vmatprep.mubr.bf16.mxu1 %v19789_v43 }
0x12b8   :  { %v12004_v12 = vpop.f32.mrb[114].mxu0 }
0x12b9   :  { %v5764_v18 = vpop.f32.mrb[115].mxu0 }
0x12ba   :  { %v17194_v55 = vadd.f32 %v5764_v18, %v19808_v51  ;;  %v17210_v18 = vadd.f32 %v12004_v12, %v19808_v51  ;;  %v12933_v12 = vld [vmem:[%s19689_s1 + $0x50] sm:$0xff]  }
0x12bb   :  { %10775 = vmatmul.mubr.msk.bf16.gmra.mrb[128].mxu1 %vm222_vm0, %v12933_v12 }
0x12bc   :  { %5557 = vmatprep.mubr.bf16.mxu1 %v19789_v43 }
0x12c0   :  { %v17124_v5 = vpop.f32.mrb[116].mxu0 }
0x12c1   :  { %v5774_v46 = vpop.f32.mrb[117].mxu0 }
0x12c8   :  { %v17126_v33 = vpop.f32.mrb[118].mxu0 }
0x12c9   :  { %v17128_v47 = vpop.f32.mrb[119].mxu0 }
0x12cc   :  { %v12050_v61 = vpop.f32.mrb[120].mxu0 }
0x12cd   :  { %v17131_v48 = vadd.f32 %v12050_v61, %v19808_v51  ;;  %v6153_v32 = vpop.f32.mrb[121].mxu0 }
0x12ce   :  { %v17135_v50 = vadd.f32 %v6153_v32, %v19808_v51  ;;  %v17213_v32 = vadd.f32 %v5774_v46, %v19808_v51  ;;  %v17232_v46 = vadd.f32 %v17124_v5, %v19808_v51  ;;  %v17252_v5 = vadd.f32 %v17126_v33, %v19808_v51 }
0x12cf   :  { %6234 = vmax.xlane.f32.xlu0 %v17131_v48 }
0x12d0   :  { %v12053_v6 = vpop.f32.mrb[122].mxu0 }
0x12d1   :  { %v6163_v11 = vpop.f32.mrb[123].mxu0  ;;  %v17149_v45 = vadd.f32 %v12053_v6, %v19808_v51 }
0x12d2   :  { %v17138_v19 = vadd.f32 %v6163_v11, %v19808_v51 }
0x12d3   :  { %6232 = vmax.xlane.f32.xlu0 %v17135_v50 }
0x12d4   :  { %6236 = vmax.xlane.f32.xlu1 %v17138_v19  ;;  %v12056_v34 = vpop.f32.mrb[124].mxu0 }
0x12d5   :  { %v6173_v40 = vpop.f32.mrb[125].mxu0  ;;  %v17165_v39 = vadd.f32 %v12056_v34, %v19808_v51  ;;  %v17236_v34 = vadd.f32 %v17128_v47, %v19808_v51 }
0x12d6   :  { %v17154_v58 = vadd.f32 %v6173_v40, %v19808_v51 }
0x12d7   :  { %5799 = vmax.xlane.f32.xlu0 %v17143_v27 }
0x12d8   :  { %5801 = vmax.xlane.f32.xlu1 %v17146_v15  ;;  %v12059_v20 = vpop.f32.mrb[126].mxu0 }
0x12d9   :  { %v6183_v16 = vpop.f32.mrb[127].mxu0  ;;  %v17181_v4 = vadd.f32 %v12059_v20, %v19808_v51 }
0x12da   :  { %v17170_v7 = vadd.f32 %v6183_v16, %v19808_v51 }
0x12db   :  { %6238 = vmax.xlane.f32.xlu0 %v17149_v45 }
0x12dc   :  { %6240 = vmax.xlane.f32.xlu1 %v17154_v58  ;;  %v12062_v57 = vpop.f32.mrb[128].mxu0 }
0x12dd   :  { %v6193_v42 = vpop.f32.mrb[129].mxu0  ;;  %v17197_v9 = vadd.f32 %v12062_v57, %v19808_v51 }
0x12de   :  { %v17186_v29 = vadd.f32 %v6193_v42, %v19808_v51 }
0x12df   :  { %5803 = vmax.xlane.f32.xlu0 %v17159_v0 }
0x12e0   :  { %5805 = vmax.xlane.f32.xlu1 %v17162_v52  ;;  %v12065_v8 = vpop.f32.mrb[130].mxu0 }
0x12e1   :  { %v6203_v38 = vpop.f32.mrb[131].mxu0  ;;  %v17217_v6 = vadd.f32 %v12065_v8, %v19808_v51 }
0x12e2   :  { %v17202_v61 = vadd.f32 %v6203_v38, %v19808_v51 }
0x12e3   :  { %6242 = vmax.xlane.f32.xlu0 %v17165_v39 }
0x12e4   :  { %6244 = vmax.xlane.f32.xlu1 %v17170_v7  ;;  %v12068_v13 = vpop.f32.mrb[132].mxu0 }
0x12e5   :  { %v6213_v44 = vpop.f32.mrb[133].mxu0  ;;  %v17240_v40 = vadd.f32 %v12068_v13, %v19808_v51 }
0x12e6   :  { %v17223_v11 = vadd.f32 %v6213_v44, %v19808_v51 }
0x12e7   :  { %5807 = vmax.xlane.f32.xlu0 %v17175_v59 }
0x12e8   :  { %5809 = vmax.xlane.f32.xlu1 %v17178_v17  ;;  %v12071_v35 = vpop.f32.mrb[134].mxu0 }
0x12e9   :  { %v6223_v63 = vpop.f32.mrb[135].mxu0  ;;  %v17255_v47 = vadd.f32 %v12071_v35, %v19808_v51 }
0x12ea   :  { %v17246_v20 = vadd.f32 %v6223_v63, %v19808_v51 }
0x12eb   :  { %6246 = vmax.xlane.f32.xlu0 %v17181_v4 }
0x12ec   :  { %6248 = vmax.xlane.f32.xlu1 %v17186_v29 }
0x12ef   :  { %5811 = vmax.xlane.f32.xlu0 %v17191_v30 }
0x12f0   :  { %5813 = vmax.xlane.f32.xlu1 %v17194_v55 }
0x12f3   :  { %6250 = vmax.xlane.f32.xlu0 %v17197_v9 }
0x12f4   :  { %6252 = vmax.xlane.f32.xlu1 %v17202_v61 }
0x12f7   :  { %5815 = vmax.xlane.f32.xlu0 %v17210_v18 }
0x12f8   :  { %5817 = vmax.xlane.f32.xlu1 %v17213_v32 }
0x12fb   :  { %6254 = vmax.xlane.f32.xlu0 %v17217_v6 }
0x12fc   :  { %6256 = vmax.xlane.f32.xlu1 %v17223_v11 }
0x12ff   :  { %5819 = vmax.xlane.f32.xlu0 %v17232_v46 }
0x1300   :  { %5821 = vmax.xlane.f32.xlu1 %v17236_v34 }
0x1303   :  { %6258 = vmax.xlane.f32.xlu0 %v17240_v40 }
0x1304   :  { %6260 = vmax.xlane.f32.xlu1 %v17246_v20 }
0x1307   :  { %5823 = vmax.xlane.f32.xlu0 %v17252_v5 }
0x130b   :  { %6262 = vmax.xlane.f32.xlu0 %v17255_v47 }
0x1320   :  { %v5796_v16 = vpop.xlane.xlu1 %5795 }
0x1321   :  { %v5826_v57 = vsub.f32 %v17113_v2, %v5796_v16  ;;  %v5794_v42 = vpop.xlane.xlu0 %5793 }
0x1322   :  { %v5825_v8 = vsub.f32 %v17116_v54, %v5794_v42 }
0x1323   :  { %v5843_v38 = vmul.f32 1.442695, %v5826_v57 }
0x1324   :  { %v5841_v13 = vmul.f32 1.442695, %v5825_v8 }
0x1325   :  { %13600 = vpow2.f32 %v5843_v38 }
0x1326   :  { %13602 = vpow2.f32 %v5841_v13 }
0x1329   :  { %v5798_v63 = vpop.xlane.xlu1 %5797 }
0x132a   :  { %v5827_v12 = vsub.f32 %v17121_v10, %v5798_v63 }
0x132c   :  { %v5845_v8 = vmul.f32 1.442695, %v5827_v12 }
0x132f   :  { %v17261_v44 = vpop.eup %13600 }
0x1330   :  { %v17263_v33 = vpop.eup %13602  ;;  %5875 = vadd.xlane.f32.xlu0 %v17261_v44 }
0x1331   :  { %5873 = vadd.xlane.f32.xlu1 %v17263_v33 }
0x135c   :  { %v6235_v35 = vpop.xlane.xlu0 %6234 }
0x135d   :  { %v6265_v14 = vsub.f32 %v17131_v48, %v6235_v35 }
0x135f   :  { %v6282_v2 = vmul.f32 1.442695, %v6265_v14 }
0x1360   :  { %v6233_v54 = vpop.xlane.xlu0 %6232 }
0x1361   :  { %13604 = vpow2.f32 %v6282_v2  ;;  %v6264_v16 = vsub.f32 %v17135_v50, %v6233_v54  ;;  %v6237_v57 = vpop.xlane.xlu1 %6236 }
0x1362   :  { %v6266_v38 = vsub.f32 %v17138_v19, %v6237_v57 }
0x1363   :  { %v6280_v42 = vmul.f32 1.442695, %v6264_v16 }
0x1364   :  { %v5800_v13 = vpop.xlane.xlu0 %5799  ;;  %v6284_v48 = vmul.f32 1.442695, %v6266_v38 }
0x1365   :  { %13606 = vpow2.f32 %v6280_v42  ;;  %v5828_v36 = vsub.f32 %v17143_v27, %v5800_v13  ;;  %v5802_v62 = vpop.xlane.xlu1 %5801 }
0x1366   :  { %13608 = vpow2.f32 %v5845_v8  ;;  %v5829_v35 = vsub.f32 %v17146_v15, %v5802_v62 }
0x1367   :  { %v5847_v25 = vmul.f32 1.442695, %v5828_v36 }
0x1368   :  { %v6239_v10 = vpop.xlane.xlu0 %6238  ;;  %v5849_v19 = vmul.f32 1.442695, %v5829_v35 }
0x1369   :  { %13610 = vpow2.f32 %v5847_v25  ;;  %v6267_v63 = vsub.f32 %v17149_v45, %v6239_v10  ;;  %v6241_v50 = vpop.xlane.xlu1 %6240 }
0x136a   :  { %13612 = vpow2.f32 %v6284_v48  ;;  %v6268_v12 = vsub.f32 %v17154_v58, %v6241_v50 }
0x136b   :  { %v17274_v14 = vpop.eup %13604  ;;  %v6286_v2 = vmul.f32 1.442695, %v6267_v63 }
0x136c   :  { %6314 = vadd.xlane.f32.xlu0 %v17274_v14  ;;  %v5804_v27 = vpop.xlane.xlu0 %5803  ;;  %v6288_v15 = vmul.f32 1.442695, %v6268_v12 }
0x136d   :  { %13614 = vpow2.f32 %v6286_v2  ;;  %v5830_v36 = vsub.f32 %v17159_v0, %v5804_v27  ;;  %v5806_v54 = vpop.xlane.xlu1 %5805 }
0x136e   :  { %13616 = vpow2.f32 %v5849_v19  ;;  %v5831_v45 = vsub.f32 %v17162_v52, %v5806_v54 }
0x136f   :  { %v17279_v62 = vpop.eup %13606  ;;  %v5851_v25 = vmul.f32 1.442695, %v5830_v36 }
0x1370   :  { %6312 = vadd.xlane.f32.xlu1 %v17279_v62  ;;  %v6243_v16 = vpop.xlane.xlu0 %6242  ;;  %v17284_v42 = vpop.eup %13608  ;;  %v5853_v38 = vmul.f32 1.442695, %v5831_v45 }
0x1371   :  { %13618 = vpow2.f32 %v5851_v25  ;;  %v6269_v58 = vsub.f32 %v17165_v39, %v6243_v16  ;;  %v6245_v57 = vpop.xlane.xlu1 %6244 }
0x1372   :  { %13620 = vpow2.f32 %v6288_v15  ;;  %v6270_v13 = vsub.f32 %v17170_v7, %v6245_v57 }
0x1373   :  { %v17286_v8 = vpop.eup %13610  ;;  %v6290_v0 = vmul.f32 1.442695, %v6269_v58 }
0x1374   :  { %5877 = vadd.xlane.f32.xlu1 %v17284_v42  ;;  %5879 = vadd.xlane.f32.xlu0 %v17286_v8  ;;  %v5808_v52 = vpop.xlane.xlu0 %5807  ;;  %v17292_v39 = vpop.eup %13612  ;;  %v6292_v50 = vmul.f32 1.442695, %v6270_v13 }
0x1375   :  { %13622 = vpow2.f32 %v6290_v0  ;;  %v5832_v48 = vsub.f32 %v17175_v59, %v5808_v52  ;;  %v5810_v35 = vpop.xlane.xlu1 %5809 }
0x1376   :  { %13624 = vpow2.f32 %v5853_v38  ;;  %v5833_v2 = vsub.f32 %v17178_v17, %v5810_v35 }
0x1377   :  { %v17294_v10 = vpop.eup %13614  ;;  %v5855_v63 = vmul.f32 1.442695, %v5832_v48 }
0x1378   :  { %6316 = vadd.xlane.f32.xlu1 %v17292_v39  ;;  %6318 = vadd.xlane.f32.xlu0 %v17294_v10  ;;  %v6247_v7 = vpop.xlane.xlu0 %6246  ;;  %v17300_v59 = vpop.eup %13616  ;;  %v5857_v54 = vmul.f32 1.442695, %v5833_v2 }
0x1379   :  { %13626 = vpow2.f32 %v5855_v63  ;;  %v6271_v19 = vsub.f32 %v17181_v4, %v6247_v7  ;;  %v6249_v12 = vpop.xlane.xlu1 %6248 }
0x137a   :  { %13628 = vpow2.f32 %v6292_v50  ;;  %v6272_v25 = vsub.f32 %v17186_v29, %v6249_v12 }
0x137b   :  { %v17302_v27 = vpop.eup %13618  ;;  %v6294_v36 = vmul.f32 1.442695, %v6271_v19 }
0x137c   :  { %5881 = vadd.xlane.f32.xlu1 %v17300_v59  ;;  %5883 = vadd.xlane.f32.xlu0 %v17302_v27  ;;  %v5812_v17 = vpop.xlane.xlu0 %5811  ;;  %v17308_v4 = vpop.eup %13620  ;;  %v6296_v57 = vmul.f32 1.442695, %v6272_v25 }
0x137d   :  { %13630 = vpow2.f32 %v6294_v36  ;;  %v5834_v15 = vsub.f32 %v17191_v30, %v5812_v17  ;;  %v5814_v45 = vpop.xlane.xlu1 %5813 }
0x137e   :  { %13632 = vpow2.f32 %v5857_v54  ;;  %v5835_v0 = vsub.f32 %v17194_v55, %v5814_v45 }
0x137f   :  { %v17310_v16 = vpop.eup %13622  ;;  %v5859_v58 = vmul.f32 1.442695, %v5834_v15 }
0x1380   :  { %6320 = vadd.xlane.f32.xlu1 %v17308_v4  ;;  %6322 = vadd.xlane.f32.xlu0 %v17310_v16  ;;  %v6251_v29 = vpop.xlane.xlu0 %6250  ;;  %v17316_v30 = vpop.eup %13624  ;;  %v5861_v35 = vmul.f32 1.442695, %v5835_v0 }
0x1381   :  { %13634 = vpow2.f32 %v5859_v58  ;;  %v6273_v38 = vsub.f32 %v17197_v9, %v6251_v29  ;;  %v6253_v13 = vpop.xlane.xlu1 %6252 }
0x1382   :  { %13636 = vpow2.f32 %v6296_v57  ;;  %v6274_v63 = vsub.f32 %v17202_v61, %v6253_v13 }
0x1383   :  { %v17318_v52 = vpop.eup %13626  ;;  %v6298_v48 = vmul.f32 1.442695, %v6273_v38 }
0x1384   :  { %5885 = vadd.xlane.f32.xlu1 %v17316_v30  ;;  %5887 = vadd.xlane.f32.xlu0 %v17318_v52  ;;  %v5816_v55 = vpop.xlane.xlu0 %5815  ;;  %v17324_v9 = vpop.eup %13628  ;;  %v6300_v12 = vmul.f32 1.442695, %v6274_v63 }
0x1385   :  { %13638 = vpow2.f32 %v6298_v48  ;;  %v5836_v50 = vsub.f32 %v17210_v18, %v5816_v55  ;;  %v5818_v2 = vpop.xlane.xlu1 %5817 }
0x1386   :  { %13640 = vpow2.f32 %v5861_v35  ;;  %v5837_v36 = vsub.f32 %v17213_v32, %v5818_v2 }
0x1387   :  { %v17326_v7 = vpop.eup %13630  ;;  %v5863_v19 = vmul.f32 1.442695, %v5836_v50 }
0x1388   :  { %6324 = vadd.xlane.f32.xlu1 %v17324_v9  ;;  %6326 = vadd.xlane.f32.xlu0 %v17326_v7  ;;  %v6255_v61 = vpop.xlane.xlu0 %6254  ;;  %v17332_v18 = vpop.eup %13632  ;;  %v5865_v45 = vmul.f32 1.442695, %v5837_v36 }
0x1389   :  { %13642 = vpow2.f32 %v5863_v19  ;;  %v6275_v54 = vsub.f32 %v17217_v6, %v6255_v61  ;;  %v6257_v25 = vpop.xlane.xlu1 %6256 }
0x138a   :  { %13644 = vpow2.f32 %v6300_v12  ;;  %v6276_v58 = vsub.f32 %v17223_v11, %v6257_v25 }
0x138b   :  { %v17334_v17 = vpop.eup %13634  ;;  %v6302_v15 = vmul.f32 1.442695, %v6275_v54 }
0x138c   :  { %5889 = vadd.xlane.f32.xlu1 %v17332_v18  ;;  %5891 = vadd.xlane.f32.xlu0 %v17334_v17  ;;  %v5820_v32 = vpop.xlane.xlu0 %5819  ;;  %v17340_v6 = vpop.eup %13636  ;;  %v6304_v13 = vmul.f32 1.442695, %v6276_v58 }
0x138d   :  { %13646 = vpow2.f32 %v6302_v15  ;;  %v5838_v57 = vsub.f32 %v17232_v46, %v5820_v32  ;;  %v5822_v0 = vpop.xlane.xlu1 %5821 }
0x138e   :  { %13648 = vpow2.f32 %v5865_v45  ;;  %v5839_v48 = vsub.f32 %v17236_v34, %v5822_v0 }
0x138f   :  { %v17342_v29 = vpop.eup %13638  ;;  %v5867_v38 = vmul.f32 1.442695, %v5838_v57 }
0x1390   :  { %6328 = vadd.xlane.f32.xlu1 %v17340_v6  ;;  %6330 = vadd.xlane.f32.xlu0 %v17342_v29  ;;  %v6259_v11 = vpop.xlane.xlu0 %6258  ;;  %v17348_v46 = vpop.eup %13640  ;;  %v5869_v2 = vmul.f32 1.442695, %v5839_v48 }
0x1391   :  { %13650 = vpow2.f32 %v5867_v38  ;;  %v6277_v35 = vsub.f32 %v17240_v40, %v6259_v11  ;;  %v6261_v63 = vpop.xlane.xlu1 %6260  ;;  %v12934_v11 = vld [vmem:[%s19689_s1 + $0x58] sm:$0xff]  }
0x1392   :  { %13652 = vpow2.f32 %v6304_v13  ;;  %v6278_v19 = vsub.f32 %v17246_v20, %v6261_v63  ;;  %10776 = vmatmul.mubr.msk.bf16.gmra.mrb[132].mxu1 %vm222_vm0, %v12934_v11 }
0x1393   :  { %v17350_v55 = vpop.eup %13642  ;;  %v6306_v50 = vmul.f32 1.442695, %v6277_v35  ;;  %12043 = vmatprep.mubr.msk.f32.mxu1 %vm14284_vm3, %v19807_v31 }
0x1394   :  { %5893 = vadd.xlane.f32.xlu1 %v17348_v46  ;;  %5895 = vadd.xlane.f32.xlu0 %v17350_v55  ;;  %v5824_v34 = vpop.xlane.xlu0 %5823  ;;  %v17356_v36 = vpop.eup %13644  ;;  %v6308_v54 = vmul.f32 1.442695, %v6278_v19 }
0x1395   :  { %13654 = vpow2.f32 %v6306_v50  ;;  %v5840_v12 = vsub.f32 %v17252_v5, %v5824_v34 }
0x1396   :  { %13656 = vpow2.f32 %v5869_v2  ;;  %v17392_v2 = vpop.f32.mrb[124].mxu1 }
0x1397   :  { %v17358_v40 = vpop.eup %13646  ;;  %v5871_v61 = vmul.f32 1.442695, %v5840_v12  ;;  %v17397_v34 = vpop.f32.mrb[125].mxu1 }
0x1398   :  { %6332 = vadd.xlane.f32.xlu1 %v17356_v36  ;;  %6334 = vadd.xlane.f32.xlu0 %v17358_v40  ;;  %v6263_v20 = vpop.xlane.xlu0 %6262  ;;  %v17363_v15 = vpop.eup %13648 }
0x1399   :  { %13658 = vpow2.f32 %v5871_v61  ;;  %v6279_v25 = vsub.f32 %v17255_v47, %v6263_v20  ;;  %v17399_v12 = vpop.f32.mrb[126].mxu1 }
0x139a   :  { %13660 = vpow2.f32 %v6308_v54  ;;  %v17401_v54 = vpop.f32.mrb[127].mxu1 }
0x139b   :  { %v17365_v45 = vpop.eup %13650  ;;  %v6310_v5 = vmul.f32 1.442695, %v6279_v25  ;;  %v17404_v20 = vpop.f32.mrb[128].mxu1 }
0x139c   :  { %5897 = vadd.xlane.f32.xlu1 %v17363_v15  ;;  %5899 = vadd.xlane.f32.xlu0 %v17365_v45  ;;  %v17369_v58 = vpop.eup %13652 }
0x139d   :  { %13662 = vpow2.f32 %v6310_v5 }
0x139f   :  { %v17371_v32 = vpop.eup %13654 }
0x13a0   :  { %6336 = vadd.xlane.f32.xlu1 %v17369_v58  ;;  %6338 = vadd.xlane.f32.xlu0 %v17371_v32  ;;  %v17375_v47 = vpop.eup %13656 }
0x13a3   :  { %v17377_v57 = vpop.eup %13658 }
0x13a4   :  { %5901 = vadd.xlane.f32.xlu1 %v17375_v47  ;;  %5903 = vadd.xlane.f32.xlu0 %v17377_v57  ;;  %v17381_v0 = vpop.eup %13660 }
0x13a7   :  { %v17383_v38 = vpop.eup %13662 }
0x13a8   :  { %6340 = vadd.xlane.f32.xlu1 %v17381_v0  ;;  %6342 = vadd.xlane.f32.xlu0 %v17383_v38 }
0x13bd   :  { %v5876_v13 = vpop.xlane.xlu0 %5875 }
0x13be   :  { %13664 = vrcp.f32 %v5876_v13  ;;  %v5874_v48 = vpop.xlane.xlu1 %5873 }
0x13bf   :  { %13666 = vrcp.f32 %v5874_v48 }
0x13c8   :  { %v13665_v35 = vpop.eup %13664 }
0x13c9   :  { %v13667_v63 = vpop.eup %13666  ;;  %v5922_v50 = vmul.f32 %v13665_v35, %v17261_v44  ;;  %v17406_v44 = vpop.f32.mrb[129].mxu1 }
0x13ca   :  { %v5921_v19 = vmul.f32 %v13667_v63, %v17263_v33  ;;  %v17408_v25 = vpop.f32.mrb[130].mxu1 }
0x13cb   :  { %v17412_v33 = vpop.f32.mrb[131].mxu1 }
0x13cc   :  { %v12666_v61 = vpack.c.bf16 %v5922_v50, %v5921_v19 }
0x13ce   :  { %12667 = vmatpush3.bf16.xpose.msra.mxu1 %v12666_v61 }
0x13cf   :  { %12668 = vmatprep.subr.bf16.mxu1 %v19806_v53 }
0x13d5   :  { %6885 = vxpose.xlu0.b32.start.end [1/1] (short) %v17069_v41, 128 }
0x13db   :  { %6446 = vxpose.xlu1.b32.start.end [1/1] (short) %v17065_v49, 128 }
0x13f9   :  { %v6315_v5 = vpop.xlane.xlu0 %6314 }
0x13fa   :  { %13668 = vrcp.f32 %v6315_v5 }
0x13fd   :  { %v6313_v13 = vpop.xlane.xlu1 %6312 }
0x13fe   :  { %13670 = vrcp.f32 %v6313_v13 }
0x1401   :  { %v5878_v48 = vpop.xlane.xlu1 %5877  ;;  %v5880_v11 = vpop.xlane.xlu0 %5879 }
0x1402   :  { %13672 = vrcp.f32 %v5878_v48 }
0x1403   :  { %13674 = vrcp.f32 %v5880_v11 }
0x1404   :  { %v13669_v50 = vpop.eup %13668 }
0x1405   :  { %v6317_v35 = vpop.xlane.xlu1 %6316  ;;  %v6319_v63 = vpop.xlane.xlu0 %6318  ;;  %v6361_v23 = vmul.f32 %v13669_v50, %v17274_v14 }
0x1406   :  { %13676 = vrcp.f32 %v6317_v35 }
0x1407   :  { %13678 = vrcp.f32 %v6319_v63 }
0x1408   :  { %v13671_v19 = vpop.eup %13670 }
0x1409   :  { %v5882_v61 = vpop.xlane.xlu1 %5881  ;;  %v5884_v41 = vpop.xlane.xlu0 %5883  ;;  %v6360_v49 = vmul.f32 %v13671_v19, %v17279_v62 }
0x140a   :  { %13680 = vrcp.f32 %v5882_v61 }
0x140b   :  { %13682 = vrcp.f32 %v5884_v41  ;;  %v12690_v5 = vpack.c.bf16 %v6361_v23, %v6360_v49 }
0x140c   :  { %v13673_v13 = vpop.eup %13672 }
0x140d   :  { %v13675_v3 = vpop.eup %13674  ;;  %v6321_v21 = vpop.xlane.xlu1 %6320  ;;  %12691 = vmatpush3.bf16.xpose.msra.mxu0 %v12690_v5  ;;  %v5923_v11 = vmul.f32 %v13673_v13, %v17284_v42 }
0x140e   :  { %v6323_v48 = vpop.xlane.xlu0 %6322  ;;  %13684 = vrcp.f32 %v6321_v21  ;;  %v5924_v35 = vmul.f32 %v13675_v3, %v17286_v8  ;;  %12692 = vmatprep.subr.bf16.mxu0 %v19806_v53 }
0x140f   :  { %13686 = vrcp.f32 %v6323_v48 }
0x1410   :  { %v13677_v63 = vpop.eup %13676  ;;  %v12669_v62 = vpack.c.bf16 %v5924_v35, %v5923_v11 }
0x1411   :  { %v13679_v19 = vpop.eup %13678  ;;  %v5886_v14 = vpop.xlane.xlu1 %5885  ;;  %v6362_v23 = vmul.f32 %v13677_v63, %v17292_v39 }
0x1412   :  { %v5888_v50 = vpop.xlane.xlu0 %5887  ;;  %13688 = vrcp.f32 %v5886_v14  ;;  %12670 = vmatpush3.bf16.xpose.msra.mxu1 %v12669_v62  ;;  %v6363_v61 = vmul.f32 %v13679_v19, %v17294_v10 }
0x1413   :  { %13690 = vrcp.f32 %v5888_v50  ;;  %12671 = vmatprep.subr.bf16.mxu1 %v19806_v53 }
0x1414   :  { %v13681_v21 = vpop.eup %13680  ;;  %v12693_v42 = vpack.c.bf16 %v6363_v61, %v6362_v23 }
0x1415   :  { %v13683_v3 = vpop.eup %13682  ;;  %v6325_v8 = vpop.xlane.xlu1 %6324  ;;  %v5925_v49 = vmul.f32 %v13681_v21, %v17300_v59 }
0x1416   :  { %v6327_v41 = vpop.xlane.xlu0 %6326  ;;  %13692 = vrcp.f32 %v6325_v8  ;;  %12694 = vmatpush3.bf16.xpose.msra.mxu0 %v12693_v42  ;;  %v5926_v5 = vmul.f32 %v13683_v3, %v17302_v27 }
0x1417   :  { %13694 = vrcp.f32 %v6327_v41  ;;  %12695 = vmatprep.subr.bf16.mxu0 %v19806_v53 }
0x1418   :  { %v13685_v39 = vpop.eup %13684  ;;  %v12672_v13 = vpack.c.bf16 %v5926_v5, %v5925_v49 }
0x1419   :  { %v13687_v10 = vpop.eup %13686  ;;  %v5890_v48 = vpop.xlane.xlu1 %5889  ;;  %v6364_v35 = vmul.f32 %v13685_v39, %v17308_v4 }
0x141a   :  { %v5892_v11 = vpop.xlane.xlu0 %5891  ;;  %13696 = vrcp.f32 %v5890_v48  ;;  %12673 = vmatpush3.bf16.xpose.msra.mxu1 %v12672_v13  ;;  %v6365_v63 = vmul.f32 %v13687_v10, %v17310_v16 }
0x141b   :  { %13698 = vrcp.f32 %v5892_v11  ;;  %12674 = vmatprep.subr.bf16.mxu1 %v19806_v53 }
0x141c   :  { %v13689_v59 = vpop.eup %13688  ;;  %v12696_v62 = vpack.c.bf16 %v6365_v63, %v6364_v35 }
0x141d   :  { %v13691_v27 = vpop.eup %13690  ;;  %v6329_v19 = vpop.xlane.xlu1 %6328  ;;  %v5927_v50 = vmul.f32 %v13689_v59, %v17316_v30 }
0x141e   :  { %v6331_v14 = vpop.xlane.xlu0 %6330  ;;  %13700 = vrcp.f32 %v6329_v19  ;;  %12697 = vmatpush3.bf16.xpose.msra.mxu0 %v12696_v62  ;;  %v5928_v23 = vmul.f32 %v13691_v27, %v17318_v52 }
0x141f   :  { %13702 = vrcp.f32 %v6331_v14  ;;  %12698 = vmatprep.subr.bf16.mxu0 %v19806_v53 }
0x1420   :  { %v13693_v4 = vpop.eup %13692  ;;  %v12675_v61 = vpack.c.bf16 %v5928_v23, %v5927_v50 }
0x1421   :  { %v13695_v16 = vpop.eup %13694  ;;  %v5894_v21 = vpop.xlane.xlu1 %5893  ;;  %v6366_v3 = vmul.f32 %v13693_v4, %v17324_v9 }
0x1422   :  { %v5896_v42 = vpop.xlane.xlu0 %5895  ;;  %13704 = vrcp.f32 %v5894_v21  ;;  %12676 = vmatpush3.bf16.xpose.msra.mxu1 %v12675_v61  ;;  %v6367_v8 = vmul.f32 %v13695_v16, %v17326_v7 }
0x1423   :  { %13706 = vrcp.f32 %v5896_v42  ;;  %12677 = vmatprep.subr.bf16.mxu1 %v19806_v53 }
0x1424   :  { %v13697_v30 = vpop.eup %13696  ;;  %v12699_v41 = vpack.c.bf16 %v6367_v8, %v6366_v3 }
0x1425   :  { %v13699_v52 = vpop.eup %13698  ;;  %v6333_v49 = vpop.xlane.xlu1 %6332  ;;  %v5929_v39 = vmul.f32 %v13697_v30, %v17332_v18 }
0x1426   :  { %v6335_v5 = vpop.xlane.xlu0 %6334  ;;  %13708 = vrcp.f32 %v6333_v49  ;;  %12700 = vmatpush3.bf16.xpose.msra.mxu0 %v12699_v41  ;;  %v5930_v13 = vmul.f32 %v13699_v52, %v17334_v17 }
0x1427   :  { %13710 = vrcp.f32 %v6335_v5  ;;  %12701 = vmatprep.subr.bf16.mxu0 %v19806_v53 }
0x1428   :  { %v13701_v9 = vpop.eup %13700  ;;  %v12678_v10 = vpack.c.bf16 %v5930_v13, %v5929_v39 }
0x1429   :  { %v13703_v7 = vpop.eup %13702  ;;  %v5898_v48 = vpop.xlane.xlu1 %5897  ;;  %v6368_v35 = vmul.f32 %v13701_v9, %v17340_v6 }
0x142a   :  { %v5900_v11 = vpop.xlane.xlu0 %5899  ;;  %13712 = vrcp.f32 %v5898_v48  ;;  %12679 = vmatpush3.bf16.xpose.msra.mxu1 %v12678_v10  ;;  %v6369_v63 = vmul.f32 %v13703_v7, %v17342_v29 }
0x142b   :  { %13714 = vrcp.f32 %v5900_v11  ;;  %12680 = vmatprep.subr.bf16.mxu1 %v19806_v53 }
0x142c   :  { %v13705_v18 = vpop.eup %13704  ;;  %v12702_v59 = vpack.c.bf16 %v6369_v63, %v6368_v35 }
0x142d   :  { %v13707_v17 = vpop.eup %13706  ;;  %v6337_v62 = vpop.xlane.xlu1 %6336  ;;  %v5931_v19 = vmul.f32 %v13705_v18, %v17348_v46 }
0x142e   :  { %v6339_v27 = vpop.xlane.xlu0 %6338  ;;  %13716 = vrcp.f32 %v6337_v62  ;;  %12703 = vmatpush3.bf16.xpose.msra.mxu0 %v12702_v59  ;;  %v5932_v14 = vmul.f32 %v13707_v17, %v17350_v55 }
0x142f   :  { %13718 = vrcp.f32 %v6339_v27  ;;  %12704 = vmatprep.subr.bf16.mxu0 %v19806_v53 }
0x1430   :  { %v13709_v6 = vpop.eup %13708  ;;  %v12681_v50 = vpack.c.bf16 %v5932_v14, %v5931_v19 }
0x1431   :  { %v13711_v29 = vpop.eup %13710  ;;  %v5902_v23 = vpop.xlane.xlu1 %5901  ;;  %v6370_v61 = vmul.f32 %v13709_v6, %v17356_v36 }
0x1432   :  { %v5904_v4 = vpop.xlane.xlu0 %5903  ;;  %13720 = vrcp.f32 %v5902_v23  ;;  %12682 = vmatpush3.bf16.xpose.msra.mxu1 %v12681_v50  ;;  %v6371_v16 = vmul.f32 %v13711_v29, %v17358_v40 }
0x1433   :  { %13722 = vrcp.f32 %v5904_v4  ;;  %12683 = vmatprep.subr.bf16.mxu1 %v19806_v53 }
0x1434   :  { %v13713_v46 = vpop.eup %13712  ;;  %v12705_v21 = vpack.c.bf16 %v6371_v16, %v6370_v61 }
0x1435   :  { %v13715_v55 = vpop.eup %13714  ;;  %v6341_v42 = vpop.xlane.xlu1 %6340  ;;  %v5933_v8 = vmul.f32 %v13713_v46, %v17363_v15 }
0x1436   :  { %v6343_v3 = vpop.xlane.xlu0 %6342  ;;  %13724 = vrcp.f32 %v6341_v42  ;;  %12706 = vmatpush3.bf16.xpose.msra.mxu0 %v12705_v21  ;;  %v5934_v30 = vmul.f32 %v13715_v55, %v17365_v45 }
0x1437   :  { %13726 = vrcp.f32 %v6343_v3  ;;  %12707 = vmatprep.subr.bf16.mxu0 %v19806_v53 }
0x1438   :  { %v13717_v36 = vpop.eup %13716  ;;  %v12684_v41 = vpack.c.bf16 %v5934_v30, %v5933_v8 }
0x1439   :  { %v13719_v40 = vpop.eup %13718  ;;  %v6372_v52 = vmul.f32 %v13717_v36, %v17369_v58 }
0x143a   :  { %12685 = vmatpush3.bf16.xpose.msra.mxu1 %v12684_v41  ;;  %v6373_v49 = vmul.f32 %v13719_v40, %v17371_v32 }
0x143b   :  { %12686 = vmatprep.subr.bf16.mxu1 %v19806_v53 }
0x143c   :  { %v13721_v5 = vpop.eup %13720  ;;  %v12708_v39 = vpack.c.bf16 %v6373_v49, %v6372_v52 }
0x143d   :  { %v13723_v15 = vpop.eup %13722  ;;  %v5935_v13 = vmul.f32 %v13721_v5, %v17375_v47 }
0x143e   :  { %12709 = vmatpush3.bf16.xpose.msra.mxu0 %v12708_v39  ;;  %v5936_v45 = vmul.f32 %v13723_v15, %v17377_v57 }
0x143f   :  { %12710 = vmatprep.subr.bf16.mxu0 %v19806_v53 }
0x1440   :  { %v13725_v9 = vpop.eup %13724  ;;  %v12687_v10 = vpack.c.bf16 %v5936_v45, %v5935_v13 }
0x1441   :  { %v13727_v7 = vpop.eup %13726  ;;  %v6374_v58 = vmul.f32 %v13725_v9, %v17381_v0 }
0x1442   :  { %12688 = vmatpush3.bf16.xpose.msra.mxu1 %v12687_v10  ;;  %v6375_v32 = vmul.f32 %v13727_v7, %v17383_v38 }
0x1443   :  { %12107 = vmatprep.subr.mxu1 %v17392_v2 }
0x1444   :  { %v12711_v48 = vpack.c.bf16 %v6375_v32, %v6374_v58 }
0x1446   :  { %12712 = vmatpush3.bf16.xpose.msra.mxu0 %v12711_v48 }
0x1447   :  { %12168 = vmatprep.subr.mxu0 %v17399_v12 }
0x1449   :  { %12044 = vmatmul.mubr.f32.vlgmr.msra.gmra.mrb[136].mxu1 %v17404_v20 }
0x144a   :  { %12108 = vmatpush3.msra.mxu1 %v17392_v2 }
0x144b   :  { %12713 = vmatprep.subr.bf16.mxu1 %v19806_v53 }
0x144d   :  { %12105 = vmatmul.mubr.f32.vlgmr.msra.gmra.mrb[136].mxu0 %v17408_v25 }
0x144e   :  { %12169 = vmatpush3.msra.mxu0 %v17399_v12 }
0x144f   :  { %12737 = vmatprep.subr.bf16.mxu0 %v19806_v53 }
0x1455   :  { %v6901_v47 = vpop.trf.xlu0 }
0x1456   :  { %12170 = vmatprep.mubr.msk.f32.mxu0 %vm366_vm1, %v6901_v47 }
0x1459   :  { %v6902_v57 = vpop.trf.xlu0 }
0x145a   :  { %12171 = vmatmul.mubr.msk.f32.vlgmr.msra.gmra.mrb[138].mxu0 %vm366_vm1, %v6902_v57 }
0x145b   :  { %v6462_v0 = vpop.trf.xlu1 }
0x145c   :  { %12109 = vmatprep.mubr.msk.f32.mxu1 %vm366_vm1, %v6462_v0 }
0x145d   :  { %v6903_v38 = vpop.trf.xlu0 }
0x145e   :  { %12173 = vmatprep.mubr.msk.f32.mxu0 %vm366_vm1, %v6903_v38 }
0x145f   :  { %v6463_v2 = vpop.trf.xlu1 }
0x1460   :  { %12110 = vmatmul.mubr.msk.f32.vlgmr.msra.gmra.mrb[138].mxu1 %vm366_vm1, %v6463_v2 }
0x1461   :  { %v6904_v20 = vpop.trf.xlu0 }
0x1462   :  { %12174 = vmatmul.mubr.msk.f32.gmra.mrb[140].mxu0 %vm366_vm1, %v6904_v20 }
0x1463   :  { %v6464_v12 = vpop.trf.xlu1 }
0x1464   :  { %12112 = vmatprep.mubr.msk.f32.mxu1 %vm366_vm1, %v6464_v12 }
0x1465   :  { %v6905_v25 = vpop.trf.xlu0  ;;  %v17501_v36 = vpop.f32.mrb[132].mxu1 }
0x1466   :  { %12176 = vmatprep.mubr.msk.f32.mxu0 %vm366_vm1, %v6905_v25  ;;  %v17503_v41 = vpop.f32.mrb[133].mxu1 }
0x1467   :  { %v6465_v11 = vpop.trf.xlu1  ;;  %v17505_v40 = vpop.f32.mrb[134].mxu1 }
0x1468   :  { %12113 = vmatmul.mubr.msk.f32.gmra.mrb[140].mxu1 %vm366_vm1, %v6465_v11  ;;  %v17507_v52 = vpop.f32.mrb[135].mxu1 }
0x1469   :  { %v6906_v35 = vpop.trf.xlu0  ;;  %19809 = vst [vmem:[#allocation15_spill] sm:$0xff] %v17507_v52 }
0x146a   :  { %12177 = vmatmul.mubr.msk.f32.gmra.mrb[142].mxu0 %vm366_vm1, %v6906_v35 }
0x146b   :  { %v6466_v63 = vpop.trf.xlu1 }
0x146c   :  { %12115 = vmatprep.mubr.msk.f32.mxu1 %vm366_vm1, %v6466_v63 }
0x146d   :  { %v6907_v18 = vpop.trf.xlu0 }
0x146e   :  { %12179 = vmatprep.mubr.msk.f32.mxu0 %vm366_vm1, %v6907_v18 }
0x146f   :  { %v6467_v59 = vpop.trf.xlu1 }
0x1470   :  { %12116 = vmatmul.mubr.msk.f32.gmra.mrb[142].mxu1 %vm366_vm1, %v6467_v59 }
0x1471   :  { %v6908_v17 = vpop.trf.xlu0 }
0x1472   :  { %12180 = vmatmul.mubr.msk.f32.gmra.mrb[144].mxu0 %vm366_vm1, %v6908_v17 }
0x1473   :  { %v6468_v62 = vpop.trf.xlu1 }
0x1474   :  { %12118 = vmatprep.mubr.msk.f32.mxu1 %vm366_vm1, %v6468_v62 }
0x1475   :  { %v6909_v27 = vpop.trf.xlu0 }
0x1476   :  { %12182 = vmatprep.mubr.msk.f32.mxu0 %vm366_vm1, %v6909_v27 }
0x1477   :  { %v6469_v19 = vpop.trf.xlu1 }
0x1478   :  { %12119 = vmatmul.mubr.msk.f32.gmra.mrb[144].mxu1 %vm366_vm1, %v6469_v19 }
0x1479   :  { %v6910_v14 = vpop.trf.xlu0 }
0x147a   :  { %12183 = vmatmul.mubr.msk.f32.gmra.mrb[146].mxu0 %vm366_vm1, %v6910_v14 }
0x147b   :  { %v6470_v6 = vpop.trf.xlu1 }
0x147c   :  { %12121 = vmatprep.mubr.msk.f32.mxu1 %vm366_vm1, %v6470_v6 }
0x147d   :  { %v6911_v50 = vpop.trf.xlu0 }
0x147e   :  { %12185 = vmatprep.mubr.msk.f32.mxu0 %vm366_vm1, %v6911_v50 }
0x147f   :  { %v6471_v29 = vpop.trf.xlu1 }
0x1480   :  { %12122 = vmatmul.mubr.msk.f32.gmra.mrb[146].mxu1 %vm366_vm1, %v6471_v29 }
0x1481   :  { %v6912_v23 = vpop.trf.xlu0 }
0x1482   :  { %12186 = vmatmul.mubr.msk.f32.gmra.mrb[148].mxu0 %vm366_vm1, %v6912_v23 }
0x1483   :  { %v6472_v4 = vpop.trf.xlu1 }
0x1484   :  { %12124 = vmatprep.mubr.msk.f32.mxu1 %vm366_vm1, %v6472_v4 }
0x1485   :  { %v6913_v61 = vpop.trf.xlu0 }
0x1486   :  { %12188 = vmatprep.mubr.msk.f32.mxu0 %vm366_vm1, %v6913_v61 }
0x1487   :  { %v6473_v16 = vpop.trf.xlu1 }
0x1488   :  { %12125 = vmatmul.mubr.msk.f32.gmra.mrb[148].mxu1 %vm366_vm1, %v6473_v16 }
0x1489   :  { %v6914_v46 = vpop.trf.xlu0 }
0x148a   :  { %12189 = vmatmul.mubr.msk.f32.gmra.mrb[150].mxu0 %vm366_vm1, %v6914_v46 }
0x148b   :  { %v6474_v21 = vpop.trf.xlu1 }
0x148c   :  { %12127 = vmatprep.mubr.msk.f32.mxu1 %vm366_vm1, %v6474_v21 }
0x148d   :  { %v6915_v55 = vpop.trf.xlu0 }
0x148e   :  { %12191 = vmatprep.mubr.msk.f32.mxu0 %vm366_vm1, %v6915_v55 }
0x148f   :  { %v6475_v42 = vpop.trf.xlu1 }
0x1490   :  { %12128 = vmatmul.mubr.msk.f32.gmra.mrb[150].mxu1 %vm366_vm1, %v6475_v42 }
0x1491   :  { %v6916_v3 = vpop.trf.xlu0 }
0x1492   :  { %12192 = vmatmul.mubr.msk.f32.gmra.mrb[152].mxu0 %vm366_vm1, %v6916_v3 }
0x1493   :  { %v6476_v8 = vpop.trf.xlu1  ;;  %12226 = vmatprep.mubr.msk.f32.mxu0 %vm14284_vm3, %v19807_v31 }
0x1494   :  { %12130 = vmatprep.mubr.msk.f32.mxu1 %vm366_vm1, %v6476_v8 }
0x1497   :  { %v6477_v30 = vpop.trf.xlu1 }
0x1498   :  { %12131 = vmatmul.mubr.msk.f32.gmra.mrb[152].mxu1 %vm366_vm1, %v6477_v30 }
0x1499   :  { %12165 = vmatprep.mubr.msk.f32.mxu1 %vm14284_vm3, %v19807_v31 }
0x151c   :  { %v17509_v49 = vpop.f32.mrb[136].mxu1 }
0x151d   :  { %v12045_v5 = vpop.f32.mrb[137].mxu1 }
0x1520   :  { %v17511_v39 = vpop.f32.mrb[136].mxu0 }
0x1521   :  { %v12106_v13 = vpop.f32.mrb[137].mxu0 }
0x152d   :  { %v12172_v45 = vpop.f32.mrb[138].mxu0 }
0x152e   :  { %v7031_v9 = vpop.f32.mrb[139].mxu0  ;;  %v17526_v0 = vadd.f32 %v12172_v45, %v19808_v51 }
0x152f   :  { %v17523_v47 = vadd.f32 %v7031_v9, %v19808_v51 }
0x1533   :  { %v12111_v10 = vpop.f32.mrb[138].mxu1 }
0x1534   :  { %v17516_v7 = vadd.f32 %v12111_v10, %v19808_v51  ;;  %v6592_v58 = vpop.f32.mrb[139].mxu1 }
0x1535   :  { %v17519_v32 = vadd.f32 %v6592_v58, %v19808_v51  ;;  %v12175_v48 = vpop.f32.mrb[140].mxu0 }
0x1536   :  { %6673 = vmax.xlane.f32.xlu1 %v17516_v7  ;;  %v7041_v57 = vpop.f32.mrb[141].mxu0  ;;  %v17538_v35 = vadd.f32 %v12175_v48, %v19808_v51 }
0x1537   :  { %6671 = vmax.xlane.f32.xlu0 %v17519_v32  ;;  %v17543_v63 = vadd.f32 %v7041_v57, %v19808_v51 }
0x153a   :  { %7110 = vmax.xlane.f32.xlu1 %v17523_v47 }
0x153b   :  { %v12114_v38 = vpop.f32.mrb[140].mxu1  ;;  %7112 = vmax.xlane.f32.xlu0 %v17526_v0 }
0x153c   :  { %v17532_v2 = vadd.f32 %v12114_v38, %v19808_v51  ;;  %v6602_v20 = vpop.f32.mrb[141].mxu1 }
0x153d   :  { %v17535_v12 = vadd.f32 %v6602_v20, %v19808_v51  ;;  %v12178_v25 = vpop.f32.mrb[142].mxu0 }
0x153e   :  { %v7051_v11 = vpop.f32.mrb[143].mxu0  ;;  %v17554_v14 = vadd.f32 %v12178_v25, %v19808_v51 }
0x153f   :  { %6675 = vmax.xlane.f32.xlu1 %v17535_v12  ;;  %6677 = vmax.xlane.f32.xlu0 %v17532_v2  ;;  %v17559_v6 = vadd.f32 %v7051_v11, %v19808_v51 }
0x1543   :  { %v12117_v18 = vpop.f32.mrb[142].mxu1  ;;  %7114 = vmax.xlane.f32.xlu1 %v17543_v63  ;;  %7116 = vmax.xlane.f32.xlu0 %v17538_v35 }
0x1544   :  { %v17548_v59 = vadd.f32 %v12117_v18, %v19808_v51  ;;  %v6612_v17 = vpop.f32.mrb[143].mxu1 }
0x1545   :  { %v17551_v62 = vadd.f32 %v6612_v17, %v19808_v51  ;;  %v12181_v27 = vpop.f32.mrb[144].mxu0 }
0x1546   :  { %v7061_v19 = vpop.f32.mrb[145].mxu0  ;;  %v17570_v46 = vadd.f32 %v12181_v27, %v19808_v51 }
0x1547   :  { %6679 = vmax.xlane.f32.xlu1 %v17551_v62  ;;  %6681 = vmax.xlane.f32.xlu0 %v17548_v59  ;;  %v17575_v21 = vadd.f32 %v7061_v19, %v19808_v51 }
0x154b   :  { %v12120_v50 = vpop.f32.mrb[144].mxu1  ;;  %7118 = vmax.xlane.f32.xlu1 %v17559_v6  ;;  %7120 = vmax.xlane.f32.xlu0 %v17554_v14 }
0x154c   :  { %v17564_v29 = vadd.f32 %v12120_v50, %v19808_v51  ;;  %v6622_v23 = vpop.f32.mrb[145].mxu1 }
0x154d   :  { %v17567_v4 = vadd.f32 %v6622_v23, %v19808_v51  ;;  %v12184_v61 = vpop.f32.mrb[146].mxu0 }
0x154e   :  { %v7071_v16 = vpop.f32.mrb[147].mxu0  ;;  %v17586_v13 = vadd.f32 %v12184_v61, %v19808_v51 }
0x154f   :  { %6683 = vmax.xlane.f32.xlu1 %v17567_v4  ;;  %6685 = vmax.xlane.f32.xlu0 %v17564_v29  ;;  %v17591_v45 = vadd.f32 %v7071_v16, %v19808_v51 }
0x1553   :  { %v12123_v55 = vpop.f32.mrb[146].mxu1  ;;  %7122 = vmax.xlane.f32.xlu1 %v17575_v21  ;;  %7124 = vmax.xlane.f32.xlu0 %v17570_v46 }
0x1554   :  { %v17580_v42 = vadd.f32 %v12123_v55, %v19808_v51  ;;  %v6632_v3 = vpop.f32.mrb[147].mxu1 }
0x1555   :  { %v17583_v8 = vadd.f32 %v6632_v3, %v19808_v51  ;;  %v12187_v30 = vpop.f32.mrb[148].mxu0 }
0x1556   :  { %v7081_v5 = vpop.f32.mrb[149].mxu0  ;;  %v17602_v20 = vadd.f32 %v12187_v30, %v19808_v51 }
0x1557   :  { %6687 = vmax.xlane.f32.xlu1 %v17583_v8  ;;  %6689 = vmax.xlane.f32.xlu0 %v17580_v42  ;;  %v17607_v25 = vadd.f32 %v7081_v5, %v19808_v51 }
0x155b   :  { %v12126_v9 = vpop.f32.mrb[148].mxu1  ;;  %7126 = vmax.xlane.f32.xlu1 %v17591_v45  ;;  %7128 = vmax.xlane.f32.xlu0 %v17586_v13 }
0x155c   :  { %v17596_v10 = vadd.f32 %v12126_v9, %v19808_v51  ;;  %v6642_v58 = vpop.f32.mrb[149].mxu1 }
0x155d   :  { %v17599_v48 = vadd.f32 %v6642_v58, %v19808_v51  ;;  %v12190_v57 = vpop.f32.mrb[150].mxu0 }
0x155e   :  { %v7091_v38 = vpop.f32.mrb[151].mxu0  ;;  %v17618_v23 = vadd.f32 %v12190_v57, %v19808_v51 }
0x155f   :  { %6691 = vmax.xlane.f32.xlu1 %v17599_v48  ;;  %6693 = vmax.xlane.f32.xlu0 %v17596_v10  ;;  %v17623_v61 = vadd.f32 %v7091_v38, %v19808_v51 }
0x1563   :  { %v12129_v11 = vpop.f32.mrb[150].mxu1  ;;  %7130 = vmax.xlane.f32.xlu1 %v17607_v25  ;;  %7132 = vmax.xlane.f32.xlu0 %v17602_v20 }
0x1564   :  { %v17612_v18 = vadd.f32 %v12129_v11, %v19808_v51  ;;  %v6652_v17 = vpop.f32.mrb[151].mxu1 }
0x1565   :  { %v17615_v27 = vadd.f32 %v6652_v17, %v19808_v51  ;;  %v12193_v19 = vpop.f32.mrb[152].mxu0 }
0x1566   :  { %v7101_v50 = vpop.f32.mrb[153].mxu0  ;;  %v17634_v5 = vadd.f32 %v12193_v19, %v19808_v51 }
0x1567   :  { %6695 = vmax.xlane.f32.xlu1 %v17615_v27  ;;  %6697 = vmax.xlane.f32.xlu0 %v17612_v18  ;;  %v17639_v9 = vadd.f32 %v7101_v50, %v19808_v51 }
0x156b   :  { %v12132_v16 = vpop.f32.mrb[152].mxu1  ;;  %7134 = vmax.xlane.f32.xlu1 %v17623_v61  ;;  %7136 = vmax.xlane.f32.xlu0 %v17618_v23 }
0x156c   :  { %v17628_v55 = vadd.f32 %v12132_v16, %v19808_v51  ;;  %v6662_v3 = vpop.f32.mrb[153].mxu1 }
0x156d   :  { %v17631_v30 = vadd.f32 %v6662_v3, %v19808_v51 }
0x156f   :  { %6699 = vmax.xlane.f32.xlu1 %v17631_v30  ;;  %6701 = vmax.xlane.f32.xlu0 %v17628_v55 }
0x1573   :  { %7138 = vmax.xlane.f32.xlu1 %v17639_v9  ;;  %7140 = vmax.xlane.f32.xlu0 %v17634_v5 }
0x15c3   :  { %v6674_v58 = vpop.xlane.xlu1 %6673 }
0x15c4   :  { %v6704_v57 = vsub.f32 %v17516_v7, %v6674_v58  ;;  %v6672_v38 = vpop.xlane.xlu0 %6671 }
0x15c5   :  { %v6703_v11 = vsub.f32 %v17519_v32, %v6672_v38 }
0x15c6   :  { %v6721_v17 = vmul.f32 1.442695, %v6704_v57 }
0x15c7   :  { %v6719_v19 = vmul.f32 1.442695, %v6703_v11  ;;  %v7111_v16 = vpop.xlane.xlu1 %7110 }
0x15c8   :  { %13728 = vpow2.f32 %v6721_v17  ;;  %v7142_v3 = vsub.f32 %v17523_v47, %v7111_v16  ;;  %v7113_v15 = vpop.xlane.xlu0 %7112 }
0x15c9   :  { %13730 = vpow2.f32 %v6719_v19  ;;  %v7143_v50 = vsub.f32 %v17526_v0, %v7113_v15 }
0x15ca   :  { %v7158_v22 = vmul.f32 1.442695, %v7142_v3 }
0x15cb   :  { %v7160_v56 = vmul.f32 1.442695, %v7143_v50 }
0x15cc   :  { %13732 = vpow2.f32 %v7158_v22  ;;  %v6676_v52 = vpop.xlane.xlu1 %6675  ;;  %v6678_v43 = vpop.xlane.xlu0 %6677 }
0x15cd   :  { %13734 = vpow2.f32 %v7160_v56  ;;  %v6705_v7 = vsub.f32 %v17535_v12, %v6676_v52  ;;  %v6706_v32 = vsub.f32 %v17532_v2, %v6678_v43 }
0x15cf   :  { %v6723_v58 = vmul.f32 1.442695, %v6705_v7  ;;  %v6725_v57 = vmul.f32 1.442695, %v6706_v32 }
0x15d0   :  { %v7115_v38 = vpop.xlane.xlu1 %7114  ;;  %v7117_v11 = vpop.xlane.xlu0 %7116 }
0x15d1   :  { %13736 = vpow2.f32 %v6723_v58  ;;  %v7144_v47 = vsub.f32 %v17543_v63, %v7115_v38  ;;  %v7145_v17 = vsub.f32 %v17538_v35, %v7117_v11 }
0x15d2   :  { %v17651_v15 = vpop.eup %13728  ;;  %13738 = vpow2.f32 %v6725_v57 }
0x15d3   :  { %v17653_v22 = vpop.eup %13730  ;;  %v7162_v0 = vmul.f32 1.442695, %v7144_v47  ;;  %v7164_v56 = vmul.f32 1.442695, %v7145_v17  ;;  %6753 = vadd.xlane.f32.xlu0 %v17651_v15 }
0x15d4   :  { %v6680_v52 = vpop.xlane.xlu1 %6679  ;;  %6751 = vadd.xlane.f32.xlu1 %v17653_v22  ;;  %v6682_v43 = vpop.xlane.xlu0 %6681 }
0x15d5   :  { %13740 = vpow2.f32 %v7162_v0  ;;  %v6707_v2 = vsub.f32 %v17551_v62, %v6680_v52  ;;  %v6708_v12 = vsub.f32 %v17548_v59, %v6682_v43 }
0x15d6   :  { %v17659_v63 = vpop.eup %13732  ;;  %13742 = vpow2.f32 %v7164_v56 }
0x15d7   :  { %v17661_v35 = vpop.eup %13734  ;;  %v6727_v19 = vmul.f32 1.442695, %v6707_v2  ;;  %v6729_v16 = vmul.f32 1.442695, %v6708_v12 }
0x15d8   :  { %v7119_v3 = vpop.xlane.xlu1 %7118  ;;  %7190 = vadd.xlane.f32.xlu1 %v17659_v63  ;;  %7192 = vadd.xlane.f32.xlu0 %v17661_v35  ;;  %v7121_v50 = vpop.xlane.xlu0 %7120 }
0x15d9   :  { %13744 = vpow2.f32 %v6727_v19  ;;  %v7146_v7 = vsub.f32 %v17559_v6, %v7119_v3  ;;  %v7147_v62 = vsub.f32 %v17554_v14, %v7121_v50 }
0x15da   :  { %13746 = vpow2.f32 %v6729_v16 }
0x15db   :  { %v17667_v59 = vpop.eup %13736  ;;  %v7166_v32 = vmul.f32 1.442695, %v7146_v7  ;;  %v7168_v58 = vmul.f32 1.442695, %v7147_v62 }
0x15dc   :  { %v17669_v57 = vpop.eup %13738  ;;  %v6684_v38 = vpop.xlane.xlu1 %6683  ;;  %6755 = vadd.xlane.f32.xlu1 %v17667_v59 }
0x15dd   :  { %v6686_v11 = vpop.xlane.xlu0 %6685  ;;  %13748 = vpow2.f32 %v7166_v32  ;;  %v6709_v47 = vsub.f32 %v17567_v4, %v6684_v38  ;;  %6757 = vadd.xlane.f32.xlu0 %v17669_v57 }
0x15de   :  { %v6710_v6 = vsub.f32 %v17564_v29, %v6686_v11  ;;  %13750 = vpow2.f32 %v7168_v58 }
0x15df   :  { %v17675_v14 = vpop.eup %13740  ;;  %v6731_v17 = vmul.f32 1.442695, %v6709_v47 }
0x15e0   :  { %v6733_v0 = vmul.f32 1.442695, %v6710_v6  ;;  %v17677_v56 = vpop.eup %13742  ;;  %v7123_v52 = vpop.xlane.xlu1 %7122  ;;  %7194 = vadd.xlane.f32.xlu1 %v17675_v14 }
0x15e1   :  { %v7125_v43 = vpop.xlane.xlu0 %7124  ;;  %13752 = vpow2.f32 %v6731_v17  ;;  %v7148_v2 = vsub.f32 %v17575_v21, %v7123_v52  ;;  %7196 = vadd.xlane.f32.xlu0 %v17677_v56 }
0x15e2   :  { %v7149_v4 = vsub.f32 %v17570_v46, %v7125_v43  ;;  %13754 = vpow2.f32 %v6733_v0 }
0x15e3   :  { %v17683_v29 = vpop.eup %13744  ;;  %v7170_v12 = vmul.f32 1.442695, %v7148_v2 }
0x15e4   :  { %v7172_v19 = vmul.f32 1.442695, %v7149_v4  ;;  %v17685_v16 = vpop.eup %13746  ;;  %v6688_v3 = vpop.xlane.xlu1 %6687  ;;  %6759 = vadd.xlane.f32.xlu1 %v17683_v29 }
0x15e5   :  { %v6690_v50 = vpop.xlane.xlu0 %6689  ;;  %13756 = vpow2.f32 %v7170_v12  ;;  %v6711_v7 = vsub.f32 %v17583_v8, %v6688_v3  ;;  %6761 = vadd.xlane.f32.xlu0 %v17685_v16 }
0x15e6   :  { %v6712_v21 = vsub.f32 %v17580_v42, %v6690_v50  ;;  %13758 = vpow2.f32 %v7172_v19 }
0x15e7   :  { %v17691_v46 = vpop.eup %13748  ;;  %v6735_v62 = vmul.f32 1.442695, %v6711_v7 }
0x15e8   :  { %v6737_v32 = vmul.f32 1.442695, %v6712_v21  ;;  %v17693_v58 = vpop.eup %13750  ;;  %v7127_v38 = vpop.xlane.xlu1 %7126  ;;  %7198 = vadd.xlane.f32.xlu1 %v17691_v46 }
0x15e9   :  { %v7129_v11 = vpop.xlane.xlu0 %7128  ;;  %13760 = vpow2.f32 %v6735_v62  ;;  %v7150_v47 = vsub.f32 %v17591_v45, %v7127_v38  ;;  %7200 = vadd.xlane.f32.xlu0 %v17693_v58 }
0x15ea   :  { %v7151_v8 = vsub.f32 %v17586_v13, %v7129_v11  ;;  %13762 = vpow2.f32 %v6737_v32 }
0x15eb   :  { %v17699_v42 = vpop.eup %13752  ;;  %v7174_v6 = vmul.f32 1.442695, %v7150_v47 }
0x15ec   :  { %v7176_v17 = vmul.f32 1.442695, %v7151_v8  ;;  %v17701_v0 = vpop.eup %13754  ;;  %v6692_v52 = vpop.xlane.xlu1 %6691  ;;  %6763 = vadd.xlane.f32.xlu1 %v17699_v42 }
0x15ed   :  { %v6694_v43 = vpop.xlane.xlu0 %6693  ;;  %13764 = vpow2.f32 %v7174_v6  ;;  %v6713_v2 = vsub.f32 %v17599_v48, %v6692_v52  ;;  %6765 = vadd.xlane.f32.xlu0 %v17701_v0 }
0x15ee   :  { %v6714_v45 = vsub.f32 %v17596_v10, %v6694_v43  ;;  %13766 = vpow2.f32 %v7176_v17 }
0x15ef   :  { %v17707_v13 = vpop.eup %13756  ;;  %v6739_v4 = vmul.f32 1.442695, %v6713_v2 }
0x15f0   :  { %v6741_v12 = vmul.f32 1.442695, %v6714_v45  ;;  %v17709_v19 = vpop.eup %13758  ;;  %v7131_v3 = vpop.xlane.xlu1 %7130  ;;  %7202 = vadd.xlane.f32.xlu1 %v17707_v13 }
0x15f1   :  { %v7133_v50 = vpop.xlane.xlu0 %7132  ;;  %13768 = vpow2.f32 %v6739_v4  ;;  %v7152_v7 = vsub.f32 %v17607_v25, %v7131_v3  ;;  %7204 = vadd.xlane.f32.xlu0 %v17709_v19 }
0x15f2   :  { %v7153_v48 = vsub.f32 %v17602_v20, %v7133_v50  ;;  %13770 = vpow2.f32 %v6741_v12 }
0x15f3   :  { %v17715_v10 = vpop.eup %13760  ;;  %v7178_v21 = vmul.f32 1.442695, %v7152_v7 }
0x15f4   :  { %v7180_v62 = vmul.f32 1.442695, %v7153_v48  ;;  %v17717_v32 = vpop.eup %13762  ;;  %v6696_v38 = vpop.xlane.xlu1 %6695  ;;  %6767 = vadd.xlane.f32.xlu1 %v17715_v10 }
0x15f5   :  { %v6698_v11 = vpop.xlane.xlu0 %6697  ;;  %13772 = vpow2.f32 %v7178_v21  ;;  %v6715_v47 = vsub.f32 %v17615_v27, %v6696_v38  ;;  %6769 = vadd.xlane.f32.xlu0 %v17717_v32 }
0x15f6   :  { %v6716_v25 = vsub.f32 %v17612_v18, %v6698_v11  ;;  %13774 = vpow2.f32 %v7180_v62 }
0x15f7   :  { %v17723_v20 = vpop.eup %13764  ;;  %v6743_v8 = vmul.f32 1.442695, %v6715_v47 }
0x15f8   :  { %v6745_v6 = vmul.f32 1.442695, %v6716_v25  ;;  %v17725_v17 = vpop.eup %13766  ;;  %v7135_v52 = vpop.xlane.xlu1 %7134  ;;  %7206 = vadd.xlane.f32.xlu1 %v17723_v20 }
0x15f9   :  { %v7137_v43 = vpop.xlane.xlu0 %7136  ;;  %13776 = vpow2.f32 %v6743_v8  ;;  %v7154_v2 = vsub.f32 %v17623_v61, %v7135_v52  ;;  %7208 = vadd.xlane.f32.xlu0 %v17725_v17 }
0x15fa   :  { %v7155_v27 = vsub.f32 %v17618_v23, %v7137_v43  ;;  %13778 = vpow2.f32 %v6745_v6 }
0x15fb   :  { %v17731_v18 = vpop.eup %13768  ;;  %v7182_v45 = vmul.f32 1.442695, %v7154_v2 }
0x15fc   :  { %v7184_v4 = vmul.f32 1.442695, %v7155_v27  ;;  %v17733_v12 = vpop.eup %13770  ;;  %v6700_v3 = vpop.xlane.xlu1 %6699  ;;  %6771 = vadd.xlane.f32.xlu1 %v17731_v18 }
0x15fd   :  { %v6702_v50 = vpop.xlane.xlu0 %6701  ;;  %13780 = vpow2.f32 %v7182_v45  ;;  %v6717_v7 = vsub.f32 %v17631_v30, %v6700_v3  ;;  %6773 = vadd.xlane.f32.xlu0 %v17733_v12 }
0x15fe   :  { %v6718_v61 = vsub.f32 %v17628_v55, %v6702_v50  ;;  %13782 = vpow2.f32 %v7184_v4 }
0x15ff   :  { %v17739_v23 = vpop.eup %13772  ;;  %v6747_v48 = vmul.f32 1.442695, %v6717_v7 }
0x1600   :  { %v6749_v21 = vmul.f32 1.442695, %v6718_v61  ;;  %v17741_v62 = vpop.eup %13774  ;;  %v7139_v38 = vpop.xlane.xlu1 %7138  ;;  %7210 = vadd.xlane.f32.xlu1 %v17739_v23 }
0x1601   :  { %v7141_v11 = vpop.xlane.xlu0 %7140  ;;  %13784 = vpow2.f32 %v6747_v48  ;;  %v7156_v47 = vsub.f32 %v17639_v9, %v7139_v38  ;;  %7212 = vadd.xlane.f32.xlu0 %v17741_v62 }
0x1602   :  { %v7157_v30 = vsub.f32 %v17634_v5, %v7141_v11  ;;  %13786 = vpow2.f32 %v6749_v21 }
0x1603   :  { %v17747_v55 = vpop.eup %13776  ;;  %v7186_v25 = vmul.f32 1.442695, %v7156_v47 }
0x1604   :  { %v7188_v8 = vmul.f32 1.442695, %v7157_v30  ;;  %v17749_v6 = vpop.eup %13778  ;;  %6775 = vadd.xlane.f32.xlu1 %v17747_v55 }
0x1605   :  { %13788 = vpow2.f32 %v7186_v25  ;;  %6777 = vadd.xlane.f32.xlu0 %v17749_v6 }
0x1606   :  { %13790 = vpow2.f32 %v7188_v8 }
0x1607   :  { %v17753_v52 = vpop.eup %13780 }
0x1608   :  { %v17755_v9 = vpop.eup %13782  ;;  %7214 = vadd.xlane.f32.xlu1 %v17753_v52 }
0x1609   :  { %7216 = vadd.xlane.f32.xlu0 %v17755_v9 }
0x160b   :  { %v17759_v5 = vpop.eup %13784 }
0x160c   :  { %v17761_v43 = vpop.eup %13786  ;;  %6779 = vadd.xlane.f32.xlu1 %v17759_v5 }
0x160d   :  { %6781 = vadd.xlane.f32.xlu0 %v17761_v43 }
0x160f   :  { %v17765_v2 = vpop.eup %13788 }
0x1610   :  { %v17767_v27 = vpop.eup %13790  ;;  %7218 = vadd.xlane.f32.xlu1 %v17765_v2 }
0x1611   :  { %7220 = vadd.xlane.f32.xlu0 %v17767_v27 }
0x163e   :  { %7763 = vxpose.xlu0.b32.start.end [1/1] (short) %v17063_v28, 128 }
0x1643   :  { %7324 = vxpose.xlu1.b32.start.end [1/1] (short) %v17061_v37, 128 }
0x1660   :  { %v6754_v45 = vpop.xlane.xlu0 %6753 }
0x1661   :  { %13792 = vrcp.f32 %v6754_v45  ;;  %v6752_v4 = vpop.xlane.xlu1 %6751 }
0x1662   :  { %13794 = vrcp.f32 %v6752_v4 }
0x1665   :  { %v7191_v3 = vpop.xlane.xlu1 %7190  ;;  %v7193_v50 = vpop.xlane.xlu0 %7192 }
0x1666   :  { %13796 = vrcp.f32 %v7191_v3 }
0x1667   :  { %13798 = vrcp.f32 %v7193_v50 }
0x1669   :  { %v6756_v7 = vpop.xlane.xlu1 %6755 }
0x166a   :  { %13800 = vrcp.f32 %v6756_v7  ;;  %v6758_v61 = vpop.xlane.xlu0 %6757 }
0x166b   :  { %v13793_v48 = vpop.eup %13792  ;;  %13802 = vrcp.f32 %v6758_v61 }
0x166c   :  { %v13795_v21 = vpop.eup %13794  ;;  %v6800_v38 = vmul.f32 %v13793_v48, %v17651_v15 }
0x166d   :  { %v7195_v11 = vpop.xlane.xlu1 %7194  ;;  %v6799_v28 = vmul.f32 %v13795_v21, %v17653_v22 }
0x166e   :  { %13804 = vrcp.f32 %v7195_v11  ;;  %v7197_v37 = vpop.xlane.xlu0 %7196 }
0x166f   :  { %13806 = vrcp.f32 %v7197_v37  ;;  %v12714_v47 = vpack.c.bf16 %v6800_v38, %v6799_v28 }
0x1670   :  { %v13797_v30 = vpop.eup %13796 }
0x1671   :  { %v13799_v25 = vpop.eup %13798  ;;  %v6760_v8 = vpop.xlane.xlu1 %6759  ;;  %12715 = vmatpush3.bf16.xpose.msra.mxu1 %v12714_v47  ;;  %v7238_v45 = vmul.f32 %v13797_v30, %v17659_v63 }
0x1672   :  { %13808 = vrcp.f32 %v6760_v8  ;;  %v6762_v4 = vpop.xlane.xlu0 %6761  ;;  %v7239_v3 = vmul.f32 %v13799_v25, %v17661_v35  ;;  %12716 = vmatprep.subr.bf16.mxu1 %v19806_v53 }
0x1673   :  { %13810 = vrcp.f32 %v6762_v4 }
0x1674   :  { %v13801_v15 = vpop.eup %13800  ;;  %v12738_v50 = vpack.c.bf16 %v7239_v3, %v7238_v45 }
0x1675   :  { %v13803_v22 = vpop.eup %13802  ;;  %v7199_v7 = vpop.xlane.xlu1 %7198  ;;  %v6801_v61 = vmul.f32 %v13801_v15, %v17667_v59 }
0x1676   :  { %13812 = vrcp.f32 %v7199_v7  ;;  %12739 = vmatpush3.bf16.xpose.msra.mxu0 %v12738_v50  ;;  %v7201_v48 = vpop.xlane.xlu0 %7200  ;;  %v6802_v21 = vmul.f32 %v13803_v22, %v17669_v57 }
0x1677   :  { %13814 = vrcp.f32 %v7201_v48  ;;  %12740 = vmatprep.subr.bf16.mxu0 %v19806_v53 }
0x1678   :  { %v13805_v63 = vpop.eup %13804  ;;  %v12717_v38 = vpack.c.bf16 %v6802_v21, %v6801_v61 }
0x1679   :  { %v13807_v35 = vpop.eup %13806  ;;  %v6764_v11 = vpop.xlane.xlu1 %6763  ;;  %v7240_v28 = vmul.f32 %v13805_v63, %v17675_v14 }
0x167a   :  { %13816 = vrcp.f32 %v6764_v11  ;;  %12718 = vmatpush3.bf16.xpose.msra.mxu1 %v12717_v38  ;;  %v6766_v37 = vpop.xlane.xlu0 %6765  ;;  %v7241_v47 = vmul.f32 %v13807_v35, %v17677_v56 }
0x167b   :  { %13818 = vrcp.f32 %v6766_v37  ;;  %12719 = vmatprep.subr.bf16.mxu1 %v19806_v53 }
0x167c   :  { %v13809_v59 = vpop.eup %13808  ;;  %v12741_v30 = vpack.c.bf16 %v7241_v47, %v7240_v28 }
0x167d   :  { %v13811_v57 = vpop.eup %13810  ;;  %v7203_v25 = vpop.xlane.xlu1 %7202  ;;  %v6803_v8 = vmul.f32 %v13809_v59, %v17683_v29 }
0x167e   :  { %13820 = vrcp.f32 %v7203_v25  ;;  %12742 = vmatpush3.bf16.xpose.msra.mxu0 %v12741_v30  ;;  %v7205_v45 = vpop.xlane.xlu0 %7204  ;;  %v6804_v4 = vmul.f32 %v13811_v57, %v17685_v16 }
0x167f   :  { %13822 = vrcp.f32 %v7205_v45  ;;  %12743 = vmatprep.subr.bf16.mxu0 %v19806_v53 }
0x1680   :  { %v13813_v14 = vpop.eup %13812  ;;  %v12720_v3 = vpack.c.bf16 %v6804_v4, %v6803_v8 }
0x1681   :  { %v13815_v56 = vpop.eup %13814  ;;  %v6768_v15 = vpop.xlane.xlu1 %6767  ;;  %v7242_v50 = vmul.f32 %v13813_v14, %v17691_v46 }
0x1682   :  { %13824 = vrcp.f32 %v6768_v15  ;;  %12721 = vmatpush3.bf16.xpose.msra.mxu1 %v12720_v3  ;;  %v6770_v22 = vpop.xlane.xlu0 %6769  ;;  %v7243_v7 = vmul.f32 %v13815_v56, %v17693_v58 }
0x1683   :  { %13826 = vrcp.f32 %v6770_v22  ;;  %12722 = vmatprep.subr.bf16.mxu1 %v19806_v53 }
0x1684   :  { %v13817_v29 = vpop.eup %13816  ;;  %v12744_v61 = vpack.c.bf16 %v7243_v7, %v7242_v50 }
0x1685   :  { %v13819_v16 = vpop.eup %13818  ;;  %v7207_v48 = vpop.xlane.xlu1 %7206  ;;  %v6805_v21 = vmul.f32 %v13817_v29, %v17699_v42 }
0x1686   :  { %13828 = vrcp.f32 %v7207_v48  ;;  %12745 = vmatpush3.bf16.xpose.msra.mxu0 %v12744_v61  ;;  %v7209_v63 = vpop.xlane.xlu0 %7208  ;;  %v6806_v38 = vmul.f32 %v13819_v16, %v17701_v0 }
0x1687   :  { %13830 = vrcp.f32 %v7209_v63  ;;  %12746 = vmatprep.subr.bf16.mxu0 %v19806_v53 }
0x1688   :  { %v13821_v46 = vpop.eup %13820  ;;  %v12723_v35 = vpack.c.bf16 %v6806_v38, %v6805_v21 }
0x1689   :  { %v13823_v58 = vpop.eup %13822  ;;  %v6772_v11 = vpop.xlane.xlu1 %6771  ;;  %v7244_v28 = vmul.f32 %v13821_v46, %v17707_v13 }
0x168a   :  { %13832 = vrcp.f32 %v6772_v11  ;;  %12724 = vmatpush3.bf16.xpose.msra.mxu1 %v12723_v35  ;;  %v6774_v37 = vpop.xlane.xlu0 %6773  ;;  %v7245_v47 = vmul.f32 %v13823_v58, %v17709_v19 }
0x168b   :  { %13834 = vrcp.f32 %v6774_v37  ;;  %12725 = vmatprep.subr.bf16.mxu1 %v19806_v53 }
0x168c   :  { %v13825_v42 = vpop.eup %13824  ;;  %v12747_v59 = vpack.c.bf16 %v7245_v47, %v7244_v28 }
0x168d   :  { %v13827_v0 = vpop.eup %13826  ;;  %v7211_v30 = vpop.xlane.xlu1 %7210  ;;  %v6807_v57 = vmul.f32 %v13825_v42, %v17715_v10 }
0x168e   :  { %13836 = vrcp.f32 %v7211_v30  ;;  %12748 = vmatpush3.bf16.xpose.msra.mxu0 %v12747_v59  ;;  %v7213_v25 = vpop.xlane.xlu0 %7212  ;;  %v6808_v8 = vmul.f32 %v13827_v0, %v17717_v32 }
0x168f   :  { %13838 = vrcp.f32 %v7213_v25  ;;  %12749 = vmatprep.subr.bf16.mxu0 %v19806_v53 }
0x1690   :  { %v13829_v13 = vpop.eup %13828  ;;  %v12726_v45 = vpack.c.bf16 %v6808_v8, %v6807_v57 }
0x1691   :  { %v13831_v19 = vpop.eup %13830  ;;  %v6776_v4 = vpop.xlane.xlu1 %6775  ;;  %v7246_v14 = vmul.f32 %v13829_v13, %v17723_v20 }
0x1692   :  { %13840 = vrcp.f32 %v6776_v4  ;;  %12727 = vmatpush3.bf16.xpose.msra.mxu1 %v12726_v45  ;;  %v6778_v3 = vpop.xlane.xlu0 %6777  ;;  %v7247_v56 = vmul.f32 %v13831_v19, %v17725_v17 }
0x1693   :  { %13842 = vrcp.f32 %v6778_v3  ;;  %12728 = vmatprep.subr.bf16.mxu1 %v19806_v53 }
0x1694   :  { %v13833_v10 = vpop.eup %13832  ;;  %v12750_v15 = vpack.c.bf16 %v7247_v56, %v7246_v14 }
0x1695   :  { %v13835_v32 = vpop.eup %13834  ;;  %v7215_v50 = vpop.xlane.xlu1 %7214  ;;  %v6809_v22 = vmul.f32 %v13833_v10, %v17731_v18 }
0x1696   :  { %13844 = vrcp.f32 %v7215_v50  ;;  %12751 = vmatpush3.bf16.xpose.msra.mxu0 %v12750_v15  ;;  %v7217_v7 = vpop.xlane.xlu0 %7216  ;;  %v6810_v29 = vmul.f32 %v13835_v32, %v17733_v12 }
0x1697   :  { %13846 = vrcp.f32 %v7217_v7  ;;  %12752 = vmatprep.subr.bf16.mxu0 %v19806_v53 }
0x1698   :  { %v13837_v20 = vpop.eup %13836  ;;  %v12729_v61 = vpack.c.bf16 %v6810_v29, %v6809_v22 }
0x1699   :  { %v13839_v17 = vpop.eup %13838  ;;  %v6780_v16 = vpop.xlane.xlu1 %6779  ;;  %v7248_v48 = vmul.f32 %v13837_v20, %v17739_v23 }
0x169a   :  { %13848 = vrcp.f32 %v6780_v16  ;;  %12730 = vmatpush3.bf16.xpose.msra.mxu1 %v12729_v61  ;;  %v6782_v21 = vpop.xlane.xlu0 %6781  ;;  %v7249_v63 = vmul.f32 %v13839_v17, %v17741_v62 }
0x169b   :  { %13850 = vrcp.f32 %v6782_v21  ;;  %12731 = vmatprep.subr.bf16.mxu1 %v19806_v53 }
0x169c   :  { %v13841_v18 = vpop.eup %13840  ;;  %v12753_v38 = vpack.c.bf16 %v7249_v63, %v7248_v48 }
0x169d   :  { %v13843_v12 = vpop.eup %13842  ;;  %v7219_v46 = vpop.xlane.xlu1 %7218  ;;  %v6811_v35 = vmul.f32 %v13841_v18, %v17747_v55 }
0x169e   :  { %13852 = vrcp.f32 %v7219_v46  ;;  %12754 = vmatpush3.bf16.xpose.msra.mxu0 %v12753_v38  ;;  %v7221_v58 = vpop.xlane.xlu0 %7220  ;;  %v6812_v11 = vmul.f32 %v13843_v12, %v17749_v6 }
0x169f   :  { %13854 = vrcp.f32 %v7221_v58  ;;  %12755 = vmatprep.subr.bf16.mxu0 %v19806_v53 }
0x16a0   :  { %v13845_v23 = vpop.eup %13844  ;;  %v12732_v28 = vpack.c.bf16 %v6812_v11, %v6811_v35 }
0x16a1   :  { %v13847_v62 = vpop.eup %13846  ;;  %v7250_v37 = vmul.f32 %v13845_v23, %v17753_v52 }
0x16a2   :  { %12733 = vmatpush3.bf16.xpose.msra.mxu1 %v12732_v28  ;;  %v7251_v47 = vmul.f32 %v13847_v62, %v17755_v9 }
0x16a3   :  { %12734 = vmatprep.subr.bf16.mxu1 %v19806_v53 }
0x16a4   :  { %v13849_v42 = vpop.eup %13848  ;;  %v12756_v55 = vpack.c.bf16 %v7251_v47, %v7250_v37 }
0x16a5   :  { %v13851_v59 = vpop.eup %13850  ;;  %v6813_v0 = vmul.f32 %v13849_v42, %v17759_v5 }
0x16a6   :  { %12757 = vmatpush3.bf16.xpose.msra.mxu0 %v12756_v55  ;;  %v6814_v6 = vmul.f32 %v13851_v59, %v17761_v43 }
0x16a7   :  { %12758 = vmatprep.subr.bf16.mxu0 %v19806_v53 }
0x16a8   :  { %v13853_v30 = vpop.eup %13852  ;;  %v12735_v57 = vpack.c.bf16 %v6814_v6, %v6813_v0 }
0x16a9   :  { %v13855_v25 = vpop.eup %13854  ;;  %v7252_v52 = vmul.f32 %v13853_v30, %v17765_v2 }
0x16aa   :  { %12736 = vmatpush3.bf16.xpose.msra.mxu1 %v12735_v57  ;;  %v7253_v9 = vmul.f32 %v13855_v25, %v17767_v27 }
0x16ab   :  { %12229 = vmatprep.subr.mxu1 %v17073_v1 }
0x16ac   :  { %v12759_v8 = vpack.c.bf16 %v7253_v9, %v7252_v52 }
0x16ae   :  { %12760 = vmatpush3.bf16.xpose.msra.mxu0 %v12759_v8 }
0x16af   :  { %12290 = vmatprep.subr.mxu0 %v17075_v24 }
0x16b1   :  { %12166 = vmatmul.mubr.f32.vlgmr.msra.gmra.mrb[154].mxu1 %v17501_v36 }
0x16b2   :  { %12230 = vmatpush3.msra.mxu1 %v17073_v1 }
0x16b3   :  { %12761 = vmatprep.subr.bf16.mxu1 %v19806_v53 }
0x16b5   :  { %12227 = vmatmul.mubr.f32.vlgmr.msra.gmra.mrb[154].mxu0 %v17505_v40 }
0x16b6   :  { %12291 = vmatpush3.msra.mxu0 %v17075_v24 }
0x16b7   :  { %12785 = vmatprep.subr.bf16.mxu0 %v19806_v53 }
0x16be   :  { %v7779_v5 = vpop.trf.xlu0 }
0x16bf   :  { %12292 = vmatprep.mubr.msk.f32.mxu0 %vm366_vm1, %v7779_v5 }
0x16c2   :  { %v7780_v43 = vpop.trf.xlu0 }
0x16c3   :  { %v7340_v2 = vpop.trf.xlu1  ;;  %12293 = vmatmul.mubr.msk.f32.vlgmr.msra.gmra.mrb[156].mxu0 %vm366_vm1, %v7780_v43 }
0x16c4   :  { %12231 = vmatprep.mubr.msk.f32.mxu1 %vm366_vm1, %v7340_v2 }
0x16c6   :  { %v7781_v36 = vpop.trf.xlu0 }
0x16c7   :  { %v7341_v27 = vpop.trf.xlu1  ;;  %12295 = vmatprep.mubr.msk.f32.mxu0 %vm366_vm1, %v7781_v36 }
0x16c8   :  { %12232 = vmatmul.mubr.msk.f32.vlgmr.msra.gmra.mrb[156].mxu1 %vm366_vm1, %v7341_v27 }
0x16ca   :  { %v7782_v1 = vpop.trf.xlu0 }
0x16cb   :  { %v7342_v40 = vpop.trf.xlu1  ;;  %12296 = vmatmul.mubr.msk.f32.gmra.mrb[158].mxu0 %vm366_vm1, %v7782_v1 }
0x16cc   :  { %12234 = vmatprep.mubr.msk.f32.mxu1 %vm366_vm1, %v7342_v40 }
0x16ce   :  { %v7783_v24 = vpop.trf.xlu0 }
0x16cf   :  { %v7343_v13 = vpop.trf.xlu1  ;;  %12298 = vmatprep.mubr.msk.f32.mxu0 %vm366_vm1, %v7783_v24 }
0x16d0   :  { %12235 = vmatmul.mubr.msk.f32.gmra.mrb[158].mxu1 %vm366_vm1, %v7343_v13 }
0x16d2   :  { %v7784_v45 = vpop.trf.xlu0 }
0x16d3   :  { %v7344_v19 = vpop.trf.xlu1  ;;  %12299 = vmatmul.mubr.msk.f32.gmra.mrb[160].mxu0 %vm366_vm1, %v7784_v45 }
0x16d4   :  { %12237 = vmatprep.mubr.msk.f32.mxu1 %vm366_vm1, %v7344_v19 }
0x16d6   :  { %v7785_v4 = vpop.trf.xlu0 }
0x16d7   :  { %v7345_v14 = vpop.trf.xlu1  ;;  %12301 = vmatprep.mubr.msk.f32.mxu0 %vm366_vm1, %v7785_v4 }
0x16d8   :  { %12238 = vmatmul.mubr.msk.f32.gmra.mrb[160].mxu1 %vm366_vm1, %v7345_v14 }
0x16da   :  { %v7786_v3 = vpop.trf.xlu0 }
0x16db   :  { %v7346_v56 = vpop.trf.xlu1  ;;  %12302 = vmatmul.mubr.msk.f32.gmra.mrb[162].mxu0 %vm366_vm1, %v7786_v3 }
0x16dc   :  { %12240 = vmatprep.mubr.msk.f32.mxu1 %vm366_vm1, %v7346_v56 }
0x16de   :  { %v7787_v10 = vpop.trf.xlu0 }
0x16df   :  { %v7347_v15 = vpop.trf.xlu1  ;;  %12304 = vmatprep.mubr.msk.f32.mxu0 %vm366_vm1, %v7787_v10 }
0x16e0   :  { %12241 = vmatmul.mubr.msk.f32.gmra.mrb[162].mxu1 %vm366_vm1, %v7347_v15 }
0x16e2   :  { %v7788_v32 = vpop.trf.xlu0 }
0x16e3   :  { %v7348_v50 = vpop.trf.xlu1  ;;  %12305 = vmatmul.mubr.msk.f32.gmra.mrb[164].mxu0 %vm366_vm1, %v7788_v32 }
0x16e4   :  { %12243 = vmatprep.mubr.msk.f32.mxu1 %vm366_vm1, %v7348_v50 }
0x16e6   :  { %v7789_v22 = vpop.trf.xlu0 }
0x16e7   :  { %v7349_v7 = vpop.trf.xlu1  ;;  %12307 = vmatprep.mubr.msk.f32.mxu0 %vm366_vm1, %v7789_v22 }
0x16e8   :  { %12244 = vmatmul.mubr.msk.f32.gmra.mrb[164].mxu1 %vm366_vm1, %v7349_v7 }
0x16ea   :  { %v7790_v29 = vpop.trf.xlu0 }
0x16eb   :  { %v7350_v20 = vpop.trf.xlu1  ;;  %12308 = vmatmul.mubr.msk.f32.gmra.mrb[166].mxu0 %vm366_vm1, %v7790_v29 }
0x16ec   :  { %12246 = vmatprep.mubr.msk.f32.mxu1 %vm366_vm1, %v7350_v20 }
0x16ee   :  { %v7791_v61 = vpop.trf.xlu0 }
0x16ef   :  { %v7351_v17 = vpop.trf.xlu1  ;;  %12310 = vmatprep.mubr.msk.f32.mxu0 %vm366_vm1, %v7791_v61 }
0x16f0   :  { %12247 = vmatmul.mubr.msk.f32.gmra.mrb[166].mxu1 %vm366_vm1, %v7351_v17 }
0x16f2   :  { %v7792_v16 = vpop.trf.xlu0 }
0x16f3   :  { %v7352_v48 = vpop.trf.xlu1  ;;  %12311 = vmatmul.mubr.msk.f32.gmra.mrb[168].mxu0 %vm366_vm1, %v7792_v16 }
0x16f4   :  { %12249 = vmatprep.mubr.msk.f32.mxu1 %vm366_vm1, %v7352_v48 }
0x16f6   :  { %v7793_v21 = vpop.trf.xlu0 }
0x16f7   :  { %v7353_v63 = vpop.trf.xlu1  ;;  %12313 = vmatprep.mubr.msk.f32.mxu0 %vm366_vm1, %v7793_v21 }
0x16f8   :  { %12250 = vmatmul.mubr.msk.f32.gmra.mrb[168].mxu1 %vm366_vm1, %v7353_v63 }
0x16fa   :  { %v7794_v18 = vpop.trf.xlu0 }
0x16fb   :  { %v7354_v38 = vpop.trf.xlu1  ;;  %12314 = vmatmul.mubr.msk.f32.gmra.mrb[170].mxu0 %vm366_vm1, %v7794_v18 }
0x16fc   :  { %12252 = vmatprep.mubr.msk.f32.mxu1 %vm366_vm1, %v7354_v38  ;;  %12348 = vmatprep.mubr.msk.f32.mxu0 %vm14284_vm3, %v19807_v31 }
0x16ff   :  { %v7355_v12 = vpop.trf.xlu1 }
0x1700   :  { %12253 = vmatmul.mubr.msk.f32.gmra.mrb[170].mxu1 %vm366_vm1, %v7355_v12 }
0x1701   :  { %12287 = vmatprep.mubr.msk.f32.mxu1 %vm14284_vm3, %v19807_v31 }
0x1784   :  { %v17863_v46 = vpop.f32.mrb[154].mxu1 }
0x1785   :  { %v12167_v35 = vpop.f32.mrb[155].mxu1 }
0x1788   :  { %v17865_v58 = vpop.f32.mrb[154].mxu0 }
0x1789   :  { %v9087_v11 = vpack.c.bf16 %v17865_v58, %v17863_v46  ;;  %v12228_v23 = vpop.f32.mrb[155].mxu0  ;;  %v19814_v58 = vld [vmem:[#allocation12_spill] sm:$0xff] }
0x1796   :  { %v12294_v28 = vpop.f32.mrb[156].mxu0 }
0x1797   :  { %v7909_v62 = vpop.f32.mrb[157].mxu0  ;;  %v17880_v6 = vadd.f32 %v12294_v28, %v19808_v51 }
0x1798   :  { %v17877_v59 = vadd.f32 %v7909_v62, %v19808_v51 }
0x179b   :  { %v12233_v37 = vpop.f32.mrb[156].mxu1 }
0x179c   :  { %v17870_v47 = vadd.f32 %v12233_v37, %v19808_v51  ;;  %v7470_v42 = vpop.f32.mrb[157].mxu1 }
0x179d   :  { %v17873_v55 = vadd.f32 %v7470_v42, %v19808_v51 }
0x179e   :  { %7551 = vmax.xlane.f32.xlu1 %v17870_v47  ;;  %v12297_v0 = vpop.f32.mrb[158].mxu0 }
0x179f   :  { %7549 = vmax.xlane.f32.xlu0 %v17873_v55  ;;  %v7919_v30 = vpop.f32.mrb[159].mxu0  ;;  %v17894_v5 = vadd.f32 %v12297_v0, %v19808_v51 }
0x17a0   :  { %v17897_v43 = vadd.f32 %v7919_v30, %v19808_v51 }
0x17a2   :  { %7988 = vmax.xlane.f32.xlu1 %v17877_v59 }
0x17a3   :  { %v12236_v57 = vpop.f32.mrb[158].mxu1  ;;  %7990 = vmax.xlane.f32.xlu0 %v17880_v6 }
0x17a4   :  { %v17886_v25 = vadd.f32 %v12236_v57, %v19808_v51  ;;  %v7480_v52 = vpop.f32.mrb[159].mxu1 }
0x17a5   :  { %v17889_v9 = vadd.f32 %v7480_v52, %v19808_v51 }
0x17a6   :  { %v12300_v8 = vpop.f32.mrb[160].mxu0 }
0x17a7   :  { %7555 = vmax.xlane.f32.xlu0 %v17886_v25  ;;  %7553 = vmax.xlane.f32.xlu1 %v17889_v9  ;;  %v7929_v2 = vpop.f32.mrb[161].mxu0  ;;  %v17910_v13 = vadd.f32 %v12300_v8, %v19808_v51 }
0x17a8   :  { %v17913_v45 = vadd.f32 %v7929_v2, %v19808_v51 }
0x17ab   :  { %v12239_v36 = vpop.f32.mrb[160].mxu1  ;;  %7994 = vmax.xlane.f32.xlu0 %v17894_v5  ;;  %7992 = vmax.xlane.f32.xlu1 %v17897_v43 }
0x17ac   :  { %v17902_v27 = vadd.f32 %v12239_v36, %v19808_v51  ;;  %v7490_v1 = vpop.f32.mrb[161].mxu1 }
0x17ad   :  { %v17905_v40 = vadd.f32 %v7490_v1, %v19808_v51 }
0x17ae   :  { %v12303_v24 = vpop.f32.mrb[162].mxu0 }
0x17af   :  { %7559 = vmax.xlane.f32.xlu0 %v17902_v27  ;;  %7557 = vmax.xlane.f32.xlu1 %v17905_v40  ;;  %v7939_v19 = vpop.f32.mrb[163].mxu0  ;;  %v17926_v15 = vadd.f32 %v12303_v24, %v19808_v51 }
0x17b0   :  { %v17929_v32 = vadd.f32 %v7939_v19, %v19808_v51 }
0x17b3   :  { %v12242_v4 = vpop.f32.mrb[162].mxu1  ;;  %7998 = vmax.xlane.f32.xlu0 %v17910_v13  ;;  %7996 = vmax.xlane.f32.xlu1 %v17913_v45 }
0x17b4   :  { %v17918_v14 = vadd.f32 %v12242_v4, %v19808_v51  ;;  %v7500_v3 = vpop.f32.mrb[163].mxu1 }
0x17b5   :  { %v17921_v56 = vadd.f32 %v7500_v3, %v19808_v51 }
0x17b6   :  { %v12306_v10 = vpop.f32.mrb[164].mxu0 }
0x17b7   :  { %7563 = vmax.xlane.f32.xlu0 %v17918_v14  ;;  %7561 = vmax.xlane.f32.xlu1 %v17921_v56  ;;  %v7949_v50 = vpop.f32.mrb[165].mxu0  ;;  %v17942_v17 = vadd.f32 %v12306_v10, %v19808_v51 }
0x17b8   :  { %v17945_v16 = vadd.f32 %v7949_v50, %v19808_v51 }
0x17bb   :  { %v12245_v22 = vpop.f32.mrb[164].mxu1  ;;  %8002 = vmax.xlane.f32.xlu0 %v17926_v15  ;;  %8000 = vmax.xlane.f32.xlu1 %v17929_v32 }
0x17bc   :  { %v17934_v7 = vadd.f32 %v12245_v22, %v19808_v51  ;;  %v7510_v29 = vpop.f32.mrb[165].mxu1 }
0x17bd   :  { %v17937_v20 = vadd.f32 %v7510_v29, %v19808_v51 }
0x17be   :  { %v12309_v61 = vpop.f32.mrb[166].mxu0 }
0x17bf   :  { %7567 = vmax.xlane.f32.xlu0 %v17934_v7  ;;  %7565 = vmax.xlane.f32.xlu1 %v17937_v20  ;;  %v7959_v48 = vpop.f32.mrb[167].mxu0  ;;  %v17958_v35 = vadd.f32 %v12309_v61, %v19808_v51 }
0x17c0   :  { %v17961_v23 = vadd.f32 %v7959_v48, %v19808_v51 }
0x17c3   :  { %v12248_v21 = vpop.f32.mrb[166].mxu1  ;;  %8006 = vmax.xlane.f32.xlu0 %v17942_v17  ;;  %8004 = vmax.xlane.f32.xlu1 %v17945_v16 }
0x17c4   :  { %v17950_v63 = vadd.f32 %v12248_v21, %v19808_v51  ;;  %v7520_v18 = vpop.f32.mrb[167].mxu1 }
0x17c5   :  { %v17953_v38 = vadd.f32 %v7520_v18, %v19808_v51 }
0x17c6   :  { %v12312_v12 = vpop.f32.mrb[168].mxu0 }
0x17c7   :  { %7571 = vmax.xlane.f32.xlu0 %v17950_v63  ;;  %7569 = vmax.xlane.f32.xlu1 %v17953_v38  ;;  %v7969_v28 = vpop.f32.mrb[169].mxu0  ;;  %v17974_v57 = vadd.f32 %v12312_v12, %v19808_v51 }
0x17c8   :  { %v17977_v52 = vadd.f32 %v7969_v28, %v19808_v51 }
0x17cb   :  { %v12251_v62 = vpop.f32.mrb[168].mxu1  ;;  %8010 = vmax.xlane.f32.xlu0 %v17958_v35  ;;  %8008 = vmax.xlane.f32.xlu1 %v17961_v23 }
0x17cc   :  { %v17966_v37 = vadd.f32 %v12251_v62, %v19808_v51  ;;  %v7530_v42 = vpop.f32.mrb[169].mxu1 }
0x17cd   :  { %v17969_v0 = vadd.f32 %v7530_v42, %v19808_v51 }
0x17ce   :  { %v12315_v30 = vpop.f32.mrb[170].mxu0 }
0x17cf   :  { %7575 = vmax.xlane.f32.xlu0 %v17966_v37  ;;  %7573 = vmax.xlane.f32.xlu1 %v17969_v0  ;;  %v7979_v8 = vpop.f32.mrb[171].mxu0  ;;  %v17990_v19 = vadd.f32 %v12315_v30, %v19808_v51 }
0x17d0   :  { %v17993_v4 = vadd.f32 %v7979_v8, %v19808_v51 }
0x17d3   :  { %v12254_v2 = vpop.f32.mrb[170].mxu1  ;;  %8014 = vmax.xlane.f32.xlu0 %v17974_v57  ;;  %8012 = vmax.xlane.f32.xlu1 %v17977_v52 }
0x17d4   :  { %v17982_v36 = vadd.f32 %v12254_v2, %v19808_v51  ;;  %v7540_v1 = vpop.f32.mrb[171].mxu1 }
0x17d5   :  { %v17985_v24 = vadd.f32 %v7540_v1, %v19808_v51 }
0x17d7   :  { %7579 = vmax.xlane.f32.xlu0 %v17982_v36  ;;  %7577 = vmax.xlane.f32.xlu1 %v17985_v24 }
0x17db   :  { %8018 = vmax.xlane.f32.xlu0 %v17990_v19  ;;  %8016 = vmax.xlane.f32.xlu1 %v17993_v4 }
0x182b   :  { %v7552_v3 = vpop.xlane.xlu1 %7551 }
0x182c   :  { %v7582_v10 = vsub.f32 %v17870_v47, %v7552_v3  ;;  %v7550_v50 = vpop.xlane.xlu0 %7549 }
0x182d   :  { %v7581_v22 = vsub.f32 %v17873_v55, %v7550_v50 }
0x182e   :  { %v7599_v29 = vmul.f32 1.442695, %v7582_v10 }
0x182f   :  { %v7597_v61 = vmul.f32 1.442695, %v7581_v22  ;;  %v7989_v48 = vpop.xlane.xlu1 %7988 }
0x1830   :  { %13856 = vpow2.f32 %v7599_v29  ;;  %v8020_v21 = vsub.f32 %v17877_v59, %v7989_v48  ;;  %v7991_v18 = vpop.xlane.xlu0 %7990 }
0x1831   :  { %13858 = vpow2.f32 %v7597_v61  ;;  %v8021_v12 = vsub.f32 %v17880_v6, %v7991_v18 }
0x1832   :  { %v8036_v28 = vmul.f32 1.442695, %v8020_v21 }
0x1833   :  { %v8038_v62 = vmul.f32 1.442695, %v8021_v12 }
0x1834   :  { %13860 = vpow2.f32 %v8036_v28  ;;  %v7554_v42 = vpop.xlane.xlu1 %7553  ;;  %v7556_v30 = vpop.xlane.xlu0 %7555 }
0x1835   :  { %13862 = vpow2.f32 %v8038_v62  ;;  %v7583_v47 = vsub.f32 %v17889_v9, %v7554_v42  ;;  %v7584_v55 = vsub.f32 %v17886_v25, %v7556_v30 }
0x1837   :  { %v7601_v8 = vmul.f32 1.442695, %v7583_v47  ;;  %v7603_v2 = vmul.f32 1.442695, %v7584_v55 }
0x1838   :  { %v7993_v1 = vpop.xlane.xlu1 %7992  ;;  %v7995_v3 = vpop.xlane.xlu0 %7994 }
0x1839   :  { %13864 = vpow2.f32 %v7601_v8  ;;  %v8022_v59 = vsub.f32 %v17897_v43, %v7993_v1  ;;  %v8023_v10 = vsub.f32 %v17894_v5, %v7995_v3 }
0x183a   :  { %v18005_v6 = vpop.eup %13856  ;;  %13866 = vpow2.f32 %v7603_v2 }
0x183b   :  { %v18007_v50 = vpop.eup %13858  ;;  %v8040_v22 = vmul.f32 1.442695, %v8022_v59  ;;  %v8042_v29 = vmul.f32 1.442695, %v8023_v10  ;;  %7631 = vadd.xlane.f32.xlu0 %v18005_v6 }
0x183c   :  { %v7558_v9 = vpop.xlane.xlu1 %7557  ;;  %7629 = vadd.xlane.f32.xlu1 %v18007_v50  ;;  %v7560_v25 = vpop.xlane.xlu0 %7559 }
0x183d   :  { %13868 = vpow2.f32 %v8040_v22  ;;  %v7585_v61 = vsub.f32 %v17905_v40, %v7558_v9  ;;  %v7586_v43 = vsub.f32 %v17902_v27, %v7560_v25 }
0x183e   :  { %v18013_v48 = vpop.eup %13860  ;;  %13870 = vpow2.f32 %v8042_v29 }
0x183f   :  { %v18015_v5 = vpop.eup %13862  ;;  %v7605_v21 = vmul.f32 1.442695, %v7585_v61  ;;  %v7607_v18 = vmul.f32 1.442695, %v7586_v43 }
0x1840   :  { %v7997_v12 = vpop.xlane.xlu1 %7996  ;;  %8068 = vadd.xlane.f32.xlu1 %v18013_v48  ;;  %8070 = vadd.xlane.f32.xlu0 %v18015_v5  ;;  %v7999_v28 = vpop.xlane.xlu0 %7998 }
0x1841   :  { %13872 = vpow2.f32 %v7605_v21  ;;  %v8024_v62 = vsub.f32 %v17913_v45, %v7997_v12  ;;  %v8025_v40 = vsub.f32 %v17910_v13, %v7999_v28 }
0x1842   :  { %13874 = vpow2.f32 %v7607_v18 }
0x1843   :  { %v18021_v27 = vpop.eup %13864  ;;  %v8044_v42 = vmul.f32 1.442695, %v8024_v62  ;;  %v8046_v30 = vmul.f32 1.442695, %v8025_v40 }
0x1844   :  { %v18023_v47 = vpop.eup %13866  ;;  %v7562_v55 = vpop.xlane.xlu1 %7561  ;;  %7633 = vadd.xlane.f32.xlu1 %v18021_v27 }
0x1845   :  { %v7564_v8 = vpop.xlane.xlu0 %7563  ;;  %13876 = vpow2.f32 %v8044_v42  ;;  %v7587_v2 = vsub.f32 %v17921_v56, %v7562_v55  ;;  %7635 = vadd.xlane.f32.xlu0 %v18023_v47 }
0x1846   :  { %v7588_v45 = vsub.f32 %v17918_v14, %v7564_v8  ;;  %13878 = vpow2.f32 %v8046_v30 }
0x1847   :  { %v18029_v13 = vpop.eup %13868  ;;  %v7609_v1 = vmul.f32 1.442695, %v7587_v2 }
0x1848   :  { %v7611_v3 = vmul.f32 1.442695, %v7588_v45  ;;  %v18031_v59 = vpop.eup %13870  ;;  %v8001_v10 = vpop.xlane.xlu1 %8000  ;;  %8072 = vadd.xlane.f32.xlu1 %v18029_v13 }
0x1849   :  { %v8003_v22 = vpop.xlane.xlu0 %8002  ;;  %13880 = vpow2.f32 %v7609_v1  ;;  %v8026_v29 = vsub.f32 %v17929_v32, %v8001_v10  ;;  %8074 = vadd.xlane.f32.xlu0 %v18031_v59 }
0x184a   :  { %v8027_v56 = vsub.f32 %v17926_v15, %v8003_v22  ;;  %13882 = vpow2.f32 %v7611_v3 }
0x184b   :  { %v18037_v14 = vpop.eup %13872  ;;  %v8048_v9 = vmul.f32 1.442695, %v8026_v29 }
0x184c   :  { %v8050_v25 = vmul.f32 1.442695, %v8027_v56  ;;  %v18039_v61 = vpop.eup %13874  ;;  %v7566_v43 = vpop.xlane.xlu1 %7565  ;;  %7637 = vadd.xlane.f32.xlu1 %v18037_v14 }
0x184d   :  { %v7568_v21 = vpop.xlane.xlu0 %7567  ;;  %13884 = vpow2.f32 %v8048_v9  ;;  %v7589_v18 = vsub.f32 %v17937_v20, %v7566_v43  ;;  %7639 = vadd.xlane.f32.xlu0 %v18039_v61 }
0x184e   :  { %v7590_v32 = vsub.f32 %v17934_v7, %v7568_v21  ;;  %13886 = vpow2.f32 %v8050_v25 }
0x184f   :  { %v18045_v15 = vpop.eup %13876  ;;  %v7613_v12 = vmul.f32 1.442695, %v7589_v18 }
0x1850   :  { %v7615_v28 = vmul.f32 1.442695, %v7590_v32  ;;  %v18047_v62 = vpop.eup %13878  ;;  %v8005_v40 = vpop.xlane.xlu1 %8004  ;;  %8076 = vadd.xlane.f32.xlu1 %v18045_v15 }
0x1851   :  { %v8007_v42 = vpop.xlane.xlu0 %8006  ;;  %13888 = vpow2.f32 %v7613_v12  ;;  %v8028_v30 = vsub.f32 %v17945_v16, %v8005_v40  ;;  %8078 = vadd.xlane.f32.xlu0 %v18047_v62 }
0x1852   :  { %v8029_v20 = vsub.f32 %v17942_v17, %v8007_v42  ;;  %13890 = vpow2.f32 %v7615_v28 }
0x1853   :  { %v18053_v7 = vpop.eup %13880  ;;  %v8052_v55 = vmul.f32 1.442695, %v8028_v30 }
0x1854   :  { %v8054_v8 = vmul.f32 1.442695, %v8029_v20  ;;  %v18055_v2 = vpop.eup %13882  ;;  %v7570_v45 = vpop.xlane.xlu1 %7569  ;;  %7641 = vadd.xlane.f32.xlu1 %v18053_v7 }
0x1855   :  { %v7572_v1 = vpop.xlane.xlu0 %7571  ;;  %13892 = vpow2.f32 %v8052_v55  ;;  %v7591_v3 = vsub.f32 %v17953_v38, %v7570_v45  ;;  %7643 = vadd.xlane.f32.xlu0 %v18055_v2 }
0x1856   :  { %v7592_v16 = vsub.f32 %v17950_v63, %v7572_v1  ;;  %13894 = vpow2.f32 %v8054_v8 }
0x1857   :  { %v18061_v17 = vpop.eup %13884  ;;  %v7617_v10 = vmul.f32 1.442695, %v7591_v3 }
0x1858   :  { %v7619_v22 = vmul.f32 1.442695, %v7592_v16  ;;  %v18063_v29 = vpop.eup %13886  ;;  %v8009_v56 = vpop.xlane.xlu1 %8008  ;;  %8080 = vadd.xlane.f32.xlu1 %v18061_v17 }
0x1859   :  { %v8011_v9 = vpop.xlane.xlu0 %8010  ;;  %13896 = vpow2.f32 %v7617_v10  ;;  %v8030_v25 = vsub.f32 %v17961_v23, %v8009_v56  ;;  %8082 = vadd.xlane.f32.xlu0 %v18063_v29 }
0x185a   :  { %v8031_v38 = vsub.f32 %v17958_v35, %v8011_v9  ;;  %13898 = vpow2.f32 %v7619_v22 }
0x185b   :  { %v18069_v63 = vpop.eup %13888  ;;  %v8056_v43 = vmul.f32 1.442695, %v8030_v25 }
0x185c   :  { %v8058_v21 = vmul.f32 1.442695, %v8031_v38  ;;  %v18071_v18 = vpop.eup %13890  ;;  %v7574_v32 = vpop.xlane.xlu1 %7573  ;;  %7645 = vadd.xlane.f32.xlu1 %v18069_v63 }
0x185d   :  { %v7576_v12 = vpop.xlane.xlu0 %7575  ;;  %13900 = vpow2.f32 %v8056_v43  ;;  %v7593_v28 = vsub.f32 %v17969_v0, %v7574_v32  ;;  %7647 = vadd.xlane.f32.xlu0 %v18071_v18 }
0x185e   :  { %v7594_v23 = vsub.f32 %v17966_v37, %v7576_v12  ;;  %13902 = vpow2.f32 %v8058_v21 }
0x185f   :  { %v18077_v35 = vpop.eup %13892  ;;  %v7621_v40 = vmul.f32 1.442695, %v7593_v28 }
0x1860   :  { %v7623_v42 = vmul.f32 1.442695, %v7594_v23  ;;  %v18079_v30 = vpop.eup %13894  ;;  %v8013_v20 = vpop.xlane.xlu1 %8012  ;;  %8084 = vadd.xlane.f32.xlu1 %v18077_v35 }
0x1861   :  { %v8015_v55 = vpop.xlane.xlu0 %8014  ;;  %13904 = vpow2.f32 %v7621_v40  ;;  %v8032_v8 = vsub.f32 %v17977_v52, %v8013_v20  ;;  %8086 = vadd.xlane.f32.xlu0 %v18079_v30 }
0x1862   :  { %v8033_v0 = vsub.f32 %v17974_v57, %v8015_v55  ;;  %13906 = vpow2.f32 %v7623_v42 }
0x1863   :  { %v18085_v37 = vpop.eup %13896  ;;  %v8060_v45 = vmul.f32 1.442695, %v8032_v8 }
0x1864   :  { %v8062_v1 = vmul.f32 1.442695, %v8033_v0  ;;  %v18087_v3 = vpop.eup %13898  ;;  %v7578_v16 = vpop.xlane.xlu1 %7577  ;;  %7649 = vadd.xlane.f32.xlu1 %v18085_v37 }
0x1865   :  { %v7580_v10 = vpop.xlane.xlu0 %7579  ;;  %13908 = vpow2.f32 %v8060_v45  ;;  %v7595_v22 = vsub.f32 %v17985_v24, %v7578_v16  ;;  %7651 = vadd.xlane.f32.xlu0 %v18087_v3 }
0x1866   :  { %v7596_v52 = vsub.f32 %v17982_v36, %v7580_v10  ;;  %13910 = vpow2.f32 %v8062_v1 }
0x1867   :  { %v18093_v57 = vpop.eup %13900  ;;  %v7625_v56 = vmul.f32 1.442695, %v7595_v22 }
0x1868   :  { %v7627_v9 = vmul.f32 1.442695, %v7596_v52  ;;  %v18095_v25 = vpop.eup %13902  ;;  %v8017_v38 = vpop.xlane.xlu1 %8016  ;;  %8088 = vadd.xlane.f32.xlu1 %v18093_v57 }
0x1869   :  { %v8019_v43 = vpop.xlane.xlu0 %8018  ;;  %13912 = vpow2.f32 %v7625_v56  ;;  %v8034_v21 = vsub.f32 %v17993_v4, %v8017_v38  ;;  %8090 = vadd.xlane.f32.xlu0 %v18095_v25 }
0x186a   :  { %v8035_v24 = vsub.f32 %v17990_v19, %v8019_v43  ;;  %13914 = vpow2.f32 %v7627_v9 }
0x186b   :  { %v18101_v36 = vpop.eup %13904  ;;  %v8064_v32 = vmul.f32 1.442695, %v8034_v21 }
0x186c   :  { %v8066_v12 = vmul.f32 1.442695, %v8035_v24  ;;  %v18103_v28 = vpop.eup %13906  ;;  %7653 = vadd.xlane.f32.xlu1 %v18101_v36 }
0x186d   :  { %13916 = vpow2.f32 %v8064_v32  ;;  %7655 = vadd.xlane.f32.xlu0 %v18103_v28 }
0x186e   :  { %13918 = vpow2.f32 %v8066_v12 }
0x186f   :  { %v18107_v23 = vpop.eup %13908 }
0x1870   :  { %v18109_v4 = vpop.eup %13910  ;;  %8092 = vadd.xlane.f32.xlu1 %v18107_v23 }
0x1871   :  { %8094 = vadd.xlane.f32.xlu0 %v18109_v4 }
0x1873   :  { %v18113_v19 = vpop.eup %13912 }
0x1874   :  { %v18115_v40 = vpop.eup %13914  ;;  %7657 = vadd.xlane.f32.xlu1 %v18113_v19 }
0x1875   :  { %7659 = vadd.xlane.f32.xlu0 %v18115_v40 }
0x1877   :  { %v18119_v42 = vpop.eup %13916 }
0x1878   :  { %v18121_v20 = vpop.eup %13918  ;;  %8096 = vadd.xlane.f32.xlu1 %v18119_v42 }
0x1879   :  { %8098 = vadd.xlane.f32.xlu0 %v18121_v20 }
0x18a6   :  { %8641 = vxpose.xlu0.b32.start.end [1/1] (short) %v17071_v26, 128 }
0x18ab   :  { %8202 = vxpose.xlu1.b32.start.end [1/1] (short) %v17067_v60, 128 }
0x18c8   :  { %v7632_v55 = vpop.xlane.xlu0 %7631 }
0x18c9   :  { %13920 = vrcp.f32 %v7632_v55  ;;  %v7630_v8 = vpop.xlane.xlu1 %7629 }
0x18ca   :  { %13922 = vrcp.f32 %v7630_v8 }
0x18cd   :  { %v8069_v0 = vpop.xlane.xlu1 %8068  ;;  %v8071_v45 = vpop.xlane.xlu0 %8070 }
0x18ce   :  { %13924 = vrcp.f32 %v8069_v0 }
0x18cf   :  { %13926 = vrcp.f32 %v8071_v45 }
0x18d1   :  { %v7634_v1 = vpop.xlane.xlu1 %7633 }
0x18d2   :  { %13928 = vrcp.f32 %v7634_v1  ;;  %v7636_v16 = vpop.xlane.xlu0 %7635 }
0x18d3   :  { %v13921_v10 = vpop.eup %13920  ;;  %13930 = vrcp.f32 %v7636_v16 }
0x18d4   :  { %v13923_v22 = vpop.eup %13922  ;;  %v7678_v52 = vmul.f32 %v13921_v10, %v18005_v6 }
0x18d5   :  { %v8073_v56 = vpop.xlane.xlu1 %8072  ;;  %v7677_v26 = vmul.f32 %v13923_v22, %v18007_v50 }
0x18d6   :  { %13932 = vrcp.f32 %v8073_v56  ;;  %v8075_v60 = vpop.xlane.xlu0 %8074 }
0x18d7   :  { %13934 = vrcp.f32 %v8075_v60  ;;  %v12762_v9 = vpack.c.bf16 %v7678_v52, %v7677_v26 }
0x18d8   :  { %v13925_v38 = vpop.eup %13924 }
0x18d9   :  { %v13927_v43 = vpop.eup %13926  ;;  %v7638_v21 = vpop.xlane.xlu1 %7637  ;;  %12763 = vmatpush3.bf16.xpose.msra.mxu1 %v12762_v9  ;;  %v8116_v24 = vmul.f32 %v13925_v38, %v18013_v48 }
0x18da   :  { %13936 = vrcp.f32 %v7638_v21  ;;  %v7640_v32 = vpop.xlane.xlu0 %7639  ;;  %v8117_v12 = vmul.f32 %v13927_v43, %v18015_v5  ;;  %12764 = vmatprep.subr.bf16.mxu1 %v19806_v53 }
0x18db   :  { %13938 = vrcp.f32 %v7640_v32 }
0x18dc   :  { %v13929_v6 = vpop.eup %13928  ;;  %v12786_v55 = vpack.c.bf16 %v8117_v12, %v8116_v24 }
0x18dd   :  { %v13931_v50 = vpop.eup %13930  ;;  %v8077_v8 = vpop.xlane.xlu1 %8076  ;;  %v7679_v0 = vmul.f32 %v13929_v6, %v18021_v27 }
0x18de   :  { %13940 = vrcp.f32 %v8077_v8  ;;  %12787 = vmatpush3.bf16.xpose.msra.mxu0 %v12786_v55  ;;  %v8079_v45 = vpop.xlane.xlu0 %8078  ;;  %v7680_v1 = vmul.f32 %v13931_v50, %v18023_v47 }
0x18df   :  { %13942 = vrcp.f32 %v8079_v45  ;;  %12788 = vmatprep.subr.bf16.mxu0 %v19806_v53 }
0x18e0   :  { %v13933_v48 = vpop.eup %13932  ;;  %v12765_v16 = vpack.c.bf16 %v7680_v1, %v7679_v0 }
0x18e1   :  { %v13935_v5 = vpop.eup %13934  ;;  %v7642_v10 = vpop.xlane.xlu1 %7641  ;;  %v8118_v22 = vmul.f32 %v13933_v48, %v18029_v13 }
0x18e2   :  { %13944 = vrcp.f32 %v7642_v10  ;;  %12766 = vmatpush3.bf16.xpose.msra.mxu1 %v12765_v16  ;;  %v7644_v52 = vpop.xlane.xlu0 %7643  ;;  %v8119_v56 = vmul.f32 %v13935_v5, %v18031_v59 }
0x18e3   :  { %13946 = vrcp.f32 %v7644_v52  ;;  %12767 = vmatprep.subr.bf16.mxu1 %v19806_v53 }
0x18e4   :  { %v13937_v27 = vpop.eup %13936  ;;  %v12789_v26 = vpack.c.bf16 %v8119_v56, %v8118_v22 }
0x18e5   :  { %v13939_v47 = vpop.eup %13938  ;;  %v8081_v60 = vpop.xlane.xlu1 %8080  ;;  %v7681_v9 = vmul.f32 %v13937_v27, %v18037_v14 }
0x18e6   :  { %13948 = vrcp.f32 %v8081_v60  ;;  %12790 = vmatpush3.bf16.xpose.msra.mxu0 %v12789_v26  ;;  %v8083_v38 = vpop.xlane.xlu0 %8082  ;;  %v7682_v43 = vmul.f32 %v13939_v47, %v18039_v61 }
0x18e7   :  { %13950 = vrcp.f32 %v8083_v38  ;;  %12791 = vmatprep.subr.bf16.mxu0 %v19806_v53 }
0x18e8   :  { %v13941_v13 = vpop.eup %13940  ;;  %v12768_v21 = vpack.c.bf16 %v7682_v43, %v7681_v9 }
0x18e9   :  { %v13943_v59 = vpop.eup %13942  ;;  %v7646_v24 = vpop.xlane.xlu1 %7645  ;;  %v8120_v32 = vmul.f32 %v13941_v13, %v18045_v15 }
0x18ea   :  { %13952 = vrcp.f32 %v7646_v24  ;;  %12769 = vmatpush3.bf16.xpose.msra.mxu1 %v12768_v21  ;;  %v7648_v12 = vpop.xlane.xlu0 %7647  ;;  %v8121_v6 = vmul.f32 %v13943_v59, %v18047_v62 }
0x18eb   :  { %13954 = vrcp.f32 %v7648_v12  ;;  %12770 = vmatprep.subr.bf16.mxu1 %v19806_v53 }
0x18ec   :  { %v13945_v14 = vpop.eup %13944  ;;  %v12792_v55 = vpack.c.bf16 %v8121_v6, %v8120_v32 }
0x18ed   :  { %v13947_v61 = vpop.eup %13946  ;;  %v8085_v50 = vpop.xlane.xlu1 %8084  ;;  %v7683_v8 = vmul.f32 %v13945_v14, %v18053_v7 }
0x18ee   :  { %13956 = vrcp.f32 %v8085_v50  ;;  %12793 = vmatpush3.bf16.xpose.msra.mxu0 %v12792_v55  ;;  %v8087_v0 = vpop.xlane.xlu0 %8086  ;;  %v7684_v45 = vmul.f32 %v13947_v61, %v18055_v2 }
0x18ef   :  { %13958 = vrcp.f32 %v8087_v0  ;;  %12794 = vmatprep.subr.bf16.mxu0 %v19806_v53 }
0x18f0   :  { %v13949_v15 = vpop.eup %13948  ;;  %v12771_v1 = vpack.c.bf16 %v7684_v45, %v7683_v8 }
0x18f1   :  { %v13951_v62 = vpop.eup %13950  ;;  %v7650_v48 = vpop.xlane.xlu1 %7649  ;;  %v8122_v16 = vmul.f32 %v13949_v15, %v18061_v17 }
0x18f2   :  { %13960 = vrcp.f32 %v7650_v48  ;;  %12772 = vmatpush3.bf16.xpose.msra.mxu1 %v12771_v1  ;;  %v7652_v5 = vpop.xlane.xlu0 %7651  ;;  %v8123_v10 = vmul.f32 %v13951_v62, %v18063_v29 }
0x18f3   :  { %13962 = vrcp.f32 %v7652_v5  ;;  %12773 = vmatprep.subr.bf16.mxu1 %v19806_v53 }
0x18f4   :  { %v13953_v7 = vpop.eup %13952  ;;  %v12795_v22 = vpack.c.bf16 %v8123_v10, %v8122_v16 }
0x18f5   :  { %v13955_v2 = vpop.eup %13954  ;;  %v8089_v52 = vpop.xlane.xlu1 %8088  ;;  %v7685_v56 = vmul.f32 %v13953_v7, %v18069_v63 }
0x18f6   :  { %13964 = vrcp.f32 %v8089_v52  ;;  %12796 = vmatpush3.bf16.xpose.msra.mxu0 %v12795_v22  ;;  %v8091_v27 = vpop.xlane.xlu0 %8090  ;;  %v7686_v26 = vmul.f32 %v13955_v2, %v18071_v18 }
0x18f7   :  { %13966 = vrcp.f32 %v8091_v27  ;;  %12797 = vmatprep.subr.bf16.mxu0 %v19806_v53 }
0x18f8   :  { %v13957_v17 = vpop.eup %13956  ;;  %v12774_v47 = vpack.c.bf16 %v7686_v26, %v7685_v56 }
0x18f9   :  { %v13959_v29 = vpop.eup %13958  ;;  %v7654_v60 = vpop.xlane.xlu1 %7653  ;;  %v8124_v9 = vmul.f32 %v13957_v17, %v18077_v35 }
0x18fa   :  { %13968 = vrcp.f32 %v7654_v60  ;;  %12775 = vmatpush3.bf16.xpose.msra.mxu1 %v12774_v47  ;;  %v7656_v38 = vpop.xlane.xlu0 %7655  ;;  %v8125_v43 = vmul.f32 %v13959_v29, %v18079_v30 }
0x18fb   :  { %13970 = vrcp.f32 %v7656_v38  ;;  %12776 = vmatprep.subr.bf16.mxu1 %v19806_v53 }
0x18fc   :  { %v13961_v63 = vpop.eup %13960  ;;  %v12798_v13 = vpack.c.bf16 %v8125_v43, %v8124_v9 }
0x18fd   :  { %v13963_v18 = vpop.eup %13962  ;;  %v8093_v21 = vpop.xlane.xlu1 %8092  ;;  %v7687_v59 = vmul.f32 %v13961_v63, %v18085_v37 }
0x18fe   :  { %13972 = vrcp.f32 %v8093_v21  ;;  %12799 = vmatpush3.bf16.xpose.msra.mxu0 %v12798_v13  ;;  %v8095_v24 = vpop.xlane.xlu0 %8094  ;;  %v7688_v32 = vmul.f32 %v13963_v18, %v18087_v3 }
0x18ff   :  { %13974 = vrcp.f32 %v8095_v24  ;;  %12800 = vmatprep.subr.bf16.mxu0 %v19806_v53 }
0x1900   :  { %v13965_v35 = vpop.eup %13964  ;;  %v12777_v12 = vpack.c.bf16 %v7688_v32, %v7687_v59 }
0x1901   :  { %v13967_v30 = vpop.eup %13966  ;;  %v7658_v6 = vpop.xlane.xlu1 %7657  ;;  %v8126_v14 = vmul.f32 %v13965_v35, %v18093_v57 }
0x1902   :  { %13976 = vrcp.f32 %v7658_v6  ;;  %12778 = vmatpush3.bf16.xpose.msra.mxu1 %v12777_v12  ;;  %v7660_v55 = vpop.xlane.xlu0 %7659  ;;  %v8127_v61 = vmul.f32 %v13967_v30, %v18095_v25 }
0x1903   :  { %13978 = vrcp.f32 %v7660_v55  ;;  %12779 = vmatprep.subr.bf16.mxu1 %v19806_v53 }
0x1904   :  { %v13969_v37 = vpop.eup %13968  ;;  %v12801_v50 = vpack.c.bf16 %v8127_v61, %v8126_v14 }
0x1905   :  { %v13971_v3 = vpop.eup %13970  ;;  %v8097_v8 = vpop.xlane.xlu1 %8096  ;;  %v7689_v0 = vmul.f32 %v13969_v37, %v18101_v36 }
0x1906   :  { %13980 = vrcp.f32 %v8097_v8  ;;  %12802 = vmatpush3.bf16.xpose.msra.mxu0 %v12801_v50  ;;  %v8099_v45 = vpop.xlane.xlu0 %8098  ;;  %v7690_v15 = vmul.f32 %v13971_v3, %v18103_v28 }
0x1907   :  { %13982 = vrcp.f32 %v8099_v45  ;;  %12803 = vmatprep.subr.bf16.mxu0 %v19806_v53 }
0x1908   :  { %v13973_v57 = vpop.eup %13972  ;;  %v12780_v1 = vpack.c.bf16 %v7690_v15, %v7689_v0 }
0x1909   :  { %v13975_v25 = vpop.eup %13974  ;;  %v8128_v62 = vmul.f32 %v13973_v57, %v18107_v23 }
0x190a   :  { %12781 = vmatpush3.bf16.xpose.msra.mxu1 %v12780_v1  ;;  %v8129_v48 = vmul.f32 %v13975_v25, %v18109_v4 }
0x190b   :  { %12782 = vmatprep.subr.bf16.mxu1 %v19806_v53 }
0x190c   :  { %v13977_v16 = vpop.eup %13976  ;;  %v12804_v36 = vpack.c.bf16 %v8129_v48, %v8128_v62 }
0x190d   :  { %v13979_v5 = vpop.eup %13978  ;;  %v7691_v10 = vmul.f32 %v13977_v16, %v18113_v19 }
0x190e   :  { %12805 = vmatpush3.bf16.xpose.msra.mxu0 %v12804_v36  ;;  %v7692_v28 = vmul.f32 %v13979_v5, %v18115_v40 }
0x190f   :  { %12806 = vmatprep.subr.bf16.mxu0 %v19806_v53 }
0x1910   :  { %v13981_v7 = vpop.eup %13980  ;;  %v12783_v22 = vpack.c.bf16 %v7692_v28, %v7691_v10 }
0x1911   :  { %v13983_v2 = vpop.eup %13982  ;;  %v8130_v23 = vmul.f32 %v13981_v7, %v18119_v42 }
0x1912   :  { %12784 = vmatpush3.bf16.xpose.msra.mxu1 %v12783_v22  ;;  %v8131_v4 = vmul.f32 %v13983_v2, %v18121_v20 }
0x1913   :  { %12351 = vmatprep.subr.mxu1 %v17397_v34 }
0x1914   :  { %v12807_v52 = vpack.c.bf16 %v8131_v4, %v8130_v23 }
0x1916   :  { %12808 = vmatpush3.bf16.xpose.msra.mxu0 %v12807_v52 }
0x1917   :  { %12412 = vmatprep.subr.mxu0 %v17401_v54 }
0x1919   :  { %12288 = vmatmul.mubr.f32.vlgmr.msra.gmra.mrb[172].mxu1 %v17406_v44 }
0x191a   :  { %12352 = vmatpush3.msra.mxu1 %v17397_v34 }
0x191b   :  { %12809 = vmatprep.subr.bf16.mxu1 %v19806_v53 }
0x191d   :  { %12349 = vmatmul.mubr.f32.vlgmr.msra.gmra.mrb[172].mxu0 %v17412_v33 }
0x191e   :  { %12413 = vmatpush3.msra.mxu0 %v17401_v54 }
0x191f   :  { %12833 = vmatprep.subr.bf16.mxu0 %v19806_v53 }
0x1926   :  { %v8657_v19 = vpop.trf.xlu0 }
0x1927   :  { %12414 = vmatprep.mubr.msk.f32.mxu0 %vm366_vm1, %v8657_v19 }
0x192a   :  { %v8658_v40 = vpop.trf.xlu0 }
0x192b   :  { %v8218_v42 = vpop.trf.xlu1  ;;  %12415 = vmatmul.mubr.msk.f32.vlgmr.msra.gmra.mrb[174].mxu0 %vm366_vm1, %v8658_v40 }
0x192c   :  { %12353 = vmatprep.mubr.msk.f32.mxu1 %vm366_vm1, %v8218_v42 }
0x192e   :  { %v8659_v44 = vpop.trf.xlu0 }
0x192f   :  { %v8219_v20 = vpop.trf.xlu1  ;;  %12417 = vmatprep.mubr.msk.f32.mxu0 %vm366_vm1, %v8659_v44 }
0x1930   :  { %12354 = vmatmul.mubr.msk.f32.vlgmr.msra.gmra.mrb[174].mxu1 %vm366_vm1, %v8219_v20 }
0x1932   :  { %v8660_v34 = vpop.trf.xlu0 }
0x1933   :  { %v8220_v33 = vpop.trf.xlu1  ;;  %12418 = vmatmul.mubr.msk.f32.gmra.mrb[176].mxu0 %vm366_vm1, %v8660_v34 }
0x1934   :  { %12356 = vmatprep.mubr.msk.f32.mxu1 %vm366_vm1, %v8220_v33 }
0x1936   :  { %v8661_v54 = vpop.trf.xlu0 }
0x1937   :  { %v8221_v56 = vpop.trf.xlu1  ;;  %12420 = vmatprep.mubr.msk.f32.mxu0 %vm366_vm1, %v8661_v54 }
0x1938   :  { %12357 = vmatmul.mubr.msk.f32.gmra.mrb[176].mxu1 %vm366_vm1, %v8221_v56 }
0x193a   :  { %v8662_v27 = vpop.trf.xlu0 }
0x193b   :  { %v8222_v26 = vpop.trf.xlu1  ;;  %12421 = vmatmul.mubr.msk.f32.gmra.mrb[178].mxu0 %vm366_vm1, %v8662_v27 }
0x193c   :  { %12359 = vmatprep.mubr.msk.f32.mxu1 %vm366_vm1, %v8222_v26 }
0x193e   :  { %v8663_v17 = vpop.trf.xlu0 }
0x193f   :  { %v8223_v47 = vpop.trf.xlu1  ;;  %12423 = vmatprep.mubr.msk.f32.mxu0 %vm366_vm1, %v8663_v17 }
0x1940   :  { %12360 = vmatmul.mubr.msk.f32.gmra.mrb[178].mxu1 %vm366_vm1, %v8223_v47 }
0x1942   :  { %v8664_v29 = vpop.trf.xlu0 }
0x1943   :  { %v8224_v60 = vpop.trf.xlu1  ;;  %12424 = vmatmul.mubr.msk.f32.gmra.mrb[180].mxu0 %vm366_vm1, %v8664_v29 }
0x1944   :  { %12362 = vmatprep.mubr.msk.f32.mxu1 %vm366_vm1, %v8224_v60 }
0x1946   :  { %v8665_v9 = vpop.trf.xlu0 }
0x1947   :  { %v8225_v38 = vpop.trf.xlu1  ;;  %12426 = vmatprep.mubr.msk.f32.mxu0 %vm366_vm1, %v8665_v9 }
0x1948   :  { %12363 = vmatmul.mubr.msk.f32.gmra.mrb[180].mxu1 %vm366_vm1, %v8225_v38 }
0x194a   :  { %v8666_v43 = vpop.trf.xlu0 }
0x194b   :  { %v8226_v63 = vpop.trf.xlu1  ;;  %12427 = vmatmul.mubr.msk.f32.gmra.mrb[182].mxu0 %vm366_vm1, %v8666_v43 }
0x194c   :  { %12365 = vmatprep.mubr.msk.f32.mxu1 %vm366_vm1, %v8226_v63 }
0x194e   :  { %v8667_v13 = vpop.trf.xlu0 }
0x194f   :  { %v8227_v18 = vpop.trf.xlu1  ;;  %12429 = vmatprep.mubr.msk.f32.mxu0 %vm366_vm1, %v8667_v13 }
0x1950   :  { %12366 = vmatmul.mubr.msk.f32.gmra.mrb[182].mxu1 %vm366_vm1, %v8227_v18 }
0x1952   :  { %v8668_v21 = vpop.trf.xlu0 }
0x1953   :  { %v8228_v59 = vpop.trf.xlu1  ;;  %12430 = vmatmul.mubr.msk.f32.gmra.mrb[184].mxu0 %vm366_vm1, %v8668_v21 }
0x1954   :  { %12368 = vmatprep.mubr.msk.f32.mxu1 %vm366_vm1, %v8228_v59 }
0x1956   :  { %v8669_v24 = vpop.trf.xlu0 }
0x1957   :  { %v8229_v32 = vpop.trf.xlu1  ;;  %12432 = vmatprep.mubr.msk.f32.mxu0 %vm366_vm1, %v8669_v24 }
0x1958   :  { %12369 = vmatmul.mubr.msk.f32.gmra.mrb[184].mxu1 %vm366_vm1, %v8229_v32 }
0x195a   :  { %v8670_v35 = vpop.trf.xlu0 }
0x195b   :  { %v8230_v12 = vpop.trf.xlu1  ;;  %12433 = vmatmul.mubr.msk.f32.gmra.mrb[186].mxu0 %vm366_vm1, %v8670_v35 }
0x195c   :  { %12371 = vmatprep.mubr.msk.f32.mxu1 %vm366_vm1, %v8230_v12 }
0x195e   :  { %v8671_v30 = vpop.trf.xlu0 }
0x195f   :  { %v8231_v6 = vpop.trf.xlu1  ;;  %12435 = vmatprep.mubr.msk.f32.mxu0 %vm366_vm1, %v8671_v30 }
0x1960   :  { %12372 = vmatmul.mubr.msk.f32.gmra.mrb[186].mxu1 %vm366_vm1, %v8231_v6 }
0x1962   :  { %v8672_v14 = vpop.trf.xlu0 }
0x1963   :  { %v8232_v55 = vpop.trf.xlu1  ;;  %12436 = vmatmul.mubr.msk.f32.gmra.mrb[188].mxu0 %vm366_vm1, %v8672_v14 }
0x1964   :  { %12374 = vmatprep.mubr.msk.f32.mxu1 %vm366_vm1, %v8232_v55  ;;  %12470 = vmatprep.mubr.msk.f32.mxu0 %vm14284_vm3, %v19807_v31 }
0x1967   :  { %v8233_v61 = vpop.trf.xlu1 }
0x1968   :  { %12375 = vmatmul.mubr.msk.f32.gmra.mrb[188].mxu1 %vm366_vm1, %v8233_v61 }
0x1969   :  { %12409 = vmatprep.mubr.msk.f32.mxu1 %vm14284_vm3, %v19807_v31 }
0x19ec   :  { %v18217_v37 = vpop.f32.mrb[172].mxu1 }
0x19ed   :  { %v12289_v50 = vpop.f32.mrb[173].mxu1 }
0x19f0   :  { %v18219_v3 = vpop.f32.mrb[172].mxu0 }
0x19f1   :  { %v9086_v8 = vpack.c.bf16 %v18219_v3, %v18217_v37  ;;  %v12350_v0 = vpop.f32.mrb[173].mxu0  ;;  %v18538_v37 = vld [vmem:[%s19687_s6] sm:$0xff]  ;;  %v18556_v3 = vld [vmem:[%s19687_s6 + $0x18] sm:$0xff] }
0x19fe   :  { %v12416_v45 = vpop.f32.mrb[174].mxu0 }
0x19ff   :  { %v8787_v15 = vpop.f32.mrb[175].mxu0  ;;  %v18234_v16 = vadd.f32 %v12416_v45, %v19808_v51 }
0x1a00   :  { %v18231_v31 = vadd.f32 %v8787_v15, %v19808_v51 }
0x1a03   :  { %v12355_v57 = vpop.f32.mrb[174].mxu1 }
0x1a04   :  { %v18224_v1 = vadd.f32 %v12355_v57, %v19808_v51  ;;  %v8348_v25 = vpop.f32.mrb[175].mxu1 }
0x1a05   :  { %v18227_v62 = vadd.f32 %v8348_v25, %v19808_v51 }
0x1a06   :  { %8429 = vmax.xlane.f32.xlu1 %v18224_v1  ;;  %v12419_v48 = vpop.f32.mrb[176].mxu0 }
0x1a07   :  { %8427 = vmax.xlane.f32.xlu0 %v18227_v62  ;;  %v8797_v36 = vpop.f32.mrb[177].mxu0  ;;  %v18248_v2 = vadd.f32 %v12419_v48, %v19808_v51 }
0x1a08   :  { %v18251_v23 = vadd.f32 %v8797_v36, %v19808_v51 }
0x1a0a   :  { %8866 = vmax.xlane.f32.xlu1 %v18231_v31 }
0x1a0b   :  { %v12358_v5 = vpop.f32.mrb[176].mxu1  ;;  %8868 = vmax.xlane.f32.xlu0 %v18234_v16 }
0x1a0c   :  { %v18240_v10 = vadd.f32 %v12358_v5, %v19808_v51  ;;  %v8358_v28 = vpop.f32.mrb[177].mxu1 }
0x1a0d   :  { %v18243_v7 = vadd.f32 %v8358_v28, %v19808_v51 }
0x1a0e   :  { %v12422_v22 = vpop.f32.mrb[178].mxu0 }
0x1a0f   :  { %8433 = vmax.xlane.f32.xlu0 %v18240_v10  ;;  %8431 = vmax.xlane.f32.xlu1 %v18243_v7  ;;  %v8807_v4 = vpop.f32.mrb[179].mxu0  ;;  %v18264_v20 = vadd.f32 %v12422_v22, %v19808_v51 }
0x1a10   :  { %v18267_v34 = vadd.f32 %v8807_v4, %v19808_v51 }
0x1a13   :  { %v12361_v52 = vpop.f32.mrb[178].mxu1  ;;  %8872 = vmax.xlane.f32.xlu0 %v18248_v2  ;;  %8870 = vmax.xlane.f32.xlu1 %v18251_v23 }
0x1a14   :  { %v18256_v19 = vadd.f32 %v12361_v52, %v19808_v51  ;;  %v8368_v40 = vpop.f32.mrb[179].mxu1 }
0x1a15   :  { %v18259_v42 = vadd.f32 %v8368_v40, %v19808_v51 }
0x1a16   :  { %v12425_v44 = vpop.f32.mrb[180].mxu0 }
0x1a17   :  { %8437 = vmax.xlane.f32.xlu0 %v18256_v19  ;;  %8435 = vmax.xlane.f32.xlu1 %v18259_v42  ;;  %v8817_v33 = vpop.f32.mrb[181].mxu0  ;;  %v18280_v47 = vadd.f32 %v12425_v44, %v19808_v51 }
0x1a18   :  { %v18283_v29 = vadd.f32 %v8817_v33, %v19808_v51 }
0x1a1b   :  { %v12364_v54 = vpop.f32.mrb[180].mxu1  ;;  %8876 = vmax.xlane.f32.xlu0 %v18264_v20  ;;  %8874 = vmax.xlane.f32.xlu1 %v18267_v34 }
0x1a1c   :  { %v18272_v56 = vadd.f32 %v12364_v54, %v19808_v51  ;;  %v8378_v27 = vpop.f32.mrb[181].mxu1 }
0x1a1d   :  { %v18275_v26 = vadd.f32 %v8378_v27, %v19808_v51 }
0x1a1e   :  { %v12428_v17 = vpop.f32.mrb[182].mxu0 }
0x1a1f   :  { %8441 = vmax.xlane.f32.xlu0 %v18272_v56  ;;  %8439 = vmax.xlane.f32.xlu1 %v18275_v26  ;;  %v8827_v60 = vpop.f32.mrb[183].mxu0  ;;  %v18296_v18 = vadd.f32 %v12428_v17, %v19808_v51 }
0x1a20   :  { %v18299_v21 = vadd.f32 %v8827_v60, %v19808_v51 }
0x1a23   :  { %v12367_v9 = vpop.f32.mrb[182].mxu1  ;;  %8880 = vmax.xlane.f32.xlu0 %v18280_v47  ;;  %8878 = vmax.xlane.f32.xlu1 %v18283_v29 }
0x1a24   :  { %v18288_v38 = vadd.f32 %v12367_v9, %v19808_v51  ;;  %v8388_v43 = vpop.f32.mrb[183].mxu1 }
0x1a25   :  { %v18291_v63 = vadd.f32 %v8388_v43, %v19808_v51 }
0x1a26   :  { %v12431_v13 = vpop.f32.mrb[184].mxu0 }
0x1a27   :  { %8445 = vmax.xlane.f32.xlu0 %v18288_v38  ;;  %8443 = vmax.xlane.f32.xlu1 %v18291_v63  ;;  %v8837_v59 = vpop.f32.mrb[185].mxu0  ;;  %v18312_v6 = vadd.f32 %v12431_v13, %v19808_v51 }
0x1a28   :  { %v18315_v14 = vadd.f32 %v8837_v59, %v19808_v51 }
0x1a2b   :  { %v12370_v24 = vpop.f32.mrb[184].mxu1  ;;  %8884 = vmax.xlane.f32.xlu0 %v18296_v18  ;;  %8882 = vmax.xlane.f32.xlu1 %v18299_v21 }
0x1a2c   :  { %v18304_v32 = vadd.f32 %v12370_v24, %v19808_v51  ;;  %v8398_v35 = vpop.f32.mrb[185].mxu1 }
0x1a2d   :  { %v18307_v12 = vadd.f32 %v8398_v35, %v19808_v51 }
0x1a2e   :  { %v12434_v30 = vpop.f32.mrb[186].mxu0 }
0x1a2f   :  { %8449 = vmax.xlane.f32.xlu0 %v18304_v32  ;;  %8447 = vmax.xlane.f32.xlu1 %v18307_v12  ;;  %v8847_v55 = vpop.f32.mrb[187].mxu0  ;;  %v18328_v57 = vadd.f32 %v12434_v30, %v19808_v51 }
0x1a30   :  { %v18331_v25 = vadd.f32 %v8847_v55, %v19808_v51 }
0x1a33   :  { %v12373_v61 = vpop.f32.mrb[186].mxu1  ;;  %8888 = vmax.xlane.f32.xlu0 %v18312_v6  ;;  %8886 = vmax.xlane.f32.xlu1 %v18315_v14 }
0x1a34   :  { %v18320_v50 = vadd.f32 %v12373_v61, %v19808_v51  ;;  %v8408_v0 = vpop.f32.mrb[187].mxu1 }
0x1a35   :  { %v18323_v45 = vadd.f32 %v8408_v0, %v19808_v51 }
0x1a36   :  { %v12437_v15 = vpop.f32.mrb[188].mxu0 }
0x1a37   :  { %8453 = vmax.xlane.f32.xlu0 %v18320_v50  ;;  %8451 = vmax.xlane.f32.xlu1 %v18323_v45  ;;  %v8857_v48 = vpop.f32.mrb[189].mxu0  ;;  %v18344_v4 = vadd.f32 %v12437_v15, %v19808_v51 }
0x1a38   :  { %v18347_v52 = vadd.f32 %v8857_v48, %v19808_v51 }
0x1a3b   :  { %v12376_v36 = vpop.f32.mrb[188].mxu1  ;;  %8892 = vmax.xlane.f32.xlu0 %v18328_v57  ;;  %8890 = vmax.xlane.f32.xlu1 %v18331_v25 }
0x1a3c   :  { %v18336_v5 = vadd.f32 %v12376_v36, %v19808_v51  ;;  %v8418_v28 = vpop.f32.mrb[189].mxu1 }
0x1a3d   :  { %v18339_v22 = vadd.f32 %v8418_v28, %v19808_v51 }
0x1a3f   :  { %8457 = vmax.xlane.f32.xlu0 %v18336_v5  ;;  %8455 = vmax.xlane.f32.xlu1 %v18339_v22 }
0x1a43   :  { %8896 = vmax.xlane.f32.xlu0 %v18344_v4  ;;  %8894 = vmax.xlane.f32.xlu1 %v18347_v52 }
0x1a93   :  { %v8430_v40 = vpop.xlane.xlu1 %8429 }
0x1a94   :  { %v8460_v44 = vsub.f32 %v18224_v1, %v8430_v40  ;;  %v8428_v33 = vpop.xlane.xlu0 %8427 }
0x1a95   :  { %v8459_v54 = vsub.f32 %v18227_v62, %v8428_v33 }
0x1a96   :  { %v8477_v27 = vmul.f32 1.442695, %v8460_v44 }
0x1a97   :  { %v8475_v17 = vmul.f32 1.442695, %v8459_v54  ;;  %v8867_v60 = vpop.xlane.xlu1 %8866 }
0x1a98   :  { %13984 = vpow2.f32 %v8477_v27  ;;  %v8898_v9 = vsub.f32 %v18231_v31, %v8867_v60  ;;  %v8869_v43 = vpop.xlane.xlu0 %8868 }
0x1a99   :  { %13986 = vpow2.f32 %v8475_v17  ;;  %v8899_v51 = vsub.f32 %v18234_v16, %v8869_v43 }
0x1a9a   :  { %v8914_v13 = vmul.f32 1.442695, %v8898_v9 }
0x1a9b   :  { %v8916_v59 = vmul.f32 1.442695, %v8899_v51 }
0x1a9c   :  { %13988 = vpow2.f32 %v8914_v13  ;;  %v8432_v24 = vpop.xlane.xlu1 %8431  ;;  %v8434_v35 = vpop.xlane.xlu0 %8433 }
0x1a9d   :  { %13990 = vpow2.f32 %v8916_v59  ;;  %v8461_v1 = vsub.f32 %v18243_v7, %v8432_v24  ;;  %v8462_v62 = vsub.f32 %v18240_v10, %v8434_v35 }
0x1a9f   :  { %v8479_v30 = vmul.f32 1.442695, %v8461_v1  ;;  %v8481_v55 = vmul.f32 1.442695, %v8462_v62 }
0x1aa0   :  { %v8871_v61 = vpop.xlane.xlu1 %8870  ;;  %v8873_v0 = vpop.xlane.xlu0 %8872 }
0x1aa1   :  { %13992 = vpow2.f32 %v8479_v30  ;;  %v8900_v31 = vsub.f32 %v18251_v23, %v8871_v61  ;;  %v8901_v15 = vsub.f32 %v18248_v2, %v8873_v0 }
0x1aa2   :  { %v18359_v16 = vpop.eup %13984  ;;  %13994 = vpow2.f32 %v8481_v55 }
0x1aa3   :  { %v18361_v48 = vpop.eup %13986  ;;  %v8918_v36 = vmul.f32 1.442695, %v8900_v31  ;;  %v8920_v28 = vmul.f32 1.442695, %v8901_v15  ;;  %8509 = vadd.xlane.f32.xlu0 %v18359_v16 }
0x1aa4   :  { %v8436_v7 = vpop.xlane.xlu1 %8435  ;;  %8507 = vadd.xlane.f32.xlu1 %v18361_v48  ;;  %v8438_v10 = vpop.xlane.xlu0 %8437 }
0x1aa5   :  { %13996 = vpow2.f32 %v8918_v36  ;;  %v8463_v40 = vsub.f32 %v18259_v42, %v8436_v7  ;;  %v8464_v23 = vsub.f32 %v18256_v19, %v8438_v10 }
0x1aa6   :  { %v18367_v44 = vpop.eup %13988  ;;  %13998 = vpow2.f32 %v8920_v28 }
0x1aa7   :  { %v18369_v2 = vpop.eup %13990  ;;  %v8483_v33 = vmul.f32 1.442695, %v8463_v40  ;;  %v8485_v54 = vmul.f32 1.442695, %v8464_v23 }
0x1aa8   :  { %v8875_v27 = vpop.xlane.xlu1 %8874  ;;  %8946 = vadd.xlane.f32.xlu1 %v18367_v44  ;;  %8948 = vadd.xlane.f32.xlu0 %v18369_v2  ;;  %v8877_v17 = vpop.xlane.xlu0 %8876 }
0x1aa9   :  { %14000 = vpow2.f32 %v8483_v33  ;;  %v8902_v60 = vsub.f32 %v18267_v34, %v8875_v27  ;;  %v8903_v42 = vsub.f32 %v18264_v20, %v8877_v17 }
0x1aaa   :  { %14002 = vpow2.f32 %v8485_v54 }
0x1aab   :  { %v18375_v19 = vpop.eup %13992  ;;  %v8922_v9 = vmul.f32 1.442695, %v8902_v60  ;;  %v8924_v43 = vmul.f32 1.442695, %v8903_v42 }
0x1aac   :  { %v18377_v51 = vpop.eup %13994  ;;  %v8440_v13 = vpop.xlane.xlu1 %8439  ;;  %8511 = vadd.xlane.f32.xlu1 %v18375_v19 }
0x1aad   :  { %v8442_v59 = vpop.xlane.xlu0 %8441  ;;  %14004 = vpow2.f32 %v8922_v9  ;;  %v8465_v24 = vsub.f32 %v18275_v26, %v8440_v13  ;;  %8513 = vadd.xlane.f32.xlu0 %v18377_v51 }
0x1aae   :  { %v8466_v34 = vsub.f32 %v18272_v56, %v8442_v59  ;;  %14006 = vpow2.f32 %v8924_v43 }
0x1aaf   :  { %v18383_v20 = vpop.eup %13996  ;;  %v8487_v35 = vmul.f32 1.442695, %v8465_v24 }
0x1ab0   :  { %v8489_v1 = vmul.f32 1.442695, %v8466_v34  ;;  %v18385_v62 = vpop.eup %13998  ;;  %v8879_v30 = vpop.xlane.xlu1 %8878  ;;  %8950 = vadd.xlane.f32.xlu1 %v18383_v20 }
0x1ab1   :  { %v8881_v55 = vpop.xlane.xlu0 %8880  ;;  %14008 = vpow2.f32 %v8487_v35  ;;  %v8904_v61 = vsub.f32 %v18283_v29, %v8879_v30  ;;  %8952 = vadd.xlane.f32.xlu0 %v18385_v62 }
0x1ab2   :  { %v8905_v26 = vsub.f32 %v18280_v47, %v8881_v55  ;;  %14010 = vpow2.f32 %v8489_v1 }
0x1ab3   :  { %v18391_v56 = vpop.eup %14000  ;;  %v8926_v0 = vmul.f32 1.442695, %v8904_v61 }
0x1ab4   :  { %v8928_v31 = vmul.f32 1.442695, %v8905_v26  ;;  %v18393_v15 = vpop.eup %14002  ;;  %v8444_v36 = vpop.xlane.xlu1 %8443  ;;  %8515 = vadd.xlane.f32.xlu1 %v18391_v56 }
0x1ab5   :  { %v8446_v28 = vpop.xlane.xlu0 %8445  ;;  %14012 = vpow2.f32 %v8926_v0  ;;  %v8467_v7 = vsub.f32 %v18291_v63, %v8444_v36  ;;  %8517 = vadd.xlane.f32.xlu0 %v18393_v15 }
0x1ab6   :  { %v8468_v29 = vsub.f32 %v18288_v38, %v8446_v28  ;;  %14014 = vpow2.f32 %v8928_v31 }
0x1ab7   :  { %v18399_v47 = vpop.eup %14004  ;;  %v8491_v10 = vmul.f32 1.442695, %v8467_v7 }
0x1ab8   :  { %v8493_v40 = vmul.f32 1.442695, %v8468_v29  ;;  %v18401_v23 = vpop.eup %14006  ;;  %v8883_v33 = vpop.xlane.xlu1 %8882  ;;  %8954 = vadd.xlane.f32.xlu1 %v18399_v47 }
0x1ab9   :  { %v8885_v54 = vpop.xlane.xlu0 %8884  ;;  %14016 = vpow2.f32 %v8491_v10  ;;  %v8906_v27 = vsub.f32 %v18299_v21, %v8883_v33  ;;  %8956 = vadd.xlane.f32.xlu0 %v18401_v23 }
0x1aba   :  { %v8907_v63 = vsub.f32 %v18296_v18, %v8885_v54  ;;  %14018 = vpow2.f32 %v8493_v40 }
0x1abb   :  { %v18407_v38 = vpop.eup %14008  ;;  %v8930_v17 = vmul.f32 1.442695, %v8906_v27 }
0x1abc   :  { %v8932_v60 = vmul.f32 1.442695, %v8907_v63  ;;  %v18409_v42 = vpop.eup %14010  ;;  %v8448_v9 = vpop.xlane.xlu1 %8447  ;;  %8519 = vadd.xlane.f32.xlu1 %v18407_v38 }
0x1abd   :  { %v8450_v43 = vpop.xlane.xlu0 %8449  ;;  %14020 = vpow2.f32 %v8930_v17  ;;  %v8469_v13 = vsub.f32 %v18307_v12, %v8448_v9  ;;  %8521 = vadd.xlane.f32.xlu0 %v18409_v42 }
0x1abe   :  { %v8470_v21 = vsub.f32 %v18304_v32, %v8450_v43  ;;  %14022 = vpow2.f32 %v8932_v60 }
0x1abf   :  { %v18415_v18 = vpop.eup %14012  ;;  %v8495_v59 = vmul.f32 1.442695, %v8469_v13 }
0x1ac0   :  { %v8497_v24 = vmul.f32 1.442695, %v8470_v21  ;;  %v18417_v34 = vpop.eup %14014  ;;  %v8887_v35 = vpop.xlane.xlu1 %8886  ;;  %8958 = vadd.xlane.f32.xlu1 %v18415_v18 }
0x1ac1   :  { %v8889_v1 = vpop.xlane.xlu0 %8888  ;;  %14024 = vpow2.f32 %v8495_v59  ;;  %v8908_v30 = vsub.f32 %v18315_v14, %v8887_v35  ;;  %8960 = vadd.xlane.f32.xlu0 %v18417_v34 }
0x1ac2   :  { %v8909_v12 = vsub.f32 %v18312_v6, %v8889_v1  ;;  %14026 = vpow2.f32 %v8497_v24 }
0x1ac3   :  { %v18423_v32 = vpop.eup %14016  ;;  %v8934_v55 = vmul.f32 1.442695, %v8908_v30 }
0x1ac4   :  { %v8936_v61 = vmul.f32 1.442695, %v8909_v12  ;;  %v18425_v26 = vpop.eup %14018  ;;  %v8452_v0 = vpop.xlane.xlu1 %8451  ;;  %8523 = vadd.xlane.f32.xlu1 %v18423_v32 }
0x1ac5   :  { %v8454_v31 = vpop.xlane.xlu0 %8453  ;;  %14028 = vpow2.f32 %v8934_v55  ;;  %v8471_v36 = vsub.f32 %v18323_v45, %v8452_v0  ;;  %8525 = vadd.xlane.f32.xlu0 %v18425_v26 }
0x1ac6   :  { %v8472_v14 = vsub.f32 %v18320_v50, %v8454_v31  ;;  %14030 = vpow2.f32 %v8936_v61 }
0x1ac7   :  { %v18431_v6 = vpop.eup %14020  ;;  %v8499_v28 = vmul.f32 1.442695, %v8471_v36 }
0x1ac8   :  { %v8501_v7 = vmul.f32 1.442695, %v8472_v14  ;;  %v18433_v29 = vpop.eup %14022  ;;  %v8891_v10 = vpop.xlane.xlu1 %8890  ;;  %8962 = vadd.xlane.f32.xlu1 %v18431_v6 }
0x1ac9   :  { %v8893_v40 = vpop.xlane.xlu0 %8892  ;;  %14032 = vpow2.f32 %v8499_v28  ;;  %v8910_v33 = vsub.f32 %v18331_v25, %v8891_v10  ;;  %8964 = vadd.xlane.f32.xlu0 %v18433_v29 }
0x1aca   :  { %v8911_v45 = vsub.f32 %v18328_v57, %v8893_v40  ;;  %14034 = vpow2.f32 %v8501_v7 }
0x1acb   :  { %v18439_v50 = vpop.eup %14024  ;;  %v8938_v54 = vmul.f32 1.442695, %v8910_v33 }
0x1acc   :  { %v8940_v27 = vmul.f32 1.442695, %v8911_v45  ;;  %v18441_v63 = vpop.eup %14026  ;;  %v8456_v17 = vpop.xlane.xlu1 %8455  ;;  %8527 = vadd.xlane.f32.xlu1 %v18439_v50 }
0x1acd   :  { %v8458_v60 = vpop.xlane.xlu0 %8457  ;;  %14036 = vpow2.f32 %v8938_v54  ;;  %v8473_v9 = vsub.f32 %v18339_v22, %v8456_v17  ;;  %8529 = vadd.xlane.f32.xlu0 %v18441_v63 }
0x1ace   :  { %v8474_v25 = vsub.f32 %v18336_v5, %v8458_v60  ;;  %14038 = vpow2.f32 %v8940_v27 }
0x1acf   :  { %v18447_v57 = vpop.eup %14028  ;;  %v8503_v43 = vmul.f32 1.442695, %v8473_v9 }
0x1ad0   :  { %v8505_v13 = vmul.f32 1.442695, %v8474_v25  ;;  %v18449_v21 = vpop.eup %14030  ;;  %v8895_v59 = vpop.xlane.xlu1 %8894  ;;  %8966 = vadd.xlane.f32.xlu1 %v18447_v57 }
0x1ad1   :  { %v8897_v24 = vpop.xlane.xlu0 %8896  ;;  %14040 = vpow2.f32 %v8503_v43  ;;  %v8912_v35 = vsub.f32 %v18347_v52, %v8895_v59  ;;  %8968 = vadd.xlane.f32.xlu0 %v18449_v21 }
0x1ad2   :  { %v8913_v22 = vsub.f32 %v18344_v4, %v8897_v24  ;;  %14042 = vpow2.f32 %v8505_v13 }
0x1ad3   :  { %v18455_v5 = vpop.eup %14032  ;;  %v8942_v1 = vmul.f32 1.442695, %v8912_v35 }
0x1ad4   :  { %v8944_v30 = vmul.f32 1.442695, %v8913_v22  ;;  %v18457_v12 = vpop.eup %14034  ;;  %8531 = vadd.xlane.f32.xlu1 %v18455_v5 }
0x1ad5   :  { %14044 = vpow2.f32 %v8942_v1  ;;  %8533 = vadd.xlane.f32.xlu0 %v18457_v12 }
0x1ad6   :  { %14046 = vpow2.f32 %v8944_v30 }
0x1ad7   :  { %v18461_v55 = vpop.eup %14036 }
0x1ad8   :  { %v18463_v52 = vpop.eup %14038  ;;  %8970 = vadd.xlane.f32.xlu1 %v18461_v55 }
0x1ad9   :  { %8972 = vadd.xlane.f32.xlu0 %v18463_v52 }
0x1adb   :  { %v18467_v4 = vpop.eup %14040 }
0x1adc   :  { %v18469_v61 = vpop.eup %14042  ;;  %8535 = vadd.xlane.f32.xlu1 %v18467_v4 }
0x1add   :  { %8537 = vadd.xlane.f32.xlu0 %v18469_v61 }
0x1adf   :  { %v18473_v0 = vpop.eup %14044 }
0x1ae0   :  { %v18475_v31 = vpop.eup %14046  ;;  %8974 = vadd.xlane.f32.xlu1 %v18473_v0 }
0x1ae1   :  { %8976 = vadd.xlane.f32.xlu0 %v18475_v31 }
0x1b30   :  { %v8510_v36 = vpop.xlane.xlu0 %8509 }
0x1b31   :  { %14048 = vrcp.f32 %v8510_v36  ;;  %v8508_v14 = vpop.xlane.xlu1 %8507 }
0x1b32   :  { %14050 = vrcp.f32 %v8508_v14 }
0x1b35   :  { %v8947_v28 = vpop.xlane.xlu1 %8946  ;;  %v8949_v7 = vpop.xlane.xlu0 %8948 }
0x1b36   :  { %14052 = vrcp.f32 %v8947_v28 }
0x1b37   :  { %14054 = vrcp.f32 %v8949_v7 }
0x1b39   :  { %v8512_v10 = vpop.xlane.xlu1 %8511 }
0x1b3a   :  { %14056 = vrcp.f32 %v8512_v10  ;;  %v8514_v40 = vpop.xlane.xlu0 %8513 }
0x1b3b   :  { %v14049_v33 = vpop.eup %14048  ;;  %14058 = vrcp.f32 %v8514_v40 }
0x1b3c   :  { %v14051_v45 = vpop.eup %14050  ;;  %v8556_v54 = vmul.f32 %v14049_v33, %v18359_v16 }
0x1b3d   :  { %v8951_v27 = vpop.xlane.xlu1 %8950  ;;  %v8555_v17 = vmul.f32 %v14051_v45, %v18361_v48 }
0x1b3e   :  { %14060 = vrcp.f32 %v8951_v27  ;;  %v8953_v60 = vpop.xlane.xlu0 %8952 }
0x1b3f   :  { %14062 = vrcp.f32 %v8953_v60  ;;  %v12810_v9 = vpack.c.bf16 %v8556_v54, %v8555_v17 }
0x1b40   :  { %v14053_v25 = vpop.eup %14052 }
0x1b41   :  { %v14055_v43 = vpop.eup %14054  ;;  %v8516_v13 = vpop.xlane.xlu1 %8515  ;;  %12811 = vmatpush3.bf16.xpose.msra.mxu1 %v12810_v9  ;;  %v8994_v59 = vmul.f32 %v14053_v25, %v18367_v44 }
0x1b42   :  { %14064 = vrcp.f32 %v8516_v13  ;;  %v8518_v24 = vpop.xlane.xlu0 %8517  ;;  %v8995_v35 = vmul.f32 %v14055_v43, %v18369_v2  ;;  %12812 = vmatprep.subr.bf16.mxu1 %v19806_v53 }
0x1b43   :  { %14066 = vrcp.f32 %v8518_v24 }
0x1b44   :  { %v14057_v16 = vpop.eup %14056  ;;  %v12834_v22 = vpack.c.bf16 %v8995_v35, %v8994_v59 }
0x1b45   :  { %v14059_v48 = vpop.eup %14058  ;;  %v8955_v1 = vpop.xlane.xlu1 %8954  ;;  %v8557_v30 = vmul.f32 %v14057_v16, %v18375_v19 }
0x1b46   :  { %14068 = vrcp.f32 %v8955_v1  ;;  %12835 = vmatpush3.bf16.xpose.msra.mxu0 %v12834_v22  ;;  %v8957_v36 = vpop.xlane.xlu0 %8956  ;;  %v8558_v14 = vmul.f32 %v14059_v48, %v18377_v51 }
0x1b47   :  { %14070 = vrcp.f32 %v8957_v36  ;;  %12836 = vmatprep.subr.bf16.mxu0 %v19806_v53 }
0x1b48   :  { %v14061_v44 = vpop.eup %14060  ;;  %v12813_v28 = vpack.c.bf16 %v8558_v14, %v8557_v30 }
0x1b49   :  { %v14063_v2 = vpop.eup %14062  ;;  %v8520_v7 = vpop.xlane.xlu1 %8519  ;;  %v8996_v10 = vmul.f32 %v14061_v44, %v18383_v20 }
0x1b4a   :  { %14072 = vrcp.f32 %v8520_v7  ;;  %12814 = vmatpush3.bf16.xpose.msra.mxu1 %v12813_v28  ;;  %v8522_v40 = vpop.xlane.xlu0 %8521  ;;  %v8997_v33 = vmul.f32 %v14063_v2, %v18385_v62 }
0x1b4b   :  { %14074 = vrcp.f32 %v8522_v40  ;;  %12815 = vmatprep.subr.bf16.mxu1 %v19806_v53 }
0x1b4c   :  { %v14065_v19 = vpop.eup %14064  ;;  %v12837_v45 = vpack.c.bf16 %v8997_v33, %v8996_v10 }
0x1b4d   :  { %v14067_v51 = vpop.eup %14066  ;;  %v8959_v54 = vpop.xlane.xlu1 %8958  ;;  %v8559_v27 = vmul.f32 %v14065_v19, %v18391_v56 }
0x1b4e   :  { %14076 = vrcp.f32 %v8959_v54  ;;  %12838 = vmatpush3.bf16.xpose.msra.mxu0 %v12837_v45  ;;  %v8961_v17 = vpop.xlane.xlu0 %8960  ;;  %v8560_v60 = vmul.f32 %v14067_v51, %v18393_v15 }
0x1b4f   :  { %14078 = vrcp.f32 %v8961_v17  ;;  %12839 = vmatprep.subr.bf16.mxu0 %v19806_v53 }
0x1b50   :  { %v14069_v20 = vpop.eup %14068  ;;  %v12816_v9 = vpack.c.bf16 %v8560_v60, %v8559_v27 }
0x1b51   :  { %v14071_v62 = vpop.eup %14070  ;;  %v8524_v25 = vpop.xlane.xlu1 %8523  ;;  %v8998_v43 = vmul.f32 %v14069_v20, %v18399_v47 }
0x1b52   :  { %14080 = vrcp.f32 %v8524_v25  ;;  %12817 = vmatpush3.bf16.xpose.msra.mxu1 %v12816_v9  ;;  %v8526_v13 = vpop.xlane.xlu0 %8525  ;;  %v8999_v59 = vmul.f32 %v14071_v62, %v18401_v23 }
0x1b53   :  { %14082 = vrcp.f32 %v8526_v13  ;;  %12818 = vmatprep.subr.bf16.mxu1 %v19806_v53 }
0x1b54   :  { %v14073_v56 = vpop.eup %14072  ;;  %v12840_v24 = vpack.c.bf16 %v8999_v59, %v8998_v43 }
0x1b55   :  { %v14075_v15 = vpop.eup %14074  ;;  %v8963_v35 = vpop.xlane.xlu1 %8962  ;;  %v8561_v16 = vmul.f32 %v14073_v56, %v18407_v38 }
0x1b56   :  { %14084 = vrcp.f32 %v8963_v35  ;;  %12841 = vmatpush3.bf16.xpose.msra.mxu0 %v12840_v24  ;;  %v8965_v22 = vpop.xlane.xlu0 %8964  ;;  %v8562_v48 = vmul.f32 %v14075_v15, %v18409_v42 }
0x1b57   :  { %14086 = vrcp.f32 %v8965_v22  ;;  %12842 = vmatprep.subr.bf16.mxu0 %v19806_v53 }
0x1b58   :  { %v14077_v47 = vpop.eup %14076  ;;  %v12819_v1 = vpack.c.bf16 %v8562_v48, %v8561_v16 }
0x1b59   :  { %v14079_v23 = vpop.eup %14078  ;;  %v8528_v30 = vpop.xlane.xlu1 %8527  ;;  %v9000_v36 = vmul.f32 %v14077_v47, %v18415_v18 }
0x1b5a   :  { %14088 = vrcp.f32 %v8528_v30  ;;  %12820 = vmatpush3.bf16.xpose.msra.mxu1 %v12819_v1  ;;  %v8530_v14 = vpop.xlane.xlu0 %8529  ;;  %v9001_v44 = vmul.f32 %v14079_v23, %v18417_v34 }
0x1b5b   :  { %14090 = vrcp.f32 %v8530_v14  ;;  %12821 = vmatprep.subr.bf16.mxu1 %v19806_v53 }
0x1b5c   :  { %v14081_v38 = vpop.eup %14080  ;;  %v12843_v28 = vpack.c.bf16 %v9001_v44, %v9000_v36 }
0x1b5d   :  { %v14083_v42 = vpop.eup %14082  ;;  %v8967_v2 = vpop.xlane.xlu1 %8966  ;;  %v8563_v7 = vmul.f32 %v14081_v38, %v18423_v32 }
0x1b5e   :  { %14092 = vrcp.f32 %v8967_v2  ;;  %12844 = vmatpush3.bf16.xpose.msra.mxu0 %v12843_v28  ;;  %v8969_v10 = vpop.xlane.xlu0 %8968  ;;  %v8564_v40 = vmul.f32 %v14083_v42, %v18425_v26 }
0x1b5f   :  { %14094 = vrcp.f32 %v8969_v10  ;;  %12845 = vmatprep.subr.bf16.mxu0 %v19806_v53  ;;  %v12935_v10 = vld [vmem:[%s19690_s2 + $0x10] sm:$0xff]  }
0x1b60   :  { %v14085_v18 = vpop.eup %14084  ;;  %v12822_v33 = vpack.c.bf16 %v8564_v40, %v8563_v7  ;;  %v12936_v40 = vld [vmem:[%s19690_s2 + $0x18] sm:$0xff]  }
0x1b61   :  { %v14087_v34 = vpop.eup %14086  ;;  %v8532_v19 = vpop.xlane.xlu1 %8531  ;;  %v9002_v45 = vmul.f32 %v14085_v18, %v18431_v6 }
0x1b62   :  { %14096 = vrcp.f32 %v8532_v19  ;;  %12823 = vmatpush3.bf16.xpose.msra.mxu1 %v12822_v33  ;;  %v8534_v51 = vpop.xlane.xlu0 %8533  ;;  %v9003_v54 = vmul.f32 %v14087_v34, %v18433_v29 }
0x1b63   :  { %14098 = vrcp.f32 %v8534_v51  ;;  %12824 = vmatprep.subr.bf16.mxu1 %v19806_v53 }
0x1b64   :  { %v14089_v32 = vpop.eup %14088  ;;  %v12846_v27 = vpack.c.bf16 %v9003_v54, %v9002_v45  ;;  %v19813_v45 = vld [vmem:[#allocation11_spill] sm:$0xff] }
0x1b65   :  { %v14091_v26 = vpop.eup %14090  ;;  %v8971_v17 = vpop.xlane.xlu1 %8970  ;;  %v8565_v60 = vmul.f32 %v14089_v32, %v18439_v50  ;;  %v19815_v32 = vld [vmem:[#allocation24_spill] sm:$0xff] }
0x1b66   :  { %14100 = vrcp.f32 %v8971_v17  ;;  %12847 = vmatpush3.bf16.xpose.msra.mxu0 %v12846_v27  ;;  %v8973_v20 = vpop.xlane.xlu0 %8972  ;;  %v8566_v9 = vmul.f32 %v14091_v26, %v18441_v63  ;;  %v19816_v26 = vld [vmem:[#allocation13_spill] sm:$0xff] }
0x1b67   :  { %14102 = vrcp.f32 %v8973_v20  ;;  %12848 = vmatprep.subr.bf16.mxu0 %v19806_v53 }
0x1b68   :  { %v14093_v6 = vpop.eup %14092  ;;  %v12825_v62 = vpack.c.bf16 %v8566_v9, %v8565_v60 }
0x1b69   :  { %v14095_v29 = vpop.eup %14094  ;;  %v8536_v25 = vpop.xlane.xlu1 %8535  ;;  %v9004_v43 = vmul.f32 %v14093_v6, %v18447_v57 }
0x1b6a   :  { %14104 = vrcp.f32 %v8536_v25  ;;  %12826 = vmatpush3.bf16.xpose.msra.mxu1 %v12825_v62  ;;  %v8538_v13 = vpop.xlane.xlu0 %8537  ;;  %v9005_v59 = vmul.f32 %v14095_v29, %v18449_v21  ;;  %v19820_v29 = vld [vmem:[#allocation16_spill] sm:$0xff] }
0x1b6b   :  { %14106 = vrcp.f32 %v8538_v13  ;;  %12827 = vmatprep.subr.bf16.mxu1 %v19806_v53 }
0x1b6c   :  { %v14097_v50 = vpop.eup %14096  ;;  %v12849_v56 = vpack.c.bf16 %v9005_v59, %v9004_v43  ;;  %v19822_v59 = vld [vmem:[#allocation22_spill] sm:$0xff] }
0x1b6d   :  { %v14099_v63 = vpop.eup %14098  ;;  %v8975_v24 = vpop.xlane.xlu1 %8974  ;;  %v8567_v15 = vmul.f32 %v14097_v50, %v18455_v5 }
0x1b6e   :  { %14108 = vrcp.f32 %v8975_v24  ;;  %12850 = vmatpush3.bf16.xpose.msra.mxu0 %v12849_v56  ;;  %v8977_v35 = vpop.xlane.xlu0 %8976  ;;  %v8568_v16 = vmul.f32 %v14099_v63, %v18457_v12 }
0x1b6f   :  { %14110 = vrcp.f32 %v8977_v35  ;;  %12851 = vmatprep.subr.bf16.mxu0 %v19806_v53 }
0x1b70   :  { %v14101_v57 = vpop.eup %14100  ;;  %v12828_v22 = vpack.c.bf16 %v8568_v16, %v8567_v15  ;;  %v19824_v15 = vld [vmem:[#allocation23_spill] sm:$0xff] }
0x1b71   :  { %v14103_v21 = vpop.eup %14102  ;;  %v9006_v48 = vmul.f32 %v14101_v57, %v18461_v55 }
0x1b72   :  { %12829 = vmatpush3.bf16.xpose.msra.mxu1 %v12828_v22  ;;  %v9007_v47 = vmul.f32 %v14103_v21, %v18463_v52 }
0x1b73   :  { %12830 = vmatprep.subr.bf16.mxu1 %v19806_v53 }
0x1b74   :  { %v14105_v1 = vpop.eup %14104  ;;  %v12852_v5 = vpack.c.bf16 %v9007_v47, %v9006_v48  ;;  %v19826_v48 = vld [vmem:[#allocation17_spill] sm:$0xff] }
0x1b75   :  { %v14107_v23 = vpop.eup %14106  ;;  %v8569_v30 = vmul.f32 %v14105_v1, %v18467_v4  ;;  %v19810_v4 = vpack.c.bf16 %v17511_v39, %v17509_v49  ;;  %v18550_v49 = vld [vmem:[%s19687_s6 + $0x10] sm:$0xff]  ;;  %v14294_v39 = vmov 9  }
0x1b76   :  { %12853 = vmatpush3.bf16.xpose.msra.mxu0 %v12852_v5  ;;  %v8570_v12 = vmul.f32 %v14107_v23, %v18469_v61  ;;  %v19812_v61 = vld [vmem:[#allocation15_spill] sm:$0xff] }
0x1b77   :  { %12854 = vmatprep.subr.bf16.mxu0 %v19806_v53  ;;  %v19811_v53 = vmov 0  }
0x1b78   :  { %v14109_v36 = vpop.eup %14108  ;;  %v12831_v14 = vpack.c.bf16 %v8570_v12, %v8569_v30  ;;  %v14296_v12 = vmov 13  }
0x1b79   :  { %v14111_v44 = vpop.eup %14110  ;;  %v9008_v55 = vmul.f32 %v14109_v36, %v18473_v0  ;;  %v14293_v0 = vmov 8  }
0x1b7a   :  { %12832 = vmatpush3.bf16.xpose.msra.mxu1 %v12831_v14  ;;  %v9009_v52 = vmul.f32 %v14111_v44, %v18475_v31  ;;  %12898 = vset.pattern.permute.xlu1 %v14293_v0 }
0x1b7b   :  { %9105 = vmatprep.subr.bf16.mxu1 %v9086_v8  ;;  %12899 = vset.pattern.permute.xlu0 %v14293_v0  ;;  %v14295_v8 = vmov 10  }
0x1b7c   :  { %v12855_v38 = vpack.c.bf16 %v9009_v52, %v9008_v55  ;;  %9167 = vperm.xlu1 %12898, %v18538_v37  }
0x1b7e   :  { %12856 = vmatpush3.bf16.xpose.msra.mxu0 %v12855_v38 }
0x1b80   :  { %9175 = vperm.xlu1 %12898, %v18550_v49  }
0x1b81   :  { %12410 = vmatmul.mubr.f32.vlgmr.msra.gmra.mrb[190].mxu1 %v17503_v41  ;;  %v18544_v41 = vld [vmem:[%s19687_s6 + $0x8] sm:$0xff] }
0x1b82   :  { %9106 = vmatpush1.bf16.msra.mxu1 %v19810_v4  ;;  %9137 = vmatprep.mubr.bf16.mxu1 %v19811_v53 }
0x1b83   :  { %9171 = vperm.xlu0 %12899, %v18544_v41  }
0x1b84   :  { %9179 = vperm.xlu1 %12898, %v18556_v3  }
0x1b85   :  { %12471 = vmatmul.mubr.f32.vlgmr.msra.gmra.mrb[190].mxu0 %v19812_v61 }
0x1b86   :  { %10465 = vmatprep.mubr.bf16.mxu0 %v19811_v53 }
0x1b87   :  { %12903 = vset.pattern.permute.xlu0 %v14294_v39 }
0x1b88   :  { %9271 = vperm.xlu0 %12903, %v18556_v3   ;;  %12900 = vset.pattern.permute.xlu1 %v14294_v39 }
0x1b89   :  { %9259 = vperm.xlu1 %12900, %v18538_v37  }
0x1b8c   :  { %12905 = vset.pattern.permute.xlu0 %v14296_v12 }
0x1b8d   :  { %9263 = vperm.xlu1 %12900, %v18544_v41   ;;  %9328 = vperm.xlu0 %12905, %v18538_v37  }
0x1b91   :  { %12901 = vset.pattern.permute.xlu1 %v14295_v8  ;;  %9340 = vperm.xlu0 %12905, %v18556_v3  }
0x1b92   :  { %9283 = vperm.xlu1 %12901, %v18538_v37   ;;  %v14265_v37 = vld [vmem:[%s19687_s6 + $0x28] sm:$0xff] }
0x1b95   :  { %9348 = vperm.xlu0 %12905, %v14265_v37  }
0x1b96   :  { %9287 = vperm.xlu1 %12901, %v18544_v41  }
0x1b9a   :  { %12902 = vset.pattern.permute.xlu1 %v14294_v39  ;;  %v14264_v39 = vld [vmem:[%s19687_s6 + $0x20] sm:$0xff] }
0x1b9b   :  { %9267 = vperm.xlu1 %12902, %v18550_v49  }
0x1b9f   :  { %12904 = vset.pattern.permute.xlu1 %v14295_v8 }
0x1ba0   :  { %9291 = vperm.xlu1 %12904, %v18550_v49  }
0x1ba4   :  { %9295 = vperm.xlu1 %12904, %v18556_v3   ;;  %v14266_v3 = vld [vmem:[%s19687_s6 + $0x30] sm:$0xff] }
0x1ba8   :  { %12906 = vset.pattern.permute.xlu1 %v14296_v12 }
0x1ba9   :  { %9332 = vperm.xlu1 %12906, %v18544_v41  }
0x1bad   :  { %9336 = vperm.xlu1 %12906, %v18550_v49  }
0x1bb1   :  { %9344 = vperm.xlu1 %12906, %v14264_v39  }
0x1bb5   :  { %9352 = vperm.xlu1 %12906, %v14266_v3  }
0x1bfb   :  { %v9168_v33 = vpop.permute.xlu1 %9167 }
0x1bff   :  { %v9176_v60 = vpop.permute.xlu1 %9175 }
0x1c02   :  { %v9172_v54 = vpop.permute.xlu0 %9171 }
0x1c03   :  { %v9180_v22 = vpop.permute.xlu1 %9179 }
0x1c54   :  { %v8637_v31 = vpop.f32.mrb[190].mxu1 }
0x1c55   :  { %v12411_v28 = vpop.f32.mrb[191].mxu1 }
0x1c56   :  { %v14267_v28 = vld [vmem:[%s19687_s6 + $0x38] sm:$0xff] }
0x1c57   :  { %9356 = vperm.xlu0 %12905, %v14267_v28  }
0x1c58   :  { %v9076_v42 = vpop.f32.mrb[190].mxu0 }
0x1c59   :  { %v9088_v2 = vpack.c.bf16 %v9076_v42, %v8637_v31  ;;  %v12472_v7 = vpop.f32.mrb[191].mxu0 }
0x1c5b   :  { %9107 = vmatprep.subr.bf16.mxu1 %v9088_v2 }
0x1c5c   :  { %9108 = vmatpush1.bf16.msra.mxu1 %v9087_v11 }
0x1c5f   :  { %10911 = vmatmul.mubr.msk.bf16.vlgmr.msra.gmra.mrb[192].mxu1 %vm222_vm0, %v12935_v10 }
0x1c60   :  { %9147 = vmatprep.mubr.bf16.mxu1 %v19811_v53 }
0x1c67   :  { %10912 = vmatmul.mubr.msk.bf16.gmra.mrb[196].mxu1 %vm222_vm0, %v12936_v40 }
0x1c68   :  { %9487 = vmatprep.mubr.bf16.mxu1 %v19811_v53 }
0x1d32   :  { %v9139_v18 = vpop.f32.mrb[192].mxu1 }
0x1d33   :  { %v9141_v34 = vpop.f32.mrb[193].mxu1  ;;  %v9158_v27 = vadd.f32 %v9139_v18, %v19815_v32  ;;  %v9260_v32 = vpop.permute.xlu1 %9259 }
0x1d34   :  { %v9143_v19 = vpop.f32.mrb[194].mxu1  ;;  %v9159_v17 = vadd.f32 %v9141_v34, %v19816_v26 }
0x1d35   :  { %v9160_v51 = vadd.f32 %v9143_v19, %v19813_v45  ;;  %v9145_v46 = vpop.f32.mrb[195].mxu1  ;;  %v18588_v62 = vadd.f32 %v9168_v33, %v9158_v27 }
0x1d36   :  { %v9161_v11 = vadd.f32 %v9145_v46, %v19814_v58  ;;  %v18591_v13 = vadd.f32 %v9168_v33, %v9159_v17  ;;  %v14268_v33 = vld [vmem:[%s19687_s6 + $0x40] sm:$0xff] }
0x1d37   :  { %v18584_v20 = vadd.f32 %v9172_v54, %v9160_v51  ;;  %19819 = vst [vmem:[#allocation19_spill] sm:$0xff] %v18588_v62  ;;  %9360 = vperm.xlu1 %12906, %v14268_v33   ;;  %v14269_v51 = vld [vmem:[%s19687_s6 + $0x48] sm:$0xff] }
0x1d38   :  { %v18586_v9 = vadd.f32 %v9172_v54, %v9161_v11  ;;  %19821 = vst [vmem:[#allocation21_spill] sm:$0xff] %v18591_v13  ;;  %9364 = vperm.xlu0 %12905, %v14269_v51  }
0x1d39   :  { %19817 = vst [vmem:[#allocation14_spill] sm:$0xff] %v18584_v20  ;;  %v9190_v63 = vadd.f32 %v18584_v20, %v18588_v62 }
0x1d3a   :  { %19818 = vst [vmem:[#allocation18_spill] sm:$0xff] %v18586_v9  ;;  %v9149_v6 = vpop.f32.mrb[196].mxu1  ;;  %v9199_v57 = vadd.f32 %v18586_v9, %v18591_v13 }
0x1d3b   :  { %v9162_v25 = vadd.f32 %v9149_v6, %v19820_v29  ;;  %v9151_v43 = vpop.f32.mrb[197].mxu1  ;;  %v14270_v6 = vld [vmem:[%s19687_s6 + $0x50] sm:$0xff] }
0x1d3c   :  { %v9163_v50 = vadd.f32 %v9151_v43, %v19822_v59  ;;  %v9153_v56 = vpop.f32.mrb[198].mxu1  ;;  %9368 = vperm.xlu1 %12906, %v14270_v6   ;;  %v14271_v43 = vld [vmem:[%s19687_s6 + $0x58] sm:$0xff] }
0x1d3d   :  { %v18596_v24 = vadd.f32 %v9176_v60, %v9162_v25  ;;  %v9164_v35 = vadd.f32 %v9153_v56, %v19824_v15  ;;  %v9155_v16 = vpop.f32.mrb[199].mxu1  ;;  %9372 = vperm.xlu0 %12905, %v14271_v43  }
0x1d3e   :  { %v18601_v21 = vadd.f32 %v9176_v60, %v9163_v50  ;;  %v9165_v47 = vadd.f32 %v9155_v16, %v19826_v48 }
0x1d3f   :  { %19823 = vst [vmem:[#allocation20_spill] sm:$0xff] %v18596_v24  ;;  %v9191_v1 = vadd.f32 %v9190_v63, %v18596_v24  ;;  %v18605_v5 = vadd.f32 %v9180_v22, %v9164_v35  ;;  %v14272_v35 = vld [vmem:[%s19687_s6 + $0x60] sm:$0xff] }
0x1d40   :  { %19825 = vst [vmem:[#allocation2_spill] sm:$0xff] %v18601_v21  ;;  %v9200_v23 = vadd.f32 %v9199_v57, %v18601_v21  ;;  %v18608_v30 = vadd.f32 %v9180_v22, %v9165_v47  ;;  %9376 = vperm.xlu1 %12906, %v14272_v35   ;;  %v9264_v57 = vpop.permute.xlu1 %9263  ;;  %v14273_v22 = vld [vmem:[%s19687_s6 + $0x68] sm:$0xff] }
0x1d41   :  { %19827 = vst [vmem:[#allocation3_spill] sm:$0xff] %v18605_v5  ;;  %v9192_v36 = vadd.f32 %v9191_v1, %v18605_v5  ;;  %9380 = vperm.xlu0 %12905, %v14273_v22  }
0x1d42   :  { %19828 = vst [vmem:[#allocation4_spill] sm:$0xff] %v18608_v30  ;;  %v9201_v14 = vadd.f32 %v9200_v23, %v18608_v30  ;;  %v14274_v23 = vld [vmem:[%s19687_s6 + $0x70] sm:$0xff] }
0x1d43   :  { %v9193_v44 = vrot.slane %v9192_v36, 4 }
0x1d44   :  { %v9202_v55 = vrot.slane %v9201_v14, 4  ;;  %9384 = vperm.xlu1 %12906, %v14274_v23   ;;  %v12941_v23 = vld [vmem:[%s19691_s3 + $0x60] sm:$0xff]  }
0x1d45   :  { %v9194_v52 = vadd.f32 %v9193_v44, %v9192_v36  ;;  %v14275_v36 = vld [vmem:[%s19687_s6 + $0x78] sm:$0xff] }
0x1d46   :  { %v9203_v38 = vadd.f32 %v9202_v55, %v9201_v14  ;;  %9388 = vperm.xlu0 %12905, %v14275_v36   ;;  %v9284_v55 = vpop.permute.xlu1 %9283  ;;  %v12943_v36 = vld [vmem:[%s19691_s3 + $0x70] sm:$0xff]  }
0x1d47   :  { %v9195_v4 = vrot.slane %v9194_v52, 2 }
0x1d48   :  { %v9204_v61 = vrot.slane %v9203_v38, 2 }
0x1d49   :  { %v9196_v0 = vadd.f32 %v9195_v4, %v9194_v52 }
0x1d4a   :  { %v9205_v41 = vadd.f32 %v9204_v61, %v9203_v38  ;;  %v9288_v37 = vpop.permute.xlu1 %9287 }
0x1d4b   :  { %v9197_v8 = vrot.slane %v9196_v0, 1 }
0x1d4c   :  { %v9206_v31 = vrot.slane %v9205_v41, 1 }
0x1d4d   :  { %v9198_v49 = vadd.f32 %v9197_v8, %v9196_v0 }
0x1d4e   :  { %v9207_v42 = vadd.f32 %v9206_v31, %v9205_v41  ;;  %v9268_v3 = vpop.permute.xlu1 %9267 }
0x1d4f   :  { %v9208_v2 = vmul.f32 0.03125, %v9198_v49 }
0x1d50   :  { %v9209_v7 = vmul.f32 0.03125, %v9207_v42 }
0x1d51   :  { %v18629_v10 = vsub.f32 %v18584_v20, %v9208_v2  ;;  %v18632_v40 = vsub.f32 %v18596_v24, %v9208_v2  ;;  %v9210_v18 = vsub.f32 %v18588_v62, %v9208_v2  ;;  %v9216_v46 = vsub.f32 %v18605_v5, %v9208_v2 }
0x1d52   :  { %v18639_v34 = vsub.f32 %v18586_v9, %v9209_v7  ;;  %v18642_v19 = vsub.f32 %v18601_v21, %v9209_v7  ;;  %v9211_v45 = vsub.f32 %v18591_v13, %v9209_v7  ;;  %v9217_v54 = vsub.f32 %v18608_v30, %v9209_v7  ;;  %v9292_v28 = vpop.permute.xlu1 %9291 }
0x1d53   :  { %v9218_v58 = vmul.f32 %v9210_v18, %v9210_v18  ;;  %v9220_v11 = vmul.f32 %v18629_v10, %v18629_v10  ;;  %v9222_v17 = vmul.f32 %v18632_v40, %v18632_v40  ;;  %v9224_v59 = vmul.f32 %v9216_v46, %v9216_v46 }
0x1d54   :  { %v9219_v27 = vmul.f32 %v9211_v45, %v9211_v45  ;;  %v9221_v26 = vmul.f32 %v18639_v34, %v18639_v34  ;;  %v9223_v29 = vmul.f32 %v18642_v19, %v18642_v19  ;;  %v9225_v56 = vmul.f32 %v9217_v54, %v9217_v54 }
0x1d55   :  { %v9226_v60 = vadd.f32 %v9220_v11, %v9218_v58  ;;  %v9272_v11 = vpop.permute.xlu0 %9271 }
0x1d56   :  { %v9235_v25 = vadd.f32 %v9221_v26, %v9219_v27 }
0x1d57   :  { %v9227_v50 = vadd.f32 %v9226_v60, %v9222_v17 }
0x1d58   :  { %v9236_v63 = vadd.f32 %v9235_v25, %v9223_v29  ;;  %v9296_v25 = vpop.permute.xlu1 %9295 }
0x1d59   :  { %v9228_v15 = vadd.f32 %v9227_v50, %v9224_v59 }
0x1d5a   :  { %v9237_v16 = vadd.f32 %v9236_v63, %v9225_v56 }
0x1d5b   :  { %v9229_v48 = vrot.slane %v9228_v15, 4 }
0x1d5c   :  { %v9238_v47 = vrot.slane %v9237_v16, 4 }
0x1d5d   :  { %v9230_v1 = vadd.f32 %v9229_v48, %v9228_v15  ;;  %v12938_v48 = vld [vmem:[%s19691_s3 + $0x48] sm:$0xff]  }
0x1d5e   :  { %v9239_v12 = vadd.f32 %v9238_v47, %v9237_v16  ;;  %v12939_v47 = vld [vmem:[%s19691_s3 + $0x50] sm:$0xff]  }
0x1d5f   :  { %v9231_v14 = vrot.slane %v9230_v1, 2 }
0x1d60   :  { %v9240_v44 = vrot.slane %v9239_v12, 2 }
0x1d61   :  { %v9232_v52 = vadd.f32 %v9231_v14, %v9230_v1  ;;  %v12940_v1 = vld [vmem:[%s19691_s3 + $0x58] sm:$0xff]  }
0x1d62   :  { %v9241_v38 = vadd.f32 %v9240_v44, %v9239_v12  ;;  %v12942_v12 = vld [vmem:[%s19691_s3 + $0x68] sm:$0xff]   ;;  %v12944_v14 = vld [vmem:[%s19691_s3 + $0x78] sm:$0xff]   ;;  %v9329_v44 = vpop.permute.xlu0 %9328 }
0x1d63   :  { %v9233_v4 = vrot.slane %v9232_v52, 1 }
0x1d64   :  { %v9242_v61 = vrot.slane %v9241_v38, 1 }
0x1d65   :  { %v9234_v0 = vadd.f32 %v9233_v4, %v9232_v52  ;;  %v9333_v52 = vpop.permute.xlu1 %9332 }
0x1d66   :  { %v9243_v39 = vadd.f32 %v9242_v61, %v9241_v38 }
0x1d67   :  { %v9244_v41 = vmul.f32 0.03125, %v9234_v0 }
0x1d68   :  { %v9245_v8 = vmul.f32 0.03125, %v9243_v39 }
0x1d69   :  { %v9246_v31 = vadd.f32 1e-05, %v9244_v41 }
0x1d6a   :  { %v9247_v49 = vadd.f32 1e-05, %v9245_v8 }
0x1d6b   :  { %14112 = vrsqrt.f32 %v9246_v31 }
0x1d6c   :  { %14114 = vrsqrt.f32 %v9247_v49 }
0x1d75   :  { %v14113_v42 = vpop.eup %14112 }
0x1d76   :  { %v14115_v2 = vpop.eup %14114  ;;  %v9250_v7 = vmul.f32 %v14113_v42, %v9210_v18  ;;  %v9252_v33 = vmul.f32 %v14113_v42, %v18629_v10  ;;  %v9254_v51 = vmul.f32 %v14113_v42, %v18632_v40  ;;  %v9256_v58 = vmul.f32 %v14113_v42, %v9216_v46 }
0x1d77   :  { %v9251_v27 = vmul.f32 %v14115_v2, %v9211_v45  ;;  %v9253_v26 = vmul.f32 %v14115_v2, %v18639_v34  ;;  %v9255_v17 = vmul.f32 %v14115_v2, %v18642_v19  ;;  %v9257_v60 = vmul.f32 %v14115_v2, %v9217_v54 }
0x1d78   :  { %v9274_v6 = vmul.f32 %v9260_v32, %v9250_v7  ;;  %v9276_v29 = vmul.f32 %v9264_v57, %v9252_v33  ;;  %v9278_v10 = vmul.f32 %v9268_v3, %v9254_v51  ;;  %v9280_v15 = vmul.f32 %v9272_v11, %v9256_v58 }
0x1d79   :  { %v9275_v43 = vmul.f32 %v9260_v32, %v9251_v27  ;;  %v9277_v59 = vmul.f32 %v9264_v57, %v9253_v26  ;;  %v9279_v50 = vmul.f32 %v9268_v3, %v9255_v17  ;;  %v9281_v56 = vmul.f32 %v9272_v11, %v9257_v60  ;;  %v12937_v57 = vld [vmem:[%s19691_s3 + $0x40] sm:$0xff]   ;;  %v9337_v60 = vpop.permute.xlu1 %9336 }
0x1d7a   :  { %v9298_v18 = vadd.f32 %v9284_v55, %v9274_v6  ;;  %v9300_v63 = vadd.f32 %v9288_v37, %v9276_v29  ;;  %v9302_v22 = vadd.f32 %v9292_v28, %v9278_v10  ;;  %v9304_v19 = vadd.f32 %v9296_v25, %v9280_v15 }
0x1d7b   :  { %v9299_v40 = vadd.f32 %v9284_v55, %v9275_v43  ;;  %v9301_v46 = vadd.f32 %v9288_v37, %v9277_v59  ;;  %v9303_v35 = vadd.f32 %v9292_v28, %v9279_v50  ;;  %v9305_v45 = vadd.f32 %v9296_v25, %v9281_v56 }
0x1d7c   :  { %v9323_v34 = vpack.c.bf16 %v9300_v63, %v9298_v18  ;;  %v9325_v32 = vpack.c.bf16 %v9304_v19, %v9302_v22  ;;  %v9341_v18 = vpop.permute.xlu0 %9340 }
0x1d7d   :  { %v9324_v16 = vpack.c.bf16 %v9301_v46, %v9299_v40  ;;  %v9326_v54 = vpack.c.bf16 %v9305_v45, %v9303_v35 }
0x1d7f   :  { %9455 = vmatprep.subr.bf16.mxu1 %v9324_v16 }
0x1d80   :  { %9456 = vmatpush1.bf16.msra.mxu1 %v9323_v34 }
0x1d81   :  { %9457 = vmatprep.subr.bf16.mxu1 %v9326_v54 }
0x1d84   :  { %9458 = vmatpush1.bf16.msra.mxu1 %v9325_v32 }
0x1d87   :  { %10937 = vmatmul.mubr.msk.bf16.vlgmr.msra.gmra.mrb[200].mxu1 %vm222_vm0, %v12937_v57 }
0x1d88   :  { %9497 = vmatprep.mubr.bf16.mxu1 %v19811_v53 }
0x1d8f   :  { %10938 = vmatmul.mubr.msk.bf16.gmra.mrb[204].mxu1 %vm222_vm0, %v12938_v48 }
0x1d90   :  { %9507 = vmatprep.mubr.bf16.mxu1 %v19811_v53 }
0x1d97   :  { %10939 = vmatmul.mubr.msk.bf16.gmra.mrb[208].mxu1 %vm222_vm0, %v12939_v47 }
0x1d98   :  { %9517 = vmatprep.mubr.bf16.mxu1 %v19811_v53 }
0x1d9f   :  { %10940 = vmatmul.mubr.msk.bf16.gmra.mrb[212].mxu1 %vm222_vm0, %v12940_v1 }
0x1da0   :  { %9527 = vmatprep.mubr.bf16.mxu1 %v19811_v53 }
0x1da7   :  { %10941 = vmatmul.mubr.msk.bf16.gmra.mrb[216].mxu1 %vm222_vm0, %v12941_v23 }
0x1da8   :  { %9537 = vmatprep.mubr.bf16.mxu1 %v19811_v53 }
0x1daf   :  { %10942 = vmatmul.mubr.msk.bf16.gmra.mrb[220].mxu1 %vm222_vm0, %v12942_v12 }
0x1db0   :  { %9547 = vmatprep.mubr.bf16.mxu1 %v19811_v53 }
0x1db7   :  { %10943 = vmatmul.mubr.msk.bf16.gmra.mrb[224].mxu1 %vm222_vm0, %v12943_v36 }
0x1db8   :  { %9557 = vmatprep.mubr.bf16.mxu1 %v19811_v53 }
0x1dbf   :  { %10944 = vmatmul.mubr.msk.bf16.gmra.mrb[228].mxu1 %vm222_vm0, %v12944_v14 }
0x1dc0   :  { %10572 = vmatprep.mubr.bf16.mxu1 %v19811_v53 }
0x1e5a   :  { %v9489_v55 = vpop.f32.mrb[200].mxu1 }
0x1e5b   :  { %v18720_v38 = vadd.f32 %v9489_v55, %v9329_v44  ;;  %v9491_v4 = vpop.f32.mrb[201].mxu1 }
0x1e5c   :  { %v18722_v61 = vadd.f32 %v9491_v4, %v9329_v44  ;;  %v9493_v0 = vpop.f32.mrb[202].mxu1 }
0x1e5d   :  { %v18725_v39 = vmul.f32 0.70710677, %v18720_v38  ;;  %v18727_v37 = vadd.f32 %v9493_v0, %v9333_v52  ;;  %v9495_v41 = vpop.f32.mrb[203].mxu1 }
0x1e5e   :  { %v18730_v8 = vmul.f32 0.70710677, %v18722_v61  ;;  %v18732_v31 = vadd.f32 %v9495_v41, %v9333_v52 }
0x1e5f   :  { %v9632_v49 = vand.u32 2147483647, %v18725_v39  ;;  %v18736_v3 = vmul.f32 0.70710677, %v18727_v37  ;;  %vm10240_vm1 = vcmp.ge.f32.partialorder %v18725_v39, 0.0 }
0x1e60   :  { %v18739_v28 = vand.u32 2147483647, %v18730_v8  ;;  %v18742_v42 = vmul.f32 0.70710677, %v18732_v31  ;;  %vm10241_vm10 = vcmp.ge.f32.partialorder %v18730_v8, 0.0 }
0x1e61   :  { %v9664_v2 = vmul.f32 0.3275911, %v9632_v49  ;;  %v9634_v7 = vand.u32 2147483647, %v18736_v3  ;;  %v10048_v45 = vsub.f32 0.0, %v9632_v49  ;;  %vm10242_vm3 = vcmp.ge.f32.partialorder %v18736_v3, 0.0 }
0x1e62   :  { %v9665_v33 = vmul.f32 0.3275911, %v18739_v28  ;;  %v18747_v51 = vand.u32 2147483647, %v18742_v42  ;;  %v9499_v27 = vpop.f32.mrb[204].mxu1  ;;  %vm10243_vm11 = vcmp.ge.f32.partialorder %v18742_v42, 0.0 }
0x1e63   :  { %v9696_v58 = vadd.f32 1.0, %v9664_v2  ;;  %v9666_v11 = vmul.f32 0.3275911, %v9634_v7  ;;  %v9501_v6 = vpop.f32.mrb[205].mxu1  ;;  %v18750_v50 = vadd.f32 %v9499_v27, %v9337_v60  ;;  %v10080_v23 = vmul.f32 %v10048_v45, %v9632_v49 }
0x1e64   :  { %v9697_v26 = vadd.f32 1.0, %v9665_v33  ;;  %v9667_v17 = vmul.f32 0.3275911, %v18747_v51  ;;  %v9503_v25 = vpop.f32.mrb[206].mxu1  ;;  %v18752_v56 = vadd.f32 %v9501_v6, %v9337_v60  ;;  %v10050_v12 = vsub.f32 0.0, %v9634_v7 }
0x1e65   :  { %14116 = vrcp.f32 %v9696_v58  ;;  %v9698_v29 = vadd.f32 1.0, %v9666_v11  ;;  %v9505_v43 = vpop.f32.mrb[207].mxu1  ;;  %v18754_v63 = vadd.f32 %v9503_v25, %v9341_v18  ;;  %v18757_v10 = vmul.f32 0.70710677, %v18750_v50  ;;  %v18806_v25 = vpop.permute.xlu1 %9344 }
0x1e66   :  { %14118 = vrcp.f32 %v9697_v26  ;;  %v9699_v59 = vadd.f32 1.0, %v9667_v17  ;;  %v18759_v15 = vadd.f32 %v9505_v43, %v9341_v18  ;;  %v18762_v40 = vmul.f32 0.70710677, %v18752_v56 }
0x1e67   :  { %14120 = vrcp.f32 %v9698_v29  ;;  %v18765_v46 = vmul.f32 0.70710677, %v18754_v63  ;;  %v18768_v16 = vand.u32 2147483647, %v18757_v10  ;;  %v10049_v33 = vsub.f32 0.0, %v18739_v28 }
0x1e68   :  { %14122 = vrcp.f32 %v9699_v59  ;;  %v18773_v22 = vand.u32 2147483647, %v18762_v40  ;;  %v18782_v57 = vmul.f32 0.70710677, %v18759_v15  ;;  %v10112_v11 = vmul.f32 1.442695, %v10080_v23 }
0x1e69   :  { %v18776_v19 = vand.u32 2147483647, %v18765_v46  ;;  %v9668_v32 = vmul.f32 0.3275911, %v18768_v16  ;;  %v10082_v26 = vmul.f32 %v10050_v12, %v9634_v7  ;;  %v10051_v17 = vsub.f32 0.0, %v18747_v51 }
0x1e6a   :  { %v9509_v35 = vpop.f32.mrb[208].mxu1  ;;  %v9669_v48 = vmul.f32 0.3275911, %v18773_v22  ;;  %v18789_v14 = vand.u32 2147483647, %v18782_v57  ;;  %vm10244_vm12 = vcmp.ge.f32.partialorder %v18757_v10, 0.0 }
0x1e6b   :  { %v18770_v34 = vpop.f32.mrb[209].mxu1  ;;  %v9670_v47 = vmul.f32 0.3275911, %v18776_v19  ;;  %v9700_v36 = vadd.f32 1.0, %v9668_v32  ;;  %v18814_v7 = vadd.f32 %v9509_v35, %v18806_v25  ;;  %vm10245_vm13 = vcmp.ge.f32.partialorder %v18762_v40, 0.0 }
0x1e6c   :  { %v18778_v54 = vpop.f32.mrb[210].mxu1  ;;  %v9701_v4 = vadd.f32 1.0, %v9669_v48  ;;  %v9671_v49 = vmul.f32 0.3275911, %v18789_v14  ;;  %vm10246_vm14 = vcmp.ge.f32.partialorder %v18765_v46, 0.0  ;;  %vm10247_vm4 = vcmp.ge.f32.partialorder %v18782_v57, 0.0 }
0x1e6d   :  { %v18791_v44 = vpop.f32.mrb[211].mxu1  ;;  %14124 = vrcp.f32 %v9700_v36  ;;  %v9702_v41 = vadd.f32 1.0, %v9670_v47  ;;  %v10081_v47 = vmul.f32 %v10049_v33, %v18739_v28 }
0x1e6e   :  { %14126 = vrcp.f32 %v9701_v4  ;;  %v9703_v45 = vadd.f32 1.0, %v9671_v49  ;;  %v10083_v4 = vmul.f32 %v10051_v17, %v18747_v51  ;;  %v18826_v49 = vmul.f32 0.70710677, %v18814_v7 }
0x1e6f   :  { %v18786_v1 = vpop.eup %14116  ;;  %14128 = vrcp.f32 %v9702_v41  ;;  %v10114_v17 = vmul.f32 1.442695, %v10081_v47 }
0x1e70   :  { %v18793_v55 = vpop.eup %14118  ;;  %v9760_v52 = vmul.f32 1.0614054, %v18786_v1  ;;  %14130 = vpow2.f32 %v10112_v11  ;;  %v18830_v11 = vand.u32 2147483647, %v18826_v49  ;;  %vm10248_vm15 = vcmp.ge.f32.partialorder %v18826_v49, 0.0 }
0x1e71   :  { %v9761_v0 = vmul.f32 1.0614054, %v18793_v55  ;;  %v18799_v58 = vpop.eup %14120  ;;  %14132 = vrcp.f32 %v9703_v45 }
0x1e72   :  { %v9792_v2 = vadd.f32 -1.4531521, %v9760_v52  ;;  %v18802_v60 = vpop.f32.mrb[212].mxu1  ;;  %v9762_v29 = vmul.f32 1.0614054, %v18799_v58  ;;  %v18810_v59 = vpop.eup %14122 }
0x1e73   :  { %v9793_v27 = vadd.f32 -1.4531521, %v9761_v0  ;;  %v18808_v43 = vpop.f32.mrb[213].mxu1  ;;  %v9763_v12 = vmul.f32 1.0614054, %v18810_v59 }
0x1e74   :  { %v9824_v6 = vmul.f32 %v18786_v1, %v9792_v2  ;;  %v18816_v32 = vpop.f32.mrb[214].mxu1  ;;  %v9794_v23 = vadd.f32 -1.4531521, %v9762_v29  ;;  %v10116_v52 = vmul.f32 1.442695, %v10082_v26 }
0x1e75   :  { %v9825_v18 = vmul.f32 %v18793_v55, %v9793_v27  ;;  %v18821_v0 = vpop.f32.mrb[215].mxu1  ;;  %v9795_v2 = vadd.f32 -1.4531521, %v9763_v12 }
0x1e76   :  { %v9856_v48 = vadd.f32 1.4214138, %v9824_v6  ;;  %v9826_v35 = vmul.f32 %v18799_v58, %v9794_v23  ;;  %14134 = vpow2.f32 %v10116_v52  ;;  %v10118_v6 = vmul.f32 1.442695, %v10083_v4 }
0x1e77   :  { %v9857_v36 = vadd.f32 1.4214138, %v9825_v18  ;;  %v9827_v27 = vmul.f32 %v18810_v59, %v9795_v2  ;;  %v18832_v26 = vpop.eup %14124 }
0x1e78   :  { %v9888_v41 = vmul.f32 %v18786_v1, %v9856_v48  ;;  %v9858_v33 = vadd.f32 1.4214138, %v9826_v35  ;;  %v18835_v29 = vpop.eup %14126  ;;  %v9764_v23 = vmul.f32 1.0614054, %v18832_v26  ;;  %v9672_v35 = vmul.f32 0.3275911, %v18830_v11 }
0x1e79   :  { %v9889_v51 = vmul.f32 %v18793_v55, %v9857_v36  ;;  %v9859_v48 = vadd.f32 1.4214138, %v9827_v27  ;;  %v18847_v30 = vpop.eup %14128  ;;  %v10053_v27 = vsub.f32 0.0, %v18773_v22 }
0x1e7a   :  { %v9920_v28 = vadd.f32 -0.28449672, %v9888_v41  ;;  %v9890_v45 = vmul.f32 %v18799_v58, %v9858_v33  ;;  %v18840_v12 = vpop.f32.mrb[216].mxu1  ;;  %v9765_v41 = vmul.f32 1.0614054, %v18835_v29  ;;  %v9704_v5 = vadd.f32 1.0, %v9672_v35 }
0x1e7b   :  { %v18844_v2 = vpop.f32.mrb[217].mxu1  ;;  %v9891_v52 = vmul.f32 %v18810_v59, %v9859_v48  ;;  %v9796_v4 = vadd.f32 -1.4531521, %v9764_v23  ;;  %v9921_v9 = vadd.f32 -0.28449672, %v9889_v51  ;;  %v14131_v48 = vpop.eup %14130 }
0x1e7c   :  { %v9952_v18 = vmul.f32 %v18786_v1, %v9920_v28  ;;  %v9922_v36 = vadd.f32 -0.28449672, %v9890_v45  ;;  %v10052_v28 = vsub.f32 0.0, %v18768_v16  ;;  %v9797_v33 = vadd.f32 -1.4531521, %v9765_v41  ;;  %v18851_v21 = vpop.f32.mrb[218].mxu1 }
0x1e7d   :  { %19829 = vst [vmem:[#allocation6_spill] sm:$0xff] %v18851_v21  ;;  %v18856_v45 = vpop.f32.mrb[219].mxu1  ;;  %v9923_v23 = vadd.f32 -0.28449672, %v9891_v52  ;;  %v9766_v41 = vmul.f32 1.0614054, %v18847_v30  ;;  %14136 = vrcp.f32 %v9704_v5  ;;  %v9953_v52 = vmul.f32 %v18793_v55, %v9921_v9 }
0x1e7e   :  { %v9984_v47 = vadd.f32 0.2548296, %v9952_v18  ;;  %v9954_v20 = vmul.f32 %v18799_v58, %v9922_v36  ;;  %v9828_v18 = vmul.f32 %v18832_v26, %v9796_v4  ;;  %19830 = vst [vmem:[#allocation7_spill] sm:$0xff] %v18856_v45  ;;  %v9829_v13 = vmul.f32 %v18835_v29, %v9797_v33 }
0x1e7f   :  { %14138 = vpow2.f32 %v10114_v17  ;;  %v10084_v51 = vmul.f32 %v10052_v28, %v18768_v16  ;;  %v9798_v36 = vadd.f32 -1.4531521, %v9766_v41  ;;  %v10085_v17 = vmul.f32 %v10053_v27, %v18773_v22 }
0x1e80   :  { %v10016_v24 = vmul.f32 %v18786_v1, %v9984_v47  ;;  %v9986_v35 = vadd.f32 0.2548296, %v9954_v20  ;;  %v9860_v53 = vadd.f32 1.4214138, %v9828_v18  ;;  %v18862_v1 = vpop.eup %14132  ;;  %v9861_v47 = vadd.f32 1.4214138, %v9829_v13 }
0x1e81   :  { %v14135_v20 = vpop.eup %14134  ;;  %14140 = vpow2.f32 %v10118_v6  ;;  %v9830_v9 = vmul.f32 %v18847_v30, %v9798_v36  ;;  %v9985_v6 = vadd.f32 0.2548296, %v9953_v52  ;;  %v9568_v22 = vmul.f32 0.5, %v18720_v38 }
0x1e82   :  { %v10176_v62 = vmul.f32 %v14131_v48, %v10016_v24  ;;  %v18860_v21 = vpop.f32.mrb[220].mxu1  ;;  %v10018_v33 = vmul.f32 %v18799_v58, %v9986_v35  ;;  %v9892_v45 = vmul.f32 %v18832_v26, %v9860_v53  ;;  %v9955_v24 = vmul.f32 %v18810_v59, %v9923_v23 }
0x1e83   :  { %v18868_v5 = vpop.f32.mrb[221].mxu1  ;;  %v9893_v18 = vmul.f32 %v18835_v29, %v9861_v47  ;;  %v10120_v53 = vmul.f32 1.442695, %v10084_v51  ;;  %v9767_v48 = vmul.f32 1.0614054, %v18862_v1  ;;  %v10054_v38 = vsub.f32 0.0, %v18776_v19 }
0x1e84   :  { %v10208_v4 = vsub.f32 1.0, %v10176_v62  ;;  %v18873_v16 = vpop.f32.mrb[222].mxu1  ;;  %v10178_v62 = vmul.f32 %v14135_v20, %v10018_v33  ;;  %v9924_v28 = vadd.f32 -0.28449672, %v9892_v45  ;;  %v9987_v27 = vadd.f32 0.2548296, %v9955_v24 }
0x1e85   :  { %v18876_v58 = vpop.f32.mrb[223].mxu1  ;;  %v9925_v35 = vadd.f32 -0.28449672, %v9893_v18  ;;  %v10122_v47 = vmul.f32 1.442695, %v10085_v17  ;;  %v18883_v45 = vadd.f32 %v18770_v34, %v18806_v25  ;;  %14142 = vpow2.f32 %v10120_v53 }
0x1e86   :  { %v10272_v13 = vsub.f32 0.0, %v10208_v4  ;;  %v10210_v41 = vsub.f32 1.0, %v10178_v62  ;;  %v9956_v39 = vmul.f32 %v18832_v26, %v9924_v28  ;;  %v9862_v51 = vadd.f32 1.4214138, %v9830_v9 }
0x1e87   :  { %v9799_v20 = vadd.f32 -1.4531521, %v9767_v48  ;;  %v10017_v24 = vmul.f32 %v18793_v55, %v9985_v6  ;;  %v9570_v34 = vmul.f32 0.5, %v18727_v37  ;;  %v9957_v3 = vmul.f32 %v18835_v29, %v9925_v35 }
0x1e88   :  { %v10304_v23 = vsel %vm10240_vm1, %v10208_v4, %v10272_v13  ;;  %v10274_v36 = vsub.f32 0.0, %v10210_v41  ;;  %v18889_v4 = vpop.eup %14136  ;;  %v10019_v62 = vmul.f32 %v18810_v59, %v9987_v27  ;;  %14144 = vpow2.f32 %v10122_v47 }
0x1e89   :  { %v10336_v52 = vadd.f32 1.0, %v10304_v23  ;;  %v14139_v17 = vpop.eup %14138  ;;  %v18899_v28 = vmul.f32 0.70710677, %v18883_v45  ;;  %v9988_v53 = vadd.f32 0.2548296, %v9956_v39  ;;  %v9894_v55 = vmul.f32 %v18847_v30, %v9862_v51 }
0x1e8a   :  { %v18887_v33 = vpop.f32.mrb[224].mxu1  ;;  %v10306_v25 = vsel %vm10242_vm3, %v10210_v41, %v10274_v36  ;;  %v9768_v37 = vmul.f32 1.0614054, %v18889_v4  ;;  %v10086_v59 = vmul.f32 %v10054_v38, %v18776_v19  ;;  %v9831_v35 = vmul.f32 %v18862_v1, %v9799_v20 }
0x1e8b   :  { %v18895_v18 = vpop.f32.mrb[225].mxu1  ;;  %v10338_v13 = vadd.f32 1.0, %v10306_v25  ;;  %v14141_v23 = vpop.eup %14140  ;;  %v18907_v6 = vmul.f32 %v10336_v52, %v9568_v22  ;;  %v10177_v27 = vmul.f32 %v14139_v17, %v10017_v24  ;;  %v9989_v47 = vadd.f32 0.2548296, %v9957_v3 }
0x1e8c   :  { %v18901_v9 = vpop.f32.mrb[226].mxu1  ;;  %v9800_v36 = vadd.f32 -1.4531521, %v9768_v37  ;;  %v18914_v39 = vmul.f32 0.5, %v18722_v61  ;;  %v10179_v25 = vmul.f32 %v14141_v23, %v10019_v62  ;;  %v9926_v22 = vadd.f32 -0.28449672, %v9894_v55  ;;  %v9349_v52 = vpop.permute.xlu0 %9348 }
0x1e8d   :  { %v18905_v48 = vpop.f32.mrb[227].mxu1  ;;  %19832 = vst [vmem:[#allocation9_spill] sm:$0xff] %v18907_v6  ;;  %v18909_v41 = vmul.f32 %v10338_v13, %v9570_v34  ;;  %v18921_v19 = vand.u32 2147483647, %v18899_v28  ;;  %v18927_v61 = vmul.f32 0.5, %v18732_v31  ;;  %v18930_v3 = vadd.f32 %v18778_v54, %v9349_v52 }
0x1e8e   :  { %19831 = vst [vmem:[#allocation8_spill] sm:$0xff] %v18905_v48  ;;  %v10020_v48 = vmul.f32 %v18832_v26, %v9988_v53  ;;  %v9832_v34 = vmul.f32 %v18889_v4, %v9800_v36  ;;  %v10124_v20 = vmul.f32 1.442695, %v10086_v59  ;;  %v9863_v24 = vadd.f32 1.4214138, %v9831_v35 }
0x1e8f   :  { %19833 = vst [vmem:[#allocation10_spill] sm:$0xff] %v18909_v41  ;;  %v10209_v17 = vsub.f32 1.0, %v10177_v27  ;;  %v10021_v13 = vmul.f32 %v18835_v29, %v9989_v47  ;;  %v10055_v62 = vsub.f32 0.0, %v18789_v14  ;;  %v9673_v53 = vmul.f32 0.3275911, %v18921_v19  ;;  %v14143_v55 = vpop.eup %14142 }
0x1e90   :  { %v10211_v37 = vsub.f32 1.0, %v10179_v25  ;;  %v18939_v31 = vmul.f32 0.5, %v18750_v50  ;;  %v9864_v23 = vadd.f32 1.4214138, %v9832_v34  ;;  %v10180_v54 = vmul.f32 %v14143_v55, %v10020_v48 }
0x1e91   :  { %v9958_v35 = vmul.f32 %v18847_v30, %v9926_v22  ;;  %v10056_v27 = vsub.f32 0.0, %v18830_v11  ;;  %v9705_v29 = vadd.f32 1.0, %v9673_v53  ;;  %v18948_v51 = vmul.f32 0.5, %v18752_v56 }
0x1e92   :  { %v18923_v38 = vpop.f32.mrb[228].mxu1  ;;  %v14145_v36 = vpop.eup %14144  ;;  %14146 = vpow2.f32 %v10124_v20  ;;  %v9895_v25 = vmul.f32 %v18862_v1, %v9863_v24  ;;  %v18952_v50 = vmul.f32 0.70710677, %v18930_v3  ;;  %v10273_v34 = vsub.f32 0.0, %v10209_v17 }
0x1e93   :  { %19834 = vst [vmem:[#allocation5_spill] sm:$0xff] %v18923_v38  ;;  %v18932_v26 = vpop.f32.mrb[229].mxu1  ;;  %v10087_v48 = vmul.f32 %v10055_v62, %v18789_v14  ;;  %14148 = vrcp.f32 %v9705_v29  ;;  %v10275_v22 = vsub.f32 0.0, %v10211_v37  ;;  %v18956_v53 = vmul.f32 0.5, %v18754_v63 }
0x1e94   :  { %19835 = vst [vmem:[#allocation15_spill] sm:$0xff] %v18932_v26  ;;  %v18941_v59 = vpop.f32.mrb[230].mxu1  ;;  %v9896_v55 = vmul.f32 %v18889_v4, %v9864_v23  ;;  %v18960_v56 = vand.u32 2147483647, %v18952_v50  ;;  %v10212_v20 = vsub.f32 1.0, %v10180_v54  ;;  %v9353_v26 = vpop.permute.xlu1 %9352  ;;  %v18968_v14 = vmul.f32 0.5, %v18759_v15 }
0x1e95   :  { %19836 = vst [vmem:[#allocation11_spill] sm:$0xff] %v18941_v59  ;;  %v18945_v47 = vpop.f32.mrb[231].mxu1  ;;  %v10181_v59 = vmul.f32 %v14145_v36, %v10021_v13  ;;  %v9990_v24 = vadd.f32 0.2548296, %v9958_v35  ;;  %v18965_v13 = vadd.f32 %v18791_v44, %v9349_v52  ;;  %v9927_v63 = vadd.f32 -0.28449672, %v9895_v25 }
0x1e96   :  { %19837 = vst [vmem:[#allocation12_spill] sm:$0xff] %v18945_v47  ;;  %v10088_v47 = vmul.f32 %v10056_v27, %v18830_v11  ;;  %v9674_v62 = vmul.f32 0.3275911, %v18960_v56  ;;  %v18972_v23 = vadd.f32 %v18802_v60, %v9353_v26  ;;  %v10305_v54 = vsel %vm10241_vm10, %v10209_v17, %v10273_v34 }
0x1e97   :  { %v10213_v29 = vsub.f32 1.0, %v10181_v59  ;;  %v10126_v11 = vmul.f32 1.442695, %v10087_v48  ;;  %v10307_v44 = vsel %vm10243_vm11, %v10211_v37, %v10275_v22  ;;  %v9928_v52 = vadd.f32 -0.28449672, %v9896_v55 }
0x1e98   :  { %v9706_v35 = vadd.f32 1.0, %v9674_v62  ;;  %v18980_v15 = vmul.f32 0.70710677, %v18965_v13  ;;  %v10276_v27 = vsub.f32 0.0, %v10212_v20  ;;  %v10022_v36 = vmul.f32 %v18847_v30, %v9990_v24 }
0x1e99   :  { %v10128_v60 = vmul.f32 1.442695, %v10088_v47  ;;  %v18984_v25 = vmul.f32 0.70710677, %v18972_v23  ;;  %v9959_v8 = vmul.f32 %v18862_v1, %v9927_v63  ;;  %v18991_v42 = vadd.f32 %v18808_v43, %v9353_v26 }
0x1e9a   :  { %14150 = vrcp.f32 %v9706_v35  ;;  %v18988_v17 = vand.u32 2147483647, %v18980_v15  ;;  %v10277_v37 = vsub.f32 0.0, %v10213_v29  ;;  %v18994_v59 = vmul.f32 0.5, %v18814_v7 }
0x1e9b   :  { %14152 = vpow2.f32 %v10126_v11  ;;  %v18997_v30 = vand.u32 2147483647, %v18984_v25  ;;  %v10337_v34 = vadd.f32 1.0, %v10305_v54  ;;  %v9960_v48 = vmul.f32 %v18889_v4, %v9928_v52  ;;  %v9357_v54 = vpop.permute.xlu0 %9356 }
0x1e9c   :  { %v14147_v47 = vpop.eup %14146  ;;  %v19001_v22 = vmul.f32 0.5, %v18883_v45  ;;  %v9675_v55 = vmul.f32 0.3275911, %v18988_v17  ;;  %v10339_v43 = vadd.f32 1.0, %v10307_v44  ;;  %14154 = vpow2.f32 %v10128_v60 }
0x1e9d   :  { %v19004_v24 = vpop.eup %14148  ;;  %v10182_v26 = vmul.f32 %v14147_v47, %v10022_v36  ;;  %v9676_v7 = vmul.f32 0.3275911, %v18997_v30  ;;  %v10308_v63 = vsel %vm10244_vm12, %v10212_v20, %v10276_v27  ;;  %v9991_v62 = vadd.f32 0.2548296, %v9959_v8 }
0x1e9e   :  { %v9707_v11 = vadd.f32 1.0, %v9675_v55  ;;  %v19010_v52 = vmul.f32 0.70710677, %v18991_v42  ;;  %v10309_v45 = vsel %vm10245_vm13, %v10213_v29, %v10277_v37  ;;  %v10058_v35 = vsub.f32 0.0, %v18960_v56 }
0x1e9f   :  { %v9708_v6 = vadd.f32 1.0, %v9676_v7  ;;  %v19016_v44 = vadd.f32 %v18816_v32, %v9357_v54  ;;  %v9992_v36 = vadd.f32 0.2548296, %v9960_v48  ;;  %v9769_v10 = vmul.f32 1.0614054, %v19004_v24 }
0x1ea0   :  { %14156 = vrcp.f32 %v9707_v11  ;;  %v19021_v20 = vand.u32 2147483647, %v19010_v52  ;;  %v19024_v27 = vmul.f32 %v10337_v34, %v18914_v39  ;;  %v10340_v40 = vadd.f32 1.0, %v10308_v63  ;;  %v19053_v11 = vpop.permute.xlu1 %9360 }
0x1ea1   :  { %v10214_v29 = vsub.f32 1.0, %v10182_v26  ;;  %14158 = vrcp.f32 %v9708_v6  ;;  %v19027_v60 = vmul.f32 %v10339_v43, %v18927_v61  ;;  %v10057_v32 = vsub.f32 0.0, %v18921_v19 }
0x1ea2   :  { %19838 = vst [vmem:[#allocation24_spill] sm:$0xff] %v19024_v27  ;;  %v19031_v8 = vmul.f32 0.5, %v18930_v3  ;;  %v9677_v37 = vmul.f32 0.3275911, %v19021_v20  ;;  %v10341_v47 = vadd.f32 1.0, %v10309_v45  ;;  %v10023_v48 = vmul.f32 %v18862_v1, %v9991_v62 }
0x1ea3   :  { %19839 = vst [vmem:[#allocation13_spill] sm:$0xff] %v19027_v60  ;;  %v10090_v55 = vmul.f32 %v10058_v35, %v18960_v56  ;;  %v19037_v39 = vmul.f32 0.70710677, %v19016_v44  ;;  %v10024_v6 = vmul.f32 %v18889_v4, %v9992_v36  ;;  %v9801_v61 = vadd.f32 -1.4531521, %v9769_v10 }
0x1ea4   :  { %v19039_v34 = vpop.eup %14150  ;;  %v9709_v43 = vadd.f32 1.0, %v9677_v37  ;;  %v19043_v26 = vadd.f32 %v18821_v0, %v9357_v54  ;;  %v19046_v7 = vmul.f32 %v10340_v40, %v18939_v31  ;;  %v10278_v63 = vsub.f32 0.0, %v10214_v29 }
0x1ea5   :  { %v14153_v3 = vpop.eup %14152  ;;  %v9770_v1 = vmul.f32 1.0614054, %v19039_v34  ;;  %v19050_v56 = vand.u32 2147483647, %v19037_v39  ;;  %v10089_v62 = vmul.f32 %v10057_v32, %v18921_v19  ;;  %v10060_v4 = vsub.f32 0.0, %v18997_v30 }
0x1ea6   :  { %19840 = vst [vmem:[#allocation16_spill] sm:$0xff] %v19046_v7  ;;  %14160 = vrcp.f32 %v9709_v43  ;;  %v19057_v0 = vmul.f32 0.70710677, %v19043_v26  ;;  %v14155_v54 = vpop.eup %14154  ;;  %v19060_v31 = vmul.f32 %v10341_v47, %v18948_v51  ;;  %v19065_v36 = vadd.f32 %v18840_v12, %v19053_v11 }
0x1ea7   :  { %v9802_v45 = vadd.f32 -1.4531521, %v9770_v1  ;;  %v9678_v35 = vmul.f32 0.3275911, %v19050_v56  ;;  %v10184_v19 = vmul.f32 %v14155_v54, %v10024_v6  ;;  %v9833_v10 = vmul.f32 %v19004_v24, %v9801_v61 }
0x1ea8   :  { %19841 = vst [vmem:[#allocation22_spill] sm:$0xff] %v19060_v31  ;;  %v10132_v40 = vmul.f32 1.442695, %v10090_v55  ;;  %v19069_v32 = vand.u32 2147483647, %v19057_v0  ;;  %v10310_v37 = vsel %vm10246_vm14, %v10214_v29, %v10278_v63  ;;  %v19073_v43 = vmul.f32 %v14153_v3, %v10023_v48 }
0x1ea9   :  { %v9834_v51 = vmul.f32 %v19039_v34, %v9802_v45  ;;  %v9710_v47 = vadd.f32 1.0, %v9678_v35  ;;  %v10130_v7 = vmul.f32 1.442695, %v10089_v62  ;;  %v10059_v12 = vsub.f32 0.0, %v18988_v17 }
0x1eaa   :  { %v19076_v1 = vpop.eup %14156  ;;  %v10092_v6 = vmul.f32 %v10060_v4, %v18997_v30  ;;  %v9679_v55 = vmul.f32 0.3275911, %v19069_v32  ;;  %v19086_v48 = vmul.f32 0.70710677, %v19065_v36  ;;  %v10216_v3 = vsub.f32 1.0, %v10184_v19 }
0x1eab   :  { %v19081_v61 = vpop.eup %14158  ;;  %v9866_v46 = vadd.f32 1.4214138, %v9834_v51  ;;  %v9771_v29 = vmul.f32 1.0614054, %v19076_v1  ;;  %14162 = vrcp.f32 %v9710_v47  ;;  %v9865_v63 = vadd.f32 1.4214138, %v9833_v10 }
0x1eac   :  { %14164 = vpow2.f32 %v10132_v40  ;;  %v9772_v62 = vmul.f32 1.0614054, %v19081_v61  ;;  %v9711_v54 = vadd.f32 1.0, %v9679_v55  ;;  %v19091_v45 = vand.u32 2147483647, %v19086_v48 }
0x1ead   :  { %v9898_v30 = vmul.f32 %v19039_v34, %v9866_v46  ;;  %v9803_v4 = vadd.f32 -1.4531521, %v9771_v29  ;;  %v19093_v35 = vadd.f32 1.0, %v10310_v37  ;;  %v10091_v51 = vmul.f32 %v10059_v12, %v18988_v17 }
0x1eae   :  { %v9804_v47 = vadd.f32 -1.4531521, %v9772_v62  ;;  %v10136_v31 = vmul.f32 1.442695, %v10092_v6  ;;  %14166 = vrcp.f32 %v9711_v54  ;;  %v9680_v10 = vmul.f32 0.3275911, %v19091_v45 }
0x1eaf   :  { %v9930_v41 = vadd.f32 -0.28449672, %v9898_v30  ;;  %v9835_v19 = vmul.f32 %v19076_v1, %v9803_v4  ;;  %v10280_v46 = vsub.f32 0.0, %v10216_v3  ;;  %v9897_v55 = vmul.f32 %v19004_v24, %v9865_v63 }
0x1eb0   :  { %v19098_v40 = vpop.eup %14160  ;;  %v9836_v29 = vmul.f32 %v19081_v61, %v9804_v47  ;;  %v10062_v37 = vsub.f32 0.0, %v19050_v56  ;;  %v9712_v6 = vadd.f32 1.0, %v9680_v10  ;;  %v19738_v62 = vsub.f32 1.0, %v19073_v43 }
0x1eb1   :  { %v9962_v60 = vmul.f32 %v19039_v34, %v9930_v41  ;;  %v9867_v17 = vadd.f32 1.4214138, %v9835_v19  ;;  %v9773_v12 = vmul.f32 1.0614054, %v19098_v40  ;;  %v10134_v30 = vmul.f32 1.442695, %v10091_v51 }
0x1eb2   :  { %v9868_v4 = vadd.f32 1.4214138, %v9836_v29  ;;  %14168 = vpow2.f32 %v10136_v31  ;;  %v10312_v63 = vsel %vm10248_vm15, %v10216_v3, %v10280_v46  ;;  %v9929_v47 = vadd.f32 -0.28449672, %v9897_v55 }
0x1eb3   :  { %v9994_v54 = vadd.f32 0.2548296, %v9962_v60  ;;  %v9899_v27 = vmul.f32 %v19076_v1, %v9867_v17  ;;  %v9805_v38 = vadd.f32 -1.4531521, %v9773_v12  ;;  %14170 = vrcp.f32 %v9712_v6 }
0x1eb4   :  { %vm10250_vm2 = vcmp.ge.f32.partialorder %v18952_v50, 0.0  ;;  %v9900_v41 = vmul.f32 %v19081_v61, %v9868_v4  ;;  %v19113_v19 = vadd.f32 %v18844_v2, %v19053_v11  ;;  %v10094_v29 = vmul.f32 %v10062_v37, %v19050_v56 }
0x1eb5   :  { %v19115_v51 = vpop.eup %14162  ;;  %v10026_v60 = vmul.f32 %v19039_v34, %v9994_v54  ;;  %v9931_v31 = vadd.f32 -0.28449672, %v9899_v27  ;;  %v9837_v10 = vmul.f32 %v19098_v40, %v9805_v38  ;;  %v19122_v3 = vsub.f32 0.0, %v19738_v62 }
0x1eb6   :  { %v14165_v49 = vpop.eup %14164  ;;  %14172 = vpow2.f32 %v10130_v7  ;;  %v9932_v46 = vadd.f32 -0.28449672, %v9900_v41  ;;  %v9774_v55 = vmul.f32 1.0614054, %v19115_v51  ;;  %v10344_v2 = vadd.f32 1.0, %v10312_v63 }
0x1eb7   :  { %v10186_v11 = vmul.f32 %v14165_v49, %v10026_v60  ;;  %v9869_v17 = vadd.f32 1.4214138, %v9837_v10  ;;  %v10061_v12 = vsub.f32 0.0, %v19021_v20  ;;  %14174 = vpow2.f32 %v10134_v30 }
0x1eb8   :  { %v9964_v27 = vmul.f32 %v19081_v61, %v9932_v46  ;;  %v9806_v38 = vadd.f32 -1.4531521, %v9774_v55  ;;  %v19128_v34 = vmul.f32 0.70710677, %v19113_v19  ;;  %v19130_v56 = vpop.eup %14166  ;;  %v9961_v37 = vmul.f32 %v19004_v24, %v9929_v47 }
0x1eb9   :  { %v10218_v7 = vsub.f32 1.0, %v10186_v11  ;;  %v9963_v6 = vmul.f32 %v19076_v1, %v9931_v31  ;;  %v10140_v4 = vmul.f32 1.442695, %v10094_v29  ;;  %v9775_v41 = vmul.f32 1.0614054, %v19130_v56 }
0x1eba   :  { %19842 = vst [vmem:[#allocation23_spill] sm:$0xff] %v19128_v34  ;;  %v9996_v54 = vadd.f32 0.2548296, %v9964_v27  ;;  %v9838_v63 = vmul.f32 %v19115_v51, %v9806_v38  ;;  %v19137_v30 = vand.u32 2147483647, %v19128_v34  ;;  %v19140_v60 = vmul.f32 %v10344_v2, %v18994_v59 }
0x1ebb   :  { %v10282_v10 = vsub.f32 0.0, %v10218_v7  ;;  %v9901_v49 = vmul.f32 %v19098_v40, %v9869_v17  ;;  %v10093_v47 = vmul.f32 %v10061_v12, %v19021_v20  ;;  %v9807_v55 = vadd.f32 -1.4531521, %v9775_v41 }
0x1ebc   :  { %v14169_v46 = vpop.eup %14168  ;;  %v10028_v31 = vmul.f32 %v19081_v61, %v9996_v54  ;;  %v9870_v29 = vadd.f32 1.4214138, %v9838_v63  ;;  %v9681_v11 = vmul.f32 0.3275911, %v19137_v30  ;;  %v9993_v38 = vadd.f32 0.2548296, %v9961_v37 }
0x1ebd   :  { %v19146_v27 = vpop.eup %14170  ;;  %v10314_v59 = vsel %vm10250_vm2, %v10218_v7, %v10282_v10  ;;  %v9995_v2 = vadd.f32 0.2548296, %v9963_v6  ;;  %14176 = vpow2.f32 %v10140_v4  ;;  %v9839_v61 = vmul.f32 %v19130_v56, %v9807_v55 }
0x1ebe   :  { %v10346_v17 = vadd.f32 1.0, %v10314_v59  ;;  %v10188_v62 = vmul.f32 %v14169_v46, %v10028_v31  ;;  %v9902_v20 = vmul.f32 %v19115_v51, %v9870_v29  ;;  %v9933_v12 = vadd.f32 -0.28449672, %v9901_v49 }
0x1ebf   :  { %v10063_v54 = vsub.f32 0.0, %v19069_v32  ;;  %v9776_v63 = vmul.f32 1.0614054, %v19146_v27  ;;  %v9713_v41 = vadd.f32 1.0, %v9681_v11  ;;  %v10138_v50 = vmul.f32 1.442695, %v10093_v47  ;;  %v9365_v47 = vpop.permute.xlu0 %9364 }
0x1ec0   :  { %v14173_v34 = vpop.eup %14172  ;;  %v19156_v37 = vmul.f32 %v10346_v17, %v19031_v8  ;;  %v9934_v7 = vadd.f32 -0.28449672, %v9902_v20  ;;  %v9871_v6 = vadd.f32 1.4214138, %v9839_v61  ;;  %v10025_v4 = vmul.f32 %v19004_v24, %v9993_v38  ;;  %v19843_v20 = vld [vmem:[#allocation6_spill] sm:$0xff] }
0x1ec1   :  { %v10220_v10 = vsub.f32 1.0, %v10188_v62  ;;  %v9808_v46 = vadd.f32 -1.4531521, %v9776_v63  ;;  %14178 = vrcp.f32 %v9713_v41  ;;  %v14175_v31 = vpop.eup %14174  ;;  %v10064_v11 = vsub.f32 0.0, %v19091_v45 }
0x1ec2   :  { %v9966_v29 = vmul.f32 %v19115_v51, %v9934_v7  ;;  %v9903_v55 = vmul.f32 %v19130_v56, %v9871_v6  ;;  %v10027_v8 = vmul.f32 %v19076_v1, %v9995_v2  ;;  %v9965_v59 = vmul.f32 %v19098_v40, %v9933_v12 }
0x1ec3   :  { %v10095_v24 = vmul.f32 %v10063_v54, %v19069_v32  ;;  %v9840_v62 = vmul.f32 %v19146_v27, %v9808_v46  ;;  %v19170_v38 = vmul.f32 %v19093_v35, %v18956_v53  ;;  %14180 = vpow2.f32 %v10138_v50 }
0x1ec4   :  { %v9998_v17 = vadd.f32 0.2548296, %v9966_v29  ;;  %v19173_v61 = vadd.f32 %v19843_v20, %v9365_v47  ;;  %v10185_v63 = vmul.f32 %v14173_v34, %v10025_v4  ;;  %v19176_v41 = vmul.f32 0.5, %v18965_v13 }
0x1ec5   :  { %v10284_v1 = vsub.f32 0.0, %v10220_v10  ;;  %v9872_v2 = vadd.f32 1.4214138, %v9840_v62  ;;  %v19844_v32 = vsub.f32 1.0, %v19073_v43  ;;  %v9935_v35 = vadd.f32 -0.28449672, %v9903_v55 }
0x1ec6   :  { %v10030_v53 = vmul.f32 %v19115_v51, %v9998_v17  ;;  %v10096_v54 = vmul.f32 %v10064_v11, %v19091_v45  ;;  %v10187_v7 = vmul.f32 %v14175_v31, %v10027_v8  ;;  %vm10252_vm5 = vcmp.ge.f32.partialorder %v18984_v25, 0.0  ;;  %v19845_v43 = vld [vmem:[#allocation7_spill] sm:$0xff] }
0x1ec7   :  { %v10311_v12 = vsel %vm10247_vm4, %v19844_v32, %v19122_v3  ;;  %v14177_v50 = vpop.eup %14176  ;;  %v9997_v34 = vadd.f32 0.2548296, %v9965_v59  ;;  %v10142_v13 = vmul.f32 1.442695, %v10095_v24  ;;  %v9904_v4 = vmul.f32 %v19146_v27, %v9872_v2 }
0x1ec8   :  { %v10190_v6 = vmul.f32 %v14177_v50, %v10030_v53  ;;  %v19188_v46 = vmul.f32 0.70710677, %v19173_v61  ;;  %v19191_v57 = vadd.f32 %v19845_v43, %v9365_v47  ;;  %v10343_v3 = vadd.f32 1.0, %v10311_v12 }
0x1ec9   :  { %v10217_v51 = vsub.f32 1.0, %v10185_v63  ;;  %vm10249_vm6 = vcmp.ge.f32.partialorder %v18899_v28, 0.0  ;;  %v9580_v45 = vmul.f32 0.5, %v18972_v23  ;;  %v10316_v31 = vsel %vm10252_vm5, %v10220_v10, %v10284_v1 }
0x1eca   :  { %vm10251_vm7 = vcmp.ge.f32.partialorder %v18980_v15, 0.0  ;;  %v10222_v25 = vsub.f32 1.0, %v10190_v6  ;;  %v9967_v29 = vmul.f32 %v19130_v56, %v9935_v35  ;;  %v10144_v55 = vmul.f32 1.442695, %v10096_v54 }
0x1ecb   :  { %v19198_v11 = vand.u32 2147483647, %v19188_v46  ;;  %v19200_v8 = vpop.eup %14178  ;;  %v10219_v47 = vsub.f32 1.0, %v10187_v7  ;;  %v10029_v59 = vmul.f32 %v19098_v40, %v9997_v34  ;;  %14182 = vpow2.f32 %v10142_v13  ;;  %v9369_v7 = vpop.permute.xlu1 %9368 }
0x1ecc   :  { %v19204_v24 = vmul.f32 0.70710677, %v19191_v57  ;;  %v10348_v23 = vadd.f32 1.0, %v10316_v31  ;;  %v9582_v10 = vmul.f32 0.5, %v19016_v44  ;;  %v10286_v62 = vsub.f32 0.0, %v10222_v25 }
0x1ecd   :  { %v9936_v17 = vadd.f32 -0.28449672, %v9904_v4  ;;  %v10281_v20 = vsub.f32 0.0, %v10217_v51  ;;  %vm10254_vm8 = vcmp.ge.f32.partialorder %v19037_v39, 0.0  ;;  %v9777_v63 = vmul.f32 1.0614054, %v19200_v8  ;;  %v14181_v2 = vpop.eup %14180 }
0x1ece   :  { %v9682_v1 = vmul.f32 0.3275911, %v19198_v11  ;;  %v10318_v32 = vsel %vm10254_vm8, %v10222_v25, %v10286_v62  ;;  %v9999_v12 = vadd.f32 0.2548296, %v9967_v29  ;;  %14184 = vpow2.f32 %v10144_v55 }
0x1ecf   :  { %v19211_v40 = vand.u32 2147483647, %v19204_v24  ;;  %v10283_v53 = vsub.f32 0.0, %v10219_v47  ;;  %v10189_v35 = vmul.f32 %v14181_v2, %v10029_v59  ;;  %v10350_v54 = vadd.f32 1.0, %v10318_v32 }
0x1ed0   :  { %v9714_v44 = vadd.f32 1.0, %v9682_v1  ;;  %v19213_v50 = vmul.f32 %v10348_v23, %v9580_v45  ;;  %v9968_v39 = vmul.f32 %v19146_v27, %v9936_v17  ;;  %v10065_v34 = vsub.f32 0.0, %v19137_v30 }
0x1ed1   :  { %v9683_v13 = vmul.f32 0.3275911, %v19211_v40  ;;  %v19218_v6 = vmul.f32 %v10350_v54, %v9582_v10  ;;  %v9809_v4 = vadd.f32 -1.4531521, %v9777_v63  ;;  %v19221_v43 = vadd.f32 %v18860_v21, %v9369_v7 }
0x1ed2   :  { %14186 = vrcp.f32 %v9714_v44  ;;  %v10313_v31 = vsel %vm10249_vm6, %v10217_v51, %v10281_v20  ;;  %v10031_v45 = vmul.f32 %v19130_v56, %v9999_v12  ;;  %v19227_v29 = vadd.f32 %v18868_v5, %v9369_v7  ;;  %v9373_v51 = vpop.permute.xlu0 %9372 }
0x1ed3   :  { %v9715_v25 = vadd.f32 1.0, %v9683_v13  ;;  %v19230_v55 = vmul.f32 %v10343_v3, %v18968_v14  ;;  %v10315_v59 = vsel %vm10251_vm7, %v10219_v47, %v10283_v53  ;;  %v10221_v23 = vsub.f32 1.0, %v10189_v35 }
0x1ed4   :  { %v19237_v10 = vmul.f32 0.5, %v18991_v42  ;;  %vm10253_vm9 = vcmp.ge.f32.partialorder %v19010_v52, 0.0  ;;  %v10000_v28 = vadd.f32 0.2548296, %v9968_v39  ;;  %v10345_v5 = vadd.f32 1.0, %v10313_v31 }
0x1ed5   :  { %14188 = vrcp.f32 %v9715_v25  ;;  %v14183_v56 = vpop.eup %14182  ;;  %v9841_v14 = vmul.f32 %v19200_v8, %v9809_v4  ;;  %v10097_v3 = vmul.f32 %v10065_v34, %v19137_v30  ;;  %v19243_v15 = vmul.f32 0.70710677, %v19221_v43 }
0x1ed6   :  { %v10347_v47 = vadd.f32 1.0, %v10315_v59  ;;  %v10191_v62 = vmul.f32 %v14183_v56, %v10031_v45  ;;  %v19246_v17 = vmul.f32 0.70710677, %v19227_v29  ;;  %v19249_v42 = vadd.f32 %v18873_v16, %v9373_v51 }
0x1ed7   :  { %v10285_v20 = vsub.f32 0.0, %v10221_v23  ;;  %v19252_v63 = vmul.f32 0.5, %v19043_v26  ;;  %v10066_v1 = vsub.f32 0.0, %v19198_v11  ;;  %v19256_v2 = vand.u32 2147483647, %v19243_v15 }
0x1ed8   :  { %v14185_v30 = vpop.eup %14184  ;;  %v19259_v32 = vmul.f32 0.5, %v19065_v36  ;;  %v10032_v12 = vmul.f32 %v19146_v27, %v10000_v28  ;;  %v19263_v53 = vmul.f32 0.5, %v19113_v19  ;;  %v19266_v16 = vand.u32 2147483647, %v19246_v17 }
0x1ed9   :  { %v19269_v26 = vmul.f32 %v10345_v5, %v19001_v22  ;;  %vm10255_vm1 = vcmp.ge.f32.partialorder %v19057_v0, 0.0  ;;  %v9873_v35 = vadd.f32 1.4214138, %v9841_v14  ;;  %v9684_v54 = vmul.f32 0.3275911, %v19256_v2 }
0x1eda   :  { %v19274_v44 = vmul.f32 0.70710677, %v19249_v42  ;;  %v19277_v36 = vmul.f32 %v10347_v47, %v19176_v41  ;;  %v10223_v27 = vsub.f32 1.0, %v10191_v62  ;;  %v10146_v19 = vmul.f32 1.442695, %v10097_v3 }
0x1edb   :  { %v9685_v7 = vmul.f32 0.3275911, %v19266_v16  ;;  %v10317_v22 = vsel %vm10253_vm9, %v10221_v23, %v10285_v20  ;;  %v10098_v34 = vmul.f32 %v10066_v1, %v19198_v11  ;;  %v9716_v13 = vadd.f32 1.0, %v9684_v54  ;;  %v9377_v1 = vpop.permute.xlu1 %9376 }
0x1edc   :  { %v19280_v39 = vpop.eup %14186  ;;  %v9654_v4 = vand.u32 2147483647, %v19274_v44  ;;  %v10192_v31 = vmul.f32 %v14185_v30, %v10032_v12  ;;  %v10067_v41 = vsub.f32 0.0, %v19211_v40  ;;  %v9905_v59 = vmul.f32 %v19200_v8, %v9873_v35 }
0x1edd   :  { %v9778_v45 = vmul.f32 1.0614054, %v19280_v39  ;;  %v9717_v25 = vadd.f32 1.0, %v9685_v7  ;;  %14190 = vrcp.f32 %v9716_v13  ;;  %v19290_v56 = vadd.f32 %v18876_v58, %v9373_v51 }
0x1ede   :  { %v9686_v28 = vmul.f32 0.3275911, %v9654_v4  ;;  %v10287_v23 = vsub.f32 0.0, %v10223_v27  ;;  %v19295_v11 = vmul.f32 0.5, %v19173_v61  ;;  %vm10256_vm3 = vcmp.ge.f32.partialorder %v19086_v48, 0.0 }
0x1edf   :  { %v19292_v52 = vpop.eup %14188  ;;  %v9810_v5 = vadd.f32 -1.4531521, %v9778_v45  ;;  %14192 = vrcp.f32 %v9717_v25  ;;  %v10148_v14 = vmul.f32 1.442695, %v10098_v34  ;;  %v10349_v62 = vadd.f32 1.0, %v10317_v22 }
0x1ee0   :  { %14194 = vpow2.f32 %v10146_v19  ;;  %v9779_v3 = vmul.f32 1.0614054, %v19292_v52  ;;  %v9718_v47 = vadd.f32 1.0, %v9686_v28  ;;  %v10224_v20 = vsub.f32 1.0, %v10192_v31 }
0x1ee1   :  { %v9842_v58 = vmul.f32 %v19280_v39, %v9810_v5  ;;  %v10099_v51 = vmul.f32 %v10067_v41, %v19211_v40  ;;  %v9937_v30 = vadd.f32 -0.28449672, %v9905_v59  ;;  %v19302_v61 = vmul.f32 0.70710677, %v19290_v56 }
0x1ee2   :  { %v9811_v12 = vadd.f32 -1.4531521, %v9779_v3  ;;  %14196 = vrcp.f32 %v9718_v47  ;;  %v10319_v35 = vsel %vm10255_vm1, %v10223_v27, %v10287_v23  ;;  %v19307_v19 = vmul.f32 0.5, %v19191_v57 }
0x1ee3   :  { %v9874_v54 = vadd.f32 1.4214138, %v9842_v58  ;;  %v19310_v7 = vadd.f32 %v18887_v33, %v9377_v1  ;;  %14198 = vpow2.f32 %v10148_v14  ;;  %v10068_v22 = vsub.f32 0.0, %v19256_v2 }
0x1ee4   :  { %v9843_v40 = vmul.f32 %v19292_v52, %v9811_v12  ;;  %v19315_v34 = vand.u32 2147483647, %v19302_v61  ;;  %v19318_v13 = vmul.f32 %v10349_v62, %v19237_v10  ;;  %v10288_v0 = vsub.f32 0.0, %v10224_v20 }
0x1ee5   :  { %v9906_v27 = vmul.f32 %v19280_v39, %v9874_v54  ;;  %v19322_v57 = vmul.f32 0.70710677, %v19310_v7  ;;  %v9969_v33 = vmul.f32 %v19200_v8, %v9937_v30  ;;  %v10150_v31 = vmul.f32 1.442695, %v10099_v51 }
0x1ee6   :  { %v10070_v45 = vsub.f32 0.0, %v9654_v4  ;;  %v9687_v41 = vmul.f32 0.3275911, %v19315_v34  ;;  %v19326_v25 = vadd.f32 1.0, %v10319_v35  ;;  %v19329_v28 = vmul.f32 0.5, %v19221_v43 }
0x1ee7   :  { %v9938_v59 = vadd.f32 -0.28449672, %v9906_v27  ;;  %v19332_v10 = vand.u32 2147483647, %v19322_v57  ;;  %v19334_v23 = vpop.eup %14190  ;;  %v9875_v5 = vadd.f32 1.4214138, %v9843_v40  ;;  %v10100_v14 = vmul.f32 %v10068_v22, %v19256_v2 }
0x1ee8   :  { %v9719_v3 = vadd.f32 1.0, %v9687_v41  ;;  %v19338_v47 = vadd.f32 %v18895_v18, %v9377_v1  ;;  %v10320_v58 = vsel %vm10256_vm3, %v10224_v20, %v10288_v0  ;;  %v9780_v51 = vmul.f32 1.0614054, %v19334_v23 }
0x1ee9   :  { %v19340_v62 = vpop.eup %14192  ;;  %v9970_v43 = vmul.f32 %v19280_v39, %v9938_v59  ;;  %v9688_v30 = vmul.f32 0.3275911, %v19332_v10  ;;  %v10001_v35 = vadd.f32 0.2548296, %v9969_v33  ;;  %v10102_v2 = vmul.f32 %v10070_v45, %v9654_v4 }
0x1eea   :  { %v14195_v12 = vpop.eup %14194  ;;  %v9781_v54 = vmul.f32 1.0614054, %v19340_v62  ;;  %14200 = vrcp.f32 %v9719_v3  ;;  %v9812_v18 = vadd.f32 -1.4531521, %v9780_v51  ;;  %v10069_v1 = vsub.f32 0.0, %v19266_v16 }
0x1eeb   :  { %v10002_v40 = vadd.f32 0.2548296, %v9970_v43  ;;  %v9720_v22 = vadd.f32 1.0, %v9688_v30  ;;  %vm10258_vm10 = vcmp.ge.f32.partialorder %v19188_v46, 0.0  ;;  %v9907_v48 = vmul.f32 %v19292_v52, %v9875_v5 }
0x1eec   :  { %v19349_v27 = vpop.eup %14196  ;;  %v10152_v20 = vmul.f32 1.442695, %v10100_v14  ;;  %v9813_v0 = vadd.f32 -1.4531521, %v9781_v54  ;;  %v19354_v41 = vmul.f32 0.70710677, %v19338_v47  ;;  %v9844_v4 = vmul.f32 %v19334_v23, %v9812_v18 }
0x1eed   :  { %v10034_v33 = vmul.f32 %v19280_v39, %v10002_v40  ;;  %v9782_v45 = vmul.f32 1.0614054, %v19349_v27  ;;  %14202 = vrcp.f32 %v9720_v22  ;;  %v14199_v59 = vpop.eup %14198  ;;  %v10033_v3 = vmul.f32 %v19200_v8, %v10001_v35 }
0x1eee   :  { %v9845_v43 = vmul.f32 %v19340_v62, %v9813_v0  ;;  %v10156_v51 = vmul.f32 1.442695, %v10102_v2  ;;  %v19362_v5 = vand.u32 2147483647, %v19354_v41  ;;  %v9876_v30 = vadd.f32 1.4214138, %v9844_v4 }
0x1eef   :  { %v10194_v14 = vmul.f32 %v14199_v59, %v10034_v33  ;;  %v9814_v54 = vadd.f32 -1.4531521, %v9782_v45  ;;  %v10071_v21 = vsub.f32 0.0, %v19315_v34  ;;  %v9939_v39 = vadd.f32 -0.28449672, %v9907_v48 }
0x1ef0   :  { %14204 = vpow2.f32 %v10152_v20  ;;  %v9877_v40 = vadd.f32 1.4214138, %v9845_v43  ;;  %v9689_v18 = vmul.f32 0.3275911, %v19362_v5  ;;  %v9908_v8 = vmul.f32 %v19334_v23, %v9876_v30 }
0x1ef1   :  { %v10226_v22 = vsub.f32 1.0, %v10194_v14  ;;  %14206 = vpow2.f32 %v10150_v31  ;;  %v9846_v35 = vmul.f32 %v19349_v27, %v9814_v54  ;;  %v10352_v2 = vadd.f32 1.0, %v10320_v58 }
0x1ef2   :  { %v9909_v0 = vmul.f32 %v19340_v62, %v9877_v40  ;;  %v10101_v33 = vmul.f32 %v10069_v1, %v19266_v16  ;;  %v9721_v4 = vadd.f32 1.0, %v9689_v18  ;;  %v9940_v59 = vadd.f32 -0.28449672, %v9908_v8 }
0x1ef3   :  { %v10290_v45 = vsub.f32 0.0, %v10226_v22  ;;  %v9878_v49 = vadd.f32 1.4214138, %v9846_v35  ;;  %14208 = vpow2.f32 %v10156_v51  ;;  %v19372_v20 = vmul.f32 %v14195_v12, %v10033_v3 }
0x1ef4   :  { %v19370_v48 = vpop.eup %14200  ;;  %v9971_v31 = vmul.f32 %v19292_v52, %v9939_v39  ;;  %v10103_v43 = vmul.f32 %v10071_v21, %v19315_v34  ;;  %14210 = vrcp.f32 %v9721_v4  ;;  %v9972_v14 = vmul.f32 %v19334_v23, %v9940_v59  ;;  %v9381_v39 = vpop.permute.xlu0 %9380 }
0x1ef5   :  { %v10322_v58 = vsel %vm10258_vm10, %v10226_v22, %v10290_v45  ;;  %v9910_v16 = vmul.f32 %v19349_v27, %v9878_v49  ;;  %v9783_v1 = vmul.f32 1.0614054, %v19370_v48  ;;  %v9941_v51 = vadd.f32 -0.28449672, %v9909_v0 }
0x1ef6   :  { %v10354_v30 = vadd.f32 1.0, %v10322_v58  ;;  %v10154_v54 = vmul.f32 1.442695, %v10101_v33  ;;  %v10072_v12 = vsub.f32 0.0, %v19332_v10  ;;  %v19385_v21 = vmul.f32 %v10352_v2, %v19259_v32 }
0x1ef7   :  { %v19382_v3 = vpop.eup %14202  ;;  %v10004_v34 = vadd.f32 0.2548296, %v9972_v14  ;;  %v9942_v46 = vadd.f32 -0.28449672, %v9910_v16  ;;  %v9815_v40 = vadd.f32 -1.4531521, %v9783_v1  ;;  %v19393_v8 = vadd.f32 %v18901_v9, %v9381_v39 }
0x1ef8   :  { %v19388_v18 = vmul.f32 %v10354_v30, %v19295_v11  ;;  %vm10260_vm11 = vcmp.ge.f32.partialorder %v19243_v15, 0.0  ;;  %v10158_v49 = vmul.f32 1.442695, %v10103_v43  ;;  %v9784_v22 = vmul.f32 1.0614054, %v19382_v3 }
0x1ef9   :  { %v10003_v35 = vadd.f32 0.2548296, %v9971_v31  ;;  %v10036_v0 = vmul.f32 %v19334_v23, %v10004_v34  ;;  %v9974_v32 = vmul.f32 %v19349_v27, %v9942_v46  ;;  %v9847_v2 = vmul.f32 %v19370_v48, %v9815_v40 }
0x1efa   :  { %v14205_v33 = vpop.eup %14204  ;;  %v10225_v4 = vsub.f32 1.0, %v19372_v20  ;;  %v9973_v45 = vmul.f32 %v19340_v62, %v9941_v51  ;;  %v9816_v59 = vadd.f32 -1.4531521, %v9784_v22  ;;  %14212 = vpow2.f32 %v10154_v54 }
0x1efb   :  { %v14207_v43 = vpop.eup %14206  ;;  %v10196_v58 = vmul.f32 %v14205_v33, %v10036_v0  ;;  %v10006_v9 = vadd.f32 0.2548296, %v9974_v32  ;;  %v9879_v31 = vadd.f32 1.4214138, %v9847_v2  ;;  %14214 = vpow2.f32 %v10158_v49  ;;  %v19846_v0 = vld [vmem:[#allocation8_spill] sm:$0xff] }
0x1efc   :  { %v9848_v23 = vmul.f32 %v19382_v3, %v9816_v59  ;;  %v10104_v14 = vmul.f32 %v10072_v12, %v19332_v10  ;;  %v19405_v16 = vmul.f32 0.70710677, %v19393_v8  ;;  %v10035_v30 = vmul.f32 %v19292_v52, %v10003_v35 }
0x1efd   :  { %v14209_v1 = vpop.eup %14208  ;;  %v10228_v34 = vsub.f32 1.0, %v10196_v58  ;;  %v10038_v51 = vmul.f32 %v19349_v27, %v10006_v9  ;;  %v9911_v46 = vmul.f32 %v19370_v48, %v9879_v31  ;;  %v10005_v54 = vadd.f32 0.2548296, %v9973_v45  ;;  %v19847_v31 = vld [vmem:[#allocation23_spill] sm:$0xff] }
0x1efe   :  { %v19410_v40 = vpop.eup %14210  ;;  %v9880_v22 = vadd.f32 1.4214138, %v9848_v23  ;;  %v19413_v49 = vand.u32 2147483647, %v19405_v16  ;;  %v19416_v10 = vadd.f32 %v19846_v0, %v9381_v39  ;;  %v10160_v27 = vmul.f32 1.442695, %v10104_v14 }
0x1eff   :  { %v10292_v12 = vsub.f32 0.0, %v10228_v34  ;;  %v10198_v32 = vmul.f32 %v14209_v1, %v10038_v51  ;;  %v9943_v2 = vadd.f32 -0.28449672, %v9911_v46  ;;  %v9785_v52 = vmul.f32 1.0614054, %v19410_v40 }
0x1f00   :  { %v9912_v35 = vmul.f32 %v19382_v3, %v9880_v22  ;;  %v10073_v33 = vsub.f32 0.0, %v19362_v5  ;;  %v9690_v59 = vmul.f32 0.3275911, %v19413_v49  ;;  %vm10257_vm12 = vcmp.ge.f32.partialorder %v19847_v31, 0.0 }
0x1f01   :  { %v10324_v45 = vsel %vm10260_vm11, %v10228_v34, %v10292_v12  ;;  %v10230_v58 = vsub.f32 1.0, %v10198_v32  ;;  %v9975_v9 = vmul.f32 %v19370_v48, %v9943_v2  ;;  %v9817_v39 = vadd.f32 -1.4531521, %v9785_v52  ;;  %v9385_v2 = vpop.permute.xlu1 %9384 }
0x1f02   :  { %v19426_v23 = vmul.f32 %v14207_v43, %v10035_v30  ;;  %v10037_v1 = vmul.f32 %v19340_v62, %v10005_v54  ;;  %v9944_v51 = vadd.f32 -0.28449672, %v9912_v35  ;;  %v9722_v46 = vadd.f32 1.0, %v9690_v59 }
0x1f03   :  { %v10294_v14 = vsub.f32 0.0, %v10230_v58  ;;  %v10007_v22 = vadd.f32 0.2548296, %v9975_v9  ;;  %v9849_v0 = vmul.f32 %v19410_v40, %v9817_v39  ;;  %v19431_v11 = vmul.f32 0.70710677, %v19416_v10 }
0x1f04   :  { %v10356_v15 = vadd.f32 1.0, %v10324_v45  ;;  %vm10262_vm13 = vcmp.ge.f32.partialorder %v19274_v44, 0.0  ;;  %v9976_v34 = vmul.f32 %v19382_v3, %v9944_v51  ;;  %14216 = vrcp.f32 %v9722_v46  ;;  %v14213_v12 = vpop.eup %14212  ;;  %v19849_v46 = vld [vmem:[#allocation24_spill] sm:$0xff] }
0x1f05   :  { %v10326_v43 = vsel %vm10262_vm13, %v10230_v58, %v10294_v14  ;;  %v10039_v30 = vmul.f32 %v19370_v48, %v10007_v22  ;;  %14218 = vpow2.f32 %v10160_v27  ;;  %v9881_v62 = vadd.f32 1.4214138, %v9849_v0  ;;  %v14215_v54 = vpop.eup %14214  ;;  %v19848_v48 = vld [vmem:[#allocation5_spill] sm:$0xff] }
0x1f06   :  { %v10289_v32 = vsub.f32 0.0, %v10225_v4  ;;  %vm10259_vm14 = vcmp.ge.f32.partialorder %v19204_v24, 0.0  ;;  %v9590_v52 = vmul.f32 0.5, %v19249_v42  ;;  %v10358_v35 = vadd.f32 1.0, %v10326_v43  ;;  %v19850_v14 = vld [vmem:[#allocation13_spill] sm:$0xff] }
0x1f07   :  { %v10105_v44 = vmul.f32 %v10073_v33, %v19362_v5  ;;  %v10227_v59 = vsub.f32 1.0, %v19426_v23  ;;  %v10197_v45 = vmul.f32 %v14213_v12, %v10037_v1  ;;  %v9659_v58 = vand.u32 2147483647, %v19431_v11  ;;  %v19851_v12 = vld [vmem:[#allocation10_spill] sm:$0xff]  ;;  %v19852_v43 = vld [vmem:[#allocation9_spill] sm:$0xff] }
0x1f08   :  { %v19444_v27 = vadd.f32 %v19848_v48, %v9385_v2  ;;  %v19447_v9 = vmul.f32 %v10356_v15, %v19329_v28  ;;  %v19449_v39 = vmul.f32 %v10358_v35, %v9590_v52  ;;  %v10008_v51 = vadd.f32 0.2548296, %v9976_v34 }
0x1f09   :  { %v10406_v42 = vpack.c.bf16 %v19850_v14, %v19849_v46  ;;  %v19455_v5 = vmul.f32 %v19326_v25, %v19252_v63  ;;  %v10199_v33 = vmul.f32 %v14215_v54, %v10039_v30  ;;  %v9913_v23 = vmul.f32 %v19410_v40, %v9881_v62 }
0x1f0a   :  { %v9691_v1 = vmul.f32 0.3275911, %v9659_v58  ;;  %v19459_v22 = vmul.f32 0.5, %v19227_v29  ;;  %v10415_v28 = vpack.c.bf16 %v19449_v39, %v19447_v9  ;;  %v10074_v0 = vsub.f32 0.0, %v19413_v49 }
0x1f0b   :  { %v19465_v15 = vmul.f32 0.70710677, %v19444_v27  ;;  %10433 = vmatprep.subr.bf16.mxu0 %v10406_v42  ;;  %v10321_v63 = vsel %vm10257_vm12, %v10225_v4, %v10289_v32  ;;  %v10291_v25 = vsub.f32 0.0, %v10227_v59  ;;  %vm10261_vm15 = vcmp.ge.f32.partialorder %v19246_v17, 0.0  ;;  %v19854_v4 = vld [vmem:[#allocation15_spill] sm:$0xff] }
0x1f0c   :  { %v19473_v29 = vmul.f32 0.5, %v19290_v56  ;;  %v9723_v34 = vadd.f32 1.0, %v9691_v1  ;;  %v19853_v30 = vpack.c.bf16 %v19851_v12, %v19852_v43  ;;  %v10229_v62 = vsub.f32 1.0, %v10197_v45  ;;  %v9389_v1 = vpop.permute.xlu0 %9388 }
0x1f0d   :  { %v10040_v54 = vmul.f32 %v19382_v3, %v10008_v51  ;;  %v10162_v52 = vmul.f32 1.442695, %v10105_v44  ;;  %v9660_v20 = vand.u32 2147483647, %v19465_v15  ;;  %v10231_v35 = vsub.f32 1.0, %v10199_v33 }
0x1f0e   :  { %10434 = vmatpush1.bf16.msra.mxu0 %v19853_v30  ;;  %v9945_v31 = vadd.f32 -0.28449672, %v9913_v23  ;;  %14220 = vrcp.f32 %v9723_v34  ;;  %v19481_v32 = vadd.f32 %v19854_v4, %v9385_v2  ;;  %v19483_v48 = vpop.eup %14216  ;;  %vm10263_vm2 = vcmp.ge.f32.partialorder %v19302_v61, 0.0 }
0x1f0f   :  { %v19487_v56 = vmul.f32 0.5, %v19310_v7  ;;  %v10106_v45 = vmul.f32 %v10074_v0, %v19413_v49  ;;  %v9692_v46 = vmul.f32 0.3275911, %v9660_v20  ;;  %v14219_v3 = vpop.eup %14218  ;;  %v10353_v44 = vadd.f32 1.0, %v10321_v63  ;;  %v19855_v63 = vld [vmem:[#allocation11_spill] sm:$0xff] }
0x1f10   :  { %v10323_v51 = vsel %vm10259_vm14, %v10227_v59, %v10291_v25  ;;  %v9786_v14 = vmul.f32 1.0614054, %v19483_v48  ;;  %v10075_v42 = vsub.f32 0.0, %v9659_v58  ;;  %v10293_v2 = vsub.f32 0.0, %v10229_v62  ;;  %v19856_v59 = vld [vmem:[#allocation12_spill] sm:$0xff] }
0x1f11   :  { %v10200_v33 = vmul.f32 %v14219_v3, %v10040_v54  ;;  %14222 = vpow2.f32 %v10162_v52  ;;  %v9724_v23 = vadd.f32 1.0, %v9692_v46  ;;  %v10295_v34 = vsub.f32 0.0, %v10231_v35 }
0x1f12   :  { %v9977_v7 = vmul.f32 %v19410_v40, %v9945_v31  ;;  %v9818_v12 = vadd.f32 -1.4531521, %v9786_v14  ;;  %v19495_v49 = vmul.f32 0.70710677, %v19481_v32  ;;  %v10164_v0 = vmul.f32 1.442695, %v10106_v45 }
0x1f13   :  { %14224 = vrcp.f32 %v9724_v23  ;;  %v19498_v24 = vadd.f32 %v19855_v63, %v9389_v1  ;;  %v19501_v25 = vadd.f32 %v19856_v59, %v9389_v1  ;;  %v19504_v43 = vmul.f32 %v10353_v44, %v19263_v53 }
0x1f14   :  { %vm10264_vm4 = vcmp.ge.f32.partialorder %v19322_v57, 0.0  ;;  %v9850_v30 = vmul.f32 %v19483_v48, %v9818_v12  ;;  %v10107_v54 = vmul.f32 %v10075_v42, %v9659_v58  ;;  %v19509_v52 = vand.u32 2147483647, %v19495_v49 }
0x1f15   :  { %v10355_v31 = vadd.f32 1.0, %v10323_v51  ;;  %v10325_v4 = vsel %vm10261_vm15, %v10229_v62, %v10293_v2  ;;  %v10232_v45 = vsub.f32 1.0, %v10200_v33  ;;  %v19514_v46 = vmul.f32 0.70710677, %v19498_v24 }
0x1f16   :  { %v10327_v53 = vsel %vm10263_vm2, %v10231_v35, %v10295_v34  ;;  %v10009_v3 = vadd.f32 0.2548296, %v9977_v7  ;;  %v9882_v44 = vadd.f32 1.4214138, %v9850_v30  ;;  %v9693_v14 = vmul.f32 0.3275911, %v19509_v52 }
0x1f17   :  { %14226 = vpow2.f32 %v10164_v0  ;;  %v10076_v58 = vsub.f32 0.0, %v9660_v20  ;;  %v19520_v42 = vand.u32 2147483647, %v19514_v46  ;;  %v19523_v51 = vmul.f32 0.70710677, %v19501_v25 }
0x1f18   :  { %v19525_v17 = vpop.eup %14220  ;;  %v10357_v62 = vadd.f32 1.0, %v10325_v4  ;;  %v9914_v2 = vmul.f32 %v19483_v48, %v9882_v44  ;;  %v10166_v33 = vmul.f32 1.442695, %v10107_v54  ;;  %v9725_v61 = vadd.f32 1.0, %v9693_v14 }
0x1f19   :  { %v10359_v35 = vadd.f32 1.0, %v10327_v53  ;;  %v10296_v23 = vsub.f32 0.0, %v10232_v45  ;;  %v9787_v1 = vmul.f32 1.0614054, %v19525_v17  ;;  %v9694_v34 = vmul.f32 0.3275911, %v19520_v42 }
0x1f1a   :  { %v10041_v7 = vmul.f32 %v19410_v40, %v10009_v3  ;;  %v9946_v12 = vadd.f32 -0.28449672, %v9914_v2  ;;  %14228 = vrcp.f32 %v9725_v61  ;;  %v19532_v0 = vand.u32 2147483647, %v19523_v51  ;;  %v19857_v61 = vld [vmem:[#allocation22_spill] sm:$0xff] }
0x1f1b   :  { %v14223_v63 = vpop.eup %14222  ;;  %v19535_v59 = vmul.f32 %v10355_v31, %v19307_v19  ;;  %v9819_v30 = vadd.f32 -1.4531521, %v9787_v1  ;;  %v10108_v54 = vmul.f32 %v10076_v58, %v9660_v20  ;;  %v9726_v4 = vadd.f32 1.0, %v9694_v34  ;;  %v19858_v34 = vld [vmem:[#allocation16_spill] sm:$0xff] }
0x1f1c   :  { %v19538_v53 = vmul.f32 %v10357_v62, %v19459_v22  ;;  %v9978_v44 = vmul.f32 %v19483_v48, %v9946_v12  ;;  %14230 = vpow2.f32 %v10166_v33  ;;  %v9695_v40 = vmul.f32 0.3275911, %v19532_v0 }
0x1f1d   :  { %v19542_v3 = vpop.eup %14224  ;;  %v19545_v14 = vmul.f32 %v10359_v35, %v19473_v29  ;;  %v10328_v19 = vsel %vm10264_vm4, %v10232_v45, %v10296_v23  ;;  %v9851_v31 = vmul.f32 %v19525_v17, %v9819_v30  ;;  %14232 = vrcp.f32 %v9726_v4 }
0x1f1e   :  { %v19550_v20 = vmul.f32 %v14223_v63, %v10041_v7  ;;  %v10010_v22 = vadd.f32 0.2548296, %v9978_v44  ;;  %v9788_v58 = vmul.f32 1.0614054, %v19542_v3  ;;  %v9727_v62 = vadd.f32 1.0, %v9695_v40 }
0x1f1f   :  { %v9883_v2 = vadd.f32 1.4214138, %v9851_v31  ;;  %v10168_v33 = vmul.f32 1.442695, %v10108_v54  ;;  %v10408_v1 = vpack.c.bf16 %v19230_v55, %v19857_v61  ;;  %v10407_v29 = vpack.c.bf16 %v19170_v38, %v19858_v34 }
0x1f20   :  { %v10042_v57 = vmul.f32 %v19483_v48, %v10010_v22  ;;  %v9820_v45 = vadd.f32 -1.4531521, %v9788_v58  ;;  %v10077_v35 = vsub.f32 0.0, %v19509_v52  ;;  %14234 = vrcp.f32 %v9727_v62  ;;  %v19581_v22 = vld [vmem:[%s19687_s6] sm:$0xff] }
0x1f21   :  { %v14227_v23 = vpop.eup %14226  ;;  %v9915_v7 = vmul.f32 %v19525_v17, %v9883_v2  ;;  %10435 = vmatprep.subr.bf16.mxu0 %v10408_v1  ;;  %v10410_v12 = vpack.c.bf16 %v19277_v36, %v19269_v26  ;;  %v10412_v63 = vpack.c.bf16 %v19455_v5, %v19318_v13  ;;  %v10414_v55 = vpack.c.bf16 %v19535_v59, %v19504_v43 }
0x1f22   :  { %v10202_v38 = vmul.f32 %v14227_v23, %v10042_v57  ;;  %v9852_v48 = vmul.f32 %v19542_v3, %v9820_v45  ;;  %v10078_v30 = vsub.f32 0.0, %v19520_v42  ;;  %10436 = vmatpush1.bf16.msra.mxu0 %v10407_v29  ;;  %v10416_v54 = vpack.c.bf16 %v19545_v14, %v19538_v53 }
0x1f23   :  { %v10233_v4 = vsub.f32 1.0, %v19550_v20  ;;  %vm10265_vm5 = vcmp.ge.f32.partialorder %v19354_v41, 0.0  ;;  %v9947_v26 = vadd.f32 -0.28449672, %v9915_v7  ;;  %10437 = vmatprep.subr.bf16.mxu0 %v10410_v12  ;;  %v9594_v13 = vmul.f32 0.5, %v19393_v8  ;;  %v19587_v8 = vld [vmem:[%s19687_s6 + $0x8] sm:$0xff] }
0x1f24   :  { %v19572_v36 = vpop.eup %14228  ;;  %v10234_v5 = vsub.f32 1.0, %v10202_v38  ;;  %v9884_v43 = vadd.f32 1.4214138, %v9852_v48  ;;  %v10109_v59 = vmul.f32 %v10077_v35, %v19509_v52  ;;  %v14297_v44 = vmov 11  }
0x1f25   :  { %12907 = vset.pattern.permute.xlu1 %v14297_v44  ;;  %12908 = vset.pattern.permute.xlu0 %v14297_v44  ;;  %v10360_v40 = vadd.f32 1.0, %v10328_v19  ;;  %v9979_v31 = vmul.f32 %v19525_v17, %v9947_v26  ;;  %14236 = vpow2.f32 %v10168_v33  ;;  %v9789_v20 = vmul.f32 1.0614054, %v19572_v36 }
0x1f26   :  { %10495 = vperm.xlu1 %12907, %v19581_v22   ;;  %10499 = vperm.xlu0 %12908, %v19587_v8   ;;  %v14231_v52 = vpop.eup %14230  ;;  %v10298_v19 = vsub.f32 0.0, %v10234_v5  ;;  %v9916_v58 = vmul.f32 %v19542_v3, %v9884_v43  ;;  %v10110_v62 = vmul.f32 %v10078_v30, %v19520_v42  ;;  %v10079_v2 = vsub.f32 0.0, %v19532_v0 }
0x1f27   :  { %v19859_v33 = vpack.c.bf16 %v19156_v37, %v19140_v60  ;;  %v19596_v61 = vpop.eup %14232  ;;  %v10297_v1 = vsub.f32 0.0, %v10233_v4  ;;  %vm10266_vm6 = vcmp.ge.f32.partialorder %v19405_v16, 0.0  ;;  %v10011_v34 = vadd.f32 0.2548296, %v9979_v31  ;;  %v14278_v16 = vld [vmem:[%s19687_s6 + $0x10] sm:$0xff] }
0x1f28   :  { %v9821_v29 = vadd.f32 -1.4531521, %v9789_v20  ;;  %v10330_v57 = vsel %vm10266_vm6, %v10234_v5, %v10298_v19  ;;  %v9948_v45 = vadd.f32 -0.28449672, %v9916_v58  ;;  %v10170_v35 = vmul.f32 1.442695, %v10109_v59 }
0x1f29   :  { %10438 = vmatpush1.bf16.msra.mxu0 %v19859_v33  ;;  %v9790_v23 = vmul.f32 1.0614054, %v19596_v61  ;;  %v19601_v42 = vmul.f32 %v10360_v40, %v19487_v56  ;;  %v10362_v7 = vadd.f32 1.0, %v10330_v57  ;;  %v10043_v60 = vmul.f32 %v19525_v17, %v10011_v34 }
0x1f2a   :  { %10439 = vmatprep.subr.bf16.mxu0 %v10412_v63  ;;  %v9853_v37 = vmul.f32 %v19572_v36, %v9821_v29  ;;  %10503 = vperm.xlu1 %12907, %v14278_v16   ;;  %v19608_v12 = vpop.eup %14234  ;;  %v9980_v63 = vmul.f32 %v19542_v3, %v9948_v45  ;;  %v10172_v48 = vmul.f32 1.442695, %v10110_v62  ;;  %v10111_v30 = vmul.f32 %v10079_v2, %v19532_v0 }
0x1f2b   :  { %v9822_v38 = vadd.f32 -1.4531521, %v9790_v23  ;;  %v19860_v56 = vpack.c.bf16 %v19218_v6, %v19213_v50  ;;  %v10394_v17 = vmul.f32 %v10362_v7, %v9594_v13  ;;  %v10203_v26 = vmul.f32 %v14231_v52, %v10043_v60  ;;  %v14279_v6 = vld [vmem:[%s19687_s6 + $0x18] sm:$0xff] }
0x1f2c   :  { %v9885_v5 = vadd.f32 1.4214138, %v9853_v37  ;;  %v9791_v43 = vmul.f32 1.0614054, %v19608_v12  ;;  %v10329_v59 = vsel %vm10265_vm5, %v10233_v4, %v10297_v1  ;;  %v10012_v44 = vadd.f32 0.2548296, %v9980_v63 }
0x1f2d   :  { %10440 = vmatpush1.bf16.msra.mxu0 %v19860_v56  ;;  %14238 = vpow2.f32 %v10170_v35  ;;  %v9854_v40 = vmul.f32 %v19596_v61, %v9822_v38  ;;  %v10417_v31 = vpack.c.bf16 %v10394_v17, %v19601_v42  ;;  %v10235_v0 = vsub.f32 1.0, %v10203_v26 }
0x1f2e   :  { %10441 = vmatprep.subr.bf16.mxu0 %v10414_v55  ;;  %v9917_v20 = vmul.f32 %v19572_v36, %v9885_v5  ;;  %v9823_v50 = vadd.f32 -1.4531521, %v9791_v43  ;;  %10507 = vperm.xlu1 %12907, %v14279_v6   ;;  %v10044_v55 = vmul.f32 %v19542_v3, %v10012_v44  ;;  %v10174_v41 = vmul.f32 1.442695, %v10111_v30 }
0x1f2f   :  { %v9886_v13 = vadd.f32 1.4214138, %v9854_v40  ;;  %v19861_v4 = vpack.c.bf16 %v19388_v18, %v19385_v21  ;;  %v14237_v52 = vpop.eup %14236  ;;  %v10299_v19 = vsub.f32 0.0, %v10235_v0  ;;  %14240 = vpow2.f32 %v10172_v48 }
0x1f30   :  { %v9949_v58 = vadd.f32 -0.28449672, %v9917_v20  ;;  %v9855_v62 = vmul.f32 %v19608_v12, %v9823_v50  ;;  %v10361_v2 = vadd.f32 1.0, %v10329_v59  ;;  %vm10267_vm7 = vcmp.ge.f32.partialorder %v19431_v11, 0.0 }
0x1f31   :  { %10442 = vmatpush1.bf16.msra.mxu0 %v19861_v4  ;;  %v10204_v3 = vmul.f32 %v14237_v52, %v10044_v55  ;;  %v9918_v33 = vmul.f32 %v19596_v61, %v9886_v13  ;;  %v9593_v1 = vmul.f32 0.5, %v19338_v47  ;;  %v10331_v21 = vsel %vm10267_vm7, %v10235_v0, %v10299_v19 }
0x1f32   :  { %10443 = vmatprep.subr.bf16.mxu0 %v10416_v54  ;;  %v9981_v18 = vmul.f32 %v19572_v36, %v9949_v58  ;;  %v9887_v34 = vadd.f32 1.4214138, %v9855_v62  ;;  %v9595_v29 = vmul.f32 0.5, %v19416_v10  ;;  %v10363_v57 = vadd.f32 1.0, %v10331_v21  ;;  %v19863_v62 = vld [vmem:[#allocation19_spill] sm:$0xff] }
0x1f33   :  { %v9950_v45 = vadd.f32 -0.28449672, %v9918_v33  ;;  %14242 = vpow2.f32 %v10174_v41  ;;  %v10393_v14 = vmul.f32 %v10361_v2, %v9593_v1  ;;  %v10236_v35 = vsub.f32 1.0, %v10204_v3  ;;  %v19864_v33 = vld [vmem:[#allocation21_spill] sm:$0xff] }
0x1f34   :  { %v10013_v53 = vadd.f32 0.2548296, %v9981_v18  ;;  %v9919_v11 = vmul.f32 %v19608_v12, %v9887_v34  ;;  %v10395_v54 = vmul.f32 %v10363_v57, %v9595_v29  ;;  %vm10268_vm8 = vcmp.ge.f32.partialorder %v19465_v15, 0.0  ;;  %v19865_v34 = vld [vmem:[#allocation14_spill] sm:$0xff] }
0x1f35   :  { %10444 = vmatpush1.bf16.msra.mxu0 %v10415_v28  ;;  %v9982_v47 = vmul.f32 %v19596_v61, %v9950_v45  ;;  %v10300_v63 = vsub.f32 0.0, %v10236_v35  ;;  %vm10269_vm9 = vcmp.ge.f32.partialorder %v19495_v49, 0.0  ;;  %vm10270_vm1 = vcmp.ge.f32.partialorder %v19514_v46, 0.0  ;;  %v19866_v45 = vld [vmem:[#allocation18_spill] sm:$0xff] }
0x1f36   :  { %v10045_v23 = vmul.f32 %v19572_v36, %v10013_v53  ;;  %v9951_v42 = vadd.f32 -0.28449672, %v9919_v11  ;;  %v10418_v60 = vpack.c.bf16 %v10395_v54, %v10393_v14  ;;  %v9598_v15 = vmul.f32 0.5, %v19498_v24 }
0x1f37   :  { %v14239_v7 = vpop.eup %14238  ;;  %v10014_v10 = vadd.f32 0.2548296, %v9982_v47  ;;  %v10332_v17 = vsel %vm10268_vm8, %v10236_v35, %v10300_v63  ;;  %vm10271_vm3 = vcmp.ge.f32.partialorder %v19523_v51, 0.0  ;;  %v9597_v49 = vmul.f32 0.5, %v19481_v32  ;;  %v12946_v32 = vld [vmem:[%s19692_s4 + $0x18] sm:$0xff]   ;;  %v19869_v63 = vld [vmem:[#allocation3_spill] sm:$0xff] }
0x1f38   :  { %v10205_v37 = vmul.f32 %v14239_v7, %v10045_v23  ;;  %v9983_v16 = vmul.f32 %v19608_v12, %v9951_v42  ;;  %10445 = vmatprep.subr.bf16.mxu0 %v10418_v60  ;;  %v10364_v59 = vadd.f32 1.0, %v10332_v17  ;;  %v9599_v13 = vmul.f32 0.5, %v19501_v25  ;;  %v19867_v42 = vld [vmem:[#allocation20_spill] sm:$0xff]  ;;  %v19868_v60 = vld [vmem:[#allocation2_spill] sm:$0xff] }
0x1f39   :  { %v10046_v9 = vmul.f32 %v19596_v61, %v10014_v10  ;;  %v14241_v39 = vpop.eup %14240  ;;  %10446 = vmatpush1.bf16.msra.mxu0 %v10417_v31  ;;  %v9596_v31 = vmul.f32 0.5, %v19444_v27  ;;  %v12945_v27 = vld [vmem:[%s19692_s4 + $0x10] sm:$0xff]   ;;  %v19862_v24 = vmov 0   ;;  %v14298_v25 = vmov 14  }
0x1f3a   :  { %v10237_v28 = vsub.f32 1.0, %v10205_v37  ;;  %v10015_v38 = vadd.f32 0.2548296, %v9983_v16  ;;  %12910 = vset.pattern.permute.xlu1 %v14298_v25  ;;  %12909 = vset.pattern.permute.xlu0 %v14298_v25 }
0x1f3b   :  { %v10206_v48 = vmul.f32 %v14241_v39, %v10046_v9  ;;  %v10396_v50 = vmul.f32 %v10364_v59, %v9596_v31  ;;  %10529 = vperm.xlu1 %12910, %v19587_v8   ;;  %10525 = vperm.xlu0 %12909, %v19581_v22  }
0x1f3c   :  { %v10301_v30 = vsub.f32 0.0, %v10237_v28  ;;  %v10047_v36 = vmul.f32 %v19608_v12, %v10015_v38  ;;  %v19870_v38 = vld [vmem:[#allocation4_spill] sm:$0xff] }
0x1f3d   :  { %v14243_v56 = vpop.eup %14242  ;;  %v10238_v26 = vsub.f32 1.0, %v10206_v48 }
0x1f3e   :  { %v10207_v5 = vmul.f32 %v14243_v56, %v10047_v36  ;;  %v10333_v61 = vsel %vm10269_vm9, %v10237_v28, %v10301_v30 }
0x1f3f   :  { %v10302_v43 = vsub.f32 0.0, %v10238_v26  ;;  %v10365_v12 = vadd.f32 1.0, %v10333_v61 }
0x1f40   :  { %v10239_v44 = vsub.f32 1.0, %v10207_v5 }
0x1f41   :  { %v10334_v40 = vsel %vm10270_vm1, %v10238_v26, %v10302_v43  ;;  %v10397_v4 = vmul.f32 %v10365_v12, %v9597_v49  ;;  %v12947_v43 = vld [vmem:[%s19693_s5] sm:$0x3f]  }
0x1f42   :  { %v10366_v0 = vadd.f32 1.0, %v10334_v40  ;;  %v10303_v20 = vsub.f32 0.0, %v10239_v44 }
0x1f44   :  { %v10398_v6 = vmul.f32 %v10366_v0, %v9598_v15  ;;  %v10335_v55 = vsel %vm10271_vm3, %v10239_v44, %v10303_v20 }
0x1f45   :  { %v10367_v41 = vadd.f32 1.0, %v10335_v55 }
0x1f46   :  { %v10419_v46 = vpack.c.bf16 %v10398_v6, %v10396_v50 }
0x1f47   :  { %v10399_v52 = vmul.f32 %v10367_v41, %v9599_v13 }
0x1f49   :  { %v10420_v19 = vpack.c.bf16 %v10399_v52, %v10397_v4 }
0x1f4b   :  { %10447 = vmatprep.subr.bf16.mxu0 %v10420_v19 }
0x1f4c   :  { %10448 = vmatpush1.bf16.msra.mxu0 %v10419_v46 }
0x1f4f   :  { %10466 = vmatmul.mubr.bf16.vlgmr.msra.gmra.mrb[192].mxu0 %v12945_v27 }
0x1f50   :  { %10475 = vmatprep.mubr.bf16.mxu0 %v19862_v24 }
0x1f57   :  { %10476 = vmatmul.mubr.bf16.gmra.mrb[196].mxu0 %v12946_v32 }
0x1fa5   :  { %v10496_v58 = vpop.permute.xlu1 %10495  ;;  %v10500_v18 = vpop.permute.xlu0 %10499 }
0x1fa9   :  { %v10504_v35 = vpop.permute.xlu1 %10503 }
0x1fad   :  { %v10508_v28 = vpop.permute.xlu1 %10507 }
0x1fba   :  { %v10526_v59 = vpop.permute.xlu0 %10525  ;;  %v10530_v44 = vpop.permute.xlu1 %10529 }
0x2022   :  { %v10467_v51 = vpop.f32.mrb[192].mxu0 }
0x2023   :  { %v10486_v2 = vadd.f32 %v10467_v51, %v19863_v62  ;;  %v10469_v3 = vpop.f32.mrb[193].mxu0 }
0x2024   :  { %v10487_v1 = vadd.f32 %v10469_v3, %v19864_v33  ;;  %v10471_v21 = vpop.f32.mrb[194].mxu0 }
0x2025   :  { %v10488_v29 = vadd.f32 %v10471_v21, %v19865_v34  ;;  %v10473_v57 = vpop.f32.mrb[195].mxu0  ;;  %v10510_v11 = vadd.f32 %v10496_v58, %v10486_v2 }
0x2026   :  { %v10489_v53 = vadd.f32 %v10473_v57, %v19866_v45  ;;  %v10511_v54 = vadd.f32 %v10496_v58, %v10487_v1 }
0x2027   :  { %v10512_v14 = vadd.f32 %v10500_v18, %v10488_v29 }
0x2028   :  { %v10513_v8 = vadd.f32 %v10500_v18, %v10489_v53 }
0x2029   :  { %v10520_v22 = vpack.c.bf16 %v10512_v14, %v10510_v11 }
0x202a   :  { %v10521_v47 = vpack.c.bf16 %v10513_v8, %v10511_v54  ;;  %v10477_v23 = vpop.f32.mrb[196].mxu0 }
0x202b   :  { %v10490_v7 = vadd.f32 %v10477_v23, %v19867_v42  ;;  %v10479_v10 = vpop.f32.mrb[197].mxu0 }
0x202c   :  { %v10491_v37 = vadd.f32 %v10479_v10, %v19868_v60  ;;  %v10481_v16 = vpop.f32.mrb[198].mxu0  ;;  %10540 = vmatprep.subr.bf16.mxu1 %v10521_v47 }
0x202d   :  { %v10492_v9 = vadd.f32 %v10481_v16, %v19869_v63  ;;  %v10483_v39 = vpop.f32.mrb[199].mxu0  ;;  %10541 = vmatpush1.bf16.msra.mxu1 %v10520_v22  ;;  %v10514_v30 = vadd.f32 %v10504_v35, %v10490_v7 }
0x202e   :  { %v10493_v48 = vadd.f32 %v10483_v39, %v19870_v38  ;;  %v10515_v56 = vadd.f32 %v10504_v35, %v10491_v37 }
0x202f   :  { %v10516_v36 = vadd.f32 %v10508_v28, %v10492_v9 }
0x2030   :  { %v10517_v17 = vadd.f32 %v10508_v28, %v10493_v48 }
0x2031   :  { %v10522_v26 = vpack.c.bf16 %v10516_v36, %v10514_v30 }
0x2032   :  { %v10523_v5 = vpack.c.bf16 %v10517_v17, %v10515_v56 }
0x2034   :  { %10542 = vmatprep.subr.bf16.mxu1 %v10523_v5 }
0x2035   :  { %10543 = vmatpush1.bf16.msra.mxu1 %v10522_v26 }
0x2038   :  { %10952 = vmatmul.mubr.msk.bf16.vlgmr.msra.gmra.mrb[232].mxu1 %vm222_vm0, %v12947_v43 }
0x210b   :  { %v10574_v61 = vpop.f32.mrb[232].mxu1 }
0x210c   :  { %v10576_v40 = vpop.f32.mrb[233].mxu1  ;;  %v10575_v31 = vadd.f32 %v10574_v61, %v10526_v59 }
0x210d   :  { %v10578_v15 = vpop.f32.mrb[234].mxu1  ;;  %v10577_v0 = vadd.f32 %v10576_v40, %v10526_v59 }
0x210e   :  { %v10579_v20 = vadd.f32 %v10578_v15, %v10530_v44  ;;  %v10580_v12 = vpop.f32.mrb[235].mxu1  ;;  %10583 = vst [vmem:[%s19694_s7] sm:$0xff] %v10575_v31 }
0x210f   :  { %v10581_v50 = vadd.f32 %v10580_v12, %v10530_v44  ;;  %10584 = vst [vmem:[%s19694_s7 + $0x8] sm:$0xff] %v10577_v0 }
0x2110   :  { %10585 = vst [vmem:[%s19694_s7 + $0x10] sm:$0xf] %v10579_v20 }
0x2111   :  { %10586 = vst [vmem:[%s19694_s7 + $0x18] sm:$0xf] %v10581_v50 }

</bundles_post_ra>
